<compile_context>
chip_gen: v6e
topology: v6e:2x2x1
jax: 0.10.0
libtpu: 0.0.40
codegen_flags: <defaults>
</compile_context>

<pallas_src>
import functools

import jax
import jax.numpy as jnp
from jax.experimental import pallas as pl
from jax.experimental.pallas import tpu as pltpu


# ---------------------------------------------------------------------------
# VMEM sizing helpers (generation-aware, lane/sublane-padding aware)
# ---------------------------------------------------------------------------
def _round_up(x, m):
    return (x + m - 1) // m * m


def _padded_bytes(shape, dtype):
    """VMEM footprint of an array, honoring (sublane, lane) tiling/padding."""
    itemsize = jnp.dtype(dtype).itemsize
    dims = list(shape)
    if not dims:
        return itemsize
    dims[-1] = _round_up(dims[-1], 128)                       # lanes
    if len(dims) >= 2:
        dims[-2] = _round_up(dims[-2], 8 * max(1, 4 // itemsize))  # sublanes
    n = 1
    for d in dims:
        n *= d
    return n * itemsize


def _vmem_capacity_bytes():
    try:
        return int(pltpu.get_tpu_info().vmem_capacity_bytes)
    except Exception:
        return 64 * 1024 * 1024      # v7x per-core VMEM: safe lower bound


def _mxu_footprint_bytes(th, W_out, Wp, C_in, C_out, K, cdtype, out_dtype):
    kkc = K * K * C_in
    halo = th + K - 1
    return (2 * _padded_bytes((halo, Wp, C_in), cdtype)        # manual dbl-buf window
            + 2 * _padded_bytes((kkc, C_out), cdtype)          # weights (2 bufs reserved)
            + 2 * _padded_bytes((th * W_out, C_out), out_dtype)  # output block (dbl-buf)
            + 2 * _padded_bytes((th * W_out, kkc), cdtype)     # im2col LHS (+slack)
            + _padded_bytes((th * W_out, C_out), jnp.float32))  # f32 matmul result


def _pick_tile_h(H_out, W_out, Wp, C_in, C_out, K, cdtype, out_dtype, budget):
    divisors = [d for d in range(1, H_out + 1) if H_out % d == 0]
    # Block legality: second-to-last output dim (th*W_out) must be a multiple
    # of 8 sublanes unless it is the full extent.
    candidates = [d for d in divisors
                  if d == H_out or (d * W_out) % 8 == 0] or [H_out]

    def fp(d):
        return _mxu_footprint_bytes(d, W_out, Wp, C_in, C_out, K, cdtype, out_dtype)

    fitting = [d for d in candidates if fp(d) <= budget]
    if fitting:
        # Prefer >=2 row tiles per image so the manual DMA overlaps compute,
        # unless that would fragment the image too much.
        sub = [d for d in fitting if d < H_out]
        th = max(sub) if (sub and max(sub) * 4 >= H_out) else max(fitting)
    else:
        th = min(candidates, key=fp)
    return th, fp(th)


# ---------------------------------------------------------------------------
# Small-channel VPU path: one batch image per grid step, NCHW kept end-to-end.
#   x_ref : (1, C_in, Hp, Wp)  zero-padded input image
#   w_ref : (C_out*C_in*K*K,)  flat weights in SMEM (scalar reads)
#   o_ref : (1, C_out, H_out, W_out) NCHW output
# ---------------------------------------------------------------------------
def _conv_relu_vpu_kernel(x_ref, w_ref, o_ref, *, C_in, C_out, K,
                          H_out, W_out, relu):
    x = x_ref[0]                                       # (C_in, Hp, Wp)
    if x.dtype != jnp.float32:
        x = x.astype(jnp.float32)                      # hoisted cast
    for co in range(C_out):
        acc = None
        for ci in range(C_in):
            for dy in range(K):
                for dx in range(K):
                    wv = w_ref[((co * C_in + ci) * K + dy) * K + dx]
                    term = wv * x[ci, dy:dy + H_out, dx:dx + W_out]
                    acc = term if acc is None else acc + term
        if relu:
            acc = jnp.maximum(acc, 0.0)
        o_ref[0, co] = acc.astype(o_ref.dtype)


# ---------------------------------------------------------------------------
# MXU path: grid = (batch, row-tiles).  Haloed row windows are DMA'd manually
# (double-buffered) from the padded NHWC input in HBM, the K*K taps are fused
# into a single im2col matmul, and the result is stored NHWC-flat.
#   x_hbm : (N, Hp, Wp, C_in)   padded input, memory_space=pl.ANY
#   w_ref : (K*K*C_in, C_out)   fused tap weights (VMEM, fetched once)
#   o_ref : (1, tile_h*W_out, C_out)
#   xbuf  : (2, halo_h, Wp, C_in) VMEM double buffer;  sem: DMA((2,))
# ---------------------------------------------------------------------------
def _conv_relu_mxu_kernel(x_hbm, w_ref, o_ref, xbuf, sem, *,
                          K, tile_h, halo_h, W_out, relu):
    n = pl.program_id(0)
    i = pl.program_id(1)
    n_tiles = pl.num_programs(1)
    slot = i % 2

    def start_fetch(row_tile, buf_slot):
        pltpu.make_async_copy(
            x_hbm.at[n, pl.ds(row_tile * tile_h, halo_h)],
            xbuf.at[buf_slot],
            sem.at[buf_slot],
        ).start()

    @pl.when(i == 0)                       # prime this image's first window
    def _():
        start_fetch(0, 0)

    @pl.when(i + 1 < n_tiles)              # prefetch next row tile (same image)
    def _():
        start_fetch(i + 1, 1 - slot)

    pltpu.make_async_copy(                 # wait for this step's window
        x_hbm.at[n, pl.ds(0, halo_h)], xbuf.at[slot], sem.at[slot]
    ).wait()

    C_in = xbuf.shape[-1]
    window = xbuf[slot]                    # (halo_h, Wp, C_in), compute dtype
    taps = []
    for dy in range(K):
        for dx in range(K):
            taps.append(window[dy:dy + tile_h, dx:dx + W_out, :]
                        .reshape(tile_h * W_out, C_in))
    lhs = jnp.concatenate(taps, axis=-1)   # (tile_h*W_out, K*K*C_in)

    out = jnp.dot(lhs, w_ref[...], preferred_element_type=jnp.float32)
    if relu:
        out = jnp.maximum(out, 0.0)
    o_ref[0] = out.astype(o_ref.dtype)     # lane-dense store, no transpose


# ---------------------------------------------------------------------------
# wrapper
# ---------------------------------------------------------------------------
def basic_conv(x_nchw, weight_oihw, *, stride=1, relu=True,
               compute_dtype=None, tile_h=None):
    """BasicConv forward: Conv2d(K, stride=1, pad=K//2, bias=False) + ReLU.

    compute_dtype=None -> bf16 MXU operands with f32 accumulation (fast path
    for v6e/v7x); pass jnp.float32 for PyTorch-matching numerics.  The
    small-channel path always computes in f32 on the VPU.
    """
    N, C_in, H, W = x_nchw.shape
    C_out, C_in_w, K, K2 = weight_oihw.shape
    if C_in_w != C_in or K != K2:
        raise ValueError("weight must be (C_out, C_in, K, K) with groups=1")
    if stride != 1:
        # TODO(synk): stride>1, ConvTranspose2d, BatchNorm2d norm, bias=True,
        # groups>1 / channel_shuffle are not implemented in this kernel.
        raise NotImplementedError("Pallas BasicConv kernel supports stride=1 only")

    pad = K // 2
    Hp, Wp = H + 2 * pad, W + 2 * pad
    H_out, W_out = Hp - K + 1, Wp - K + 1          # == H, W for odd K
    out_dtype = x_nchw.dtype

    cap = _vmem_capacity_bytes()
    budget = int(0.70 * cap)

    # ---------------- small-channel fast path (e.g. C_in=4, C_out=8) --------
    small = (C_in * K * K <= 96 and C_out <= 32
             and C_out * C_in * K * K <= 1024)
    if small:
        fp_small = (2 * _padded_bytes((C_in, Hp, Wp), out_dtype)
                    + 2 * _padded_bytes((C_out, H_out, W_out), out_dtype)
                    + 4 * _padded_bytes((H_out, W_out), jnp.float32))
        small = fp_small <= budget

    if small:
        x_p = jnp.pad(x_nchw, ((0, 0), (0, 0), (pad, pad), (pad, pad)))
        w_flat = weight_oihw.astype(jnp.float32).reshape(-1)
        vmem_limit = int(min(0.9 * cap, max(32 << 20, 2 * fp_small)))
        kernel = functools.partial(
            _conv_relu_vpu_kernel, C_in=C_in, C_out=C_out, K=K,
            H_out=H_out, W_out=W_out, relu=relu)
        return pl.pallas_call(
            kernel,
            out_shape=jax.ShapeDtypeStruct((N, C_out, H_out, W_out), out_dtype),
            grid_spec=pltpu.PrefetchScalarGridSpec(
                num_scalar_prefetch=0,
                grid=(N,),
                in_specs=[
                    pl.BlockSpec((1, C_in, Hp, Wp), lambda n: (n, 0, 0, 0)),
                    pl.BlockSpec(memory_space=pltpu.MemorySpace.SMEM),
                ],
                out_specs=pl.BlockSpec((1, C_out, H_out, W_out),
                                       lambda n: (n, 0, 0, 0)),
            ),
            compiler_params=pltpu.CompilerParams(
                dimension_semantics=("parallel",),
                vmem_limit_bytes=vmem_limit),
        )(x_p, w_flat)

    # ---------------- MXU im2col path ---------------------------------------
    cdtype = jnp.dtype(compute_dtype) if compute_dtype is not None else jnp.dtype(jnp.bfloat16)

    if tile_h is None or H_out % tile_h != 0 or \
            (tile_h != H_out and (tile_h * W_out) % 8 != 0):
        tile_h, fp = _pick_tile_h(H_out, W_out, Wp, C_in, C_out, K,
                                  cdtype, out_dtype, budget)
    else:
        fp = _mxu_footprint_bytes(tile_h, W_out, Wp, C_in, C_out, K,
                                  cdtype, out_dtype)
    n_tiles = H_out // tile_h
    halo_h = tile_h + K - 1

    # Host prep: one transpose+pad pass, casts hoisted out of the kernel.
    x_p = jnp.pad(jnp.transpose(x_nchw, (0, 2, 3, 1)),
                  ((0, 0), (pad, pad), (pad, pad), (0, 0))).astype(cdtype)
    w_mat = jnp.transpose(weight_oihw, (2, 3, 1, 0)) \
               .reshape(K * K * C_in, C_out).astype(cdtype)

    vmem_limit = int(min(0.9 * cap, max(32 << 20, int(1.25 * fp) + (2 << 20))))

    kernel = functools.partial(_conv_relu_mxu_kernel, K=K, tile_h=tile_h,
                               halo_h=halo_h, W_out=W_out, relu=relu)
    out_flat = pl.pallas_call(
        kernel,
        out_shape=jax.ShapeDtypeStruct((N, H_out * W_out, C_out), out_dtype),
        grid_spec=pltpu.PrefetchScalarGridSpec(
            num_scalar_prefetch=0,
            grid=(N, n_tiles),
            in_specs=[
                pl.BlockSpec(memory_space=pl.ANY),            # padded NHWC in HBM
                # Constant index map -> fetched once (a spare buffer is still
                # reserved by the auto-pipeliner; accounted for in `fp`).
                pl.BlockSpec((K * K * C_in, C_out), lambda n, i: (0, 0)),
            ],
            out_specs=pl.BlockSpec((1, tile_h * W_out, C_out),
                                   lambda n, i: (n, i, 0)),
            scratch_shapes=[
                pltpu.VMEM((2, halo_h, Wp, C_in), cdtype),
                pltpu.SemaphoreType.DMA((2,)),
            ],
        ),
        compiler_params=pltpu.CompilerParams(
            dimension_semantics=("parallel", "arbitrary"),
            vmem_limit_bytes=vmem_limit),
    )(x_p, w_mat)

    # NHWC-flat -> NCHW once at the boundary (single XLA pass over the output).
    return jnp.transpose(out_flat.reshape(N, H_out, W_out, C_out), (0, 3, 1, 2))


if __name__ == "__main__":
    key = jax.random.PRNGKey(0)
    k1, k2, k3, k4 = jax.random.split(key, 4)

    def ref_conv(x, w, relu=True):
        kk = w.shape[-1]
        p = kk // 2
        y = jax.lax.conv_general_dilated(
            x, w, window_strides=(1, 1), padding=((p, p), (p, p)),
            dimension_numbers=("NCHW", "OIHW", "NCHW"),
            precision=jax.lax.Precision.HIGHEST)
        return jnp.maximum(y, 0.0) if relu else y

    # Config 1: BasicConv(4, 8, 3, 1) -- small-channel VPU path (f32, exact).
    x1 = jax.random.normal(k1, (2, 4, 16, 16), jnp.float32)
    w1 = 0.1 * jax.random.normal(k2, (8, 4, 3, 3), jnp.float32)
    y1 = jax.block_until_ready(basic_conv(x1, w1))
    r1 = ref_conv(x1, w1)
    e1 = float(jnp.max(jnp.abs(y1 - r1)))
    assert y1.shape == r1.shape and y1.dtype == jnp.float32, "VPU path shape/dtype"
    assert e1 < 1e-3, f"VPU path max abs err {e1}"

    # Config 2: BasicConv(64, 128, 3, 1) -- MXU im2col path, f32 compute.
    x2 = jax.random.normal(k3, (2, 64, 16, 16), jnp.float32)
    w2 = 0.05 * jax.random.normal(k4, (128, 64, 3, 3), jnp.float32)
    y2 = jax.block_until_ready(basic_conv(x2, w2, compute_dtype=jnp.float32))
    r2 = ref_conv(x2, w2)
    e2 = float(jnp.max(jnp.abs(y2 - r2)))
    assert y2.shape == r2.shape, "MXU path shape"
    assert e2 < 5e-2, f"MXU f32 path max abs err {e2}"

    # Same config through the default (bf16 MXU operands, f32 accumulate).
    y2b = jax.block_until_ready(basic_conv(x2, w2))
    e2b = float(jnp.max(jnp.abs(y2b.astype(jnp.float32) - r2)))
    assert e2b < 0.15, f"MXU bf16 path max abs err {e2b}"

    print("KERNEL_OK")
</pallas_src>

<mosaic_0001>
module attributes {stable_mosaic.version = 11 : i64} {
  func.func @_conv_relu_vpu_kernel(%arg0: i32, %arg1: memref<1x4x18x18xf32, #tpu.memory_space<vmem>>, %arg2: memref<288xf32, #tpu.memory_space<smem>>, %arg3: memref<1x8x16x16xf32, #tpu.memory_space<vmem>>) attributes {dimension_semantics = [#tpu.dimension_semantics<parallel>], iteration_bounds = array<i64: 2>, scalar_prefetch = 0 : i64, scratch_operands = 0 : i64, tpu.core_type = #tpu.core_type<tc>, window_params = [{transform_indices = @transform_0, window_bounds = array<i64: 1, 4, 18, 18>}, {transform_indices = @transform_1, window_bounds = array<i64: 288>}, {transform_indices = @transform_2, window_bounds = array<i64: 1, 8, 16, 16>}]} {
    %c0 = arith.constant 0 : index
    %c0_0 = arith.constant 0 : index
    %c0_1 = arith.constant 0 : index
    %c0_2 = arith.constant 0 : index
    %0 = vector.load %arg1[%c0, %c0_0, %c0_1, %c0_2] : memref<1x4x18x18xf32, #tpu.memory_space<vmem>>, vector<1x4x18x18xf32>
    %1 = vector.shape_cast %0 : vector<1x4x18x18xf32> to vector<4x18x18xf32>
    %c0_3 = arith.constant 0 : index
    %2 = memref.load %arg2[%c0_3] : memref<288xf32, #tpu.memory_space<smem>>
    %3 = vector.extract_strided_slice %1 {offsets = [0, 0, 0], sizes = [1, 16, 16], strides = [1, 1, 1]} : vector<4x18x18xf32> to vector<1x16x16xf32>
    %4 = vector.shape_cast %3 : vector<1x16x16xf32> to vector<16x16xf32>
    %5 = vector.broadcast %2 : f32 to vector<16x16xf32>
    %6 = arith.mulf %5, %4 : vector<16x16xf32>
    %c1 = arith.constant 1 : index
    %7 = memref.load %arg2[%c1] : memref<288xf32, #tpu.memory_space<smem>>
    %8 = vector.extract_strided_slice %1 {offsets = [0, 0, 1], sizes = [1, 16, 16], strides = [1, 1, 1]} : vector<4x18x18xf32> to vector<1x16x16xf32>
    %9 = vector.shape_cast %8 : vector<1x16x16xf32> to vector<16x16xf32>
    %10 = vector.broadcast %7 : f32 to vector<16x16xf32>
    %11 = arith.mulf %10, %9 : vector<16x16xf32>
    %12 = arith.addf %6, %11 : vector<16x16xf32>
    %c2 = arith.constant 2 : index
    %13 = memref.load %arg2[%c2] : memref<288xf32, #tpu.memory_space<smem>>
    %14 = vector.extract_strided_slice %1 {offsets = [0, 0, 2], sizes = [1, 16, 16], strides = [1, 1, 1]} : vector<4x18x18xf32> to vector<1x16x16xf32>
    %15 = vector.shape_cast %14 : vector<1x16x16xf32> to vector<16x16xf32>
    %16 = vector.broadcast %13 : f32 to vector<16x16xf32>
    %17 = arith.mulf %16, %15 : vector<16x16xf32>
    %18 = arith.addf %12, %17 : vector<16x16xf32>
    %c3 = arith.constant 3 : index
    %19 = memref.load %arg2[%c3] : memref<288xf32, #tpu.memory_space<smem>>
    %20 = vector.extract_strided_slice %1 {offsets = [0, 1, 0], sizes = [1, 16, 16], strides = [1, 1, 1]} : vector<4x18x18xf32> to vector<1x16x16xf32>
    %21 = vector.shape_cast %20 : vector<1x16x16xf32> to vector<16x16xf32>
    %22 = vector.broadcast %19 : f32 to vector<16x16xf32>
    %23 = arith.mulf %22, %21 : vector<16x16xf32>
    %24 = arith.addf %18, %23 : vector<16x16xf32>
    %c4 = arith.constant 4 : index
    %25 = memref.load %arg2[%c4] : memref<288xf32, #tpu.memory_space<smem>>
    %26 = vector.extract_strided_slice %1 {offsets = [0, 1, 1], sizes = [1, 16, 16], strides = [1, 1, 1]} : vector<4x18x18xf32> to vector<1x16x16xf32>
    %27 = vector.shape_cast %26 : vector<1x16x16xf32> to vector<16x16xf32>
    %28 = vector.broadcast %25 : f32 to vector<16x16xf32>
    %29 = arith.mulf %28, %27 : vector<16x16xf32>
    %30 = arith.addf %24, %29 : vector<16x16xf32>
    %c5 = arith.constant 5 : index
    %31 = memref.load %arg2[%c5] : memref<288xf32, #tpu.memory_space<smem>>
    %32 = vector.extract_strided_slice %1 {offsets = [0, 1, 2], sizes = [1, 16, 16], strides = [1, 1, 1]} : vector<4x18x18xf32> to vector<1x16x16xf32>
    %33 = vector.shape_cast %32 : vector<1x16x16xf32> to vector<16x16xf32>
    %34 = vector.broadcast %31 : f32 to vector<16x16xf32>
    %35 = arith.mulf %34, %33 : vector<16x16xf32>
    %36 = arith.addf %30, %35 : vector<16x16xf32>
    %c6 = arith.constant 6 : index
    %37 = memref.load %arg2[%c6] : memref<288xf32, #tpu.memory_space<smem>>
    %38 = vector.extract_strided_slice %1 {offsets = [0, 2, 0], sizes = [1, 16, 16], strides = [1, 1, 1]} : vector<4x18x18xf32> to vector<1x16x16xf32>
    %39 = vector.shape_cast %38 : vector<1x16x16xf32> to vector<16x16xf32>
    %40 = vector.broadcast %37 : f32 to vector<16x16xf32>
    %41 = arith.mulf %40, %39 : vector<16x16xf32>
    %42 = arith.addf %36, %41 : vector<16x16xf32>
    %c7 = arith.constant 7 : index
    %43 = memref.load %arg2[%c7] : memref<288xf32, #tpu.memory_space<smem>>
    %44 = vector.extract_strided_slice %1 {offsets = [0, 2, 1], sizes = [1, 16, 16], strides = [1, 1, 1]} : vector<4x18x18xf32> to vector<1x16x16xf32>
    %45 = vector.shape_cast %44 : vector<1x16x16xf32> to vector<16x16xf32>
    %46 = vector.broadcast %43 : f32 to vector<16x16xf32>
    %47 = arith.mulf %46, %45 : vector<16x16xf32>
    %48 = arith.addf %42, %47 : vector<16x16xf32>
    %c8 = arith.constant 8 : index
    %49 = memref.load %arg2[%c8] : memref<288xf32, #tpu.memory_space<smem>>
    %50 = vector.extract_strided_slice %1 {offsets = [0, 2, 2], sizes = [1, 16, 16], strides = [1, 1, 1]} : vector<4x18x18xf32> to vector<1x16x16xf32>
    %51 = vector.shape_cast %50 : vector<1x16x16xf32> to vector<16x16xf32>
    %52 = vector.broadcast %49 : f32 to vector<16x16xf32>
    %53 = arith.mulf %52, %51 : vector<16x16xf32>
    %54 = arith.addf %48, %53 : vector<16x16xf32>
    %c9 = arith.constant 9 : index
    %55 = memref.load %arg2[%c9] : memref<288xf32, #tpu.memory_space<smem>>
    %56 = vector.extract_strided_slice %1 {offsets = [1, 0, 0], sizes = [1, 16, 16], strides = [1, 1, 1]} : vector<4x18x18xf32> to vector<1x16x16xf32>
    %57 = vector.shape_cast %56 : vector<1x16x16xf32> to vector<16x16xf32>
    %58 = vector.broadcast %55 : f32 to vector<16x16xf32>
    %59 = arith.mulf %58, %57 : vector<16x16xf32>
    %60 = arith.addf %54, %59 : vector<16x16xf32>
    %c10 = arith.constant 10 : index
    %61 = memref.load %arg2[%c10] : memref<288xf32, #tpu.memory_space<smem>>
    %62 = vector.extract_strided_slice %1 {offsets = [1, 0, 1], sizes = [1, 16, 16], strides = [1, 1, 1]} : vector<4x18x18xf32> to vector<1x16x16xf32>
    %63 = vector.shape_cast %62 : vector<1x16x16xf32> to vector<16x16xf32>
    %64 = vector.broadcast %61 : f32 to vector<16x16xf32>
    %65 = arith.mulf %64, %63 : vector<16x16xf32>
    %66 = arith.addf %60, %65 : vector<16x16xf32>
    %c11 = arith.constant 11 : index
    %67 = memref.load %arg2[%c11] : memref<288xf32, #tpu.memory_space<smem>>
    %68 = vector.extract_strided_slice %1 {offsets = [1, 0, 2], sizes = [1, 16, 16], strides = [1, 1, 1]} : vector<4x18x18xf32> to vector<1x16x16xf32>
    %69 = vector.shape_cast %68 : vector<1x16x16xf32> to vector<16x16xf32>
    %70 = vector.broadcast %67 : f32 to vector<16x16xf32>
    %71 = arith.mulf %70, %69 : vector<16x16xf32>
    %72 = arith.addf %66, %71 : vector<16x16xf32>
    %c12 = arith.constant 12 : index
    %73 = memref.load %arg2[%c12] : memref<288xf32, #tpu.memory_space<smem>>
    %74 = vector.extract_strided_slice %1 {offsets = [1, 1, 0], sizes = [1, 16, 16], strides = [1, 1, 1]} : vector<4x18x18xf32> to vector<1x16x16xf32>
    %75 = vector.shape_cast %74 : vector<1x16x16xf32> to vector<16x16xf32>
    %76 = vector.broadcast %73 : f32 to vector<16x16xf32>
    %77 = arith.mulf %76, %75 : vector<16x16xf32>
    %78 = arith.addf %72, %77 : vector<16x16xf32>
    %c13 = arith.constant 13 : index
    %79 = memref.load %arg2[%c13] : memref<288xf32, #tpu.memory_space<smem>>
    %80 = vector.extract_strided_slice %1 {offsets = [1, 1, 1], sizes = [1, 16, 16], strides = [1, 1, 1]} : vector<4x18x18xf32> to vector<1x16x16xf32>
    %81 = vector.shape_cast %80 : vector<1x16x16xf32> to vector<16x16xf32>
    %82 = vector.broadcast %79 : f32 to vector<16x16xf32>
    %83 = arith.mulf %82, %81 : vector<16x16xf32>
    %84 = arith.addf %78, %83 : vector<16x16xf32>
    %c14 = arith.constant 14 : index
    %85 = memref.load %arg2[%c14] : memref<288xf32, #tpu.memory_space<smem>>
    %86 = vector.extract_strided_slice %1 {offsets = [1, 1, 2], sizes = [1, 16, 16], strides = [1, 1, 1]} : vector<4x18x18xf32> to vector<1x16x16xf32>
    %87 = vector.shape_cast %86 : vector<1x16x16xf32> to vector<16x16xf32>
    %88 = vector.broadcast %85 : f32 to vector<16x16xf32>
    %89 = arith.mulf %88, %87 : vector<16x16xf32>
    %90 = arith.addf %84, %89 : vector<16x16xf32>
    %c15 = arith.constant 15 : index
    %91 = memref.load %arg2[%c15] : memref<288xf32, #tpu.memory_space<smem>>
    %92 = vector.extract_strided_slice %1 {offsets = [1, 2, 0], sizes = [1, 16, 16], strides = [1, 1, 1]} : vector<4x18x18xf32> to vector<1x16x16xf32>
    %93 = vector.shape_cast %92 : vector<1x16x16xf32> to vector<16x16xf32>
    %94 = vector.broadcast %91 : f32 to vector<16x16xf32>
    %95 = arith.mulf %94, %93 : vector<16x16xf32>
    %96 = arith.addf %90, %95 : vector<16x16xf32>
    %c16 = arith.constant 16 : index
    %97 = memref.load %arg2[%c16] : memref<288xf32, #tpu.memory_space<smem>>
    %98 = vector.extract_strided_slice %1 {offsets = [1, 2, 1], sizes = [1, 16, 16], strides = [1, 1, 1]} : vector<4x18x18xf32> to vector<1x16x16xf32>
    %99 = vector.shape_cast %98 : vector<1x16x16xf32> to vector<16x16xf32>
    %100 = vector.broadcast %97 : f32 to vector<16x16xf32>
    %101 = arith.mulf %100, %99 : vector<16x16xf32>
    %102 = arith.addf %96, %101 : vector<16x16xf32>
    %c17 = arith.constant 17 : index
    %103 = memref.load %arg2[%c17] : memref<288xf32, #tpu.memory_space<smem>>
    %104 = vector.extract_strided_slice %1 {offsets = [1, 2, 2], sizes = [1, 16, 16], strides = [1, 1, 1]} : vector<4x18x18xf32> to vector<1x16x16xf32>
    %105 = vector.shape_cast %104 : vector<1x16x16xf32> to vector<16x16xf32>
    %106 = vector.broadcast %103 : f32 to vector<16x16xf32>
    %107 = arith.mulf %106, %105 : vector<16x16xf32>
    %108 = arith.addf %102, %107 : vector<16x16xf32>
    %c18 = arith.constant 18 : index
    %109 = memref.load %arg2[%c18] : memref<288xf32, #tpu.memory_space<smem>>
    %110 = vector.extract_strided_slice %1 {offsets = [2, 0, 0], sizes = [1, 16, 16], strides = [1, 1, 1]} : vector<4x18x18xf32> to vector<1x16x16xf32>
    %111 = vector.shape_cast %110 : vector<1x16x16xf32> to vector<16x16xf32>
    %112 = vector.broadcast %109 : f32 to vector<16x16xf32>
    %113 = arith.mulf %112, %111 : vector<16x16xf32>
    %114 = arith.addf %108, %113 : vector<16x16xf32>
    %c19 = arith.constant 19 : index
    %115 = memref.load %arg2[%c19] : memref<288xf32, #tpu.memory_space<smem>>
    %116 = vector.extract_strided_slice %1 {offsets = [2, 0, 1], sizes = [1, 16, 16], strides = [1, 1, 1]} : vector<4x18x18xf32> to vector<1x16x16xf32>
    %117 = vector.shape_cast %116 : vector<1x16x16xf32> to vector<16x16xf32>
    %118 = vector.broadcast %115 : f32 to vector<16x16xf32>
    %119 = arith.mulf %118, %117 : vector<16x16xf32>
    %120 = arith.addf %114, %119 : vector<16x16xf32>
    %c20 = arith.constant 20 : index
    %121 = memref.load %arg2[%c20] : memref<288xf32, #tpu.memory_space<smem>>
    %122 = vector.extract_strided_slice %1 {offsets = [2, 0, 2], sizes = [1, 16, 16], strides = [1, 1, 1]} : vector<4x18x18xf32> to vector<1x16x16xf32>
    %123 = vector.shape_cast %122 : vector<1x16x16xf32> to vector<16x16xf32>
    %124 = vector.broadcast %121 : f32 to vector<16x16xf32>
    %125 = arith.mulf %124, %123 : vector<16x16xf32>
    %126 = arith.addf %120, %125 : vector<16x16xf32>
    %c21 = arith.constant 21 : index
    %127 = memref.load %arg2[%c21] : memref<288xf32, #tpu.memory_space<smem>>
    %128 = vector.extract_strided_slice %1 {offsets = [2, 1, 0], sizes = [1, 16, 16], strides = [1, 1, 1]} : vector<4x18x18xf32> to vector<1x16x16xf32>
    %129 = vector.shape_cast %128 : vector<1x16x16xf32> to vector<16x16xf32>
    %130 = vector.broadcast %127 : f32 to vector<16x16xf32>
    %131 = arith.mulf %130, %129 : vector<16x16xf32>
    %132 = arith.addf %126, %131 : vector<16x16xf32>
    %c22 = arith.constant 22 : index
    %133 = memref.load %arg2[%c22] : memref<288xf32, #tpu.memory_space<smem>>
    %134 = vector.extract_strided_slice %1 {offsets = [2, 1, 1], sizes = [1, 16, 16], strides = [1, 1, 1]} : vector<4x18x18xf32> to vector<1x16x16xf32>
    %135 = vector.shape_cast %134 : vector<1x16x16xf32> to vector<16x16xf32>
    %136 = vector.broadcast %133 : f32 to vector<16x16xf32>
    %137 = arith.mulf %136, %135 : vector<16x16xf32>
    %138 = arith.addf %132, %137 : vector<16x16xf32>
    %c23 = arith.constant 23 : index
    %139 = memref.load %arg2[%c23] : memref<288xf32, #tpu.memory_space<smem>>
    %140 = vector.extract_strided_slice %1 {offsets = [2, 1, 2], sizes = [1, 16, 16], strides = [1, 1, 1]} : vector<4x18x18xf32> to vector<1x16x16xf32>
    %141 = vector.shape_cast %140 : vector<1x16x16xf32> to vector<16x16xf32>
    %142 = vector.broadcast %139 : f32 to vector<16x16xf32>
    %143 = arith.mulf %142, %141 : vector<16x16xf32>
    %144 = arith.addf %138, %143 : vector<16x16xf32>
    %c24 = arith.constant 24 : index
    %145 = memref.load %arg2[%c24] : memref<288xf32, #tpu.memory_space<smem>>
    %146 = vector.extract_strided_slice %1 {offsets = [2, 2, 0], sizes = [1, 16, 16], strides = [1, 1, 1]} : vector<4x18x18xf32> to vector<1x16x16xf32>
    %147 = vector.shape_cast %146 : vector<1x16x16xf32> to vector<16x16xf32>
    %148 = vector.broadcast %145 : f32 to vector<16x16xf32>
    %149 = arith.mulf %148, %147 : vector<16x16xf32>
    %150 = arith.addf %144, %149 : vector<16x16xf32>
    %c25 = arith.constant 25 : index
    %151 = memref.load %arg2[%c25] : memref<288xf32, #tpu.memory_space<smem>>
    %152 = vector.extract_strided_slice %1 {offsets = [2, 2, 1], sizes = [1, 16, 16], strides = [1, 1, 1]} : vector<4x18x18xf32> to vector<1x16x16xf32>
    %153 = vector.shape_cast %152 : vector<1x16x16xf32> to vector<16x16xf32>
    %154 = vector.broadcast %151 : f32 to vector<16x16xf32>
    %155 = arith.mulf %154, %153 : vector<16x16xf32>
    %156 = arith.addf %150, %155 : vector<16x16xf32>
    %c26 = arith.constant 26 : index
    %157 = memref.load %arg2[%c26] : memref<288xf32, #tpu.memory_space<smem>>
    %158 = vector.extract_strided_slice %1 {offsets = [2, 2, 2], sizes = [1, 16, 16], strides = [1, 1, 1]} : vector<4x18x18xf32> to vector<1x16x16xf32>
    %159 = vector.shape_cast %158 : vector<1x16x16xf32> to vector<16x16xf32>
    %160 = vector.broadcast %157 : f32 to vector<16x16xf32>
    %161 = arith.mulf %160, %159 : vector<16x16xf32>
    %162 = arith.addf %156, %161 : vector<16x16xf32>
    %c27 = arith.constant 27 : index
    %163 = memref.load %arg2[%c27] : memref<288xf32, #tpu.memory_space<smem>>
    %164 = vector.extract_strided_slice %1 {offsets = [3, 0, 0], sizes = [1, 16, 16], strides = [1, 1, 1]} : vector<4x18x18xf32> to vector<1x16x16xf32>
    %165 = vector.shape_cast %164 : vector<1x16x16xf32> to vector<16x16xf32>
    %166 = vector.broadcast %163 : f32 to vector<16x16xf32>
    %167 = arith.mulf %166, %165 : vector<16x16xf32>
    %168 = arith.addf %162, %167 : vector<16x16xf32>
    %c28 = arith.constant 28 : index
    %169 = memref.load %arg2[%c28] : memref<288xf32, #tpu.memory_space<smem>>
    %170 = vector.extract_strided_slice %1 {offsets = [3, 0, 1], sizes = [1, 16, 16], strides = [1, 1, 1]} : vector<4x18x18xf32> to vector<1x16x16xf32>
    %171 = vector.shape_cast %170 : vector<1x16x16xf32> to vector<16x16xf32>
    %172 = vector.broadcast %169 : f32 to vector<16x16xf32>
    %173 = arith.mulf %172, %171 : vector<16x16xf32>
    %174 = arith.addf %168, %173 : vector<16x16xf32>
    %c29 = arith.constant 29 : index
    %175 = memref.load %arg2[%c29] : memref<288xf32, #tpu.memory_space<smem>>
    %176 = vector.extract_strided_slice %1 {offsets = [3, 0, 2], sizes = [1, 16, 16], strides = [1, 1, 1]} : vector<4x18x18xf32> to vector<1x16x16xf32>
    %177 = vector.shape_cast %176 : vector<1x16x16xf32> to vector<16x16xf32>
    %178 = vector.broadcast %175 : f32 to vector<16x16xf32>
    %179 = arith.mulf %178, %177 : vector<16x16xf32>
    %180 = arith.addf %174, %179 : vector<16x16xf32>
    %c30 = arith.constant 30 : index
    %181 = memref.load %arg2[%c30] : memref<288xf32, #tpu.memory_space<smem>>
    %182 = vector.extract_strided_slice %1 {offsets = [3, 1, 0], sizes = [1, 16, 16], strides = [1, 1, 1]} : vector<4x18x18xf32> to vector<1x16x16xf32>
    %183 = vector.shape_cast %182 : vector<1x16x16xf32> to vector<16x16xf32>
    %184 = vector.broadcast %181 : f32 to vector<16x16xf32>
    %185 = arith.mulf %184, %183 : vector<16x16xf32>
    %186 = arith.addf %180, %185 : vector<16x16xf32>
    %c31 = arith.constant 31 : index
    %187 = memref.load %arg2[%c31] : memref<288xf32, #tpu.memory_space<smem>>
    %188 = vector.extract_strided_slice %1 {offsets = [3, 1, 1], sizes = [1, 16, 16], strides = [1, 1, 1]} : vector<4x18x18xf32> to vector<1x16x16xf32>
    %189 = vector.shape_cast %188 : vector<1x16x16xf32> to vector<16x16xf32>
    %190 = vector.broadcast %187 : f32 to vector<16x16xf32>
    %191 = arith.mulf %190, %189 : vector<16x16xf32>
    %192 = arith.addf %186, %191 : vector<16x16xf32>
    %c32 = arith.constant 32 : index
    %193 = memref.load %arg2[%c32] : memref<288xf32, #tpu.memory_space<smem>>
    %194 = vector.extract_strided_slice %1 {offsets = [3, 1, 2], sizes = [1, 16, 16], strides = [1, 1, 1]} : vector<4x18x18xf32> to vector<1x16x16xf32>
    %195 = vector.shape_cast %194 : vector<1x16x16xf32> to vector<16x16xf32>
    %196 = vector.broadcast %193 : f32 to vector<16x16xf32>
    %197 = arith.mulf %196, %195 : vector<16x16xf32>
    %198 = arith.addf %192, %197 : vector<16x16xf32>
    %c33 = arith.constant 33 : index
    %199 = memref.load %arg2[%c33] : memref<288xf32, #tpu.memory_space<smem>>
    %200 = vector.extract_strided_slice %1 {offsets = [3, 2, 0], sizes = [1, 16, 16], strides = [1, 1, 1]} : vector<4x18x18xf32> to vector<1x16x16xf32>
    %201 = vector.shape_cast %200 : vector<1x16x16xf32> to vector<16x16xf32>
    %202 = vector.broadcast %199 : f32 to vector<16x16xf32>
    %203 = arith.mulf %202, %201 : vector<16x16xf32>
    %204 = arith.addf %198, %203 : vector<16x16xf32>
    %c34 = arith.constant 34 : index
    %205 = memref.load %arg2[%c34] : memref<288xf32, #tpu.memory_space<smem>>
    %206 = vector.extract_strided_slice %1 {offsets = [3, 2, 1], sizes = [1, 16, 16], strides = [1, 1, 1]} : vector<4x18x18xf32> to vector<1x16x16xf32>
    %207 = vector.shape_cast %206 : vector<1x16x16xf32> to vector<16x16xf32>
    %208 = vector.broadcast %205 : f32 to vector<16x16xf32>
    %209 = arith.mulf %208, %207 : vector<16x16xf32>
    %210 = arith.addf %204, %209 : vector<16x16xf32>
    %c35 = arith.constant 35 : index
    %211 = memref.load %arg2[%c35] : memref<288xf32, #tpu.memory_space<smem>>
    %212 = vector.extract_strided_slice %1 {offsets = [3, 2, 2], sizes = [1, 16, 16], strides = [1, 1, 1]} : vector<4x18x18xf32> to vector<1x16x16xf32>
    %213 = vector.shape_cast %212 : vector<1x16x16xf32> to vector<16x16xf32>
    %214 = vector.broadcast %211 : f32 to vector<16x16xf32>
    %215 = arith.mulf %214, %213 : vector<16x16xf32>
    %216 = arith.addf %210, %215 : vector<16x16xf32>
    %cst = arith.constant 0.000000e+00 : f32
    %217 = vector.broadcast %cst : f32 to vector<16x16xf32>
    %218 = arith.maximumf %216, %217 : vector<16x16xf32>
    %c0_4 = arith.constant 0 : index
    %c0_5 = arith.constant 0 : index
    %c0_6 = arith.constant 0 : index
    %c0_7 = arith.constant 0 : index
    %219 = vector.load %arg3[%c0_4, %c0_5, %c0_6, %c0_7] : memref<1x8x16x16xf32, #tpu.memory_space<vmem>>, vector<1x1x16x16xf32>
    %220 = vector.shape_cast %219 : vector<1x1x16x16xf32> to vector<16x16xf32>
    %221 = vector.shape_cast %218 : vector<16x16xf32> to vector<1x1x16x16xf32>
    tpu.vector_store %arg3[%c0_4, %c0_5, %c0_6, %c0_7], %221 {strides = array<i32>} : memref<1x8x16x16xf32, #tpu.memory_space<vmem>>, vector<1x1x16x16xf32>,
    %c36 = arith.constant 36 : index
    %222 = memref.load %arg2[%c36] : memref<288xf32, #tpu.memory_space<smem>>
    %223 = vector.extract_strided_slice %1 {offsets = [0, 0, 0], sizes = [1, 16, 16], strides = [1, 1, 1]} : vector<4x18x18xf32> to vector<1x16x16xf32>
    %224 = vector.shape_cast %223 : vector<1x16x16xf32> to vector<16x16xf32>
    %225 = vector.broadcast %222 : f32 to vector<16x16xf32>
    %226 = arith.mulf %225, %224 : vector<16x16xf32>
    %c37 = arith.constant 37 : index
    %227 = memref.load %arg2[%c37] : memref<288xf32, #tpu.memory_space<smem>>
    %228 = vector.extract_strided_slice %1 {offsets = [0, 0, 1], sizes = [1, 16, 16], strides = [1, 1, 1]} : vector<4x18x18xf32> to vector<1x16x16xf32>
    %229 = vector.shape_cast %228 : vector<1x16x16xf32> to vector<16x16xf32>
    %230 = vector.broadcast %227 : f32 to vector<16x16xf32>
    %231 = arith.mulf %230, %229 : vector<16x16xf32>
    %232 = arith.addf %226, %231 : vector<16x16xf32>
    %c38 = arith.constant 38 : index
    %233 = memref.load %arg2[%c38] : memref<288xf32, #tpu.memory_space<smem>>
    %234 = vector.extract_strided_slice %1 {offsets = [0, 0, 2], sizes = [1, 16, 16], strides = [1, 1, 1]} : vector<4x18x18xf32> to vector<1x16x16xf32>
    %235 = vector.shape_cast %234 : vector<1x16x16xf32> to vector<16x16xf32>
    %236 = vector.broadcast %233 : f32 to vector<16x16xf32>
    %237 = arith.mulf %236, %235 : vector<16x16xf32>
    %238 = arith.addf %232, %237 : vector<16x16xf32>
    %c39 = arith.constant 39 : index
    %239 = memref.load %arg2[%c39] : memref<288xf32, #tpu.memory_space<smem>>
    %240 = vector.extract_strided_slice %1 {offsets = [0, 1, 0], sizes = [1, 16, 16], strides = [1, 1, 1]} : vector<4x18x18xf32> to vector<1x16x16xf32>
    %241 = vector.shape_cast %240 : vector<1x16x16xf32> to vector<16x16xf32>
    %242 = vector.broadcast %239 : f32 to vector<16x16xf32>
    %243 = arith.mulf %242, %241 : vector<16x16xf32>
    %244 = arith.addf %238, %243 : vector<16x16xf32>
    %c40 = arith.constant 40 : index
    %245 = memref.load %arg2[%c40] : memref<288xf32, #tpu.memory_space<smem>>
    %246 = vector.extract_strided_slice %1 {offsets = [0, 1, 1], sizes = [1, 16, 16], strides = [1, 1, 1]} : vector<4x18x18xf32> to vector<1x16x16xf32>
    %247 = vector.shape_cast %246 : vector<1x16x16xf32> to vector<16x16xf32>
    %248 = vector.broadcast %245 : f32 to vector<16x16xf32>
    %249 = arith.mulf %248, %247 : vector<16x16xf32>
    %250 = arith.addf %244, %249 : vector<16x16xf32>
    %c41 = arith.constant 41 : index
    %251 = memref.load %arg2[%c41] : memref<288xf32, #tpu.memory_space<smem>>
    %252 = vector.extract_strided_slice %1 {offsets = [0, 1, 2], sizes = [1, 16, 16], strides = [1, 1, 1]} : vector<4x18x18xf32> to vector<1x16x16xf32>
    %253 = vector.shape_cast %252 : vector<1x16x16xf32> to vector<16x16xf32>
    %254 = vector.broadcast %251 : f32 to vector<16x16xf32>
    %255 = arith.mulf %254, %253 : vector<16x16xf32>
    %256 = arith.addf %250, %255 : vector<16x16xf32>
    %c42 = arith.constant 42 : index
    %257 = memref.load %arg2[%c42] : memref<288xf32, #tpu.memory_space<smem>>
    %258 = vector.extract_strided_slice %1 {offsets = [0, 2, 0], sizes = [1, 16, 16], strides = [1, 1, 1]} : vector<4x18x18xf32> to vector<1x16x16xf32>
    %259 = vector.shape_cast %258 : vector<1x16x16xf32> to vector<16x16xf32>
    %260 = vector.broadcast %257 : f32 to vector<16x16xf32>
    %261 = arith.mulf %260, %259 : vector<16x16xf32>
    %262 = arith.addf %256, %261 : vector<16x16xf32>
    %c43 = arith.constant 43 : index
    %263 = memref.load %arg2[%c43] : memref<288xf32, #tpu.memory_space<smem>>
    %264 = vector.extract_strided_slice %1 {offsets = [0, 2, 1], sizes = [1, 16, 16], strides = [1, 1, 1]} : vector<4x18x18xf32> to vector<1x16x16xf32>
    %265 = vector.shape_cast %264 : vector<1x16x16xf32> to vector<16x16xf32>
    %266 = vector.broadcast %263 : f32 to vector<16x16xf32>
    %267 = arith.mulf %266, %265 : vector<16x16xf32>
    %268 = arith.addf %262, %267 : vector<16x16xf32>
    %c44 = arith.constant 44 : index
    %269 = memref.load %arg2[%c44] : memref<288xf32, #tpu.memory_space<smem>>
    %270 = vector.extract_strided_slice %1 {offsets = [0, 2, 2], sizes = [1, 16, 16], strides = [1, 1, 1]} : vector<4x18x18xf32> to vector<1x16x16xf32>
    %271 = vector.shape_cast %270 : vector<1x16x16xf32> to vector<16x16xf32>
    %272 = vector.broadcast %269 : f32 to vector<16x16xf32>
    %273 = arith.mulf %272, %271 : vector<16x16xf32>
    %274 = arith.addf %268, %273 : vector<16x16xf32>
    %c45 = arith.constant 45 : index
    %275 = memref.load %arg2[%c45] : memref<288xf32, #tpu.memory_space<smem>>
    %276 = vector.extract_strided_slice %1 {offsets = [1, 0, 0], sizes = [1, 16, 16], strides = [1, 1, 1]} : vector<4x18x18xf32> to vector<1x16x16xf32>
    %277 = vector.shape_cast %276 : vector<1x16x16xf32> to vector<16x16xf32>
    %278 = vector.broadcast %275 : f32 to vector<16x16xf32>
    %279 = arith.mulf %278, %277 : vector<16x16xf32>
    %280 = arith.addf %274, %279 : vector<16x16xf32>
    %c46 = arith.constant 46 : index
    %281 = memref.load %arg2[%c46] : memref<288xf32, #tpu.memory_space<smem>>
    %282 = vector.extract_strided_slice %1 {offsets = [1, 0, 1], sizes = [1, 16, 16], strides = [1, 1, 1]} : vector<4x18x18xf32> to vector<1x16x16xf32>
    %283 = vector.shape_cast %282 : vector<1x16x16xf32> to vector<16x16xf32>
    %284 = vector.broadcast %281 : f32 to vector<16x16xf32>
    %285 = arith.mulf %284, %283 : vector<16x16xf32>
    %286 = arith.addf %280, %285 : vector<16x16xf32>
    %c47 = arith.constant 47 : index
    %287 = memref.load %arg2[%c47] : memref<288xf32, #tpu.memory_space<smem>>
    %288 = vector.extract_strided_slice %1 {offsets = [1, 0, 2], sizes = [1, 16, 16], strides = [1, 1, 1]} : vector<4x18x18xf32> to vector<1x16x16xf32>
    %289 = vector.shape_cast %288 : vector<1x16x16xf32> to vector<16x16xf32>
    %290 = vector.broadcast %287 : f32 to vector<16x16xf32>
    %291 = arith.mulf %290, %289 : vector<16x16xf32>
    %292 = arith.addf %286, %291 : vector<16x16xf32>
    %c48 = arith.constant 48 : index
    %293 = memref.load %arg2[%c48] : memref<288xf32, #tpu.memory_space<smem>>
    %294 = vector.extract_strided_slice %1 {offsets = [1, 1, 0], sizes = [1, 16, 16], strides = [1, 1, 1]} : vector<4x18x18xf32> to vector<1x16x16xf32>
    %295 = vector.shape_cast %294 : vector<1x16x16xf32> to vector<16x16xf32>
    %296 = vector.broadcast %293 : f32 to vector<16x16xf32>
    %297 = arith.mulf %296, %295 : vector<16x16xf32>
    %298 = arith.addf %292, %297 : vector<16x16xf32>
    %c49 = arith.constant 49 : index
    %299 = memref.load %arg2[%c49] : memref<288xf32, #tpu.memory_space<smem>>
    %300 = vector.extract_strided_slice %1 {offsets = [1, 1, 1], sizes = [1, 16, 16], strides = [1, 1, 1]} : vector<4x18x18xf32> to vector<1x16x16xf32>
    %301 = vector.shape_cast %300 : vector<1x16x16xf32> to vector<16x16xf32>
    %302 = vector.broadcast %299 : f32 to vector<16x16xf32>
    %303 = arith.mulf %302, %301 : vector<16x16xf32>
    %304 = arith.addf %298, %303 : vector<16x16xf32>
    %c50 = arith.constant 50 : index
    %305 = memref.load %arg2[%c50] : memref<288xf32, #tpu.memory_space<smem>>
    %306 = vector.extract_strided_slice %1 {offsets = [1, 1, 2], sizes = [1, 16, 16], strides = [1, 1, 1]} : vector<4x18x18xf32> to vector<1x16x16xf32>
    %307 = vector.shape_cast %306 : vector<1x16x16xf32> to vector<16x16xf32>
    %308 = vector.broadcast %305 : f32 to vector<16x16xf32>
    %309 = arith.mulf %308, %307 : vector<16x16xf32>
    %310 = arith.addf %304, %309 : vector<16x16xf32>
    %c51 = arith.constant 51 : index
    %311 = memref.load %arg2[%c51] : memref<288xf32, #tpu.memory_space<smem>>
    %312 = vector.extract_strided_slice %1 {offsets = [1, 2, 0], sizes = [1, 16, 16], strides = [1, 1, 1]} : vector<4x18x18xf32> to vector<1x16x16xf32>
    %313 = vector.shape_cast %312 : vector<1x16x16xf32> to vector<16x16xf32>
    %314 = vector.broadcast %311 : f32 to vector<16x16xf32>
    %315 = arith.mulf %314, %313 : vector<16x16xf32>
    %316 = arith.addf %310, %315 : vector<16x16xf32>
    %c52 = arith.constant 52 : index
    %317 = memref.load %arg2[%c52] : memref<288xf32, #tpu.memory_space<smem>>
    %318 = vector.extract_strided_slice %1 {offsets = [1, 2, 1], sizes = [1, 16, 16], strides = [1, 1, 1]} : vector<4x18x18xf32> to vector<1x16x16xf32>
    %319 = vector.shape_cast %318 : vector<1x16x16xf32> to vector<16x16xf32>
    %320 = vector.broadcast %317 : f32 to vector<16x16xf32>
    %321 = arith.mulf %320, %319 : vector<16x16xf32>
    %322 = arith.addf %316, %321 : vector<16x16xf32>
    %c53 = arith.constant 53 : index
    %323 = memref.load %arg2[%c53] : memref<288xf32, #tpu.memory_space<smem>>
    %324 = vector.extract_strided_slice %1 {offsets = [1, 2, 2], sizes = [1, 16, 16], strides = [1, 1, 1]} : vector<4x18x18xf32> to vector<1x16x16xf32>
    %325 = vector.shape_cast %324 : vector<1x16x16xf32> to vector<16x16xf32>
    %326 = vector.broadcast %323 : f32 to vector<16x16xf32>
    %327 = arith.mulf %326, %325 : vector<16x16xf32>
    %328 = arith.addf %322, %327 : vector<16x16xf32>
    %c54 = arith.constant 54 : index
    %329 = memref.load %arg2[%c54] : memref<288xf32, #tpu.memory_space<smem>>
    %330 = vector.extract_strided_slice %1 {offsets = [2, 0, 0], sizes = [1, 16, 16], strides = [1, 1, 1]} : vector<4x18x18xf32> to vector<1x16x16xf32>
    %331 = vector.shape_cast %330 : vector<1x16x16xf32> to vector<16x16xf32>
    %332 = vector.broadcast %329 : f32 to vector<16x16xf32>
    %333 = arith.mulf %332, %331 : vector<16x16xf32>
    %334 = arith.addf %328, %333 : vector<16x16xf32>
    %c55 = arith.constant 55 : index
    %335 = memref.load %arg2[%c55] : memref<288xf32, #tpu.memory_space<smem>>
    %336 = vector.extract_strided_slice %1 {offsets = [2, 0, 1], sizes = [1, 16, 16], strides = [1, 1, 1]} : vector<4x18x18xf32> to vector<1x16x16xf32>
    %337 = vector.shape_cast %336 : vector<1x16x16xf32> to vector<16x16xf32>
    %338 = vector.broadcast %335 : f32 to vector<16x16xf32>
    %339 = arith.mulf %338, %337 : vector<16x16xf32>
    %340 = arith.addf %334, %339 : vector<16x16xf32>
    %c56 = arith.constant 56 : index
    %341 = memref.load %arg2[%c56] : memref<288xf32, #tpu.memory_space<smem>>
    %342 = vector.extract_strided_slice %1 {offsets = [2, 0, 2], sizes = [1, 16, 16], strides = [1, 1, 1]} : vector<4x18x18xf32> to vector<1x16x16xf32>
    %343 = vector.shape_cast %342 : vector<1x16x16xf32> to vector<16x16xf32>
    %344 = vector.broadcast %341 : f32 to vector<16x16xf32>
    %345 = arith.mulf %344, %343 : vector<16x16xf32>
    %346 = arith.addf %340, %345 : vector<16x16xf32>
    %c57 = arith.constant 57 : index
    %347 = memref.load %arg2[%c57] : memref<288xf32, #tpu.memory_space<smem>>
    %348 = vector.extract_strided_slice %1 {offsets = [2, 1, 0], sizes = [1, 16, 16], strides = [1, 1, 1]} : vector<4x18x18xf32> to vector<1x16x16xf32>
    %349 = vector.shape_cast %348 : vector<1x16x16xf32> to vector<16x16xf32>
    %350 = vector.broadcast %347 : f32 to vector<16x16xf32>
    %351 = arith.mulf %350, %349 : vector<16x16xf32>
    %352 = arith.addf %346, %351 : vector<16x16xf32>
    %c58 = arith.constant 58 : index
    %353 = memref.load %arg2[%c58] : memref<288xf32, #tpu.memory_space<smem>>
    %354 = vector.extract_strided_slice %1 {offsets = [2, 1, 1], sizes = [1, 16, 16], strides = [1, 1, 1]} : vector<4x18x18xf32> to vector<1x16x16xf32>
    %355 = vector.shape_cast %354 : vector<1x16x16xf32> to vector<16x16xf32>
    %356 = vector.broadcast %353 : f32 to vector<16x16xf32>
    %357 = arith.mulf %356, %355 : vector<16x16xf32>
    %358 = arith.addf %352, %357 : vector<16x16xf32>
    %c59 = arith.constant 59 : index
    %359 = memref.load %arg2[%c59] : memref<288xf32, #tpu.memory_space<smem>>
    %360 = vector.extract_strided_slice %1 {offsets = [2, 1, 2], sizes = [1, 16, 16], strides = [1, 1, 1]} : vector<4x18x18xf32> to vector<1x16x16xf32>
    %361 = vector.shape_cast %360 : vector<1x16x16xf32> to vector<16x16xf32>
    %362 = vector.broadcast %359 : f32 to vector<16x16xf32>
    %363 = arith.mulf %362, %361 : vector<16x16xf32>
    %364 = arith.addf %358, %363 : vector<16x16xf32>
    %c60 = arith.constant 60 : index
    %365 = memref.load %arg2[%c60] : memref<288xf32, #tpu.memory_space<smem>>
    %366 = vector.extract_strided_slice %1 {offsets = [2, 2, 0], sizes = [1, 16, 16], strides = [1, 1, 1]} : vector<4x18x18xf32> to vector<1x16x16xf32>
    %367 = vector.shape_cast %366 : vector<1x16x16xf32> to vector<16x16xf32>
    %368 = vector.broadcast %365 : f32 to vector<16x16xf32>
    %369 = arith.mulf %368, %367 : vector<16x16xf32>
    %370 = arith.addf %364, %369 : vector<16x16xf32>
    %c61 = arith.constant 61 : index
    %371 = memref.load %arg2[%c61] : memref<288xf32, #tpu.memory_space<smem>>
    %372 = vector.extract_strided_slice %1 {offsets = [2, 2, 1], sizes = [1, 16, 16], strides = [1, 1, 1]} : vector<4x18x18xf32> to vector<1x16x16xf32>
    %373 = vector.shape_cast %372 : vector<1x16x16xf32> to vector<16x16xf32>
    %374 = vector.broadcast %371 : f32 to vector<16x16xf32>
    %375 = arith.mulf %374, %373 : vector<16x16xf32>
    %376 = arith.addf %370, %375 : vector<16x16xf32>
    %c62 = arith.constant 62 : index
    %377 = memref.load %arg2[%c62] : memref<288xf32, #tpu.memory_space<smem>>
    %378 = vector.extract_strided_slice %1 {offsets = [2, 2, 2], sizes = [1, 16, 16], strides = [1, 1, 1]} : vector<4x18x18xf32> to vector<1x16x16xf32>
    %379 = vector.shape_cast %378 : vector<1x16x16xf32> to vector<16x16xf32>
    %380 = vector.broadcast %377 : f32 to vector<16x16xf32>
    %381 = arith.mulf %380, %379 : vector<16x16xf32>
    %382 = arith.addf %376, %381 : vector<16x16xf32>
    %c63 = arith.constant 63 : index
    %383 = memref.load %arg2[%c63] : memref<288xf32, #tpu.memory_space<smem>>
    %384 = vector.extract_strided_slice %1 {offsets = [3, 0, 0], sizes = [1, 16, 16], strides = [1, 1, 1]} : vector<4x18x18xf32> to vector<1x16x16xf32>
    %385 = vector.shape_cast %384 : vector<1x16x16xf32> to vector<16x16xf32>
    %386 = vector.broadcast %383 : f32 to vector<16x16xf32>
    %387 = arith.mulf %386, %385 : vector<16x16xf32>
    %388 = arith.addf %382, %387 : vector<16x16xf32>
    %c64 = arith.constant 64 : index
    %389 = memref.load %arg2[%c64] : memref<288xf32, #tpu.memory_space<smem>>
    %390 = vector.extract_strided_slice %1 {offsets = [3, 0, 1], sizes = [1, 16, 16], strides = [1, 1, 1]} : vector<4x18x18xf32> to vector<1x16x16xf32>
    %391 = vector.shape_cast %390 : vector<1x16x16xf32> to vector<16x16xf32>
    %392 = vector.broadcast %389 : f32 to vector<16x16xf32>
    %393 = arith.mulf %392, %391 : vector<16x16xf32>
    %394 = arith.addf %388, %393 : vector<16x16xf32>
    %c65 = arith.constant 65 : index
    %395 = memref.load %arg2[%c65] : memref<288xf32, #tpu.memory_space<smem>>
    %396 = vector.extract_strided_slice %1 {offsets = [3, 0, 2], sizes = [1, 16, 16], strides = [1, 1, 1]} : vector<4x18x18xf32> to vector<1x16x16xf32>
    %397 = vector.shape_cast %396 : vector<1x16x16xf32> to vector<16x16xf32>
    %398 = vector.broadcast %395 : f32 to vector<16x16xf32>
    %399 = arith.mulf %398, %397 : vector<16x16xf32>
    %400 = arith.addf %394, %399 : vector<16x16xf32>
    %c66 = arith.constant 66 : index
    %401 = memref.load %arg2[%c66] : memref<288xf32, #tpu.memory_space<smem>>
    %402 = vector.extract_strided_slice %1 {offsets = [3, 1, 0], sizes = [1, 16, 16], strides = [1, 1, 1]} : vector<4x18x18xf32> to vector<1x16x16xf32>
    %403 = vector.shape_cast %402 : vector<1x16x16xf32> to vector<16x16xf32>
    %404 = vector.broadcast %401 : f32 to vector<16x16xf32>
    %405 = arith.mulf %404, %403 : vector<16x16xf32>
    %406 = arith.addf %400, %405 : vector<16x16xf32>
    %c67 = arith.constant 67 : index
    %407 = memref.load %arg2[%c67] : memref<288xf32, #tpu.memory_space<smem>>
    %408 = vector.extract_strided_slice %1 {offsets = [3, 1, 1], sizes = [1, 16, 16], strides = [1, 1, 1]} : vector<4x18x18xf32> to vector<1x16x16xf32>
    %409 = vector.shape_cast %408 : vector<1x16x16xf32> to vector<16x16xf32>
    %410 = vector.broadcast %407 : f32 to vector<16x16xf32>
    %411 = arith.mulf %410, %409 : vector<16x16xf32>
    %412 = arith.addf %406, %411 : vector<16x16xf32>
    %c68 = arith.constant 68 : index
    %413 = memref.load %arg2[%c68] : memref<288xf32, #tpu.memory_space<smem>>
    %414 = vector.extract_strided_slice %1 {offsets = [3, 1, 2], sizes = [1, 16, 16], strides = [1, 1, 1]} : vector<4x18x18xf32> to vector<1x16x16xf32>
    %415 = vector.shape_cast %414 : vector<1x16x16xf32> to vector<16x16xf32>
    %416 = vector.broadcast %413 : f32 to vector<16x16xf32>
    %417 = arith.mulf %416, %415 : vector<16x16xf32>
    %418 = arith.addf %412, %417 : vector<16x16xf32>
    %c69 = arith.constant 69 : index
    %419 = memref.load %arg2[%c69] : memref<288xf32, #tpu.memory_space<smem>>
    %420 = vector.extract_strided_slice %1 {offsets = [3, 2, 0], sizes = [1, 16, 16], strides = [1, 1, 1]} : vector<4x18x18xf32> to vector<1x16x16xf32>
    %421 = vector.shape_cast %420 : vector<1x16x16xf32> to vector<16x16xf32>
    %422 = vector.broadcast %419 : f32 to vector<16x16xf32>
    %423 = arith.mulf %422, %421 : vector<16x16xf32>
    %424 = arith.addf %418, %423 : vector<16x16xf32>
    %c70 = arith.constant 70 : index
    %425 = memref.load %arg2[%c70] : memref<288xf32, #tpu.memory_space<smem>>
    %426 = vector.extract_strided_slice %1 {offsets = [3, 2, 1], sizes = [1, 16, 16], strides = [1, 1, 1]} : vector<4x18x18xf32> to vector<1x16x16xf32>
    %427 = vector.shape_cast %426 : vector<1x16x16xf32> to vector<16x16xf32>
    %428 = vector.broadcast %425 : f32 to vector<16x16xf32>
    %429 = arith.mulf %428, %427 : vector<16x16xf32>
    %430 = arith.addf %424, %429 : vector<16x16xf32>
    %c71 = arith.constant 71 : index
    %431 = memref.load %arg2[%c71] : memref<288xf32, #tpu.memory_space<smem>>
    %432 = vector.extract_strided_slice %1 {offsets = [3, 2, 2], sizes = [1, 16, 16], strides = [1, 1, 1]} : vector<4x18x18xf32> to vector<1x16x16xf32>
    %433 = vector.shape_cast %432 : vector<1x16x16xf32> to vector<16x16xf32>
    %434 = vector.broadcast %431 : f32 to vector<16x16xf32>
    %435 = arith.mulf %434, %433 : vector<16x16xf32>
    %436 = arith.addf %430, %435 : vector<16x16xf32>
    %cst_8 = arith.constant 0.000000e+00 : f32
    %437 = vector.broadcast %cst_8 : f32 to vector<16x16xf32>
    %438 = arith.maximumf %436, %437 : vector<16x16xf32>
    %c0_9 = arith.constant 0 : index
    %c1_10 = arith.constant 1 : index
    %c0_11 = arith.constant 0 : index
    %c0_12 = arith.constant 0 : index
    %439 = vector.load %arg3[%c0_9, %c1_10, %c0_11, %c0_12] : memref<1x8x16x16xf32, #tpu.memory_space<vmem>>, vector<1x1x16x16xf32>
    %440 = vector.shape_cast %439 : vector<1x1x16x16xf32> to vector<16x16xf32>
    %441 = vector.shape_cast %438 : vector<16x16xf32> to vector<1x1x16x16xf32>
    tpu.vector_store %arg3[%c0_9, %c1_10, %c0_11, %c0_12], %441 {strides = array<i32>} : memref<1x8x16x16xf32, #tpu.memory_space<vmem>>, vector<1x1x16x16xf32>,
    %c72 = arith.constant 72 : index
    %442 = memref.load %arg2[%c72] : memref<288xf32, #tpu.memory_space<smem>>
    %443 = vector.extract_strided_slice %1 {offsets = [0, 0, 0], sizes = [1, 16, 16], strides = [1, 1, 1]} : vector<4x18x18xf32> to vector<1x16x16xf32>
    %444 = vector.shape_cast %443 : vector<1x16x16xf32> to vector<16x16xf32>
    %445 = vector.broadcast %442 : f32 to vector<16x16xf32>
    %446 = arith.mulf %445, %444 : vector<16x16xf32>
    %c73 = arith.constant 73 : index
    %447 = memref.load %arg2[%c73] : memref<288xf32, #tpu.memory_space<smem>>
    %448 = vector.extract_strided_slice %1 {offsets = [0, 0, 1], sizes = [1, 16, 16], strides = [1, 1, 1]} : vector<4x18x18xf32> to vector<1x16x16xf32>
    %449 = vector.shape_cast %448 : vector<1x16x16xf32> to vector<16x16xf32>
    %450 = vector.broadcast %447 : f32 to vector<16x16xf32>
    %451 = arith.mulf %450, %449 : vector<16x16xf32>
    %452 = arith.addf %446, %451 : vector<16x16xf32>
    %c74 = arith.constant 74 : index
    %453 = memref.load %arg2[%c74] : memref<288xf32, #tpu.memory_space<smem>>
    %454 = vector.extract_strided_slice %1 {offsets = [0, 0, 2], sizes = [1, 16, 16], strides = [1, 1, 1]} : vector<4x18x18xf32> to vector<1x16x16xf32>
    %455 = vector.shape_cast %454 : vector<1x16x16xf32> to vector<16x16xf32>
    %456 = vector.broadcast %453 : f32 to vector<16x16xf32>
    %457 = arith.mulf %456, %455 : vector<16x16xf32>
    %458 = arith.addf %452, %457 : vector<16x16xf32>
    %c75 = arith.constant 75 : index
    %459 = memref.load %arg2[%c75] : memref<288xf32, #tpu.memory_space<smem>>
    %460 = vector.extract_strided_slice %1 {offsets = [0, 1, 0], sizes = [1, 16, 16], strides = [1, 1, 1]} : vector<4x18x18xf32> to vector<1x16x16xf32>
    %461 = vector.shape_cast %460 : vector<1x16x16xf32> to vector<16x16xf32>
    %462 = vector.broadcast %459 : f32 to vector<16x16xf32>
    %463 = arith.mulf %462, %461 : vector<16x16xf32>
    %464 = arith.addf %458, %463 : vector<16x16xf32>
    %c76 = arith.constant 76 : index
    %465 = memref.load %arg2[%c76] : memref<288xf32, #tpu.memory_space<smem>>
    %466 = vector.extract_strided_slice %1 {offsets = [0, 1, 1], sizes = [1, 16, 16], strides = [1, 1, 1]} : vector<4x18x18xf32> to vector<1x16x16xf32>
    %467 = vector.shape_cast %466 : vector<1x16x16xf32> to vector<16x16xf32>
    %468 = vector.broadcast %465 : f32 to vector<16x16xf32>
    %469 = arith.mulf %468, %467 : vector<16x16xf32>
    %470 = arith.addf %464, %469 : vector<16x16xf32>
    %c77 = arith.constant 77 : index
    %471 = memref.load %arg2[%c77] : memref<288xf32, #tpu.memory_space<smem>>
    %472 = vector.extract_strided_slice %1 {offsets = [0, 1, 2], sizes = [1, 16, 16], strides = [1, 1, 1]} : vector<4x18x18xf32> to vector<1x16x16xf32>
    %473 = vector.shape_cast %472 : vector<1x16x16xf32> to vector<16x16xf32>
    %474 = vector.broadcast %471 : f32 to vector<16x16xf32>
    %475 = arith.mulf %474, %473 : vector<16x16xf32>
    %476 = arith.addf %470, %475 : vector<16x16xf32>
    %c78 = arith.constant 78 : index
    %477 = memref.load %arg2[%c78] : memref<288xf32, #tpu.memory_space<smem>>
    %478 = vector.extract_strided_slice %1 {offsets = [0, 2, 0], sizes = [1, 16, 16], strides = [1, 1, 1]} : vector<4x18x18xf32> to vector<1x16x16xf32>
    %479 = vector.shape_cast %478 : vector<1x16x16xf32> to vector<16x16xf32>
    %480 = vector.broadcast %477 : f32 to vector<16x16xf32>
    %481 = arith.mulf %480, %479 : vector<16x16xf32>
    %482 = arith.addf %476, %481 : vector<16x16xf32>
    %c79 = arith.constant 79 : index
    %483 = memref.load %arg2[%c79] : memref<288xf32, #tpu.memory_space<smem>>
    %484 = vector.extract_strided_slice %1 {offsets = [0, 2, 1], sizes = [1, 16, 16], strides = [1, 1, 1]} : vector<4x18x18xf32> to vector<1x16x16xf32>
    %485 = vector.shape_cast %484 : vector<1x16x16xf32> to vector<16x16xf32>
    %486 = vector.broadcast %483 : f32 to vector<16x16xf32>
    %487 = arith.mulf %486, %485 : vector<16x16xf32>
    %488 = arith.addf %482, %487 : vector<16x16xf32>
    %c80 = arith.constant 80 : index
    %489 = memref.load %arg2[%c80] : memref<288xf32, #tpu.memory_space<smem>>
    %490 = vector.extract_strided_slice %1 {offsets = [0, 2, 2], sizes = [1, 16, 16], strides = [1, 1, 1]} : vector<4x18x18xf32> to vector<1x16x16xf32>
    %491 = vector.shape_cast %490 : vector<1x16x16xf32> to vector<16x16xf32>
    %492 = vector.broadcast %489 : f32 to vector<16x16xf32>
    %493 = arith.mulf %492, %491 : vector<16x16xf32>
    %494 = arith.addf %488, %493 : vector<16x16xf32>
    %c81 = arith.constant 81 : index
    %495 = memref.load %arg2[%c81] : memref<288xf32, #tpu.memory_space<smem>>
    %496 = vector.extract_strided_slice %1 {offsets = [1, 0, 0], sizes = [1, 16, 16], strides = [1, 1, 1]} : vector<4x18x18xf32> to vector<1x16x16xf32>
    %497 = vector.shape_cast %496 : vector<1x16x16xf32> to vector<16x16xf32>
    %498 = vector.broadcast %495 : f32 to vector<16x16xf32>
    %499 = arith.mulf %498, %497 : vector<16x16xf32>
    %500 = arith.addf %494, %499 : vector<16x16xf32>
    %c82 = arith.constant 82 : index
    %501 = memref.load %arg2[%c82] : memref<288xf32, #tpu.memory_space<smem>>
    %502 = vector.extract_strided_slice %1 {offsets = [1, 0, 1], sizes = [1, 16, 16], strides = [1, 1, 1]} : vector<4x18x18xf32> to vector<1x16x16xf32>
    %503 = vector.shape_cast %502 : vector<1x16x16xf32> to vector<16x16xf32>
    %504 = vector.broadcast %501 : f32 to vector<16x16xf32>
    %505 = arith.mulf %504, %503 : vector<16x16xf32>
    %506 = arith.addf %500, %505 : vector<16x16xf32>
    %c83 = arith.constant 83 : index
    %507 = memref.load %arg2[%c83] : memref<288xf32, #tpu.memory_space<smem>>
    %508 = vector.extract_strided_slice %1 {offsets = [1, 0, 2], sizes = [1, 16, 16], strides = [1, 1, 1]} : vector<4x18x18xf32> to vector<1x16x16xf32>
    %509 = vector.shape_cast %508 : vector<1x16x16xf32> to vector<16x16xf32>
    %510 = vector.broadcast %507 : f32 to vector<16x16xf32>
    %511 = arith.mulf %510, %509 : vector<16x16xf32>
    %512 = arith.addf %506, %511 : vector<16x16xf32>
    %c84 = arith.constant 84 : index
    %513 = memref.load %arg2[%c84] : memref<288xf32, #tpu.memory_space<smem>>
    %514 = vector.extract_strided_slice %1 {offsets = [1, 1, 0], sizes = [1, 16, 16], strides = [1, 1, 1]} : vector<4x18x18xf32> to vector<1x16x16xf32>
    %515 = vector.shape_cast %514 : vector<1x16x16xf32> to vector<16x16xf32>
    %516 = vector.broadcast %513 : f32 to vector<16x16xf32>
    %517 = arith.mulf %516, %515 : vector<16x16xf32>
    %518 = arith.addf %512, %517 : vector<16x16xf32>
    %c85 = arith.constant 85 : index
    %519 = memref.load %arg2[%c85] : memref<288xf32, #tpu.memory_space<smem>>
    %520 = vector.extract_strided_slice %1 {offsets = [1, 1, 1], sizes = [1, 16, 16], strides = [1, 1, 1]} : vector<4x18x18xf32> to vector<1x16x16xf32>
    %521 = vector.shape_cast %520 : vector<1x16x16xf32> to vector<16x16xf32>
    %522 = vector.broadcast %519 : f32 to vector<16x16xf32>
    %523 = arith.mulf %522, %521 : vector<16x16xf32>
    %524 = arith.addf %518, %523 : vector<16x16xf32>
    %c86 = arith.constant 86 : index
    %525 = memref.load %arg2[%c86] : memref<288xf32, #tpu.memory_space<smem>>
    %526 = vector.extract_strided_slice %1 {offsets = [1, 1, 2], sizes = [1, 16, 16], strides = [1, 1, 1]} : vector<4x18x18xf32> to vector<1x16x16xf32>
    %527 = vector.shape_cast %526 : vector<1x16x16xf32> to vector<16x16xf32>
    %528 = vector.broadcast %525 : f32 to vector<16x16xf32>
    %529 = arith.mulf %528, %527 : vector<16x16xf32>
    %530 = arith.addf %524, %529 : vector<16x16xf32>
    %c87 = arith.constant 87 : index
    %531 = memref.load %arg2[%c87] : memref<288xf32, #tpu.memory_space<smem>>
    %532 = vector.extract_strided_slice %1 {offsets = [1, 2, 0], sizes = [1, 16, 16], strides = [1, 1, 1]} : vector<4x18x18xf32> to vector<1x16x16xf32>
    %533 = vector.shape_cast %532 : vector<1x16x16xf32> to vector<16x16xf32>
    %534 = vector.broadcast %531 : f32 to vector<16x16xf32>
    %535 = arith.mulf %534, %533 : vector<16x16xf32>
    %536 = arith.addf %530, %535 : vector<16x16xf32>
    %c88 = arith.constant 88 : index
    %537 = memref.load %arg2[%c88] : memref<288xf32, #tpu.memory_space<smem>>
    %538 = vector.extract_strided_slice %1 {offsets = [1, 2, 1], sizes = [1, 16, 16], strides = [1, 1, 1]} : vector<4x18x18xf32> to vector<1x16x16xf32>
    %539 = vector.shape_cast %538 : vector<1x16x16xf32> to vector<16x16xf32>
    %540 = vector.broadcast %537 : f32 to vector<16x16xf32>
    %541 = arith.mulf %540, %539 : vector<16x16xf32>
    %542 = arith.addf %536, %541 : vector<16x16xf32>
    %c89 = arith.constant 89 : index
    %543 = memref.load %arg2[%c89] : memref<288xf32, #tpu.memory_space<smem>>
    %544 = vector.extract_strided_slice %1 {offsets = [1, 2, 2], sizes = [1, 16, 16], strides = [1, 1, 1]} : vector<4x18x18xf32> to vector<1x16x16xf32>
    %545 = vector.shape_cast %544 : vector<1x16x16xf32> to vector<16x16xf32>
    %546 = vector.broadcast %543 : f32 to vector<16x16xf32>
    %547 = arith.mulf %546, %545 : vector<16x16xf32>
    %548 = arith.addf %542, %547 : vector<16x16xf32>
    %c90 = arith.constant 90 : index
    %549 = memref.load %arg2[%c90] : memref<288xf32, #tpu.memory_space<smem>>
    %550 = vector.extract_strided_slice %1 {offsets = [2, 0, 0], sizes = [1, 16, 16], strides = [1, 1, 1]} : vector<4x18x18xf32> to vector<1x16x16xf32>
    %551 = vector.shape_cast %550 : vector<1x16x16xf32> to vector<16x16xf32>
    %552 = vector.broadcast %549 : f32 to vector<16x16xf32>
    %553 = arith.mulf %552, %551 : vector<16x16xf32>
    %554 = arith.addf %548, %553 : vector<16x16xf32>
    %c91 = arith.constant 91 : index
    %555 = memref.load %arg2[%c91] : memref<288xf32, #tpu.memory_space<smem>>
    %556 = vector.extract_strided_slice %1 {offsets = [2, 0, 1], sizes = [1, 16, 16], strides = [1, 1, 1]} : vector<4x18x18xf32> to vector<1x16x16xf32>
    %557 = vector.shape_cast %556 : vector<1x16x16xf32> to vector<16x16xf32>
    %558 = vector.broadcast %555 : f32 to vector<16x16xf32>
    %559 = arith.mulf %558, %557 : vector<16x16xf32>
    %560 = arith.addf %554, %559 : vector<16x16xf32>
    %c92 = arith.constant 92 : index
    %561 = memref.load %arg2[%c92] : memref<288xf32, #tpu.memory_space<smem>>
    %562 = vector.extract_strided_slice %1 {offsets = [2, 0, 2], sizes = [1, 16, 16], strides = [1, 1, 1]} : vector<4x18x18xf32> to vector<1x16x16xf32>
    %563 = vector.shape_cast %562 : vector<1x16x16xf32> to vector<16x16xf32>
    %564 = vector.broadcast %561 : f32 to vector<16x16xf32>
    %565 = arith.mulf %564, %563 : vector<16x16xf32>
    %566 = arith.addf %560, %565 : vector<16x16xf32>
    %c93 = arith.constant 93 : index
    %567 = memref.load %arg2[%c93] : memref<288xf32, #tpu.memory_space<smem>>
    %568 = vector.extract_strided_slice %1 {offsets = [2, 1, 0], sizes = [1, 16, 16], strides = [1, 1, 1]} : vector<4x18x18xf32> to vector<1x16x16xf32>
    %569 = vector.shape_cast %568 : vector<1x16x16xf32> to vector<16x16xf32>
    %570 = vector.broadcast %567 : f32 to vector<16x16xf32>
    %571 = arith.mulf %570, %569 : vector<16x16xf32>
    %572 = arith.addf %566, %571 : vector<16x16xf32>
    %c94 = arith.constant 94 : index
    %573 = memref.load %arg2[%c94] : memref<288xf32, #tpu.memory_space<smem>>
    %574 = vector.extract_strided_slice %1 {offsets = [2, 1, 1], sizes = [1, 16, 16], strides = [1, 1, 1]} : vector<4x18x18xf32> to vector<1x16x16xf32>
    %575 = vector.shape_cast %574 : vector<1x16x16xf32> to vector<16x16xf32>
    %576 = vector.broadcast %573 : f32 to vector<16x16xf32>
    %577 = arith.mulf %576, %575 : vector<16x16xf32>
    %578 = arith.addf %572, %577 : vector<16x16xf32>
    %c95 = arith.constant 95 : index
    %579 = memref.load %arg2[%c95] : memref<288xf32, #tpu.memory_space<smem>>
    %580 = vector.extract_strided_slice %1 {offsets = [2, 1, 2], sizes = [1, 16, 16], strides = [1, 1, 1]} : vector<4x18x18xf32> to vector<1x16x16xf32>
    %581 = vector.shape_cast %580 : vector<1x16x16xf32> to vector<16x16xf32>
    %582 = vector.broadcast %579 : f32 to vector<16x16xf32>
    %583 = arith.mulf %582, %581 : vector<16x16xf32>
    %584 = arith.addf %578, %583 : vector<16x16xf32>
    %c96 = arith.constant 96 : index
    %585 = memref.load %arg2[%c96] : memref<288xf32, #tpu.memory_space<smem>>
    %586 = vector.extract_strided_slice %1 {offsets = [2, 2, 0], sizes = [1, 16, 16], strides = [1, 1, 1]} : vector<4x18x18xf32> to vector<1x16x16xf32>
    %587 = vector.shape_cast %586 : vector<1x16x16xf32> to vector<16x16xf32>
    %588 = vector.broadcast %585 : f32 to vector<16x16xf32>
    %589 = arith.mulf %588, %587 : vector<16x16xf32>
    %590 = arith.addf %584, %589 : vector<16x16xf32>
    %c97 = arith.constant 97 : index
    %591 = memref.load %arg2[%c97] : memref<288xf32, #tpu.memory_space<smem>>
    %592 = vector.extract_strided_slice %1 {offsets = [2, 2, 1], sizes = [1, 16, 16], strides = [1, 1, 1]} : vector<4x18x18xf32> to vector<1x16x16xf32>
    %593 = vector.shape_cast %592 : vector<1x16x16xf32> to vector<16x16xf32>
    %594 = vector.broadcast %591 : f32 to vector<16x16xf32>
    %595 = arith.mulf %594, %593 : vector<16x16xf32>
    %596 = arith.addf %590, %595 : vector<16x16xf32>
    %c98 = arith.constant 98 : index
    %597 = memref.load %arg2[%c98] : memref<288xf32, #tpu.memory_space<smem>>
    %598 = vector.extract_strided_slice %1 {offsets = [2, 2, 2], sizes = [1, 16, 16], strides = [1, 1, 1]} : vector<4x18x18xf32> to vector<1x16x16xf32>
    %599 = vector.shape_cast %598 : vector<1x16x16xf32> to vector<16x16xf32>
    %600 = vector.broadcast %597 : f32 to vector<16x16xf32>
    %601 = arith.mulf %600, %599 : vector<16x16xf32>
    %602 = arith.addf %596, %601 : vector<16x16xf32>
    %c99 = arith.constant 99 : index
    %603 = memref.load %arg2[%c99] : memref<288xf32, #tpu.memory_space<smem>>
    %604 = vector.extract_strided_slice %1 {offsets = [3, 0, 0], sizes = [1, 16, 16], strides = [1, 1, 1]} : vector<4x18x18xf32> to vector<1x16x16xf32>
    %605 = vector.shape_cast %604 : vector<1x16x16xf32> to vector<16x16xf32>
    %606 = vector.broadcast %603 : f32 to vector<16x16xf32>
    %607 = arith.mulf %606, %605 : vector<16x16xf32>
    %608 = arith.addf %602, %607 : vector<16x16xf32>
    %c100 = arith.constant 100 : index
    %609 = memref.load %arg2[%c100] : memref<288xf32, #tpu.memory_space<smem>>
    %610 = vector.extract_strided_slice %1 {offsets = [3, 0, 1], sizes = [1, 16, 16], strides = [1, 1, 1]} : vector<4x18x18xf32> to vector<1x16x16xf32>
    %611 = vector.shape_cast %610 : vector<1x16x16xf32> to vector<16x16xf32>
    %612 = vector.broadcast %609 : f32 to vector<16x16xf32>
    %613 = arith.mulf %612, %611 : vector<16x16xf32>
    %614 = arith.addf %608, %613 : vector<16x16xf32>
    %c101 = arith.constant 101 : index
    %615 = memref.load %arg2[%c101] : memref<288xf32, #tpu.memory_space<smem>>
    %616 = vector.extract_strided_slice %1 {offsets = [3, 0, 2], sizes = [1, 16, 16], strides = [1, 1, 1]} : vector<4x18x18xf32> to vector<1x16x16xf32>
    %617 = vector.shape_cast %616 : vector<1x16x16xf32> to vector<16x16xf32>
    %618 = vector.broadcast %615 : f32 to vector<16x16xf32>
    %619 = arith.mulf %618, %617 : vector<16x16xf32>
    %620 = arith.addf %614, %619 : vector<16x16xf32>
    %c102 = arith.constant 102 : index
    %621 = memref.load %arg2[%c102] : memref<288xf32, #tpu.memory_space<smem>>
    %622 = vector.extract_strided_slice %1 {offsets = [3, 1, 0], sizes = [1, 16, 16], strides = [1, 1, 1]} : vector<4x18x18xf32> to vector<1x16x16xf32>
    %623 = vector.shape_cast %622 : vector<1x16x16xf32> to vector<16x16xf32>
    %624 = vector.broadcast %621 : f32 to vector<16x16xf32>
    %625 = arith.mulf %624, %623 : vector<16x16xf32>
    %626 = arith.addf %620, %625 : vector<16x16xf32>
    %c103 = arith.constant 103 : index
    %627 = memref.load %arg2[%c103] : memref<288xf32, #tpu.memory_space<smem>>
    %628 = vector.extract_strided_slice %1 {offsets = [3, 1, 1], sizes = [1, 16, 16], strides = [1, 1, 1]} : vector<4x18x18xf32> to vector<1x16x16xf32>
    %629 = vector.shape_cast %628 : vector<1x16x16xf32> to vector<16x16xf32>
    %630 = vector.broadcast %627 : f32 to vector<16x16xf32>
    %631 = arith.mulf %630, %629 : vector<16x16xf32>
    %632 = arith.addf %626, %631 : vector<16x16xf32>
    %c104 = arith.constant 104 : index
    %633 = memref.load %arg2[%c104] : memref<288xf32, #tpu.memory_space<smem>>
    %634 = vector.extract_strided_slice %1 {offsets = [3, 1, 2], sizes = [1, 16, 16], strides = [1, 1, 1]} : vector<4x18x18xf32> to vector<1x16x16xf32>
    %635 = vector.shape_cast %634 : vector<1x16x16xf32> to vector<16x16xf32>
    %636 = vector.broadcast %633 : f32 to vector<16x16xf32>
    %637 = arith.mulf %636, %635 : vector<16x16xf32>
    %638 = arith.addf %632, %637 : vector<16x16xf32>
    %c105 = arith.constant 105 : index
    %639 = memref.load %arg2[%c105] : memref<288xf32, #tpu.memory_space<smem>>
    %640 = vector.extract_strided_slice %1 {offsets = [3, 2, 0], sizes = [1, 16, 16], strides = [1, 1, 1]} : vector<4x18x18xf32> to vector<1x16x16xf32>
    %641 = vector.shape_cast %640 : vector<1x16x16xf32> to vector<16x16xf32>
    %642 = vector.broadcast %639 : f32 to vector<16x16xf32>
    %643 = arith.mulf %642, %641 : vector<16x16xf32>
    %644 = arith.addf %638, %643 : vector<16x16xf32>
    %c106 = arith.constant 106 : index
    %645 = memref.load %arg2[%c106] : memref<288xf32, #tpu.memory_space<smem>>
    %646 = vector.extract_strided_slice %1 {offsets = [3, 2, 1], sizes = [1, 16, 16], strides = [1, 1, 1]} : vector<4x18x18xf32> to vector<1x16x16xf32>
    %647 = vector.shape_cast %646 : vector<1x16x16xf32> to vector<16x16xf32>
    %648 = vector.broadcast %645 : f32 to vector<16x16xf32>
    %649 = arith.mulf %648, %647 : vector<16x16xf32>
    %650 = arith.addf %644, %649 : vector<16x16xf32>
    %c107 = arith.constant 107 : index
    %651 = memref.load %arg2[%c107] : memref<288xf32, #tpu.memory_space<smem>>
    %652 = vector.extract_strided_slice %1 {offsets = [3, 2, 2], sizes = [1, 16, 16], strides = [1, 1, 1]} : vector<4x18x18xf32> to vector<1x16x16xf32>
    %653 = vector.shape_cast %652 : vector<1x16x16xf32> to vector<16x16xf32>
    %654 = vector.broadcast %651 : f32 to vector<16x16xf32>
    %655 = arith.mulf %654, %653 : vector<16x16xf32>
    %656 = arith.addf %650, %655 : vector<16x16xf32>
    %cst_13 = arith.constant 0.000000e+00 : f32
    %657 = vector.broadcast %cst_13 : f32 to vector<16x16xf32>
    %658 = arith.maximumf %656, %657 : vector<16x16xf32>
    %c0_14 = arith.constant 0 : index
    %c2_15 = arith.constant 2 : index
    %c0_16 = arith.constant 0 : index
    %c0_17 = arith.constant 0 : index
    %659 = vector.load %arg3[%c0_14, %c2_15, %c0_16, %c0_17] : memref<1x8x16x16xf32, #tpu.memory_space<vmem>>, vector<1x1x16x16xf32>
    %660 = vector.shape_cast %659 : vector<1x1x16x16xf32> to vector<16x16xf32>
    %661 = vector.shape_cast %658 : vector<16x16xf32> to vector<1x1x16x16xf32>
    tpu.vector_store %arg3[%c0_14, %c2_15, %c0_16, %c0_17], %661 {strides = array<i32>} : memref<1x8x16x16xf32, #tpu.memory_space<vmem>>, vector<1x1x16x16xf32>,
    %c108 = arith.constant 108 : index
    %662 = memref.load %arg2[%c108] : memref<288xf32, #tpu.memory_space<smem>>
    %663 = vector.extract_strided_slice %1 {offsets = [0, 0, 0], sizes = [1, 16, 16], strides = [1, 1, 1]} : vector<4x18x18xf32> to vector<1x16x16xf32>
    %664 = vector.shape_cast %663 : vector<1x16x16xf32> to vector<16x16xf32>
    %665 = vector.broadcast %662 : f32 to vector<16x16xf32>
    %666 = arith.mulf %665, %664 : vector<16x16xf32>
    %c109 = arith.constant 109 : index
    %667 = memref.load %arg2[%c109] : memref<288xf32, #tpu.memory_space<smem>>
    %668 = vector.extract_strided_slice %1 {offsets = [0, 0, 1], sizes = [1, 16, 16], strides = [1, 1, 1]} : vector<4x18x18xf32> to vector<1x16x16xf32>
    %669 = vector.shape_cast %668 : vector<1x16x16xf32> to vector<16x16xf32>
    %670 = vector.broadcast %667 : f32 to vector<16x16xf32>
    %671 = arith.mulf %670, %669 : vector<16x16xf32>
    %672 = arith.addf %666, %671 : vector<16x16xf32>
    %c110 = arith.constant 110 : index
    %673 = memref.load %arg2[%c110] : memref<288xf32, #tpu.memory_space<smem>>
    %674 = vector.extract_strided_slice %1 {offsets = [0, 0, 2], sizes = [1, 16, 16], strides = [1, 1, 1]} : vector<4x18x18xf32> to vector<1x16x16xf32>
    %675 = vector.shape_cast %674 : vector<1x16x16xf32> to vector<16x16xf32>
    %676 = vector.broadcast %673 : f32 to vector<16x16xf32>
    %677 = arith.mulf %676, %675 : vector<16x16xf32>
    %678 = arith.addf %672, %677 : vector<16x16xf32>
    %c111 = arith.constant 111 : index
    %679 = memref.load %arg2[%c111] : memref<288xf32, #tpu.memory_space<smem>>
    %680 = vector.extract_strided_slice %1 {offsets = [0, 1, 0], sizes = [1, 16, 16], strides = [1, 1, 1]} : vector<4x18x18xf32> to vector<1x16x16xf32>
    %681 = vector.shape_cast %680 : vector<1x16x16xf32> to vector<16x16xf32>
    %682 = vector.broadcast %679 : f32 to vector<16x16xf32>
    %683 = arith.mulf %682, %681 : vector<16x16xf32>
    %684 = arith.addf %678, %683 : vector<16x16xf32>
    %c112 = arith.constant 112 : index
    %685 = memref.load %arg2[%c112] : memref<288xf32, #tpu.memory_space<smem>>
    %686 = vector.extract_strided_slice %1 {offsets = [0, 1, 1], sizes = [1, 16, 16], strides = [1, 1, 1]} : vector<4x18x18xf32> to vector<1x16x16xf32>
    %687 = vector.shape_cast %686 : vector<1x16x16xf32> to vector<16x16xf32>
    %688 = vector.broadcast %685 : f32 to vector<16x16xf32>
    %689 = arith.mulf %688, %687 : vector<16x16xf32>
    %690 = arith.addf %684, %689 : vector<16x16xf32>
    %c113 = arith.constant 113 : index
    %691 = memref.load %arg2[%c113] : memref<288xf32, #tpu.memory_space<smem>>
    %692 = vector.extract_strided_slice %1 {offsets = [0, 1, 2], sizes = [1, 16, 16], strides = [1, 1, 1]} : vector<4x18x18xf32> to vector<1x16x16xf32>
    %693 = vector.shape_cast %692 : vector<1x16x16xf32> to vector<16x16xf32>
    %694 = vector.broadcast %691 : f32 to vector<16x16xf32>
    %695 = arith.mulf %694, %693 : vector<16x16xf32>
    %696 = arith.addf %690, %695 : vector<16x16xf32>
    %c114 = arith.constant 114 : index
    %697 = memref.load %arg2[%c114] : memref<288xf32, #tpu.memory_space<smem>>
    %698 = vector.extract_strided_slice %1 {offsets = [0, 2, 0], sizes = [1, 16, 16], strides = [1, 1, 1]} : vector<4x18x18xf32> to vector<1x16x16xf32>
    %699 = vector.shape_cast %698 : vector<1x16x16xf32> to vector<16x16xf32>
    %700 = vector.broadcast %697 : f32 to vector<16x16xf32>
    %701 = arith.mulf %700, %699 : vector<16x16xf32>
    %702 = arith.addf %696, %701 : vector<16x16xf32>
    %c115 = arith.constant 115 : index
    %703 = memref.load %arg2[%c115] : memref<288xf32, #tpu.memory_space<smem>>
    %704 = vector.extract_strided_slice %1 {offsets = [0, 2, 1], sizes = [1, 16, 16], strides = [1, 1, 1]} : vector<4x18x18xf32> to vector<1x16x16xf32>
    %705 = vector.shape_cast %704 : vector<1x16x16xf32> to vector<16x16xf32>
    %706 = vector.broadcast %703 : f32 to vector<16x16xf32>
    %707 = arith.mulf %706, %705 : vector<16x16xf32>
    %708 = arith.addf %702, %707 : vector<16x16xf32>
    %c116 = arith.constant 116 : index
    %709 = memref.load %arg2[%c116] : memref<288xf32, #tpu.memory_space<smem>>
    %710 = vector.extract_strided_slice %1 {offsets = [0, 2, 2], sizes = [1, 16, 16], strides = [1, 1, 1]} : vector<4x18x18xf32> to vector<1x16x16xf32>
    %711 = vector.shape_cast %710 : vector<1x16x16xf32> to vector<16x16xf32>
    %712 = vector.broadcast %709 : f32 to vector<16x16xf32>
    %713 = arith.mulf %712, %711 : vector<16x16xf32>
    %714 = arith.addf %708, %713 : vector<16x16xf32>
    %c117 = arith.constant 117 : index
    %715 = memref.load %arg2[%c117] : memref<288xf32, #tpu.memory_space<smem>>
    %716 = vector.extract_strided_slice %1 {offsets = [1, 0, 0], sizes = [1, 16, 16], strides = [1, 1, 1]} : vector<4x18x18xf32> to vector<1x16x16xf32>
    %717 = vector.shape_cast %716 : vector<1x16x16xf32> to vector<16x16xf32>
    %718 = vector.broadcast %715 : f32 to vector<16x16xf32>
    %719 = arith.mulf %718, %717 : vector<16x16xf32>
    %720 = arith.addf %714, %719 : vector<16x16xf32>
    %c118 = arith.constant 118 : index
    %721 = memref.load %arg2[%c118] : memref<288xf32, #tpu.memory_space<smem>>
    %722 = vector.extract_strided_slice %1 {offsets = [1, 0, 1], sizes = [1, 16, 16], strides = [1, 1, 1]} : vector<4x18x18xf32> to vector<1x16x16xf32>
    %723 = vector.shape_cast %722 : vector<1x16x16xf32> to vector<16x16xf32>
    %724 = vector.broadcast %721 : f32 to vector<16x16xf32>
    %725 = arith.mulf %724, %723 : vector<16x16xf32>
    %726 = arith.addf %720, %725 : vector<16x16xf32>
    %c119 = arith.constant 119 : index
    %727 = memref.load %arg2[%c119] : memref<288xf32, #tpu.memory_space<smem>>
    %728 = vector.extract_strided_slice %1 {offsets = [1, 0, 2], sizes = [1, 16, 16], strides = [1, 1, 1]} : vector<4x18x18xf32> to vector<1x16x16xf32>
    %729 = vector.shape_cast %728 : vector<1x16x16xf32> to vector<16x16xf32>
    %730 = vector.broadcast %727 : f32 to vector<16x16xf32>
    %731 = arith.mulf %730, %729 : vector<16x16xf32>
    %732 = arith.addf %726, %731 : vector<16x16xf32>
    %c120 = arith.constant 120 : index
    %733 = memref.load %arg2[%c120] : memref<288xf32, #tpu.memory_space<smem>>
    %734 = vector.extract_strided_slice %1 {offsets = [1, 1, 0], sizes = [1, 16, 16], strides = [1, 1, 1]} : vector<4x18x18xf32> to vector<1x16x16xf32>
    %735 = vector.shape_cast %734 : vector<1x16x16xf32> to vector<16x16xf32>
    %736 = vector.broadcast %733 : f32 to vector<16x16xf32>
    %737 = arith.mulf %736, %735 : vector<16x16xf32>
    %738 = arith.addf %732, %737 : vector<16x16xf32>
    %c121 = arith.constant 121 : index
    %739 = memref.load %arg2[%c121] : memref<288xf32, #tpu.memory_space<smem>>
    %740 = vector.extract_strided_slice %1 {offsets = [1, 1, 1], sizes = [1, 16, 16], strides = [1, 1, 1]} : vector<4x18x18xf32> to vector<1x16x16xf32>
    %741 = vector.shape_cast %740 : vector<1x16x16xf32> to vector<16x16xf32>
    %742 = vector.broadcast %739 : f32 to vector<16x16xf32>
    %743 = arith.mulf %742, %741 : vector<16x16xf32>
    %744 = arith.addf %738, %743 : vector<16x16xf32>
    %c122 = arith.constant 122 : index
    %745 = memref.load %arg2[%c122] : memref<288xf32, #tpu.memory_space<smem>>
    %746 = vector.extract_strided_slice %1 {offsets = [1, 1, 2], sizes = [1, 16, 16], strides = [1, 1, 1]} : vector<4x18x18xf32> to vector<1x16x16xf32>
    %747 = vector.shape_cast %746 : vector<1x16x16xf32> to vector<16x16xf32>
    %748 = vector.broadcast %745 : f32 to vector<16x16xf32>
    %749 = arith.mulf %748, %747 : vector<16x16xf32>
    %750 = arith.addf %744, %749 : vector<16x16xf32>
    %c123 = arith.constant 123 : index
    %751 = memref.load %arg2[%c123] : memref<288xf32, #tpu.memory_space<smem>>
    %752 = vector.extract_strided_slice %1 {offsets = [1, 2, 0], sizes = [1, 16, 16], strides = [1, 1, 1]} : vector<4x18x18xf32> to vector<1x16x16xf32>
    %753 = vector.shape_cast %752 : vector<1x16x16xf32> to vector<16x16xf32>
    %754 = vector.broadcast %751 : f32 to vector<16x16xf32>
    %755 = arith.mulf %754, %753 : vector<16x16xf32>
    %756 = arith.addf %750, %755 : vector<16x16xf32>
    %c124 = arith.constant 124 : index
    %757 = memref.load %arg2[%c124] : memref<288xf32, #tpu.memory_space<smem>>
    %758 = vector.extract_strided_slice %1 {offsets = [1, 2, 1], sizes = [1, 16, 16], strides = [1, 1, 1]} : vector<4x18x18xf32> to vector<1x16x16xf32>
    %759 = vector.shape_cast %758 : vector<1x16x16xf32> to vector<16x16xf32>
    %760 = vector.broadcast %757 : f32 to vector<16x16xf32>
    %761 = arith.mulf %760, %759 : vector<16x16xf32>
    %762 = arith.addf %756, %761 : vector<16x16xf32>
    %c125 = arith.constant 125 : index
    %763 = memref.load %arg2[%c125] : memref<288xf32, #tpu.memory_space<smem>>
    %764 = vector.extract_strided_slice %1 {offsets = [1, 2, 2], sizes = [1, 16, 16], strides = [1, 1, 1]} : vector<4x18x18xf32> to vector<1x16x16xf32>
    %765 = vector.shape_cast %764 : vector<1x16x16xf32> to vector<16x16xf32>
    %766 = vector.broadcast %763 : f32 to vector<16x16xf32>
    %767 = arith.mulf %766, %765 : vector<16x16xf32>
    %768 = arith.addf %762, %767 : vector<16x16xf32>
    %c126 = arith.constant 126 : index
    %769 = memref.load %arg2[%c126] : memref<288xf32, #tpu.memory_space<smem>>
    %770 = vector.extract_strided_slice %1 {offsets = [2, 0, 0], sizes = [1, 16, 16], strides = [1, 1, 1]} : vector<4x18x18xf32> to vector<1x16x16xf32>
    %771 = vector.shape_cast %770 : vector<1x16x16xf32> to vector<16x16xf32>
    %772 = vector.broadcast %769 : f32 to vector<16x16xf32>
    %773 = arith.mulf %772, %771 : vector<16x16xf32>
    %774 = arith.addf %768, %773 : vector<16x16xf32>
    %c127 = arith.constant 127 : index
    %775 = memref.load %arg2[%c127] : memref<288xf32, #tpu.memory_space<smem>>
    %776 = vector.extract_strided_slice %1 {offsets = [2, 0, 1], sizes = [1, 16, 16], strides = [1, 1, 1]} : vector<4x18x18xf32> to vector<1x16x16xf32>
    %777 = vector.shape_cast %776 : vector<1x16x16xf32> to vector<16x16xf32>
    %778 = vector.broadcast %775 : f32 to vector<16x16xf32>
    %779 = arith.mulf %778, %777 : vector<16x16xf32>
    %780 = arith.addf %774, %779 : vector<16x16xf32>
    %c128 = arith.constant 128 : index
    %781 = memref.load %arg2[%c128] : memref<288xf32, #tpu.memory_space<smem>>
    %782 = vector.extract_strided_slice %1 {offsets = [2, 0, 2], sizes = [1, 16, 16], strides = [1, 1, 1]} : vector<4x18x18xf32> to vector<1x16x16xf32>
    %783 = vector.shape_cast %782 : vector<1x16x16xf32> to vector<16x16xf32>
    %784 = vector.broadcast %781 : f32 to vector<16x16xf32>
    %785 = arith.mulf %784, %783 : vector<16x16xf32>
    %786 = arith.addf %780, %785 : vector<16x16xf32>
    %c129 = arith.constant 129 : index
    %787 = memref.load %arg2[%c129] : memref<288xf32, #tpu.memory_space<smem>>
    %788 = vector.extract_strided_slice %1 {offsets = [2, 1, 0], sizes = [1, 16, 16], strides = [1, 1, 1]} : vector<4x18x18xf32> to vector<1x16x16xf32>
    %789 = vector.shape_cast %788 : vector<1x16x16xf32> to vector<16x16xf32>
    %790 = vector.broadcast %787 : f32 to vector<16x16xf32>
    %791 = arith.mulf %790, %789 : vector<16x16xf32>
    %792 = arith.addf %786, %791 : vector<16x16xf32>
    %c130 = arith.constant 130 : index
    %793 = memref.load %arg2[%c130] : memref<288xf32, #tpu.memory_space<smem>>
    %794 = vector.extract_strided_slice %1 {offsets = [2, 1, 1], sizes = [1, 16, 16], strides = [1, 1, 1]} : vector<4x18x18xf32> to vector<1x16x16xf32>
    %795 = vector.shape_cast %794 : vector<1x16x16xf32> to vector<16x16xf32>
    %796 = vector.broadcast %793 : f32 to vector<16x16xf32>
    %797 = arith.mulf %796, %795 : vector<16x16xf32>
    %798 = arith.addf %792, %797 : vector<16x16xf32>
    %c131 = arith.constant 131 : index
    %799 = memref.load %arg2[%c131] : memref<288xf32, #tpu.memory_space<smem>>
    %800 = vector.extract_strided_slice %1 {offsets = [2, 1, 2], sizes = [1, 16, 16], strides = [1, 1, 1]} : vector<4x18x18xf32> to vector<1x16x16xf32>
    %801 = vector.shape_cast %800 : vector<1x16x16xf32> to vector<16x16xf32>
    %802 = vector.broadcast %799 : f32 to vector<16x16xf32>
    %803 = arith.mulf %802, %801 : vector<16x16xf32>
    %804 = arith.addf %798, %803 : vector<16x16xf32>
    %c132 = arith.constant 132 : index
    %805 = memref.load %arg2[%c132] : memref<288xf32, #tpu.memory_space<smem>>
    %806 = vector.extract_strided_slice %1 {offsets = [2, 2, 0], sizes = [1, 16, 16], strides = [1, 1, 1]} : vector<4x18x18xf32> to vector<1x16x16xf32>
    %807 = vector.shape_cast %806 : vector<1x16x16xf32> to vector<16x16xf32>
    %808 = vector.broadcast %805 : f32 to vector<16x16xf32>
    %809 = arith.mulf %808, %807 : vector<16x16xf32>
    %810 = arith.addf %804, %809 : vector<16x16xf32>
    %c133 = arith.constant 133 : index
    %811 = memref.load %arg2[%c133] : memref<288xf32, #tpu.memory_space<smem>>
    %812 = vector.extract_strided_slice %1 {offsets = [2, 2, 1], sizes = [1, 16, 16], strides = [1, 1, 1]} : vector<4x18x18xf32> to vector<1x16x16xf32>
    %813 = vector.shape_cast %812 : vector<1x16x16xf32> to vector<16x16xf32>
    %814 = vector.broadcast %811 : f32 to vector<16x16xf32>
    %815 = arith.mulf %814, %813 : vector<16x16xf32>
    %816 = arith.addf %810, %815 : vector<16x16xf32>
    %c134 = arith.constant 134 : index
    %817 = memref.load %arg2[%c134] : memref<288xf32, #tpu.memory_space<smem>>
    %818 = vector.extract_strided_slice %1 {offsets = [2, 2, 2], sizes = [1, 16, 16], strides = [1, 1, 1]} : vector<4x18x18xf32> to vector<1x16x16xf32>
    %819 = vector.shape_cast %818 : vector<1x16x16xf32> to vector<16x16xf32>
    %820 = vector.broadcast %817 : f32 to vector<16x16xf32>
    %821 = arith.mulf %820, %819 : vector<16x16xf32>
    %822 = arith.addf %816, %821 : vector<16x16xf32>
    %c135 = arith.constant 135 : index
    %823 = memref.load %arg2[%c135] : memref<288xf32, #tpu.memory_space<smem>>
    %824 = vector.extract_strided_slice %1 {offsets = [3, 0, 0], sizes = [1, 16, 16], strides = [1, 1, 1]} : vector<4x18x18xf32> to vector<1x16x16xf32>
    %825 = vector.shape_cast %824 : vector<1x16x16xf32> to vector<16x16xf32>
    %826 = vector.broadcast %823 : f32 to vector<16x16xf32>
    %827 = arith.mulf %826, %825 : vector<16x16xf32>
    %828 = arith.addf %822, %827 : vector<16x16xf32>
    %c136 = arith.constant 136 : index
    %829 = memref.load %arg2[%c136] : memref<288xf32, #tpu.memory_space<smem>>
    %830 = vector.extract_strided_slice %1 {offsets = [3, 0, 1], sizes = [1, 16, 16], strides = [1, 1, 1]} : vector<4x18x18xf32> to vector<1x16x16xf32>
    %831 = vector.shape_cast %830 : vector<1x16x16xf32> to vector<16x16xf32>
    %832 = vector.broadcast %829 : f32 to vector<16x16xf32>
    %833 = arith.mulf %832, %831 : vector<16x16xf32>
    %834 = arith.addf %828, %833 : vector<16x16xf32>
    %c137 = arith.constant 137 : index
    %835 = memref.load %arg2[%c137] : memref<288xf32, #tpu.memory_space<smem>>
    %836 = vector.extract_strided_slice %1 {offsets = [3, 0, 2], sizes = [1, 16, 16], strides = [1, 1, 1]} : vector<4x18x18xf32> to vector<1x16x16xf32>
    %837 = vector.shape_cast %836 : vector<1x16x16xf32> to vector<16x16xf32>
    %838 = vector.broadcast %835 : f32 to vector<16x16xf32>
    %839 = arith.mulf %838, %837 : vector<16x16xf32>
    %840 = arith.addf %834, %839 : vector<16x16xf32>
    %c138 = arith.constant 138 : index
    %841 = memref.load %arg2[%c138] : memref<288xf32, #tpu.memory_space<smem>>
    %842 = vector.extract_strided_slice %1 {offsets = [3, 1, 0], sizes = [1, 16, 16], strides = [1, 1, 1]} : vector<4x18x18xf32> to vector<1x16x16xf32>
    %843 = vector.shape_cast %842 : vector<1x16x16xf32> to vector<16x16xf32>
    %844 = vector.broadcast %841 : f32 to vector<16x16xf32>
    %845 = arith.mulf %844, %843 : vector<16x16xf32>
    %846 = arith.addf %840, %845 : vector<16x16xf32>
    %c139 = arith.constant 139 : index
    %847 = memref.load %arg2[%c139] : memref<288xf32, #tpu.memory_space<smem>>
    %848 = vector.extract_strided_slice %1 {offsets = [3, 1, 1], sizes = [1, 16, 16], strides = [1, 1, 1]} : vector<4x18x18xf32> to vector<1x16x16xf32>
    %849 = vector.shape_cast %848 : vector<1x16x16xf32> to vector<16x16xf32>
    %850 = vector.broadcast %847 : f32 to vector<16x16xf32>
    %851 = arith.mulf %850, %849 : vector<16x16xf32>
    %852 = arith.addf %846, %851 : vector<16x16xf32>
    %c140 = arith.constant 140 : index
    %853 = memref.load %arg2[%c140] : memref<288xf32, #tpu.memory_space<smem>>
    %854 = vector.extract_strided_slice %1 {offsets = [3, 1, 2], sizes = [1, 16, 16], strides = [1, 1, 1]} : vector<4x18x18xf32> to vector<1x16x16xf32>
    %855 = vector.shape_cast %854 : vector<1x16x16xf32> to vector<16x16xf32>
    %856 = vector.broadcast %853 : f32 to vector<16x16xf32>
    %857 = arith.mulf %856, %855 : vector<16x16xf32>
    %858 = arith.addf %852, %857 : vector<16x16xf32>
    %c141 = arith.constant 141 : index
    %859 = memref.load %arg2[%c141] : memref<288xf32, #tpu.memory_space<smem>>
    %860 = vector.extract_strided_slice %1 {offsets = [3, 2, 0], sizes = [1, 16, 16], strides = [1, 1, 1]} : vector<4x18x18xf32> to vector<1x16x16xf32>
    %861 = vector.shape_cast %860 : vector<1x16x16xf32> to vector<16x16xf32>
    %862 = vector.broadcast %859 : f32 to vector<16x16xf32>
    %863 = arith.mulf %862, %861 : vector<16x16xf32>
    %864 = arith.addf %858, %863 : vector<16x16xf32>
    %c142 = arith.constant 142 : index
    %865 = memref.load %arg2[%c142] : memref<288xf32, #tpu.memory_space<smem>>
    %866 = vector.extract_strided_slice %1 {offsets = [3, 2, 1], sizes = [1, 16, 16], strides = [1, 1, 1]} : vector<4x18x18xf32> to vector<1x16x16xf32>
    %867 = vector.shape_cast %866 : vector<1x16x16xf32> to vector<16x16xf32>
    %868 = vector.broadcast %865 : f32 to vector<16x16xf32>
    %869 = arith.mulf %868, %867 : vector<16x16xf32>
    %870 = arith.addf %864, %869 : vector<16x16xf32>
    %c143 = arith.constant 143 : index
    %871 = memref.load %arg2[%c143] : memref<288xf32, #tpu.memory_space<smem>>
    %872 = vector.extract_strided_slice %1 {offsets = [3, 2, 2], sizes = [1, 16, 16], strides = [1, 1, 1]} : vector<4x18x18xf32> to vector<1x16x16xf32>
    %873 = vector.shape_cast %872 : vector<1x16x16xf32> to vector<16x16xf32>
    %874 = vector.broadcast %871 : f32 to vector<16x16xf32>
    %875 = arith.mulf %874, %873 : vector<16x16xf32>
    %876 = arith.addf %870, %875 : vector<16x16xf32>
    %cst_18 = arith.constant 0.000000e+00 : f32
    %877 = vector.broadcast %cst_18 : f32 to vector<16x16xf32>
    %878 = arith.maximumf %876, %877 : vector<16x16xf32>
    %c0_19 = arith.constant 0 : index
    %c3_20 = arith.constant 3 : index
    %c0_21 = arith.constant 0 : index
    %c0_22 = arith.constant 0 : index
    %879 = vector.load %arg3[%c0_19, %c3_20, %c0_21, %c0_22] : memref<1x8x16x16xf32, #tpu.memory_space<vmem>>, vector<1x1x16x16xf32>
    %880 = vector.shape_cast %879 : vector<1x1x16x16xf32> to vector<16x16xf32>
    %881 = vector.shape_cast %878 : vector<16x16xf32> to vector<1x1x16x16xf32>
    tpu.vector_store %arg3[%c0_19, %c3_20, %c0_21, %c0_22], %881 {strides = array<i32>} : memref<1x8x16x16xf32, #tpu.memory_space<vmem>>, vector<1x1x16x16xf32>,
    %c144 = arith.constant 144 : index
    %882 = memref.load %arg2[%c144] : memref<288xf32, #tpu.memory_space<smem>>
    %883 = vector.extract_strided_slice %1 {offsets = [0, 0, 0], sizes = [1, 16, 16], strides = [1, 1, 1]} : vector<4x18x18xf32> to vector<1x16x16xf32>
    %884 = vector.shape_cast %883 : vector<1x16x16xf32> to vector<16x16xf32>
    %885 = vector.broadcast %882 : f32 to vector<16x16xf32>
    %886 = arith.mulf %885, %884 : vector<16x16xf32>
    %c145 = arith.constant 145 : index
    %887 = memref.load %arg2[%c145] : memref<288xf32, #tpu.memory_space<smem>>
    %888 = vector.extract_strided_slice %1 {offsets = [0, 0, 1], sizes = [1, 16, 16], strides = [1, 1, 1]} : vector<4x18x18xf32> to vector<1x16x16xf32>
    %889 = vector.shape_cast %888 : vector<1x16x16xf32> to vector<16x16xf32>
    %890 = vector.broadcast %887 : f32 to vector<16x16xf32>
    %891 = arith.mulf %890, %889 : vector<16x16xf32>
    %892 = arith.addf %886, %891 : vector<16x16xf32>
    %c146 = arith.constant 146 : index
    %893 = memref.load %arg2[%c146] : memref<288xf32, #tpu.memory_space<smem>>
    %894 = vector.extract_strided_slice %1 {offsets = [0, 0, 2], sizes = [1, 16, 16], strides = [1, 1, 1]} : vector<4x18x18xf32> to vector<1x16x16xf32>
    %895 = vector.shape_cast %894 : vector<1x16x16xf32> to vector<16x16xf32>
    %896 = vector.broadcast %893 : f32 to vector<16x16xf32>
    %897 = arith.mulf %896, %895 : vector<16x16xf32>
    %898 = arith.addf %892, %897 : vector<16x16xf32>
    %c147 = arith.constant 147 : index
    %899 = memref.load %arg2[%c147] : memref<288xf32, #tpu.memory_space<smem>>
    %900 = vector.extract_strided_slice %1 {offsets = [0, 1, 0], sizes = [1, 16, 16], strides = [1, 1, 1]} : vector<4x18x18xf32> to vector<1x16x16xf32>
    %901 = vector.shape_cast %900 : vector<1x16x16xf32> to vector<16x16xf32>
    %902 = vector.broadcast %899 : f32 to vector<16x16xf32>
    %903 = arith.mulf %902, %901 : vector<16x16xf32>
    %904 = arith.addf %898, %903 : vector<16x16xf32>
    %c148 = arith.constant 148 : index
    %905 = memref.load %arg2[%c148] : memref<288xf32, #tpu.memory_space<smem>>
    %906 = vector.extract_strided_slice %1 {offsets = [0, 1, 1], sizes = [1, 16, 16], strides = [1, 1, 1]} : vector<4x18x18xf32> to vector<1x16x16xf32>
    %907 = vector.shape_cast %906 : vector<1x16x16xf32> to vector<16x16xf32>
    %908 = vector.broadcast %905 : f32 to vector<16x16xf32>
    %909 = arith.mulf %908, %907 : vector<16x16xf32>
    %910 = arith.addf %904, %909 : vector<16x16xf32>
    %c149 = arith.constant 149 : index
    %911 = memref.load %arg2[%c149] : memref<288xf32, #tpu.memory_space<smem>>
    %912 = vector.extract_strided_slice %1 {offsets = [0, 1, 2], sizes = [1, 16, 16], strides = [1, 1, 1]} : vector<4x18x18xf32> to vector<1x16x16xf32>
    %913 = vector.shape_cast %912 : vector<1x16x16xf32> to vector<16x16xf32>
    %914 = vector.broadcast %911 : f32 to vector<16x16xf32>
    %915 = arith.mulf %914, %913 : vector<16x16xf32>
    %916 = arith.addf %910, %915 : vector<16x16xf32>
    %c150 = arith.constant 150 : index
    %917 = memref.load %arg2[%c150] : memref<288xf32, #tpu.memory_space<smem>>
    %918 = vector.extract_strided_slice %1 {offsets = [0, 2, 0], sizes = [1, 16, 16], strides = [1, 1, 1]} : vector<4x18x18xf32> to vector<1x16x16xf32>
    %919 = vector.shape_cast %918 : vector<1x16x16xf32> to vector<16x16xf32>
    %920 = vector.broadcast %917 : f32 to vector<16x16xf32>
    %921 = arith.mulf %920, %919 : vector<16x16xf32>
    %922 = arith.addf %916, %921 : vector<16x16xf32>
    %c151 = arith.constant 151 : index
    %923 = memref.load %arg2[%c151] : memref<288xf32, #tpu.memory_space<smem>>
    %924 = vector.extract_strided_slice %1 {offsets = [0, 2, 1], sizes = [1, 16, 16], strides = [1, 1, 1]} : vector<4x18x18xf32> to vector<1x16x16xf32>
    %925 = vector.shape_cast %924 : vector<1x16x16xf32> to vector<16x16xf32>
    %926 = vector.broadcast %923 : f32 to vector<16x16xf32>
    %927 = arith.mulf %926, %925 : vector<16x16xf32>
    %928 = arith.addf %922, %927 : vector<16x16xf32>
    %c152 = arith.constant 152 : index
    %929 = memref.load %arg2[%c152] : memref<288xf32, #tpu.memory_space<smem>>
    %930 = vector.extract_strided_slice %1 {offsets = [0, 2, 2], sizes = [1, 16, 16], strides = [1, 1, 1]} : vector<4x18x18xf32> to vector<1x16x16xf32>
    %931 = vector.shape_cast %930 : vector<1x16x16xf32> to vector<16x16xf32>
    %932 = vector.broadcast %929 : f32 to vector<16x16xf32>
    %933 = arith.mulf %932, %931 : vector<16x16xf32>
    %934 = arith.addf %928, %933 : vector<16x16xf32>
    %c153 = arith.constant 153 : index
    %935 = memref.load %arg2[%c153] : memref<288xf32, #tpu.memory_space<smem>>
    %936 = vector.extract_strided_slice %1 {offsets = [1, 0, 0], sizes = [1, 16, 16], strides = [1, 1, 1]} : vector<4x18x18xf32> to vector<1x16x16xf32>
    %937 = vector.shape_cast %936 : vector<1x16x16xf32> to vector<16x16xf32>
    %938 = vector.broadcast %935 : f32 to vector<16x16xf32>
    %939 = arith.mulf %938, %937 : vector<16x16xf32>
    %940 = arith.addf %934, %939 : vector<16x16xf32>
    %c154 = arith.constant 154 : index
    %941 = memref.load %arg2[%c154] : memref<288xf32, #tpu.memory_space<smem>>
    %942 = vector.extract_strided_slice %1 {offsets = [1, 0, 1], sizes = [1, 16, 16], strides = [1, 1, 1]} : vector<4x18x18xf32> to vector<1x16x16xf32>
    %943 = vector.shape_cast %942 : vector<1x16x16xf32> to vector<16x16xf32>
    %944 = vector.broadcast %941 : f32 to vector<16x16xf32>
    %945 = arith.mulf %944, %943 : vector<16x16xf32>
    %946 = arith.addf %940, %945 : vector<16x16xf32>
    %c155 = arith.constant 155 : index
    %947 = memref.load %arg2[%c155] : memref<288xf32, #tpu.memory_space<smem>>
    %948 = vector.extract_strided_slice %1 {offsets = [1, 0, 2], sizes = [1, 16, 16], strides = [1, 1, 1]} : vector<4x18x18xf32> to vector<1x16x16xf32>
    %949 = vector.shape_cast %948 : vector<1x16x16xf32> to vector<16x16xf32>
    %950 = vector.broadcast %947 : f32 to vector<16x16xf32>
    %951 = arith.mulf %950, %949 : vector<16x16xf32>
    %952 = arith.addf %946, %951 : vector<16x16xf32>
    %c156 = arith.constant 156 : index
    %953 = memref.load %arg2[%c156] : memref<288xf32, #tpu.memory_space<smem>>
    %954 = vector.extract_strided_slice %1 {offsets = [1, 1, 0], sizes = [1, 16, 16], strides = [1, 1, 1]} : vector<4x18x18xf32> to vector<1x16x16xf32>
    %955 = vector.shape_cast %954 : vector<1x16x16xf32> to vector<16x16xf32>
    %956 = vector.broadcast %953 : f32 to vector<16x16xf32>
    %957 = arith.mulf %956, %955 : vector<16x16xf32>
    %958 = arith.addf %952, %957 : vector<16x16xf32>
    %c157 = arith.constant 157 : index
    %959 = memref.load %arg2[%c157] : memref<288xf32, #tpu.memory_space<smem>>
    %960 = vector.extract_strided_slice %1 {offsets = [1, 1, 1], sizes = [1, 16, 16], strides = [1, 1, 1]} : vector<4x18x18xf32> to vector<1x16x16xf32>
    %961 = vector.shape_cast %960 : vector<1x16x16xf32> to vector<16x16xf32>
    %962 = vector.broadcast %959 : f32 to vector<16x16xf32>
    %963 = arith.mulf %962, %961 : vector<16x16xf32>
    %964 = arith.addf %958, %963 : vector<16x16xf32>
    %c158 = arith.constant 158 : index
    %965 = memref.load %arg2[%c158] : memref<288xf32, #tpu.memory_space<smem>>
    %966 = vector.extract_strided_slice %1 {offsets = [1, 1, 2], sizes = [1, 16, 16], strides = [1, 1, 1]} : vector<4x18x18xf32> to vector<1x16x16xf32>
    %967 = vector.shape_cast %966 : vector<1x16x16xf32> to vector<16x16xf32>
    %968 = vector.broadcast %965 : f32 to vector<16x16xf32>
    %969 = arith.mulf %968, %967 : vector<16x16xf32>
    %970 = arith.addf %964, %969 : vector<16x16xf32>
    %c159 = arith.constant 159 : index
    %971 = memref.load %arg2[%c159] : memref<288xf32, #tpu.memory_space<smem>>
    %972 = vector.extract_strided_slice %1 {offsets = [1, 2, 0], sizes = [1, 16, 16], strides = [1, 1, 1]} : vector<4x18x18xf32> to vector<1x16x16xf32>
    %973 = vector.shape_cast %972 : vector<1x16x16xf32> to vector<16x16xf32>
    %974 = vector.broadcast %971 : f32 to vector<16x16xf32>
    %975 = arith.mulf %974, %973 : vector<16x16xf32>
    %976 = arith.addf %970, %975 : vector<16x16xf32>
    %c160 = arith.constant 160 : index
    %977 = memref.load %arg2[%c160] : memref<288xf32, #tpu.memory_space<smem>>
    %978 = vector.extract_strided_slice %1 {offsets = [1, 2, 1], sizes = [1, 16, 16], strides = [1, 1, 1]} : vector<4x18x18xf32> to vector<1x16x16xf32>
    %979 = vector.shape_cast %978 : vector<1x16x16xf32> to vector<16x16xf32>
    %980 = vector.broadcast %977 : f32 to vector<16x16xf32>
    %981 = arith.mulf %980, %979 : vector<16x16xf32>
    %982 = arith.addf %976, %981 : vector<16x16xf32>
    %c161 = arith.constant 161 : index
    %983 = memref.load %arg2[%c161] : memref<288xf32, #tpu.memory_space<smem>>
    %984 = vector.extract_strided_slice %1 {offsets = [1, 2, 2], sizes = [1, 16, 16], strides = [1, 1, 1]} : vector<4x18x18xf32> to vector<1x16x16xf32>
    %985 = vector.shape_cast %984 : vector<1x16x16xf32> to vector<16x16xf32>
    %986 = vector.broadcast %983 : f32 to vector<16x16xf32>
    %987 = arith.mulf %986, %985 : vector<16x16xf32>
    %988 = arith.addf %982, %987 : vector<16x16xf32>
    %c162 = arith.constant 162 : index
    %989 = memref.load %arg2[%c162] : memref<288xf32, #tpu.memory_space<smem>>
    %990 = vector.extract_strided_slice %1 {offsets = [2, 0, 0], sizes = [1, 16, 16], strides = [1, 1, 1]} : vector<4x18x18xf32> to vector<1x16x16xf32>
    %991 = vector.shape_cast %990 : vector<1x16x16xf32> to vector<16x16xf32>
    %992 = vector.broadcast %989 : f32 to vector<16x16xf32>
    %993 = arith.mulf %992, %991 : vector<16x16xf32>
    %994 = arith.addf %988, %993 : vector<16x16xf32>
    %c163 = arith.constant 163 : index
    %995 = memref.load %arg2[%c163] : memref<288xf32, #tpu.memory_space<smem>>
    %996 = vector.extract_strided_slice %1 {offsets = [2, 0, 1], sizes = [1, 16, 16], strides = [1, 1, 1]} : vector<4x18x18xf32> to vector<1x16x16xf32>
    %997 = vector.shape_cast %996 : vector<1x16x16xf32> to vector<16x16xf32>
    %998 = vector.broadcast %995 : f32 to vector<16x16xf32>
    %999 = arith.mulf %998, %997 : vector<16x16xf32>
    %1000 = arith.addf %994, %999 : vector<16x16xf32>
    %c164 = arith.constant 164 : index
    %1001 = memref.load %arg2[%c164] : memref<288xf32, #tpu.memory_space<smem>>
    %1002 = vector.extract_strided_slice %1 {offsets = [2, 0, 2], sizes = [1, 16, 16], strides = [1, 1, 1]} : vector<4x18x18xf32> to vector<1x16x16xf32>
    %1003 = vector.shape_cast %1002 : vector<1x16x16xf32> to vector<16x16xf32>
    %1004 = vector.broadcast %1001 : f32 to vector<16x16xf32>
    %1005 = arith.mulf %1004, %1003 : vector<16x16xf32>
    %1006 = arith.addf %1000, %1005 : vector<16x16xf32>
    %c165 = arith.constant 165 : index
    %1007 = memref.load %arg2[%c165] : memref<288xf32, #tpu.memory_space<smem>>
    %1008 = vector.extract_strided_slice %1 {offsets = [2, 1, 0], sizes = [1, 16, 16], strides = [1, 1, 1]} : vector<4x18x18xf32> to vector<1x16x16xf32>
    %1009 = vector.shape_cast %1008 : vector<1x16x16xf32> to vector<16x16xf32>
    %1010 = vector.broadcast %1007 : f32 to vector<16x16xf32>
    %1011 = arith.mulf %1010, %1009 : vector<16x16xf32>
    %1012 = arith.addf %1006, %1011 : vector<16x16xf32>
    %c166 = arith.constant 166 : index
    %1013 = memref.load %arg2[%c166] : memref<288xf32, #tpu.memory_space<smem>>
    %1014 = vector.extract_strided_slice %1 {offsets = [2, 1, 1], sizes = [1, 16, 16], strides = [1, 1, 1]} : vector<4x18x18xf32> to vector<1x16x16xf32>
    %1015 = vector.shape_cast %1014 : vector<1x16x16xf32> to vector<16x16xf32>
    %1016 = vector.broadcast %1013 : f32 to vector<16x16xf32>
    %1017 = arith.mulf %1016, %1015 : vector<16x16xf32>
    %1018 = arith.addf %1012, %1017 : vector<16x16xf32>
    %c167 = arith.constant 167 : index
    %1019 = memref.load %arg2[%c167] : memref<288xf32, #tpu.memory_space<smem>>
    %1020 = vector.extract_strided_slice %1 {offsets = [2, 1, 2], sizes = [1, 16, 16], strides = [1, 1, 1]} : vector<4x18x18xf32> to vector<1x16x16xf32>
    %1021 = vector.shape_cast %1020 : vector<1x16x16xf32> to vector<16x16xf32>
    %1022 = vector.broadcast %1019 : f32 to vector<16x16xf32>
    %1023 = arith.mulf %1022, %1021 : vector<16x16xf32>
    %1024 = arith.addf %1018, %1023 : vector<16x16xf32>
    %c168 = arith.constant 168 : index
    %1025 = memref.load %arg2[%c168] : memref<288xf32, #tpu.memory_space<smem>>
    %1026 = vector.extract_strided_slice %1 {offsets = [2, 2, 0], sizes = [1, 16, 16], strides = [1, 1, 1]} : vector<4x18x18xf32> to vector<1x16x16xf32>
    %1027 = vector.shape_cast %1026 : vector<1x16x16xf32> to vector<16x16xf32>
    %1028 = vector.broadcast %1025 : f32 to vector<16x16xf32>
    %1029 = arith.mulf %1028, %1027 : vector<16x16xf32>
    %1030 = arith.addf %1024, %1029 : vector<16x16xf32>
    %c169 = arith.constant 169 : index
    %1031 = memref.load %arg2[%c169] : memref<288xf32, #tpu.memory_space<smem>>
    %1032 = vector.extract_strided_slice %1 {offsets = [2, 2, 1], sizes = [1, 16, 16], strides = [1, 1, 1]} : vector<4x18x18xf32> to vector<1x16x16xf32>
    %1033 = vector.shape_cast %1032 : vector<1x16x16xf32> to vector<16x16xf32>
    %1034 = vector.broadcast %1031 : f32 to vector<16x16xf32>
    %1035 = arith.mulf %1034, %1033 : vector<16x16xf32>
    %1036 = arith.addf %1030, %1035 : vector<16x16xf32>
    %c170 = arith.constant 170 : index
    %1037 = memref.load %arg2[%c170] : memref<288xf32, #tpu.memory_space<smem>>
    %1038 = vector.extract_strided_slice %1 {offsets = [2, 2, 2], sizes = [1, 16, 16], strides = [1, 1, 1]} : vector<4x18x18xf32> to vector<1x16x16xf32>
    %1039 = vector.shape_cast %1038 : vector<1x16x16xf32> to vector<16x16xf32>
    %1040 = vector.broadcast %1037 : f32 to vector<16x16xf32>
    %1041 = arith.mulf %1040, %1039 : vector<16x16xf32>
    %1042 = arith.addf %1036, %1041 : vector<16x16xf32>
    %c171 = arith.constant 171 : index
    %1043 = memref.load %arg2[%c171] : memref<288xf32, #tpu.memory_space<smem>>
    %1044 = vector.extract_strided_slice %1 {offsets = [3, 0, 0], sizes = [1, 16, 16], strides = [1, 1, 1]} : vector<4x18x18xf32> to vector<1x16x16xf32>
    %1045 = vector.shape_cast %1044 : vector<1x16x16xf32> to vector<16x16xf32>
    %1046 = vector.broadcast %1043 : f32 to vector<16x16xf32>
    %1047 = arith.mulf %1046, %1045 : vector<16x16xf32>
    %1048 = arith.addf %1042, %1047 : vector<16x16xf32>
    %c172 = arith.constant 172 : index
    %1049 = memref.load %arg2[%c172] : memref<288xf32, #tpu.memory_space<smem>>
    %1050 = vector.extract_strided_slice %1 {offsets = [3, 0, 1], sizes = [1, 16, 16], strides = [1, 1, 1]} : vector<4x18x18xf32> to vector<1x16x16xf32>
    %1051 = vector.shape_cast %1050 : vector<1x16x16xf32> to vector<16x16xf32>
    %1052 = vector.broadcast %1049 : f32 to vector<16x16xf32>
    %1053 = arith.mulf %1052, %1051 : vector<16x16xf32>
    %1054 = arith.addf %1048, %1053 : vector<16x16xf32>
    %c173 = arith.constant 173 : index
    %1055 = memref.load %arg2[%c173] : memref<288xf32, #tpu.memory_space<smem>>
    %1056 = vector.extract_strided_slice %1 {offsets = [3, 0, 2], sizes = [1, 16, 16], strides = [1, 1, 1]} : vector<4x18x18xf32> to vector<1x16x16xf32>
    %1057 = vector.shape_cast %1056 : vector<1x16x16xf32> to vector<16x16xf32>
    %1058 = vector.broadcast %1055 : f32 to vector<16x16xf32>
    %1059 = arith.mulf %1058, %1057 : vector<16x16xf32>
    %1060 = arith.addf %1054, %1059 : vector<16x16xf32>
    %c174 = arith.constant 174 : index
    %1061 = memref.load %arg2[%c174] : memref<288xf32, #tpu.memory_space<smem>>
    %1062 = vector.extract_strided_slice %1 {offsets = [3, 1, 0], sizes = [1, 16, 16], strides = [1, 1, 1]} : vector<4x18x18xf32> to vector<1x16x16xf32>
    %1063 = vector.shape_cast %1062 : vector<1x16x16xf32> to vector<16x16xf32>
    %1064 = vector.broadcast %1061 : f32 to vector<16x16xf32>
    %1065 = arith.mulf %1064, %1063 : vector<16x16xf32>
    %1066 = arith.addf %1060, %1065 : vector<16x16xf32>
    %c175 = arith.constant 175 : index
    %1067 = memref.load %arg2[%c175] : memref<288xf32, #tpu.memory_space<smem>>
    %1068 = vector.extract_strided_slice %1 {offsets = [3, 1, 1], sizes = [1, 16, 16], strides = [1, 1, 1]} : vector<4x18x18xf32> to vector<1x16x16xf32>
    %1069 = vector.shape_cast %1068 : vector<1x16x16xf32> to vector<16x16xf32>
    %1070 = vector.broadcast %1067 : f32 to vector<16x16xf32>
    %1071 = arith.mulf %1070, %1069 : vector<16x16xf32>
    %1072 = arith.addf %1066, %1071 : vector<16x16xf32>
    %c176 = arith.constant 176 : index
    %1073 = memref.load %arg2[%c176] : memref<288xf32, #tpu.memory_space<smem>>
    %1074 = vector.extract_strided_slice %1 {offsets = [3, 1, 2], sizes = [1, 16, 16], strides = [1, 1, 1]} : vector<4x18x18xf32> to vector<1x16x16xf32>
    %1075 = vector.shape_cast %1074 : vector<1x16x16xf32> to vector<16x16xf32>
    %1076 = vector.broadcast %1073 : f32 to vector<16x16xf32>
    %1077 = arith.mulf %1076, %1075 : vector<16x16xf32>
    %1078 = arith.addf %1072, %1077 : vector<16x16xf32>
    %c177 = arith.constant 177 : index
    %1079 = memref.load %arg2[%c177] : memref<288xf32, #tpu.memory_space<smem>>
    %1080 = vector.extract_strided_slice %1 {offsets = [3, 2, 0], sizes = [1, 16, 16], strides = [1, 1, 1]} : vector<4x18x18xf32> to vector<1x16x16xf32>
    %1081 = vector.shape_cast %1080 : vector<1x16x16xf32> to vector<16x16xf32>
    %1082 = vector.broadcast %1079 : f32 to vector<16x16xf32>
    %1083 = arith.mulf %1082, %1081 : vector<16x16xf32>
    %1084 = arith.addf %1078, %1083 : vector<16x16xf32>
    %c178 = arith.constant 178 : index
    %1085 = memref.load %arg2[%c178] : memref<288xf32, #tpu.memory_space<smem>>
    %1086 = vector.extract_strided_slice %1 {offsets = [3, 2, 1], sizes = [1, 16, 16], strides = [1, 1, 1]} : vector<4x18x18xf32> to vector<1x16x16xf32>
    %1087 = vector.shape_cast %1086 : vector<1x16x16xf32> to vector<16x16xf32>
    %1088 = vector.broadcast %1085 : f32 to vector<16x16xf32>
    %1089 = arith.mulf %1088, %1087 : vector<16x16xf32>
    %1090 = arith.addf %1084, %1089 : vector<16x16xf32>
    %c179 = arith.constant 179 : index
    %1091 = memref.load %arg2[%c179] : memref<288xf32, #tpu.memory_space<smem>>
    %1092 = vector.extract_strided_slice %1 {offsets = [3, 2, 2], sizes = [1, 16, 16], strides = [1, 1, 1]} : vector<4x18x18xf32> to vector<1x16x16xf32>
    %1093 = vector.shape_cast %1092 : vector<1x16x16xf32> to vector<16x16xf32>
    %1094 = vector.broadcast %1091 : f32 to vector<16x16xf32>
    %1095 = arith.mulf %1094, %1093 : vector<16x16xf32>
    %1096 = arith.addf %1090, %1095 : vector<16x16xf32>
    %cst_23 = arith.constant 0.000000e+00 : f32
    %1097 = vector.broadcast %cst_23 : f32 to vector<16x16xf32>
    %1098 = arith.maximumf %1096, %1097 : vector<16x16xf32>
    %c0_24 = arith.constant 0 : index
    %c4_25 = arith.constant 4 : index
    %c0_26 = arith.constant 0 : index
    %c0_27 = arith.constant 0 : index
    %1099 = vector.load %arg3[%c0_24, %c4_25, %c0_26, %c0_27] : memref<1x8x16x16xf32, #tpu.memory_space<vmem>>, vector<1x1x16x16xf32>
    %1100 = vector.shape_cast %1099 : vector<1x1x16x16xf32> to vector<16x16xf32>
    %1101 = vector.shape_cast %1098 : vector<16x16xf32> to vector<1x1x16x16xf32>
    tpu.vector_store %arg3[%c0_24, %c4_25, %c0_26, %c0_27], %1101 {strides = array<i32>} : memref<1x8x16x16xf32, #tpu.memory_space<vmem>>, vector<1x1x16x16xf32>,
    %c180 = arith.constant 180 : index
    %1102 = memref.load %arg2[%c180] : memref<288xf32, #tpu.memory_space<smem>>
    %1103 = vector.extract_strided_slice %1 {offsets = [0, 0, 0], sizes = [1, 16, 16], strides = [1, 1, 1]} : vector<4x18x18xf32> to vector<1x16x16xf32>
    %1104 = vector.shape_cast %1103 : vector<1x16x16xf32> to vector<16x16xf32>
    %1105 = vector.broadcast %1102 : f32 to vector<16x16xf32>
    %1106 = arith.mulf %1105, %1104 : vector<16x16xf32>
    %c181 = arith.constant 181 : index
    %1107 = memref.load %arg2[%c181] : memref<288xf32, #tpu.memory_space<smem>>
    %1108 = vector.extract_strided_slice %1 {offsets = [0, 0, 1], sizes = [1, 16, 16], strides = [1, 1, 1]} : vector<4x18x18xf32> to vector<1x16x16xf32>
    %1109 = vector.shape_cast %1108 : vector<1x16x16xf32> to vector<16x16xf32>
    %1110 = vector.broadcast %1107 : f32 to vector<16x16xf32>
    %1111 = arith.mulf %1110, %1109 : vector<16x16xf32>
    %1112 = arith.addf %1106, %1111 : vector<16x16xf32>
    %c182 = arith.constant 182 : index
    %1113 = memref.load %arg2[%c182] : memref<288xf32, #tpu.memory_space<smem>>
    %1114 = vector.extract_strided_slice %1 {offsets = [0, 0, 2], sizes = [1, 16, 16], strides = [1, 1, 1]} : vector<4x18x18xf32> to vector<1x16x16xf32>
    %1115 = vector.shape_cast %1114 : vector<1x16x16xf32> to vector<16x16xf32>
    %1116 = vector.broadcast %1113 : f32 to vector<16x16xf32>
    %1117 = arith.mulf %1116, %1115 : vector<16x16xf32>
    %1118 = arith.addf %1112, %1117 : vector<16x16xf32>
    %c183 = arith.constant 183 : index
    %1119 = memref.load %arg2[%c183] : memref<288xf32, #tpu.memory_space<smem>>
    %1120 = vector.extract_strided_slice %1 {offsets = [0, 1, 0], sizes = [1, 16, 16], strides = [1, 1, 1]} : vector<4x18x18xf32> to vector<1x16x16xf32>
    %1121 = vector.shape_cast %1120 : vector<1x16x16xf32> to vector<16x16xf32>
    %1122 = vector.broadcast %1119 : f32 to vector<16x16xf32>
    %1123 = arith.mulf %1122, %1121 : vector<16x16xf32>
    %1124 = arith.addf %1118, %1123 : vector<16x16xf32>
    %c184 = arith.constant 184 : index
    %1125 = memref.load %arg2[%c184] : memref<288xf32, #tpu.memory_space<smem>>
    %1126 = vector.extract_strided_slice %1 {offsets = [0, 1, 1], sizes = [1, 16, 16], strides = [1, 1, 1]} : vector<4x18x18xf32> to vector<1x16x16xf32>
    %1127 = vector.shape_cast %1126 : vector<1x16x16xf32> to vector<16x16xf32>
    %1128 = vector.broadcast %1125 : f32 to vector<16x16xf32>
    %1129 = arith.mulf %1128, %1127 : vector<16x16xf32>
    %1130 = arith.addf %1124, %1129 : vector<16x16xf32>
    %c185 = arith.constant 185 : index
    %1131 = memref.load %arg2[%c185] : memref<288xf32, #tpu.memory_space<smem>>
    %1132 = vector.extract_strided_slice %1 {offsets = [0, 1, 2], sizes = [1, 16, 16], strides = [1, 1, 1]} : vector<4x18x18xf32> to vector<1x16x16xf32>
    %1133 = vector.shape_cast %1132 : vector<1x16x16xf32> to vector<16x16xf32>
    %1134 = vector.broadcast %1131 : f32 to vector<16x16xf32>
    %1135 = arith.mulf %1134, %1133 : vector<16x16xf32>
    %1136 = arith.addf %1130, %1135 : vector<16x16xf32>
    %c186 = arith.constant 186 : index
    %1137 = memref.load %arg2[%c186] : memref<288xf32, #tpu.memory_space<smem>>
    %1138 = vector.extract_strided_slice %1 {offsets = [0, 2, 0], sizes = [1, 16, 16], strides = [1, 1, 1]} : vector<4x18x18xf32> to vector<1x16x16xf32>
    %1139 = vector.shape_cast %1138 : vector<1x16x16xf32> to vector<16x16xf32>
    %1140 = vector.broadcast %1137 : f32 to vector<16x16xf32>
    %1141 = arith.mulf %1140, %1139 : vector<16x16xf32>
    %1142 = arith.addf %1136, %1141 : vector<16x16xf32>
    %c187 = arith.constant 187 : index
    %1143 = memref.load %arg2[%c187] : memref<288xf32, #tpu.memory_space<smem>>
    %1144 = vector.extract_strided_slice %1 {offsets = [0, 2, 1], sizes = [1, 16, 16], strides = [1, 1, 1]} : vector<4x18x18xf32> to vector<1x16x16xf32>
    %1145 = vector.shape_cast %1144 : vector<1x16x16xf32> to vector<16x16xf32>
    %1146 = vector.broadcast %1143 : f32 to vector<16x16xf32>
    %1147 = arith.mulf %1146, %1145 : vector<16x16xf32>
    %1148 = arith.addf %1142, %1147 : vector<16x16xf32>
    %c188 = arith.constant 188 : index
    %1149 = memref.load %arg2[%c188] : memref<288xf32, #tpu.memory_space<smem>>
    %1150 = vector.extract_strided_slice %1 {offsets = [0, 2, 2], sizes = [1, 16, 16], strides = [1, 1, 1]} : vector<4x18x18xf32> to vector<1x16x16xf32>
    %1151 = vector.shape_cast %1150 : vector<1x16x16xf32> to vector<16x16xf32>
    %1152 = vector.broadcast %1149 : f32 to vector<16x16xf32>
    %1153 = arith.mulf %1152, %1151 : vector<16x16xf32>
    %1154 = arith.addf %1148, %1153 : vector<16x16xf32>
    %c189 = arith.constant 189 : index
    %1155 = memref.load %arg2[%c189] : memref<288xf32, #tpu.memory_space<smem>>
    %1156 = vector.extract_strided_slice %1 {offsets = [1, 0, 0], sizes = [1, 16, 16], strides = [1, 1, 1]} : vector<4x18x18xf32> to vector<1x16x16xf32>
    %1157 = vector.shape_cast %1156 : vector<1x16x16xf32> to vector<16x16xf32>
    %1158 = vector.broadcast %1155 : f32 to vector<16x16xf32>
    %1159 = arith.mulf %1158, %1157 : vector<16x16xf32>
    %1160 = arith.addf %1154, %1159 : vector<16x16xf32>
    %c190 = arith.constant 190 : index
    %1161 = memref.load %arg2[%c190] : memref<288xf32, #tpu.memory_space<smem>>
    %1162 = vector.extract_strided_slice %1 {offsets = [1, 0, 1], sizes = [1, 16, 16], strides = [1, 1, 1]} : vector<4x18x18xf32> to vector<1x16x16xf32>
    %1163 = vector.shape_cast %1162 : vector<1x16x16xf32> to vector<16x16xf32>
    %1164 = vector.broadcast %1161 : f32 to vector<16x16xf32>
    %1165 = arith.mulf %1164, %1163 : vector<16x16xf32>
    %1166 = arith.addf %1160, %1165 : vector<16x16xf32>
    %c191 = arith.constant 191 : index
    %1167 = memref.load %arg2[%c191] : memref<288xf32, #tpu.memory_space<smem>>
    %1168 = vector.extract_strided_slice %1 {offsets = [1, 0, 2], sizes = [1, 16, 16], strides = [1, 1, 1]} : vector<4x18x18xf32> to vector<1x16x16xf32>
    %1169 = vector.shape_cast %1168 : vector<1x16x16xf32> to vector<16x16xf32>
    %1170 = vector.broadcast %1167 : f32 to vector<16x16xf32>
    %1171 = arith.mulf %1170, %1169 : vector<16x16xf32>
    %1172 = arith.addf %1166, %1171 : vector<16x16xf32>
    %c192 = arith.constant 192 : index
    %1173 = memref.load %arg2[%c192] : memref<288xf32, #tpu.memory_space<smem>>
    %1174 = vector.extract_strided_slice %1 {offsets = [1, 1, 0], sizes = [1, 16, 16], strides = [1, 1, 1]} : vector<4x18x18xf32> to vector<1x16x16xf32>
    %1175 = vector.shape_cast %1174 : vector<1x16x16xf32> to vector<16x16xf32>
    %1176 = vector.broadcast %1173 : f32 to vector<16x16xf32>
    %1177 = arith.mulf %1176, %1175 : vector<16x16xf32>
    %1178 = arith.addf %1172, %1177 : vector<16x16xf32>
    %c193 = arith.constant 193 : index
    %1179 = memref.load %arg2[%c193] : memref<288xf32, #tpu.memory_space<smem>>
    %1180 = vector.extract_strided_slice %1 {offsets = [1, 1, 1], sizes = [1, 16, 16], strides = [1, 1, 1]} : vector<4x18x18xf32> to vector<1x16x16xf32>
    %1181 = vector.shape_cast %1180 : vector<1x16x16xf32> to vector<16x16xf32>
    %1182 = vector.broadcast %1179 : f32 to vector<16x16xf32>
    %1183 = arith.mulf %1182, %1181 : vector<16x16xf32>
    %1184 = arith.addf %1178, %1183 : vector<16x16xf32>
    %c194 = arith.constant 194 : index
    %1185 = memref.load %arg2[%c194] : memref<288xf32, #tpu.memory_space<smem>>
    %1186 = vector.extract_strided_slice %1 {offsets = [1, 1, 2], sizes = [1, 16, 16], strides = [1, 1, 1]} : vector<4x18x18xf32> to vector<1x16x16xf32>
    %1187 = vector.shape_cast %1186 : vector<1x16x16xf32> to vector<16x16xf32>
    %1188 = vector.broadcast %1185 : f32 to vector<16x16xf32>
    %1189 = arith.mulf %1188, %1187 : vector<16x16xf32>
    %1190 = arith.addf %1184, %1189 : vector<16x16xf32>
    %c195 = arith.constant 195 : index
    %1191 = memref.load %arg2[%c195] : memref<288xf32, #tpu.memory_space<smem>>
    %1192 = vector.extract_strided_slice %1 {offsets = [1, 2, 0], sizes = [1, 16, 16], strides = [1, 1, 1]} : vector<4x18x18xf32> to vector<1x16x16xf32>
    %1193 = vector.shape_cast %1192 : vector<1x16x16xf32> to vector<16x16xf32>
    %1194 = vector.broadcast %1191 : f32 to vector<16x16xf32>
    %1195 = arith.mulf %1194, %1193 : vector<16x16xf32>
    %1196 = arith.addf %1190, %1195 : vector<16x16xf32>
    %c196 = arith.constant 196 : index
    %1197 = memref.load %arg2[%c196] : memref<288xf32, #tpu.memory_space<smem>>
    %1198 = vector.extract_strided_slice %1 {offsets = [1, 2, 1], sizes = [1, 16, 16], strides = [1, 1, 1]} : vector<4x18x18xf32> to vector<1x16x16xf32>
    %1199 = vector.shape_cast %1198 : vector<1x16x16xf32> to vector<16x16xf32>
    %1200 = vector.broadcast %1197 : f32 to vector<16x16xf32>
    %1201 = arith.mulf %1200, %1199 : vector<16x16xf32>
    %1202 = arith.addf %1196, %1201 : vector<16x16xf32>
    %c197 = arith.constant 197 : index
    %1203 = memref.load %arg2[%c197] : memref<288xf32, #tpu.memory_space<smem>>
    %1204 = vector.extract_strided_slice %1 {offsets = [1, 2, 2], sizes = [1, 16, 16], strides = [1, 1, 1]} : vector<4x18x18xf32> to vector<1x16x16xf32>
    %1205 = vector.shape_cast %1204 : vector<1x16x16xf32> to vector<16x16xf32>
    %1206 = vector.broadcast %1203 : f32 to vector<16x16xf32>
    %1207 = arith.mulf %1206, %1205 : vector<16x16xf32>
    %1208 = arith.addf %1202, %1207 : vector<16x16xf32>
    %c198 = arith.constant 198 : index
    %1209 = memref.load %arg2[%c198] : memref<288xf32, #tpu.memory_space<smem>>
    %1210 = vector.extract_strided_slice %1 {offsets = [2, 0, 0], sizes = [1, 16, 16], strides = [1, 1, 1]} : vector<4x18x18xf32> to vector<1x16x16xf32>
    %1211 = vector.shape_cast %1210 : vector<1x16x16xf32> to vector<16x16xf32>
    %1212 = vector.broadcast %1209 : f32 to vector<16x16xf32>
    %1213 = arith.mulf %1212, %1211 : vector<16x16xf32>
    %1214 = arith.addf %1208, %1213 : vector<16x16xf32>
    %c199 = arith.constant 199 : index
    %1215 = memref.load %arg2[%c199] : memref<288xf32, #tpu.memory_space<smem>>
    %1216 = vector.extract_strided_slice %1 {offsets = [2, 0, 1], sizes = [1, 16, 16], strides = [1, 1, 1]} : vector<4x18x18xf32> to vector<1x16x16xf32>
    %1217 = vector.shape_cast %1216 : vector<1x16x16xf32> to vector<16x16xf32>
    %1218 = vector.broadcast %1215 : f32 to vector<16x16xf32>
    %1219 = arith.mulf %1218, %1217 : vector<16x16xf32>
    %1220 = arith.addf %1214, %1219 : vector<16x16xf32>
    %c200 = arith.constant 200 : index
    %1221 = memref.load %arg2[%c200] : memref<288xf32, #tpu.memory_space<smem>>
    %1222 = vector.extract_strided_slice %1 {offsets = [2, 0, 2], sizes = [1, 16, 16], strides = [1, 1, 1]} : vector<4x18x18xf32> to vector<1x16x16xf32>
    %1223 = vector.shape_cast %1222 : vector<1x16x16xf32> to vector<16x16xf32>
    %1224 = vector.broadcast %1221 : f32 to vector<16x16xf32>
    %1225 = arith.mulf %1224, %1223 : vector<16x16xf32>
    %1226 = arith.addf %1220, %1225 : vector<16x16xf32>
    %c201 = arith.constant 201 : index
    %1227 = memref.load %arg2[%c201] : memref<288xf32, #tpu.memory_space<smem>>
    %1228 = vector.extract_strided_slice %1 {offsets = [2, 1, 0], sizes = [1, 16, 16], strides = [1, 1, 1]} : vector<4x18x18xf32> to vector<1x16x16xf32>
    %1229 = vector.shape_cast %1228 : vector<1x16x16xf32> to vector<16x16xf32>
    %1230 = vector.broadcast %1227 : f32 to vector<16x16xf32>
    %1231 = arith.mulf %1230, %1229 : vector<16x16xf32>
    %1232 = arith.addf %1226, %1231 : vector<16x16xf32>
    %c202 = arith.constant 202 : index
    %1233 = memref.load %arg2[%c202] : memref<288xf32, #tpu.memory_space<smem>>
    %1234 = vector.extract_strided_slice %1 {offsets = [2, 1, 1], sizes = [1, 16, 16], strides = [1, 1, 1]} : vector<4x18x18xf32> to vector<1x16x16xf32>
    %1235 = vector.shape_cast %1234 : vector<1x16x16xf32> to vector<16x16xf32>
    %1236 = vector.broadcast %1233 : f32 to vector<16x16xf32>
    %1237 = arith.mulf %1236, %1235 : vector<16x16xf32>
    %1238 = arith.addf %1232, %1237 : vector<16x16xf32>
    %c203 = arith.constant 203 : index
    %1239 = memref.load %arg2[%c203] : memref<288xf32, #tpu.memory_space<smem>>
    %1240 = vector.extract_strided_slice %1 {offsets = [2, 1, 2], sizes = [1, 16, 16], strides = [1, 1, 1]} : vector<4x18x18xf32> to vector<1x16x16xf32>
    %1241 = vector.shape_cast %1240 : vector<1x16x16xf32> to vector<16x16xf32>
    %1242 = vector.broadcast %1239 : f32 to vector<16x16xf32>
    %1243 = arith.mulf %1242, %1241 : vector<16x16xf32>
    %1244 = arith.addf %1238, %1243 : vector<16x16xf32>
    %c204 = arith.constant 204 : index
    %1245 = memref.load %arg2[%c204] : memref<288xf32, #tpu.memory_space<smem>>
    %1246 = vector.extract_strided_slice %1 {offsets = [2, 2, 0], sizes = [1, 16, 16], strides = [1, 1, 1]} : vector<4x18x18xf32> to vector<1x16x16xf32>
    %1247 = vector.shape_cast %1246 : vector<1x16x16xf32> to vector<16x16xf32>
    %1248 = vector.broadcast %1245 : f32 to vector<16x16xf32>
    %1249 = arith.mulf %1248, %1247 : vector<16x16xf32>
    %1250 = arith.addf %1244, %1249 : vector<16x16xf32>
    %c205 = arith.constant 205 : index
    %1251 = memref.load %arg2[%c205] : memref<288xf32, #tpu.memory_space<smem>>
    %1252 = vector.extract_strided_slice %1 {offsets = [2, 2, 1], sizes = [1, 16, 16], strides = [1, 1, 1]} : vector<4x18x18xf32> to vector<1x16x16xf32>
    %1253 = vector.shape_cast %1252 : vector<1x16x16xf32> to vector<16x16xf32>
    %1254 = vector.broadcast %1251 : f32 to vector<16x16xf32>
    %1255 = arith.mulf %1254, %1253 : vector<16x16xf32>
    %1256 = arith.addf %1250, %1255 : vector<16x16xf32>
    %c206 = arith.constant 206 : index
    %1257 = memref.load %arg2[%c206] : memref<288xf32, #tpu.memory_space<smem>>
    %1258 = vector.extract_strided_slice %1 {offsets = [2, 2, 2], sizes = [1, 16, 16], strides = [1, 1, 1]} : vector<4x18x18xf32> to vector<1x16x16xf32>
    %1259 = vector.shape_cast %1258 : vector<1x16x16xf32> to vector<16x16xf32>
    %1260 = vector.broadcast %1257 : f32 to vector<16x16xf32>
    %1261 = arith.mulf %1260, %1259 : vector<16x16xf32>
    %1262 = arith.addf %1256, %1261 : vector<16x16xf32>
    %c207 = arith.constant 207 : index
    %1263 = memref.load %arg2[%c207] : memref<288xf32, #tpu.memory_space<smem>>
    %1264 = vector.extract_strided_slice %1 {offsets = [3, 0, 0], sizes = [1, 16, 16], strides = [1, 1, 1]} : vector<4x18x18xf32> to vector<1x16x16xf32>
    %1265 = vector.shape_cast %1264 : vector<1x16x16xf32> to vector<16x16xf32>
    %1266 = vector.broadcast %1263 : f32 to vector<16x16xf32>
    %1267 = arith.mulf %1266, %1265 : vector<16x16xf32>
    %1268 = arith.addf %1262, %1267 : vector<16x16xf32>
    %c208 = arith.constant 208 : index
    %1269 = memref.load %arg2[%c208] : memref<288xf32, #tpu.memory_space<smem>>
    %1270 = vector.extract_strided_slice %1 {offsets = [3, 0, 1], sizes = [1, 16, 16], strides = [1, 1, 1]} : vector<4x18x18xf32> to vector<1x16x16xf32>
    %1271 = vector.shape_cast %1270 : vector<1x16x16xf32> to vector<16x16xf32>
    %1272 = vector.broadcast %1269 : f32 to vector<16x16xf32>
    %1273 = arith.mulf %1272, %1271 : vector<16x16xf32>
    %1274 = arith.addf %1268, %1273 : vector<16x16xf32>
    %c209 = arith.constant 209 : index
    %1275 = memref.load %arg2[%c209] : memref<288xf32, #tpu.memory_space<smem>>
    %1276 = vector.extract_strided_slice %1 {offsets = [3, 0, 2], sizes = [1, 16, 16], strides = [1, 1, 1]} : vector<4x18x18xf32> to vector<1x16x16xf32>
    %1277 = vector.shape_cast %1276 : vector<1x16x16xf32> to vector<16x16xf32>
    %1278 = vector.broadcast %1275 : f32 to vector<16x16xf32>
    %1279 = arith.mulf %1278, %1277 : vector<16x16xf32>
    %1280 = arith.addf %1274, %1279 : vector<16x16xf32>
    %c210 = arith.constant 210 : index
    %1281 = memref.load %arg2[%c210] : memref<288xf32, #tpu.memory_space<smem>>
    %1282 = vector.extract_strided_slice %1 {offsets = [3, 1, 0], sizes = [1, 16, 16], strides = [1, 1, 1]} : vector<4x18x18xf32> to vector<1x16x16xf32>
    %1283 = vector.shape_cast %1282 : vector<1x16x16xf32> to vector<16x16xf32>
    %1284 = vector.broadcast %1281 : f32 to vector<16x16xf32>
    %1285 = arith.mulf %1284, %1283 : vector<16x16xf32>
    %1286 = arith.addf %1280, %1285 : vector<16x16xf32>
    %c211 = arith.constant 211 : index
    %1287 = memref.load %arg2[%c211] : memref<288xf32, #tpu.memory_space<smem>>
    %1288 = vector.extract_strided_slice %1 {offsets = [3, 1, 1], sizes = [1, 16, 16], strides = [1, 1, 1]} : vector<4x18x18xf32> to vector<1x16x16xf32>
    %1289 = vector.shape_cast %1288 : vector<1x16x16xf32> to vector<16x16xf32>
    %1290 = vector.broadcast %1287 : f32 to vector<16x16xf32>
    %1291 = arith.mulf %1290, %1289 : vector<16x16xf32>
    %1292 = arith.addf %1286, %1291 : vector<16x16xf32>
    %c212 = arith.constant 212 : index
    %1293 = memref.load %arg2[%c212] : memref<288xf32, #tpu.memory_space<smem>>
    %1294 = vector.extract_strided_slice %1 {offsets = [3, 1, 2], sizes = [1, 16, 16], strides = [1, 1, 1]} : vector<4x18x18xf32> to vector<1x16x16xf32>
    %1295 = vector.shape_cast %1294 : vector<1x16x16xf32> to vector<16x16xf32>
    %1296 = vector.broadcast %1293 : f32 to vector<16x16xf32>
    %1297 = arith.mulf %1296, %1295 : vector<16x16xf32>
    %1298 = arith.addf %1292, %1297 : vector<16x16xf32>
    %c213 = arith.constant 213 : index
    %1299 = memref.load %arg2[%c213] : memref<288xf32, #tpu.memory_space<smem>>
    %1300 = vector.extract_strided_slice %1 {offsets = [3, 2, 0], sizes = [1, 16, 16], strides = [1, 1, 1]} : vector<4x18x18xf32> to vector<1x16x16xf32>
    %1301 = vector.shape_cast %1300 : vector<1x16x16xf32> to vector<16x16xf32>
    %1302 = vector.broadcast %1299 : f32 to vector<16x16xf32>
    %1303 = arith.mulf %1302, %1301 : vector<16x16xf32>
    %1304 = arith.addf %1298, %1303 : vector<16x16xf32>
    %c214 = arith.constant 214 : index
    %1305 = memref.load %arg2[%c214] : memref<288xf32, #tpu.memory_space<smem>>
    %1306 = vector.extract_strided_slice %1 {offsets = [3, 2, 1], sizes = [1, 16, 16], strides = [1, 1, 1]} : vector<4x18x18xf32> to vector<1x16x16xf32>
    %1307 = vector.shape_cast %1306 : vector<1x16x16xf32> to vector<16x16xf32>
    %1308 = vector.broadcast %1305 : f32 to vector<16x16xf32>
    %1309 = arith.mulf %1308, %1307 : vector<16x16xf32>
    %1310 = arith.addf %1304, %1309 : vector<16x16xf32>
    %c215 = arith.constant 215 : index
    %1311 = memref.load %arg2[%c215] : memref<288xf32, #tpu.memory_space<smem>>
    %1312 = vector.extract_strided_slice %1 {offsets = [3, 2, 2], sizes = [1, 16, 16], strides = [1, 1, 1]} : vector<4x18x18xf32> to vector<1x16x16xf32>
    %1313 = vector.shape_cast %1312 : vector<1x16x16xf32> to vector<16x16xf32>
    %1314 = vector.broadcast %1311 : f32 to vector<16x16xf32>
    %1315 = arith.mulf %1314, %1313 : vector<16x16xf32>
    %1316 = arith.addf %1310, %1315 : vector<16x16xf32>
    %cst_28 = arith.constant 0.000000e+00 : f32
    %1317 = vector.broadcast %cst_28 : f32 to vector<16x16xf32>
    %1318 = arith.maximumf %1316, %1317 : vector<16x16xf32>
    %c0_29 = arith.constant 0 : index
    %c5_30 = arith.constant 5 : index
    %c0_31 = arith.constant 0 : index
    %c0_32 = arith.constant 0 : index
    %1319 = vector.load %arg3[%c0_29, %c5_30, %c0_31, %c0_32] : memref<1x8x16x16xf32, #tpu.memory_space<vmem>>, vector<1x1x16x16xf32>
    %1320 = vector.shape_cast %1319 : vector<1x1x16x16xf32> to vector<16x16xf32>
    %1321 = vector.shape_cast %1318 : vector<16x16xf32> to vector<1x1x16x16xf32>
    tpu.vector_store %arg3[%c0_29, %c5_30, %c0_31, %c0_32], %1321 {strides = array<i32>} : memref<1x8x16x16xf32, #tpu.memory_space<vmem>>, vector<1x1x16x16xf32>,
    %c216 = arith.constant 216 : index
    %1322 = memref.load %arg2[%c216] : memref<288xf32, #tpu.memory_space<smem>>
    %1323 = vector.extract_strided_slice %1 {offsets = [0, 0, 0], sizes = [1, 16, 16], strides = [1, 1, 1]} : vector<4x18x18xf32> to vector<1x16x16xf32>
    %1324 = vector.shape_cast %1323 : vector<1x16x16xf32> to vector<16x16xf32>
    %1325 = vector.broadcast %1322 : f32 to vector<16x16xf32>
    %1326 = arith.mulf %1325, %1324 : vector<16x16xf32>
    %c217 = arith.constant 217 : index
    %1327 = memref.load %arg2[%c217] : memref<288xf32, #tpu.memory_space<smem>>
    %1328 = vector.extract_strided_slice %1 {offsets = [0, 0, 1], sizes = [1, 16, 16], strides = [1, 1, 1]} : vector<4x18x18xf32> to vector<1x16x16xf32>
    %1329 = vector.shape_cast %1328 : vector<1x16x16xf32> to vector<16x16xf32>
    %1330 = vector.broadcast %1327 : f32 to vector<16x16xf32>
    %1331 = arith.mulf %1330, %1329 : vector<16x16xf32>
    %1332 = arith.addf %1326, %1331 : vector<16x16xf32>
    %c218 = arith.constant 218 : index
    %1333 = memref.load %arg2[%c218] : memref<288xf32, #tpu.memory_space<smem>>
    %1334 = vector.extract_strided_slice %1 {offsets = [0, 0, 2], sizes = [1, 16, 16], strides = [1, 1, 1]} : vector<4x18x18xf32> to vector<1x16x16xf32>
    %1335 = vector.shape_cast %1334 : vector<1x16x16xf32> to vector<16x16xf32>
    %1336 = vector.broadcast %1333 : f32 to vector<16x16xf32>
    %1337 = arith.mulf %1336, %1335 : vector<16x16xf32>
    %1338 = arith.addf %1332, %1337 : vector<16x16xf32>
    %c219 = arith.constant 219 : index
    %1339 = memref.load %arg2[%c219] : memref<288xf32, #tpu.memory_space<smem>>
    %1340 = vector.extract_strided_slice %1 {offsets = [0, 1, 0], sizes = [1, 16, 16], strides = [1, 1, 1]} : vector<4x18x18xf32> to vector<1x16x16xf32>
    %1341 = vector.shape_cast %1340 : vector<1x16x16xf32> to vector<16x16xf32>
    %1342 = vector.broadcast %1339 : f32 to vector<16x16xf32>
    %1343 = arith.mulf %1342, %1341 : vector<16x16xf32>
    %1344 = arith.addf %1338, %1343 : vector<16x16xf32>
    %c220 = arith.constant 220 : index
    %1345 = memref.load %arg2[%c220] : memref<288xf32, #tpu.memory_space<smem>>
    %1346 = vector.extract_strided_slice %1 {offsets = [0, 1, 1], sizes = [1, 16, 16], strides = [1, 1, 1]} : vector<4x18x18xf32> to vector<1x16x16xf32>
    %1347 = vector.shape_cast %1346 : vector<1x16x16xf32> to vector<16x16xf32>
    %1348 = vector.broadcast %1345 : f32 to vector<16x16xf32>
    %1349 = arith.mulf %1348, %1347 : vector<16x16xf32>
    %1350 = arith.addf %1344, %1349 : vector<16x16xf32>
    %c221 = arith.constant 221 : index
    %1351 = memref.load %arg2[%c221] : memref<288xf32, #tpu.memory_space<smem>>
    %1352 = vector.extract_strided_slice %1 {offsets = [0, 1, 2], sizes = [1, 16, 16], strides = [1, 1, 1]} : vector<4x18x18xf32> to vector<1x16x16xf32>
    %1353 = vector.shape_cast %1352 : vector<1x16x16xf32> to vector<16x16xf32>
    %1354 = vector.broadcast %1351 : f32 to vector<16x16xf32>
    %1355 = arith.mulf %1354, %1353 : vector<16x16xf32>
    %1356 = arith.addf %1350, %1355 : vector<16x16xf32>
    %c222 = arith.constant 222 : index
    %1357 = memref.load %arg2[%c222] : memref<288xf32, #tpu.memory_space<smem>>
    %1358 = vector.extract_strided_slice %1 {offsets = [0, 2, 0], sizes = [1, 16, 16], strides = [1, 1, 1]} : vector<4x18x18xf32> to vector<1x16x16xf32>
    %1359 = vector.shape_cast %1358 : vector<1x16x16xf32> to vector<16x16xf32>
    %1360 = vector.broadcast %1357 : f32 to vector<16x16xf32>
    %1361 = arith.mulf %1360, %1359 : vector<16x16xf32>
    %1362 = arith.addf %1356, %1361 : vector<16x16xf32>
    %c223 = arith.constant 223 : index
    %1363 = memref.load %arg2[%c223] : memref<288xf32, #tpu.memory_space<smem>>
    %1364 = vector.extract_strided_slice %1 {offsets = [0, 2, 1], sizes = [1, 16, 16], strides = [1, 1, 1]} : vector<4x18x18xf32> to vector<1x16x16xf32>
    %1365 = vector.shape_cast %1364 : vector<1x16x16xf32> to vector<16x16xf32>
    %1366 = vector.broadcast %1363 : f32 to vector<16x16xf32>
    %1367 = arith.mulf %1366, %1365 : vector<16x16xf32>
    %1368 = arith.addf %1362, %1367 : vector<16x16xf32>
    %c224 = arith.constant 224 : index
    %1369 = memref.load %arg2[%c224] : memref<288xf32, #tpu.memory_space<smem>>
    %1370 = vector.extract_strided_slice %1 {offsets = [0, 2, 2], sizes = [1, 16, 16], strides = [1, 1, 1]} : vector<4x18x18xf32> to vector<1x16x16xf32>
    %1371 = vector.shape_cast %1370 : vector<1x16x16xf32> to vector<16x16xf32>
    %1372 = vector.broadcast %1369 : f32 to vector<16x16xf32>
    %1373 = arith.mulf %1372, %1371 : vector<16x16xf32>
    %1374 = arith.addf %1368, %1373 : vector<16x16xf32>
    %c225 = arith.constant 225 : index
    %1375 = memref.load %arg2[%c225] : memref<288xf32, #tpu.memory_space<smem>>
    %1376 = vector.extract_strided_slice %1 {offsets = [1, 0, 0], sizes = [1, 16, 16], strides = [1, 1, 1]} : vector<4x18x18xf32> to vector<1x16x16xf32>
    %1377 = vector.shape_cast %1376 : vector<1x16x16xf32> to vector<16x16xf32>
    %1378 = vector.broadcast %1375 : f32 to vector<16x16xf32>
    %1379 = arith.mulf %1378, %1377 : vector<16x16xf32>
    %1380 = arith.addf %1374, %1379 : vector<16x16xf32>
    %c226 = arith.constant 226 : index
    %1381 = memref.load %arg2[%c226] : memref<288xf32, #tpu.memory_space<smem>>
    %1382 = vector.extract_strided_slice %1 {offsets = [1, 0, 1], sizes = [1, 16, 16], strides = [1, 1, 1]} : vector<4x18x18xf32> to vector<1x16x16xf32>
    %1383 = vector.shape_cast %1382 : vector<1x16x16xf32> to vector<16x16xf32>
    %1384 = vector.broadcast %1381 : f32 to vector<16x16xf32>
    %1385 = arith.mulf %1384, %1383 : vector<16x16xf32>
    %1386 = arith.addf %1380, %1385 : vector<16x16xf32>
    %c227 = arith.constant 227 : index
    %1387 = memref.load %arg2[%c227] : memref<288xf32, #tpu.memory_space<smem>>
    %1388 = vector.extract_strided_slice %1 {offsets = [1, 0, 2], sizes = [1, 16, 16], strides = [1, 1, 1]} : vector<4x18x18xf32> to vector<1x16x16xf32>
    %1389 = vector.shape_cast %1388 : vector<1x16x16xf32> to vector<16x16xf32>
    %1390 = vector.broadcast %1387 : f32 to vector<16x16xf32>
    %1391 = arith.mulf %1390, %1389 : vector<16x16xf32>
    %1392 = arith.addf %1386, %1391 : vector<16x16xf32>
    %c228 = arith.constant 228 : index
    %1393 = memref.load %arg2[%c228] : memref<288xf32, #tpu.memory_space<smem>>
    %1394 = vector.extract_strided_slice %1 {offsets = [1, 1, 0], sizes = [1, 16, 16], strides = [1, 1, 1]} : vector<4x18x18xf32> to vector<1x16x16xf32>
    %1395 = vector.shape_cast %1394 : vector<1x16x16xf32> to vector<16x16xf32>
    %1396 = vector.broadcast %1393 : f32 to vector<16x16xf32>
    %1397 = arith.mulf %1396, %1395 : vector<16x16xf32>
    %1398 = arith.addf %1392, %1397 : vector<16x16xf32>
    %c229 = arith.constant 229 : index
    %1399 = memref.load %arg2[%c229] : memref<288xf32, #tpu.memory_space<smem>>
    %1400 = vector.extract_strided_slice %1 {offsets = [1, 1, 1], sizes = [1, 16, 16], strides = [1, 1, 1]} : vector<4x18x18xf32> to vector<1x16x16xf32>
    %1401 = vector.shape_cast %1400 : vector<1x16x16xf32> to vector<16x16xf32>
    %1402 = vector.broadcast %1399 : f32 to vector<16x16xf32>
    %1403 = arith.mulf %1402, %1401 : vector<16x16xf32>
    %1404 = arith.addf %1398, %1403 : vector<16x16xf32>
    %c230 = arith.constant 230 : index
    %1405 = memref.load %arg2[%c230] : memref<288xf32, #tpu.memory_space<smem>>
    %1406 = vector.extract_strided_slice %1 {offsets = [1, 1, 2], sizes = [1, 16, 16], strides = [1, 1, 1]} : vector<4x18x18xf32> to vector<1x16x16xf32>
    %1407 = vector.shape_cast %1406 : vector<1x16x16xf32> to vector<16x16xf32>
    %1408 = vector.broadcast %1405 : f32 to vector<16x16xf32>
    %1409 = arith.mulf %1408, %1407 : vector<16x16xf32>
    %1410 = arith.addf %1404, %1409 : vector<16x16xf32>
    %c231 = arith.constant 231 : index
    %1411 = memref.load %arg2[%c231] : memref<288xf32, #tpu.memory_space<smem>>
    %1412 = vector.extract_strided_slice %1 {offsets = [1, 2, 0], sizes = [1, 16, 16], strides = [1, 1, 1]} : vector<4x18x18xf32> to vector<1x16x16xf32>
    %1413 = vector.shape_cast %1412 : vector<1x16x16xf32> to vector<16x16xf32>
    %1414 = vector.broadcast %1411 : f32 to vector<16x16xf32>
    %1415 = arith.mulf %1414, %1413 : vector<16x16xf32>
    %1416 = arith.addf %1410, %1415 : vector<16x16xf32>
    %c232 = arith.constant 232 : index
    %1417 = memref.load %arg2[%c232] : memref<288xf32, #tpu.memory_space<smem>>
    %1418 = vector.extract_strided_slice %1 {offsets = [1, 2, 1], sizes = [1, 16, 16], strides = [1, 1, 1]} : vector<4x18x18xf32> to vector<1x16x16xf32>
    %1419 = vector.shape_cast %1418 : vector<1x16x16xf32> to vector<16x16xf32>
    %1420 = vector.broadcast %1417 : f32 to vector<16x16xf32>
    %1421 = arith.mulf %1420, %1419 : vector<16x16xf32>
    %1422 = arith.addf %1416, %1421 : vector<16x16xf32>
    %c233 = arith.constant 233 : index
    %1423 = memref.load %arg2[%c233] : memref<288xf32, #tpu.memory_space<smem>>
    %1424 = vector.extract_strided_slice %1 {offsets = [1, 2, 2], sizes = [1, 16, 16], strides = [1, 1, 1]} : vector<4x18x18xf32> to vector<1x16x16xf32>
    %1425 = vector.shape_cast %1424 : vector<1x16x16xf32> to vector<16x16xf32>
    %1426 = vector.broadcast %1423 : f32 to vector<16x16xf32>
    %1427 = arith.mulf %1426, %1425 : vector<16x16xf32>
    %1428 = arith.addf %1422, %1427 : vector<16x16xf32>
    %c234 = arith.constant 234 : index
    %1429 = memref.load %arg2[%c234] : memref<288xf32, #tpu.memory_space<smem>>
    %1430 = vector.extract_strided_slice %1 {offsets = [2, 0, 0], sizes = [1, 16, 16], strides = [1, 1, 1]} : vector<4x18x18xf32> to vector<1x16x16xf32>
    %1431 = vector.shape_cast %1430 : vector<1x16x16xf32> to vector<16x16xf32>
    %1432 = vector.broadcast %1429 : f32 to vector<16x16xf32>
    %1433 = arith.mulf %1432, %1431 : vector<16x16xf32>
    %1434 = arith.addf %1428, %1433 : vector<16x16xf32>
    %c235 = arith.constant 235 : index
    %1435 = memref.load %arg2[%c235] : memref<288xf32, #tpu.memory_space<smem>>
    %1436 = vector.extract_strided_slice %1 {offsets = [2, 0, 1], sizes = [1, 16, 16], strides = [1, 1, 1]} : vector<4x18x18xf32> to vector<1x16x16xf32>
    %1437 = vector.shape_cast %1436 : vector<1x16x16xf32> to vector<16x16xf32>
    %1438 = vector.broadcast %1435 : f32 to vector<16x16xf32>
    %1439 = arith.mulf %1438, %1437 : vector<16x16xf32>
    %1440 = arith.addf %1434, %1439 : vector<16x16xf32>
    %c236 = arith.constant 236 : index
    %1441 = memref.load %arg2[%c236] : memref<288xf32, #tpu.memory_space<smem>>
    %1442 = vector.extract_strided_slice %1 {offsets = [2, 0, 2], sizes = [1, 16, 16], strides = [1, 1, 1]} : vector<4x18x18xf32> to vector<1x16x16xf32>
    %1443 = vector.shape_cast %1442 : vector<1x16x16xf32> to vector<16x16xf32>
    %1444 = vector.broadcast %1441 : f32 to vector<16x16xf32>
    %1445 = arith.mulf %1444, %1443 : vector<16x16xf32>
    %1446 = arith.addf %1440, %1445 : vector<16x16xf32>
    %c237 = arith.constant 237 : index
    %1447 = memref.load %arg2[%c237] : memref<288xf32, #tpu.memory_space<smem>>
    %1448 = vector.extract_strided_slice %1 {offsets = [2, 1, 0], sizes = [1, 16, 16], strides = [1, 1, 1]} : vector<4x18x18xf32> to vector<1x16x16xf32>
    %1449 = vector.shape_cast %1448 : vector<1x16x16xf32> to vector<16x16xf32>
    %1450 = vector.broadcast %1447 : f32 to vector<16x16xf32>
    %1451 = arith.mulf %1450, %1449 : vector<16x16xf32>
    %1452 = arith.addf %1446, %1451 : vector<16x16xf32>
    %c238 = arith.constant 238 : index
    %1453 = memref.load %arg2[%c238] : memref<288xf32, #tpu.memory_space<smem>>
    %1454 = vector.extract_strided_slice %1 {offsets = [2, 1, 1], sizes = [1, 16, 16], strides = [1, 1, 1]} : vector<4x18x18xf32> to vector<1x16x16xf32>
    %1455 = vector.shape_cast %1454 : vector<1x16x16xf32> to vector<16x16xf32>
    %1456 = vector.broadcast %1453 : f32 to vector<16x16xf32>
    %1457 = arith.mulf %1456, %1455 : vector<16x16xf32>
    %1458 = arith.addf %1452, %1457 : vector<16x16xf32>
    %c239 = arith.constant 239 : index
    %1459 = memref.load %arg2[%c239] : memref<288xf32, #tpu.memory_space<smem>>
    %1460 = vector.extract_strided_slice %1 {offsets = [2, 1, 2], sizes = [1, 16, 16], strides = [1, 1, 1]} : vector<4x18x18xf32> to vector<1x16x16xf32>
    %1461 = vector.shape_cast %1460 : vector<1x16x16xf32> to vector<16x16xf32>
    %1462 = vector.broadcast %1459 : f32 to vector<16x16xf32>
    %1463 = arith.mulf %1462, %1461 : vector<16x16xf32>
    %1464 = arith.addf %1458, %1463 : vector<16x16xf32>
    %c240 = arith.constant 240 : index
    %1465 = memref.load %arg2[%c240] : memref<288xf32, #tpu.memory_space<smem>>
    %1466 = vector.extract_strided_slice %1 {offsets = [2, 2, 0], sizes = [1, 16, 16], strides = [1, 1, 1]} : vector<4x18x18xf32> to vector<1x16x16xf32>
    %1467 = vector.shape_cast %1466 : vector<1x16x16xf32> to vector<16x16xf32>
    %1468 = vector.broadcast %1465 : f32 to vector<16x16xf32>
    %1469 = arith.mulf %1468, %1467 : vector<16x16xf32>
    %1470 = arith.addf %1464, %1469 : vector<16x16xf32>
    %c241 = arith.constant 241 : index
    %1471 = memref.load %arg2[%c241] : memref<288xf32, #tpu.memory_space<smem>>
    %1472 = vector.extract_strided_slice %1 {offsets = [2, 2, 1], sizes = [1, 16, 16], strides = [1, 1, 1]} : vector<4x18x18xf32> to vector<1x16x16xf32>
    %1473 = vector.shape_cast %1472 : vector<1x16x16xf32> to vector<16x16xf32>
    %1474 = vector.broadcast %1471 : f32 to vector<16x16xf32>
    %1475 = arith.mulf %1474, %1473 : vector<16x16xf32>
    %1476 = arith.addf %1470, %1475 : vector<16x16xf32>
    %c242 = arith.constant 242 : index
    %1477 = memref.load %arg2[%c242] : memref<288xf32, #tpu.memory_space<smem>>
    %1478 = vector.extract_strided_slice %1 {offsets = [2, 2, 2], sizes = [1, 16, 16], strides = [1, 1, 1]} : vector<4x18x18xf32> to vector<1x16x16xf32>
    %1479 = vector.shape_cast %1478 : vector<1x16x16xf32> to vector<16x16xf32>
    %1480 = vector.broadcast %1477 : f32 to vector<16x16xf32>
    %1481 = arith.mulf %1480, %1479 : vector<16x16xf32>
    %1482 = arith.addf %1476, %1481 : vector<16x16xf32>
    %c243 = arith.constant 243 : index
    %1483 = memref.load %arg2[%c243] : memref<288xf32, #tpu.memory_space<smem>>
    %1484 = vector.extract_strided_slice %1 {offsets = [3, 0, 0], sizes = [1, 16, 16], strides = [1, 1, 1]} : vector<4x18x18xf32> to vector<1x16x16xf32>
    %1485 = vector.shape_cast %1484 : vector<1x16x16xf32> to vector<16x16xf32>
    %1486 = vector.broadcast %1483 : f32 to vector<16x16xf32>
    %1487 = arith.mulf %1486, %1485 : vector<16x16xf32>
    %1488 = arith.addf %1482, %1487 : vector<16x16xf32>
    %c244 = arith.constant 244 : index
    %1489 = memref.load %arg2[%c244] : memref<288xf32, #tpu.memory_space<smem>>
    %1490 = vector.extract_strided_slice %1 {offsets = [3, 0, 1], sizes = [1, 16, 16], strides = [1, 1, 1]} : vector<4x18x18xf32> to vector<1x16x16xf32>
    %1491 = vector.shape_cast %1490 : vector<1x16x16xf32> to vector<16x16xf32>
    %1492 = vector.broadcast %1489 : f32 to vector<16x16xf32>
    %1493 = arith.mulf %1492, %1491 : vector<16x16xf32>
    %1494 = arith.addf %1488, %1493 : vector<16x16xf32>
    %c245 = arith.constant 245 : index
    %1495 = memref.load %arg2[%c245] : memref<288xf32, #tpu.memory_space<smem>>
    %1496 = vector.extract_strided_slice %1 {offsets = [3, 0, 2], sizes = [1, 16, 16], strides = [1, 1, 1]} : vector<4x18x18xf32> to vector<1x16x16xf32>
    %1497 = vector.shape_cast %1496 : vector<1x16x16xf32> to vector<16x16xf32>
    %1498 = vector.broadcast %1495 : f32 to vector<16x16xf32>
    %1499 = arith.mulf %1498, %1497 : vector<16x16xf32>
    %1500 = arith.addf %1494, %1499 : vector<16x16xf32>
    %c246 = arith.constant 246 : index
    %1501 = memref.load %arg2[%c246] : memref<288xf32, #tpu.memory_space<smem>>
    %1502 = vector.extract_strided_slice %1 {offsets = [3, 1, 0], sizes = [1, 16, 16], strides = [1, 1, 1]} : vector<4x18x18xf32> to vector<1x16x16xf32>
    %1503 = vector.shape_cast %1502 : vector<1x16x16xf32> to vector<16x16xf32>
    %1504 = vector.broadcast %1501 : f32 to vector<16x16xf32>
    %1505 = arith.mulf %1504, %1503 : vector<16x16xf32>
    %1506 = arith.addf %1500, %1505 : vector<16x16xf32>
    %c247 = arith.constant 247 : index
    %1507 = memref.load %arg2[%c247] : memref<288xf32, #tpu.memory_space<smem>>
    %1508 = vector.extract_strided_slice %1 {offsets = [3, 1, 1], sizes = [1, 16, 16], strides = [1, 1, 1]} : vector<4x18x18xf32> to vector<1x16x16xf32>
    %1509 = vector.shape_cast %1508 : vector<1x16x16xf32> to vector<16x16xf32>
    %1510 = vector.broadcast %1507 : f32 to vector<16x16xf32>
    %1511 = arith.mulf %1510, %1509 : vector<16x16xf32>
    %1512 = arith.addf %1506, %1511 : vector<16x16xf32>
    %c248 = arith.constant 248 : index
    %1513 = memref.load %arg2[%c248] : memref<288xf32, #tpu.memory_space<smem>>
    %1514 = vector.extract_strided_slice %1 {offsets = [3, 1, 2], sizes = [1, 16, 16], strides = [1, 1, 1]} : vector<4x18x18xf32> to vector<1x16x16xf32>
    %1515 = vector.shape_cast %1514 : vector<1x16x16xf32> to vector<16x16xf32>
    %1516 = vector.broadcast %1513 : f32 to vector<16x16xf32>
    %1517 = arith.mulf %1516, %1515 : vector<16x16xf32>
    %1518 = arith.addf %1512, %1517 : vector<16x16xf32>
    %c249 = arith.constant 249 : index
    %1519 = memref.load %arg2[%c249] : memref<288xf32, #tpu.memory_space<smem>>
    %1520 = vector.extract_strided_slice %1 {offsets = [3, 2, 0], sizes = [1, 16, 16], strides = [1, 1, 1]} : vector<4x18x18xf32> to vector<1x16x16xf32>
    %1521 = vector.shape_cast %1520 : vector<1x16x16xf32> to vector<16x16xf32>
    %1522 = vector.broadcast %1519 : f32 to vector<16x16xf32>
    %1523 = arith.mulf %1522, %1521 : vector<16x16xf32>
    %1524 = arith.addf %1518, %1523 : vector<16x16xf32>
    %c250 = arith.constant 250 : index
    %1525 = memref.load %arg2[%c250] : memref<288xf32, #tpu.memory_space<smem>>
    %1526 = vector.extract_strided_slice %1 {offsets = [3, 2, 1], sizes = [1, 16, 16], strides = [1, 1, 1]} : vector<4x18x18xf32> to vector<1x16x16xf32>
    %1527 = vector.shape_cast %1526 : vector<1x16x16xf32> to vector<16x16xf32>
    %1528 = vector.broadcast %1525 : f32 to vector<16x16xf32>
    %1529 = arith.mulf %1528, %1527 : vector<16x16xf32>
    %1530 = arith.addf %1524, %1529 : vector<16x16xf32>
    %c251 = arith.constant 251 : index
    %1531 = memref.load %arg2[%c251] : memref<288xf32, #tpu.memory_space<smem>>
    %1532 = vector.extract_strided_slice %1 {offsets = [3, 2, 2], sizes = [1, 16, 16], strides = [1, 1, 1]} : vector<4x18x18xf32> to vector<1x16x16xf32>
    %1533 = vector.shape_cast %1532 : vector<1x16x16xf32> to vector<16x16xf32>
    %1534 = vector.broadcast %1531 : f32 to vector<16x16xf32>
    %1535 = arith.mulf %1534, %1533 : vector<16x16xf32>
    %1536 = arith.addf %1530, %1535 : vector<16x16xf32>
    %cst_33 = arith.constant 0.000000e+00 : f32
    %1537 = vector.broadcast %cst_33 : f32 to vector<16x16xf32>
    %1538 = arith.maximumf %1536, %1537 : vector<16x16xf32>
    %c0_34 = arith.constant 0 : index
    %c6_35 = arith.constant 6 : index
    %c0_36 = arith.constant 0 : index
    %c0_37 = arith.constant 0 : index
    %1539 = vector.load %arg3[%c0_34, %c6_35, %c0_36, %c0_37] : memref<1x8x16x16xf32, #tpu.memory_space<vmem>>, vector<1x1x16x16xf32>
    %1540 = vector.shape_cast %1539 : vector<1x1x16x16xf32> to vector<16x16xf32>
    %1541 = vector.shape_cast %1538 : vector<16x16xf32> to vector<1x1x16x16xf32>
    tpu.vector_store %arg3[%c0_34, %c6_35, %c0_36, %c0_37], %1541 {strides = array<i32>} : memref<1x8x16x16xf32, #tpu.memory_space<vmem>>, vector<1x1x16x16xf32>,
    %c252 = arith.constant 252 : index
    %1542 = memref.load %arg2[%c252] : memref<288xf32, #tpu.memory_space<smem>>
    %1543 = vector.extract_strided_slice %1 {offsets = [0, 0, 0], sizes = [1, 16, 16], strides = [1, 1, 1]} : vector<4x18x18xf32> to vector<1x16x16xf32>
    %1544 = vector.shape_cast %1543 : vector<1x16x16xf32> to vector<16x16xf32>
    %1545 = vector.broadcast %1542 : f32 to vector<16x16xf32>
    %1546 = arith.mulf %1545, %1544 : vector<16x16xf32>
    %c253 = arith.constant 253 : index
    %1547 = memref.load %arg2[%c253] : memref<288xf32, #tpu.memory_space<smem>>
    %1548 = vector.extract_strided_slice %1 {offsets = [0, 0, 1], sizes = [1, 16, 16], strides = [1, 1, 1]} : vector<4x18x18xf32> to vector<1x16x16xf32>
    %1549 = vector.shape_cast %1548 : vector<1x16x16xf32> to vector<16x16xf32>
    %1550 = vector.broadcast %1547 : f32 to vector<16x16xf32>
    %1551 = arith.mulf %1550, %1549 : vector<16x16xf32>
    %1552 = arith.addf %1546, %1551 : vector<16x16xf32>
    %c254 = arith.constant 254 : index
    %1553 = memref.load %arg2[%c254] : memref<288xf32, #tpu.memory_space<smem>>
    %1554 = vector.extract_strided_slice %1 {offsets = [0, 0, 2], sizes = [1, 16, 16], strides = [1, 1, 1]} : vector<4x18x18xf32> to vector<1x16x16xf32>
    %1555 = vector.shape_cast %1554 : vector<1x16x16xf32> to vector<16x16xf32>
    %1556 = vector.broadcast %1553 : f32 to vector<16x16xf32>
    %1557 = arith.mulf %1556, %1555 : vector<16x16xf32>
    %1558 = arith.addf %1552, %1557 : vector<16x16xf32>
    %c255 = arith.constant 255 : index
    %1559 = memref.load %arg2[%c255] : memref<288xf32, #tpu.memory_space<smem>>
    %1560 = vector.extract_strided_slice %1 {offsets = [0, 1, 0], sizes = [1, 16, 16], strides = [1, 1, 1]} : vector<4x18x18xf32> to vector<1x16x16xf32>
    %1561 = vector.shape_cast %1560 : vector<1x16x16xf32> to vector<16x16xf32>
    %1562 = vector.broadcast %1559 : f32 to vector<16x16xf32>
    %1563 = arith.mulf %1562, %1561 : vector<16x16xf32>
    %1564 = arith.addf %1558, %1563 : vector<16x16xf32>
    %c256 = arith.constant 256 : index
    %1565 = memref.load %arg2[%c256] : memref<288xf32, #tpu.memory_space<smem>>
    %1566 = vector.extract_strided_slice %1 {offsets = [0, 1, 1], sizes = [1, 16, 16], strides = [1, 1, 1]} : vector<4x18x18xf32> to vector<1x16x16xf32>
    %1567 = vector.shape_cast %1566 : vector<1x16x16xf32> to vector<16x16xf32>
    %1568 = vector.broadcast %1565 : f32 to vector<16x16xf32>
    %1569 = arith.mulf %1568, %1567 : vector<16x16xf32>
    %1570 = arith.addf %1564, %1569 : vector<16x16xf32>
    %c257 = arith.constant 257 : index
    %1571 = memref.load %arg2[%c257] : memref<288xf32, #tpu.memory_space<smem>>
    %1572 = vector.extract_strided_slice %1 {offsets = [0, 1, 2], sizes = [1, 16, 16], strides = [1, 1, 1]} : vector<4x18x18xf32> to vector<1x16x16xf32>
    %1573 = vector.shape_cast %1572 : vector<1x16x16xf32> to vector<16x16xf32>
    %1574 = vector.broadcast %1571 : f32 to vector<16x16xf32>
    %1575 = arith.mulf %1574, %1573 : vector<16x16xf32>
    %1576 = arith.addf %1570, %1575 : vector<16x16xf32>
    %c258 = arith.constant 258 : index
    %1577 = memref.load %arg2[%c258] : memref<288xf32, #tpu.memory_space<smem>>
    %1578 = vector.extract_strided_slice %1 {offsets = [0, 2, 0], sizes = [1, 16, 16], strides = [1, 1, 1]} : vector<4x18x18xf32> to vector<1x16x16xf32>
    %1579 = vector.shape_cast %1578 : vector<1x16x16xf32> to vector<16x16xf32>
    %1580 = vector.broadcast %1577 : f32 to vector<16x16xf32>
    %1581 = arith.mulf %1580, %1579 : vector<16x16xf32>
    %1582 = arith.addf %1576, %1581 : vector<16x16xf32>
    %c259 = arith.constant 259 : index
    %1583 = memref.load %arg2[%c259] : memref<288xf32, #tpu.memory_space<smem>>
    %1584 = vector.extract_strided_slice %1 {offsets = [0, 2, 1], sizes = [1, 16, 16], strides = [1, 1, 1]} : vector<4x18x18xf32> to vector<1x16x16xf32>
    %1585 = vector.shape_cast %1584 : vector<1x16x16xf32> to vector<16x16xf32>
    %1586 = vector.broadcast %1583 : f32 to vector<16x16xf32>
    %1587 = arith.mulf %1586, %1585 : vector<16x16xf32>
    %1588 = arith.addf %1582, %1587 : vector<16x16xf32>
    %c260 = arith.constant 260 : index
    %1589 = memref.load %arg2[%c260] : memref<288xf32, #tpu.memory_space<smem>>
    %1590 = vector.extract_strided_slice %1 {offsets = [0, 2, 2], sizes = [1, 16, 16], strides = [1, 1, 1]} : vector<4x18x18xf32> to vector<1x16x16xf32>
    %1591 = vector.shape_cast %1590 : vector<1x16x16xf32> to vector<16x16xf32>
    %1592 = vector.broadcast %1589 : f32 to vector<16x16xf32>
    %1593 = arith.mulf %1592, %1591 : vector<16x16xf32>
    %1594 = arith.addf %1588, %1593 : vector<16x16xf32>
    %c261 = arith.constant 261 : index
    %1595 = memref.load %arg2[%c261] : memref<288xf32, #tpu.memory_space<smem>>
    %1596 = vector.extract_strided_slice %1 {offsets = [1, 0, 0], sizes = [1, 16, 16], strides = [1, 1, 1]} : vector<4x18x18xf32> to vector<1x16x16xf32>
    %1597 = vector.shape_cast %1596 : vector<1x16x16xf32> to vector<16x16xf32>
    %1598 = vector.broadcast %1595 : f32 to vector<16x16xf32>
    %1599 = arith.mulf %1598, %1597 : vector<16x16xf32>
    %1600 = arith.addf %1594, %1599 : vector<16x16xf32>
    %c262 = arith.constant 262 : index
    %1601 = memref.load %arg2[%c262] : memref<288xf32, #tpu.memory_space<smem>>
    %1602 = vector.extract_strided_slice %1 {offsets = [1, 0, 1], sizes = [1, 16, 16], strides = [1, 1, 1]} : vector<4x18x18xf32> to vector<1x16x16xf32>
    %1603 = vector.shape_cast %1602 : vector<1x16x16xf32> to vector<16x16xf32>
    %1604 = vector.broadcast %1601 : f32 to vector<16x16xf32>
    %1605 = arith.mulf %1604, %1603 : vector<16x16xf32>
    %1606 = arith.addf %1600, %1605 : vector<16x16xf32>
    %c263 = arith.constant 263 : index
    %1607 = memref.load %arg2[%c263] : memref<288xf32, #tpu.memory_space<smem>>
    %1608 = vector.extract_strided_slice %1 {offsets = [1, 0, 2], sizes = [1, 16, 16], strides = [1, 1, 1]} : vector<4x18x18xf32> to vector<1x16x16xf32>
    %1609 = vector.shape_cast %1608 : vector<1x16x16xf32> to vector<16x16xf32>
    %1610 = vector.broadcast %1607 : f32 to vector<16x16xf32>
    %1611 = arith.mulf %1610, %1609 : vector<16x16xf32>
    %1612 = arith.addf %1606, %1611 : vector<16x16xf32>
    %c264 = arith.constant 264 : index
    %1613 = memref.load %arg2[%c264] : memref<288xf32, #tpu.memory_space<smem>>
    %1614 = vector.extract_strided_slice %1 {offsets = [1, 1, 0], sizes = [1, 16, 16], strides = [1, 1, 1]} : vector<4x18x18xf32> to vector<1x16x16xf32>
    %1615 = vector.shape_cast %1614 : vector<1x16x16xf32> to vector<16x16xf32>
    %1616 = vector.broadcast %1613 : f32 to vector<16x16xf32>
    %1617 = arith.mulf %1616, %1615 : vector<16x16xf32>
    %1618 = arith.addf %1612, %1617 : vector<16x16xf32>
    %c265 = arith.constant 265 : index
    %1619 = memref.load %arg2[%c265] : memref<288xf32, #tpu.memory_space<smem>>
    %1620 = vector.extract_strided_slice %1 {offsets = [1, 1, 1], sizes = [1, 16, 16], strides = [1, 1, 1]} : vector<4x18x18xf32> to vector<1x16x16xf32>
    %1621 = vector.shape_cast %1620 : vector<1x16x16xf32> to vector<16x16xf32>
    %1622 = vector.broadcast %1619 : f32 to vector<16x16xf32>
    %1623 = arith.mulf %1622, %1621 : vector<16x16xf32>
    %1624 = arith.addf %1618, %1623 : vector<16x16xf32>
    %c266 = arith.constant 266 : index
    %1625 = memref.load %arg2[%c266] : memref<288xf32, #tpu.memory_space<smem>>
    %1626 = vector.extract_strided_slice %1 {offsets = [1, 1, 2], sizes = [1, 16, 16], strides = [1, 1, 1]} : vector<4x18x18xf32> to vector<1x16x16xf32>
    %1627 = vector.shape_cast %1626 : vector<1x16x16xf32> to vector<16x16xf32>
    %1628 = vector.broadcast %1625 : f32 to vector<16x16xf32>
    %1629 = arith.mulf %1628, %1627 : vector<16x16xf32>
    %1630 = arith.addf %1624, %1629 : vector<16x16xf32>
    %c267 = arith.constant 267 : index
    %1631 = memref.load %arg2[%c267] : memref<288xf32, #tpu.memory_space<smem>>
    %1632 = vector.extract_strided_slice %1 {offsets = [1, 2, 0], sizes = [1, 16, 16], strides = [1, 1, 1]} : vector<4x18x18xf32> to vector<1x16x16xf32>
    %1633 = vector.shape_cast %1632 : vector<1x16x16xf32> to vector<16x16xf32>
    %1634 = vector.broadcast %1631 : f32 to vector<16x16xf32>
    %1635 = arith.mulf %1634, %1633 : vector<16x16xf32>
    %1636 = arith.addf %1630, %1635 : vector<16x16xf32>
    %c268 = arith.constant 268 : index
    %1637 = memref.load %arg2[%c268] : memref<288xf32, #tpu.memory_space<smem>>
    %1638 = vector.extract_strided_slice %1 {offsets = [1, 2, 1], sizes = [1, 16, 16], strides = [1, 1, 1]} : vector<4x18x18xf32> to vector<1x16x16xf32>
    %1639 = vector.shape_cast %1638 : vector<1x16x16xf32> to vector<16x16xf32>
    %1640 = vector.broadcast %1637 : f32 to vector<16x16xf32>
    %1641 = arith.mulf %1640, %1639 : vector<16x16xf32>
    %1642 = arith.addf %1636, %1641 : vector<16x16xf32>
    %c269 = arith.constant 269 : index
    %1643 = memref.load %arg2[%c269] : memref<288xf32, #tpu.memory_space<smem>>
    %1644 = vector.extract_strided_slice %1 {offsets = [1, 2, 2], sizes = [1, 16, 16], strides = [1, 1, 1]} : vector<4x18x18xf32> to vector<1x16x16xf32>
    %1645 = vector.shape_cast %1644 : vector<1x16x16xf32> to vector<16x16xf32>
    %1646 = vector.broadcast %1643 : f32 to vector<16x16xf32>
    %1647 = arith.mulf %1646, %1645 : vector<16x16xf32>
    %1648 = arith.addf %1642, %1647 : vector<16x16xf32>
    %c270 = arith.constant 270 : index
    %1649 = memref.load %arg2[%c270] : memref<288xf32, #tpu.memory_space<smem>>
    %1650 = vector.extract_strided_slice %1 {offsets = [2, 0, 0], sizes = [1, 16, 16], strides = [1, 1, 1]} : vector<4x18x18xf32> to vector<1x16x16xf32>
    %1651 = vector.shape_cast %1650 : vector<1x16x16xf32> to vector<16x16xf32>
    %1652 = vector.broadcast %1649 : f32 to vector<16x16xf32>
    %1653 = arith.mulf %1652, %1651 : vector<16x16xf32>
    %1654 = arith.addf %1648, %1653 : vector<16x16xf32>
    %c271 = arith.constant 271 : index
    %1655 = memref.load %arg2[%c271] : memref<288xf32, #tpu.memory_space<smem>>
    %1656 = vector.extract_strided_slice %1 {offsets = [2, 0, 1], sizes = [1, 16, 16], strides = [1, 1, 1]} : vector<4x18x18xf32> to vector<1x16x16xf32>
    %1657 = vector.shape_cast %1656 : vector<1x16x16xf32> to vector<16x16xf32>
    %1658 = vector.broadcast %1655 : f32 to vector<16x16xf32>
    %1659 = arith.mulf %1658, %1657 : vector<16x16xf32>
    %1660 = arith.addf %1654, %1659 : vector<16x16xf32>
    %c272 = arith.constant 272 : index
    %1661 = memref.load %arg2[%c272] : memref<288xf32, #tpu.memory_space<smem>>
    %1662 = vector.extract_strided_slice %1 {offsets = [2, 0, 2], sizes = [1, 16, 16], strides = [1, 1, 1]} : vector<4x18x18xf32> to vector<1x16x16xf32>
    %1663 = vector.shape_cast %1662 : vector<1x16x16xf32> to vector<16x16xf32>
    %1664 = vector.broadcast %1661 : f32 to vector<16x16xf32>
    %1665 = arith.mulf %1664, %1663 : vector<16x16xf32>
    %1666 = arith.addf %1660, %1665 : vector<16x16xf32>
    %c273 = arith.constant 273 : index
    %1667 = memref.load %arg2[%c273] : memref<288xf32, #tpu.memory_space<smem>>
    %1668 = vector.extract_strided_slice %1 {offsets = [2, 1, 0], sizes = [1, 16, 16], strides = [1, 1, 1]} : vector<4x18x18xf32> to vector<1x16x16xf32>
    %1669 = vector.shape_cast %1668 : vector<1x16x16xf32> to vector<16x16xf32>
    %1670 = vector.broadcast %1667 : f32 to vector<16x16xf32>
    %1671 = arith.mulf %1670, %1669 : vector<16x16xf32>
    %1672 = arith.addf %1666, %1671 : vector<16x16xf32>
    %c274 = arith.constant 274 : index
    %1673 = memref.load %arg2[%c274] : memref<288xf32, #tpu.memory_space<smem>>
    %1674 = vector.extract_strided_slice %1 {offsets = [2, 1, 1], sizes = [1, 16, 16], strides = [1, 1, 1]} : vector<4x18x18xf32> to vector<1x16x16xf32>
    %1675 = vector.shape_cast %1674 : vector<1x16x16xf32> to vector<16x16xf32>
    %1676 = vector.broadcast %1673 : f32 to vector<16x16xf32>
    %1677 = arith.mulf %1676, %1675 : vector<16x16xf32>
    %1678 = arith.addf %1672, %1677 : vector<16x16xf32>
    %c275 = arith.constant 275 : index
    %1679 = memref.load %arg2[%c275] : memref<288xf32, #tpu.memory_space<smem>>
    %1680 = vector.extract_strided_slice %1 {offsets = [2, 1, 2], sizes = [1, 16, 16], strides = [1, 1, 1]} : vector<4x18x18xf32> to vector<1x16x16xf32>
    %1681 = vector.shape_cast %1680 : vector<1x16x16xf32> to vector<16x16xf32>
    %1682 = vector.broadcast %1679 : f32 to vector<16x16xf32>
    %1683 = arith.mulf %1682, %1681 : vector<16x16xf32>
    %1684 = arith.addf %1678, %1683 : vector<16x16xf32>
    %c276 = arith.constant 276 : index
    %1685 = memref.load %arg2[%c276] : memref<288xf32, #tpu.memory_space<smem>>
    %1686 = vector.extract_strided_slice %1 {offsets = [2, 2, 0], sizes = [1, 16, 16], strides = [1, 1, 1]} : vector<4x18x18xf32> to vector<1x16x16xf32>
    %1687 = vector.shape_cast %1686 : vector<1x16x16xf32> to vector<16x16xf32>
    %1688 = vector.broadcast %1685 : f32 to vector<16x16xf32>
    %1689 = arith.mulf %1688, %1687 : vector<16x16xf32>
    %1690 = arith.addf %1684, %1689 : vector<16x16xf32>
    %c277 = arith.constant 277 : index
    %1691 = memref.load %arg2[%c277] : memref<288xf32, #tpu.memory_space<smem>>
    %1692 = vector.extract_strided_slice %1 {offsets = [2, 2, 1], sizes = [1, 16, 16], strides = [1, 1, 1]} : vector<4x18x18xf32> to vector<1x16x16xf32>
    %1693 = vector.shape_cast %1692 : vector<1x16x16xf32> to vector<16x16xf32>
    %1694 = vector.broadcast %1691 : f32 to vector<16x16xf32>
    %1695 = arith.mulf %1694, %1693 : vector<16x16xf32>
    %1696 = arith.addf %1690, %1695 : vector<16x16xf32>
    %c278 = arith.constant 278 : index
    %1697 = memref.load %arg2[%c278] : memref<288xf32, #tpu.memory_space<smem>>
    %1698 = vector.extract_strided_slice %1 {offsets = [2, 2, 2], sizes = [1, 16, 16], strides = [1, 1, 1]} : vector<4x18x18xf32> to vector<1x16x16xf32>
    %1699 = vector.shape_cast %1698 : vector<1x16x16xf32> to vector<16x16xf32>
    %1700 = vector.broadcast %1697 : f32 to vector<16x16xf32>
    %1701 = arith.mulf %1700, %1699 : vector<16x16xf32>
    %1702 = arith.addf %1696, %1701 : vector<16x16xf32>
    %c279 = arith.constant 279 : index
    %1703 = memref.load %arg2[%c279] : memref<288xf32, #tpu.memory_space<smem>>
    %1704 = vector.extract_strided_slice %1 {offsets = [3, 0, 0], sizes = [1, 16, 16], strides = [1, 1, 1]} : vector<4x18x18xf32> to vector<1x16x16xf32>
    %1705 = vector.shape_cast %1704 : vector<1x16x16xf32> to vector<16x16xf32>
    %1706 = vector.broadcast %1703 : f32 to vector<16x16xf32>
    %1707 = arith.mulf %1706, %1705 : vector<16x16xf32>
    %1708 = arith.addf %1702, %1707 : vector<16x16xf32>
    %c280 = arith.constant 280 : index
    %1709 = memref.load %arg2[%c280] : memref<288xf32, #tpu.memory_space<smem>>
    %1710 = vector.extract_strided_slice %1 {offsets = [3, 0, 1], sizes = [1, 16, 16], strides = [1, 1, 1]} : vector<4x18x18xf32> to vector<1x16x16xf32>
    %1711 = vector.shape_cast %1710 : vector<1x16x16xf32> to vector<16x16xf32>
    %1712 = vector.broadcast %1709 : f32 to vector<16x16xf32>
    %1713 = arith.mulf %1712, %1711 : vector<16x16xf32>
    %1714 = arith.addf %1708, %1713 : vector<16x16xf32>
    %c281 = arith.constant 281 : index
    %1715 = memref.load %arg2[%c281] : memref<288xf32, #tpu.memory_space<smem>>
    %1716 = vector.extract_strided_slice %1 {offsets = [3, 0, 2], sizes = [1, 16, 16], strides = [1, 1, 1]} : vector<4x18x18xf32> to vector<1x16x16xf32>
    %1717 = vector.shape_cast %1716 : vector<1x16x16xf32> to vector<16x16xf32>
    %1718 = vector.broadcast %1715 : f32 to vector<16x16xf32>
    %1719 = arith.mulf %1718, %1717 : vector<16x16xf32>
    %1720 = arith.addf %1714, %1719 : vector<16x16xf32>
    %c282 = arith.constant 282 : index
    %1721 = memref.load %arg2[%c282] : memref<288xf32, #tpu.memory_space<smem>>
    %1722 = vector.extract_strided_slice %1 {offsets = [3, 1, 0], sizes = [1, 16, 16], strides = [1, 1, 1]} : vector<4x18x18xf32> to vector<1x16x16xf32>
    %1723 = vector.shape_cast %1722 : vector<1x16x16xf32> to vector<16x16xf32>
    %1724 = vector.broadcast %1721 : f32 to vector<16x16xf32>
    %1725 = arith.mulf %1724, %1723 : vector<16x16xf32>
    %1726 = arith.addf %1720, %1725 : vector<16x16xf32>
    %c283 = arith.constant 283 : index
    %1727 = memref.load %arg2[%c283] : memref<288xf32, #tpu.memory_space<smem>>
    %1728 = vector.extract_strided_slice %1 {offsets = [3, 1, 1], sizes = [1, 16, 16], strides = [1, 1, 1]} : vector<4x18x18xf32> to vector<1x16x16xf32>
    %1729 = vector.shape_cast %1728 : vector<1x16x16xf32> to vector<16x16xf32>
    %1730 = vector.broadcast %1727 : f32 to vector<16x16xf32>
    %1731 = arith.mulf %1730, %1729 : vector<16x16xf32>
    %1732 = arith.addf %1726, %1731 : vector<16x16xf32>
    %c284 = arith.constant 284 : index
    %1733 = memref.load %arg2[%c284] : memref<288xf32, #tpu.memory_space<smem>>
    %1734 = vector.extract_strided_slice %1 {offsets = [3, 1, 2], sizes = [1, 16, 16], strides = [1, 1, 1]} : vector<4x18x18xf32> to vector<1x16x16xf32>
    %1735 = vector.shape_cast %1734 : vector<1x16x16xf32> to vector<16x16xf32>
    %1736 = vector.broadcast %1733 : f32 to vector<16x16xf32>
    %1737 = arith.mulf %1736, %1735 : vector<16x16xf32>
    %1738 = arith.addf %1732, %1737 : vector<16x16xf32>
    %c285 = arith.constant 285 : index
    %1739 = memref.load %arg2[%c285] : memref<288xf32, #tpu.memory_space<smem>>
    %1740 = vector.extract_strided_slice %1 {offsets = [3, 2, 0], sizes = [1, 16, 16], strides = [1, 1, 1]} : vector<4x18x18xf32> to vector<1x16x16xf32>
    %1741 = vector.shape_cast %1740 : vector<1x16x16xf32> to vector<16x16xf32>
    %1742 = vector.broadcast %1739 : f32 to vector<16x16xf32>
    %1743 = arith.mulf %1742, %1741 : vector<16x16xf32>
    %1744 = arith.addf %1738, %1743 : vector<16x16xf32>
    %c286 = arith.constant 286 : index
    %1745 = memref.load %arg2[%c286] : memref<288xf32, #tpu.memory_space<smem>>
    %1746 = vector.extract_strided_slice %1 {offsets = [3, 2, 1], sizes = [1, 16, 16], strides = [1, 1, 1]} : vector<4x18x18xf32> to vector<1x16x16xf32>
    %1747 = vector.shape_cast %1746 : vector<1x16x16xf32> to vector<16x16xf32>
    %1748 = vector.broadcast %1745 : f32 to vector<16x16xf32>
    %1749 = arith.mulf %1748, %1747 : vector<16x16xf32>
    %1750 = arith.addf %1744, %1749 : vector<16x16xf32>
    %c287 = arith.constant 287 : index
    %1751 = memref.load %arg2[%c287] : memref<288xf32, #tpu.memory_space<smem>>
    %1752 = vector.extract_strided_slice %1 {offsets = [3, 2, 2], sizes = [1, 16, 16], strides = [1, 1, 1]} : vector<4x18x18xf32> to vector<1x16x16xf32>
    %1753 = vector.shape_cast %1752 : vector<1x16x16xf32> to vector<16x16xf32>
    %1754 = vector.broadcast %1751 : f32 to vector<16x16xf32>
    %1755 = arith.mulf %1754, %1753 : vector<16x16xf32>
    %1756 = arith.addf %1750, %1755 : vector<16x16xf32>
    %cst_38 = arith.constant 0.000000e+00 : f32
    %1757 = vector.broadcast %cst_38 : f32 to vector<16x16xf32>
    %1758 = arith.maximumf %1756, %1757 : vector<16x16xf32>
    %c0_39 = arith.constant 0 : index
    %c7_40 = arith.constant 7 : index
    %c0_41 = arith.constant 0 : index
    %c0_42 = arith.constant 0 : index
    %1759 = vector.load %arg3[%c0_39, %c7_40, %c0_41, %c0_42] : memref<1x8x16x16xf32, #tpu.memory_space<vmem>>, vector<1x1x16x16xf32>
    %1760 = vector.shape_cast %1759 : vector<1x1x16x16xf32> to vector<16x16xf32>
    %1761 = vector.shape_cast %1758 : vector<16x16xf32> to vector<1x1x16x16xf32>
    tpu.vector_store %arg3[%c0_39, %c7_40, %c0_41, %c0_42], %1761 {strides = array<i32>} : memref<1x8x16x16xf32, #tpu.memory_space<vmem>>, vector<1x1x16x16xf32>,
    return
  }
  func.func @transform_0(%arg0: i32) -> (i32, i32, i32, i32) {
    %c0_i32 = arith.constant 0 : i32
    %c0_i32_0 = arith.constant 0 : i32
    %c0_i32_1 = arith.constant 0 : i32
    %c0_i32_2 = arith.constant 0 : i32
    return %arg0, %c0_i32, %c0_i32_0, %c0_i32_1 : i32, i32, i32, i32
  }
  func.func @transform_1(%arg0: i32) -> i32 {
    %c0_i32 = arith.constant 0 : i32
    %c0_i32_0 = arith.constant 0 : i32
    return %c0_i32 : i32
  }
  func.func @transform_2(%arg0: i32) -> (i32, i32, i32, i32) {
    %c0_i32 = arith.constant 0 : i32
    %c0_i32_0 = arith.constant 0 : i32
    %c0_i32_1 = arith.constant 0 : i32
    %c0_i32_2 = arith.constant 0 : i32
    return %arg0, %c0_i32, %c0_i32_0, %c0_i32_1 : i32, i32, i32, i32
  }
}

</mosaic_0001>

<bundles_post_ra>
// kernel: tpu_custom_call.1
= control target key start
LH: loop header
LB: loop body
LE: loop exit
PB: predicated region body
PF: predicated region fallthrough
CT: control target
= control target key end

     0   :  { %7 = vsyncpa [#allocation4], 0  ;;  %s8425_s0 = inlined_call_operand.vmem [shape: f32[2,4,18,18], index: 0, kind: input, shape index: {}]   ;;  %s8426_s1 = inlined_call_operand.vmem [shape: f32[288], index: 1, kind: input, shape index: {}]   ;;  %s8427_s2 = inlined_call_operand.hbm [shape: f32[2,8,16,16], index: 2, kind: output, shape index: {}]  }
   0x1   :  { %8 = vsyncpa [#allocation3], 0 }
   0x2   :  { %10 = vsyncpa [#allocation3 + $0x1], 0  ;;  %s5678_s9 = smov 0   ;;  %s5680_s10 = smov 0  }
   0x3   :  { %s5682_s11 = smov 0   ;;  %s5684_s12 = smov 0  }
   0x4 LB: > { %s5699_s13 = sadd.s32 4294967295, %s5655_s12   ;;  %s5146_s14 = sadd.s32 4294967294, %s5655_s12   ;;  %s5655_s12 = sphi %s5684_s12, %s8434_s12   ;;  %s5651_s11 = sphi %s5682_s11, %s8433_s11   ;;  %s5647_s10 = sphi %s5680_s10, %s8432_s10   ;;  %s5643_s9 = sphi %s5678_s9, %s8431_s9  }
   0x5   : > { %s5703_s15 = sadd.s32 1, %s5655_s12   ;;  %s70_s16 = sadd.s32 1, %s5651_s11 }
   0x6   : > { %s67_s17 = ssub.s32 %s5655_s12, %s5703_s15  ;;  %p80_p0 = scmp.ne.s32.totalorder %s5651_s11, %s5647_s10 }
   0x7   : > { %p68_p1 = scmp.eq.s32.totalorder %s67_s17, 0  ;;  %p81_p2 = scmp.eq.s32.totalorder %s5699_s13, 1 }
   0x8   : > { %p86_p3 = scmp.ne.s32.totalorder %s5647_s10, %s5643_s9  ;;  %p87_p4 = scmp.eq.s32.totalorder %s5146_s14, 1 }
   0x9   : > { %s5714_s18 = scalar_select %p68_p1, %s5651_s11, %s70_s16  }
   0xa   : > { %p5716_p5 = por %p81_p2, %p80_p0  ;;  %p5720_p6 = por %p87_p4, %p86_p3 }
   0xb   : > { %p5147_p7 = scmp.ge.s32.totalorder %s5655_s12, 1  ;;  %p94_p8 = scmp.lt.s32.totalorder %s5655_s12, 3 }
   0xc   : > { %p5476_p9 = scmp.eq.s32.totalorder %s5699_s13, 0  ;;  %s107_s24 = sshll.u32 %s8426_s1, 4  ;;  %s108_s24 = int_to_ptr.vmem [resolvable:$true] %s107_s24 }
   0xd   : > { %p5727_p10 = pnand %p5147_p7, %p94_p8  ;;  %s5576_s25 = scalar_lea.vmem %s108_s24, 48 }
   0xe   : > { %p5577_p13 = scmp.ne.s32.totalorder %s108_s24, %s5576_s25  ;;  %s5583_s26 = scalar_lea.vmem %s108_s24, 64 }
   0xf   : > { %p5468_p11 = pneg %p5727_p10  ;;  %p5584_p3 = scmp.lt.s32.totalorder %s108_s24, %s108_s24 }
  0x10   : > { %p5585_p4 = scmp.lt.s32.totalorder %s5583_s26, %s5576_s25 }
  0x11   : > { %p5469_p12 = pnand %p5476_p9, %p5468_p11 }
  0x12   : > { %p5586_p7 = por %p5585_p4, %p5584_p3 }
  0x13   : > { %p5578_p0 = pneg %p5469_p12 }
  0x15   : > { %p5579_p1 = pnand %p5578_p0, %p5577_p13 }
  0x17   : > { %p5580_p2 = pneg %p5579_p1 }
  0x19   : > { %p5587_p8 = pnand %p5586_p7, %p5580_p2 }
  0x1b   : > { %5590 = shalt.err (!%p5587_p8)
}
  0x1c   : > { %s5657_s27 = smov [#allocation2]   ;;  %128 = sbr.rel (%p5727_p10) target bundleno = 943 (0x3af), region = 28 }
  0x1d   : > { %5471 = dma.vmem_to_smem (!%p5469_p12), %s108_s24, 48, %s5657_s27, [#allocation4]  }
  0x21   : > { %5634 = dma.done.wait (%p5476_p9), [#allocation4], 48  }
  0x22   : > { %5636 = vsyncadd (%p5476_p9), [#allocation4], 4294967248 }
  0x23   : > { %134 = sfence }
  0x24   : > { %p151_p11 = scmp.lt.s32.totalorder %s5699_s13, 1  ;;  %s5155_s28 = sld [smem:[#allocation2 + $0x2]]  ;;  %vm208_vm0 = vcmask 1046528   ;;  %vm268_vm1 = vcmask 1045504   ;;  %vm778_vm2 = vcmask 130048  }
  0x25   : > { %s5154_s29 = sld [smem:[#allocation2 + $0x1]]  ;;  %s5658_s17 = smov 126  }
  0x26   : > { %s152_s30 = scalar_select %p151_p11, %s5699_s13, 1 }
  0x27   : > { %s5157_s3 = sld [smem:[#allocation2 + $0x4]]  ;;  %s5659_s21 = smov 127  }
  0x28   : > { %s5461_s4 = smul.u32 96, %s152_s30  ;;  %s5158_s5 = sld [smem:[#allocation2 + $0x5]] }
  0x29   : > { %s5160_s6 = sld [smem:[#allocation2 + $0x7]] }
  0x2a   : > { %s5749_s14 = scalar_lea.vmem %s8425_s0, %s5461_s4  ;;  %v187_v0 = vstv %s5155_s28  ;;  %s5161_s16 = sld [smem:[#allocation2 + $0x8]] }
  0x2b   : > { %v5752_v1 = vld [vmem:[%s5749_s14] sm:$0xff]  ;;  %v5755_v2 = vld [vmem:[%s5749_s14 + $0x8] sm:$0xff]  ;;  %v173_v3 = vstv %s5154_s29  ;;  %v5758_v4 = vld [vmem:[%s5749_s14 + $0x10] sm:$0x3]  ;;  %s5163_s22 = sld [smem:[#allocation2 + $0xa]] }
  0x2c   : > { %v188_v5 = vmul.f32 %v187_v0, %v5752_v1  ;;  %v174_v6 = vmul.f32 %v173_v3, %v5752_v1  ;;  %v189_v7 = vmul.f32 %v187_v0, %v5755_v2  ;;  %v175_v8 = vmul.f32 %v173_v3, %v5755_v2  ;;  %s5166_s23 = sld [smem:[#allocation2 + $0xd]]  ;;  %v5795_v45 = vld [vmem:[%s5749_s14 + $0x20] sm:$0xff]  ;;  %v5798_v47 = vld [vmem:[%s5749_s14 + $0x18] sm:$0xff]  ;;  %v5801_v48 = vld [vmem:[%s5749_s14 + $0x28] sm:$0x3] }
  0x2d   : > { %v219_v9 = vstv %s5157_s3  ;;  %s5164_s24 = sld [smem:[#allocation2 + $0xb]] }
  0x2e   : > { %192 = vrot.lane.b32.xlu1 %v188_v5, %s5658_s17  ;;  %178 = vrot.lane.b32.xlu0 %v174_v6, %s5659_s21  ;;  %v221_v10 = vmul.f32 %v219_v9, %v5755_v2  ;;  %v222_v11 = vmul.f32 %v219_v9, %v5758_v4  ;;  %v220_v12 = vmul.f32 %v219_v9, %v5752_v1  ;;  %v240_v13 = vstv %s5158_s5  ;;  %s5167_s25 = sld [smem:[#allocation2 + $0xe]] }
  0x2f   : > { %v242_v14 = vmul.f32 %v240_v13, %v5755_v2  ;;  %v243_v15 = vmul.f32 %v240_v13, %v5758_v4  ;;  %v241_v16 = vmul.f32 %v240_v13, %v5752_v1  ;;  %v279_v17 = vstv %s5160_s6  ;;  %s5169_s26 = sld [smem:[#allocation2 + $0x10]] }
  0x30   : > { %v227_v18 = vrot.slane %v221_v10, 1  ;;  %v229_v19 = vrot.slane %v222_v11, 1  ;;  %v226_v20 = vrot.slane %v220_v12, 1  ;;  %v281_v21 = vmul.f32 %v279_v17, %v5755_v2  ;;  %s5170_s27 = sld [smem:[#allocation2 + $0x11]] }
  0x31   : > { %v248_v22 = vrot.slane %v242_v14, 1  ;;  %v250_v23 = vrot.slane %v243_v15, 1  ;;  %v247_v24 = vrot.slane %v241_v16, 1  ;;  %v282_v25 = vmul.f32 %v279_v17, %v5758_v4  ;;  %s5172_s28 = sld [smem:[#allocation2 + $0x13]] }
  0x32   : > { %194 = vrot.lane.b32.xlu1 %v189_v7, %s5658_s17  ;;  %180 = vrot.lane.b32.xlu0 %v175_v8, %s5659_s21  ;;  %v230_v26 = vsel %vm208_vm0, %v227_v18, %v229_v19  ;;  %v228_v27 = vsel %vm208_vm0, %v226_v20, %v227_v18  ;;  %v280_v28 = vmul.f32 %v279_v17, %v5752_v1  ;;  %v300_v29 = vstv %s5161_s16  ;;  %s5175_s29 = sld [smem:[#allocation2 + $0x16]] }
  0x33   : > { %v251_v30 = vsel %vm208_vm0, %v248_v22, %v250_v23  ;;  %v249_v31 = vsel %vm208_vm0, %v247_v24, %v248_v22  ;;  %v287_v32 = vrot.slane %v281_v21, 2  ;;  %v289_v33 = vrot.slane %v282_v25, 2  ;;  %s5173_s30 = sld [smem:[#allocation2 + $0x14]] }
  0x34   : > { %v286_v34 = vrot.slane %v280_v28, 2  ;;  %v302_v35 = vmul.f32 %v300_v29, %v5755_v2  ;;  %v303_v36 = vmul.f32 %v300_v29, %v5758_v4  ;;  %v301_v37 = vmul.f32 %v300_v29, %v5752_v1  ;;  %s5176_s3 = sld [smem:[#allocation2 + $0x17]]  ;;  %v5840_v29 = vld [vmem:[%s5749_s14 + $0x38] sm:$0xff] }
  0x35   : > { %v290_v38 = vsel %vm268_vm1, %v287_v32, %v289_v33  ;;  %v327_v46 = vstv %s5163_s22  ;;  %v372_v49 = vstv %s5166_s23  ;;  %v341_v52 = vstv %s5164_s24  ;;  %s5178_s4 = sld [smem:[#allocation2 + $0x19]] }
  0x36   : > { %233 = vrot.lane.b32.xlu1 %v230_v26, %s5659_s21  ;;  %231 = vrot.lane.b32.xlu0 %v228_v27, %s5659_s21  ;;  %v288_v39 = vsel %vm268_vm1, %v286_v34, %v287_v32  ;;  %v308_v40 = vrot.slane %v302_v35, 2  ;;  %v310_v41 = vrot.slane %v303_v36, 2  ;;  %v307_v42 = vrot.slane %v301_v37, 2  ;;  %v5846_v32 = vld [vmem:[%s5749_s14 + $0x40] sm:$0x3]  ;;  %s5179_s5 = sld [smem:[#allocation2 + $0x1a]] }
  0x37   : > { %v329_v50 = vmul.f32 %v327_v46, %v5795_v45  ;;  %v328_v51 = vmul.f32 %v327_v46, %v5798_v47  ;;  %v374_v53 = vmul.f32 %v372_v49, %v5795_v45  ;;  %v375_v54 = vmul.f32 %v372_v49, %v5801_v48  ;;  %s5181_s6 = sld [smem:[#allocation2 + $0x1c]] }
  0x38   : > { %v311_v43 = vsel %vm268_vm1, %v308_v40, %v310_v41  ;;  %v309_v44 = vsel %vm268_vm1, %v307_v42, %v308_v40  ;;  %v373_v55 = vmul.f32 %v372_v49, %v5798_v47  ;;  %v393_v56 = vstv %s5167_s25  ;;  %s5184_s7 = sld [smem:[#allocation2 + $0x1f]] }
  0x39   : > { %v343_v57 = vmul.f32 %v341_v52, %v5795_v45  ;;  %v342_v58 = vmul.f32 %v341_v52, %v5798_v47  ;;  %v395_v59 = vmul.f32 %v393_v56, %v5795_v45  ;;  %v396_v60 = vmul.f32 %v393_v56, %v5801_v48  ;;  %s5182_s8 = sld [smem:[#allocation2 + $0x1d]] }
  0x3a   : > { %254 = vrot.lane.b32.xlu1 %v251_v30, %s5658_s17  ;;  %252 = vrot.lane.b32.xlu0 %v249_v31, %s5658_s17  ;;  %v431_v61 = vstv %s5169_s26  ;;  %v380_v62 = vrot.slane %v374_v53, 1  ;;  %v382_v63 = vrot.slane %v375_v54, 1  ;;  %v379_v0 = vrot.slane %v373_v55, 1  ;;  %v5843_v31 = vld [vmem:[%s5749_s14 + $0x30] sm:$0xff]  ;;  %s5185_s16 = sld [smem:[#allocation2 + $0x20]] }
  0x3b   : > { %v394_v3 = vmul.f32 %v393_v56, %v5798_v47  ;;  %v433_v5 = vmul.f32 %v431_v61, %v5795_v45  ;;  %v401_v6 = vrot.slane %v395_v59, 1  ;;  %v403_v7 = vrot.slane %v396_v60, 1  ;;  %s5187_s22 = sld [smem:[#allocation2 + $0x22]] }
  0x3c   : > { %v434_v8 = vmul.f32 %v431_v61, %v5801_v48  ;;  %v432_v9 = vmul.f32 %v431_v61, %v5798_v47  ;;  %v383_v10 = vsel %vm208_vm0, %v380_v62, %v382_v63  ;;  %v381_v11 = vsel %vm208_vm0, %v379_v0, %v380_v62  ;;  %s5188_s23 = sld [smem:[#allocation2 + $0x23]] }
  0x3d   : > { %v400_v12 = vrot.slane %v394_v3, 1  ;;  %v452_v13 = vstv %s5170_s27  ;;  %v404_v14 = vsel %vm208_vm0, %v401_v6, %v403_v7  ;;  %v439_v15 = vrot.slane %v433_v5, 2  ;;  %s5190_s24 = sld [smem:[#allocation2 + $0x25]] }
  0x3e   : > { %293 = vrot.lane.b32.xlu1 %v290_v38, %s5659_s21  ;;  %291 = vrot.lane.b32.xlu0 %v288_v39, %s5659_s21  ;;  %v441_v16 = vrot.slane %v434_v8, 2  ;;  %v438_v17 = vrot.slane %v432_v9, 2  ;;  %v454_v19 = vmul.f32 %v452_v13, %v5795_v45  ;;  %v455_v20 = vmul.f32 %v452_v13, %v5801_v48  ;;  %s5193_s25 = sld [smem:[#allocation2 + $0x28]] }
  0x3f   : > { %v402_v18 = vsel %vm208_vm0, %v400_v12, %v401_v6  ;;  %v453_v21 = vmul.f32 %v452_v13, %v5798_v47  ;;  %v479_v30 = vstv %s5172_s28  ;;  %v524_v33 = vstv %s5175_s29  ;;  %s5921_s26 = sld [smem:[#allocation2 + $0x26]] }
  0x40   : > { %v442_v22 = vsel %vm268_vm1, %v439_v15, %v441_v16  ;;  %v440_v23 = vsel %vm268_vm1, %v438_v17, %v439_v15  ;;  %v460_v24 = vrot.slane %v454_v19, 2  ;;  %v462_v25 = vrot.slane %v455_v20, 2  ;;  %v5885_v16 = vld [vmem:[%s5749_s14 + $0x50] sm:$0xff]  ;;  %v5891_v19 = vld [vmem:[%s5749_s14 + $0x58] sm:$0x3]  ;;  %s5194_s27 = sld [smem:[#allocation2 + $0x29]] }
  0x41   : > { %v459_v26 = vrot.slane %v453_v21, 2  ;;  %v481_v34 = vmul.f32 %v479_v30, %v5840_v29  ;;  %v480_v35 = vmul.f32 %v479_v30, %v5843_v31  ;;  %v493_v36 = vstv %s5173_s30  ;;  %s5196_s28 = sld [smem:[#allocation2 + $0x2b]] }
  0x42   : > { %314 = vrot.lane.b32.xlu1 %v311_v43, %s5658_s17  ;;  %312 = vrot.lane.b32.xlu0 %v309_v44, %s5658_s17  ;;  %v463_v27 = vsel %vm268_vm1, %v460_v24, %v462_v25  ;;  %v526_v37 = vmul.f32 %v524_v33, %v5840_v29  ;;  %v527_v38 = vmul.f32 %v524_v33, %v5846_v32  ;;  %v545_v40 = vstv %s5176_s3  ;;  %s5197_s29 = sld [smem:[#allocation2 + $0x2c]] }
  0x43   : > { %v461_v28 = vsel %vm268_vm1, %v459_v26, %v460_v24  ;;  %v525_v39 = vmul.f32 %v524_v33, %v5843_v31  ;;  %v495_v41 = vmul.f32 %v493_v36, %v5840_v29  ;;  %v494_v42 = vmul.f32 %v493_v36, %v5843_v31  ;;  %s5951_s30 = sld [smem:[#allocation2]] }
  0x44   : > { %v547_v43 = vmul.f32 %v545_v40, %v5840_v29  ;;  %v548_v44 = vmul.f32 %v545_v40, %v5846_v32  ;;  %v546_v46 = vmul.f32 %v545_v40, %v5843_v31  ;;  %v583_v49 = vstv %s5178_s4  ;;  %s5156_s3 = sld [smem:[#allocation2 + $0x3]] }
  0x45   : > { %v531_v52 = vrot.slane %v525_v39, 1  ;;  %v585_v53 = vmul.f32 %v583_v49, %v5840_v29  ;;  %v584_v60 = vmul.f32 %v583_v49, %v5843_v31  ;;  %v604_v61 = vstv %s5179_s5  ;;  %s5955_s4 = sld [smem:[#allocation2 + $0x2e]] }
  0x46   : > { %334 = vrot.lane.b32.xlu1 %v329_v50, %s5659_s21  ;;  %332 = vrot.lane.b32.xlu0 %v328_v51, %s5659_s21  ;;  %v532_v50 = vrot.slane %v526_v37, 1  ;;  %v534_v51 = vrot.slane %v527_v38, 1  ;;  %v553_v54 = vrot.slane %v547_v43, 1  ;;  %v555_v55 = vrot.slane %v548_v44, 1  ;;  %s5960_s5 = sld [smem:[#allocation2 + $0x2f]] }
  0x47   : > { %v552_v56 = vrot.slane %v546_v46, 1  ;;  %v591_v0 = vrot.slane %v585_v53, 2  ;;  %v590_v5 = vrot.slane %v584_v60, 2  ;;  %v606_v6 = vmul.f32 %v604_v61, %v5840_v29 }
  0x48   : > { %v533_v59 = vsel %vm208_vm0, %v531_v52, %v532_v50  ;;  %v556_v62 = vsel %vm208_vm0, %v553_v54, %v555_v55  ;;  %v607_v7 = vmul.f32 %v604_v61, %v5846_v32  ;;  %v605_v8 = vmul.f32 %v604_v61, %v5843_v31 }
  0x49   : > { %v554_v63 = vsel %vm208_vm0, %v552_v56, %v553_v54  ;;  %v631_v17 = vstv %s5181_s6  ;;  %v676_v20 = vstv %s5184_s7  ;;  %v735_v36 = vstv %s5187_s22  ;;  %s5202_s6 = sld [smem:[#allocation2 + $0x31]] }
  0x4a   : > { %348 = vrot.lane.b32.xlu1 %v343_v57, %s5658_s17  ;;  %346 = vrot.lane.b32.xlu0 %v342_v58, %s5658_s17  ;;  %v586_v57 = vmul.f32 %v583_v49, %v5846_v32  ;;  %v535_v58 = vsel %vm208_vm0, %v532_v50, %v534_v51  ;;  %v614_v12 = vrot.slane %v607_v7, 2  ;;  %v611_v13 = vrot.slane %v605_v8, 2  ;;  %s5159_s7 = sld [smem:[#allocation2 + $0x6]] }
  0x4b   : > { %v633_v21 = vmul.f32 %v631_v17, %v5885_v16  ;;  %v678_v24 = vmul.f32 %v676_v20, %v5885_v16  ;;  %v679_v25 = vmul.f32 %v676_v20, %v5891_v19  ;;  %v737_v40 = vmul.f32 %v735_v36, %v5885_v16  ;;  %s5994_s22 = sld [smem:[#allocation2 + $0x35]] }
  0x4c   : > { %v593_v3 = vrot.slane %v586_v57, 2  ;;  %v738_v44 = vmul.f32 %v735_v36, %v5891_v19  ;;  %v756_v51 = vstv %s5188_s23  ;;  %v831_v7 = vstv %s5193_s25  ;;  %s6006_s23 = sld [smem:[#allocation2 + $0x9]] }
  0x4d   : > { %v684_v37 = vrot.slane %v678_v24, 1  ;;  %v686_v38 = vrot.slane %v679_v25, 1  ;;  %v743_v54 = vrot.slane %v737_v40, 2  ;;  %v758_v57 = vmul.f32 %v756_v51, %v5885_v16  ;;  %s6021_s25 = sld [smem:[#allocation2 + $0x37]] }
  0x4e   : > { %386 = vrot.lane.b32.xlu1 %v383_v10, %s5659_s21  ;;  %384 = vrot.lane.b32.xlu0 %v381_v11, %s5659_s21  ;;  %v594_v9 = vsel %vm268_vm1, %v591_v0, %v593_v3  ;;  %v592_v10 = vsel %vm268_vm1, %v590_v5, %v591_v0  ;;  %v612_v11 = vrot.slane %v606_v6, 2  ;;  %v745_v55 = vrot.slane %v738_v44, 2 }
  0x4f   : > { %v687_v46 = vsel %vm208_vm0, %v684_v37, %v686_v38  ;;  %v786_v6 = vstv %s5190_s24  ;;  %v911_v38 = vstv %s5197_s29  ;;  %s6008_s24 = sld [smem:[#allocation2 + $0xc]] }
  0x50   : > { %v613_v15 = vsel %vm268_vm1, %v611_v13, %v612_v11  ;;  %v746_v60 = vsel %vm268_vm1, %v743_v54, %v745_v55  ;;  %v788_v8 = vmul.f32 %v786_v6, %v5755_v2  ;;  %v834_v13 = vmul.f32 %v831_v7, %v5758_v4  ;;  %s6045_s29 = sld [smem:[#allocation2 + $0x38]] }
  0x51   : > { %v913_v44 = vmul.f32 %v911_v38, %v5755_v2 }
  0x52   : > { %407 = vrot.lane.b32.xlu1 %v404_v14, %s5658_s17  ;;  %405 = vrot.lane.b32.xlu0 %v402_v18, %s5658_s17  ;;  %v615_v14 = vsel %vm268_vm1, %v612_v11, %v614_v12  ;;  %v5888_v18 = vld [vmem:[%s5749_s14 + $0x48] sm:$0xff]  ;;  %v852_v11 = vstv %s5194_s27  ;;  %v833_v12 = vmul.f32 %v831_v7, %v5755_v2  ;;  %v841_v24 = vrot.slane %v834_v13, 1  ;;  %s6033_s27 = sld [smem:[#allocation2 + $0xf]] }
  0x53   : > { %v677_v26 = vmul.f32 %v676_v20, %v5888_v18  ;;  %v736_v50 = vmul.f32 %v735_v36, %v5888_v18 }
  0x55   : > { %v683_v39 = vrot.slane %v677_v26, 1  ;;  %v742_v56 = vrot.slane %v736_v50, 2  ;;  %v890_v26 = vstv %s5196_s28  ;;  %s6039_s28 = sld [smem:[#allocation2 + $0x3b]] }
  0x56   : > { %445 = vrot.lane.b32.xlu1 %v442_v22, %s5659_s21  ;;  %443 = vrot.lane.b32.xlu0 %v440_v23, %s5659_s21  ;;  %v632_v22 = vmul.f32 %v631_v17, %v5888_v18  ;;  %v645_v23 = vstv %s5182_s8  ;;  %v854_v17 = vmul.f32 %v852_v11, %v5755_v2  ;;  %s5203_s8 = sld [smem:[#allocation2 + $0x32]] }
  0x57   : > { %v646_v30 = vmul.f32 %v645_v23, %v5888_v18  ;;  %v685_v49 = vsel %vm208_vm0, %v683_v39, %v684_v37  ;;  %v744_v61 = vsel %vm268_vm1, %v742_v56, %v743_v54  ;;  %v201_v56 = vstv %s5156_s3  ;;  %s6069_s3 = sld [smem:[#allocation2 + $0x3e]] }
  0x5a   : > { %466 = vrot.lane.b32.xlu1 %v463_v27, %s5658_s17  ;;  %464 = vrot.lane.b32.xlu0 %v461_v28, %s5658_s17  ;;  %v697_v27 = vstv %s5185_s16  ;;  %v647_v28 = vmul.f32 %v645_v23, %v5885_v16  ;;  %v839_v23 = vrot.slane %v833_v12, 1  ;;  %s5974_s16 = sld [smem:[#allocation2 + $0x34]] }
  0x5b   : > { %v699_v33 = vmul.f32 %v697_v27, %v5885_v16 }
  0x5c   : > { %v1004_v13 = vstv %s5203_s8  ;;  %s6106_s8 = sld [smem:[#allocation2 + $0x43]] }
  0x5e   : > { %486 = vrot.lane.b32.xlu1 %v481_v34, %s5659_s21  ;;  %484 = vrot.lane.b32.xlu0 %v480_v35, %s5659_s21  ;;  %v700_v34 = vmul.f32 %v697_v27, %v5891_v19  ;;  %v698_v35 = vmul.f32 %v697_v27, %v5888_v18  ;;  %v860_v27 = vrot.slane %v854_v17, 1 }
  0x60   : > { %v704_v43 = vrot.slane %v698_v35, 1  ;;  %v842_v35 = vsel %vm208_vm0, %v839_v23, %v841_v24 }
  0x62   : > { %500 = vrot.lane.b32.xlu1 %v495_v41, %s5658_s17  ;;  %498 = vrot.lane.b32.xlu0 %v494_v42, %s5658_s17  ;;  %v705_v41 = vrot.slane %v699_v33, 1  ;;  %v707_v42 = vrot.slane %v700_v34, 1  ;;  %v893_v33 = vmul.f32 %v890_v26, %v5758_v4  ;;  %v891_v34 = vmul.f32 %v890_v26, %v5752_v1 }
  0x64   : > { %v708_v52 = vsel %vm208_vm0, %v705_v41, %v707_v42  ;;  %v706_v53 = vsel %vm208_vm0, %v704_v43, %v705_v41  ;;  %v900_v41 = vrot.slane %v893_v33, 2  ;;  %v897_v42 = vrot.slane %v891_v34, 2 }
  0x65   : > { %v1007_v33 = vmul.f32 %v1004_v13, %v5801_v48 }
  0x66   : > { %538 = vrot.lane.b32.xlu1 %v535_v58, %s5659_s21  ;;  %536 = vrot.lane.b32.xlu0 %v533_v59, %s5659_s21  ;;  %v759_v58 = vmul.f32 %v756_v51, %v5891_v19  ;;  %v757_v59 = vmul.f32 %v756_v51, %v5888_v18 }
  0x68   : > { %v763_v0 = vrot.slane %v757_v59, 2  ;;  %v204_v59 = vmul.f32 %v201_v56, %v5758_v4 }
  0x6a   : > { %559 = vrot.lane.b32.xlu1 %v556_v62, %s5658_s17  ;;  %557 = vrot.lane.b32.xlu0 %v554_v63, %s5658_s17  ;;  %v764_v62 = vrot.slane %v758_v57, 2  ;;  %v766_v63 = vrot.slane %v759_v58, 2  ;;  %v938_v58 = vstv %s5955_s4  ;;  %v212_v12 = vrot.slane %v204_v59, 1  ;;  %s6075_s4 = sld [smem:[#allocation2 + $0x12]] }
  0x6c   : > { %v767_v3 = vsel %vm268_vm1, %v764_v62, %v766_v63  ;;  %v765_v5 = vsel %vm268_vm1, %v763_v0, %v764_v62  ;;  %v983_v0 = vstv %s5202_s6  ;;  %s6097_s6 = sld [smem:[#allocation2 + $0x40]] }
  0x6d   : > { %v985_v17 = vmul.f32 %v983_v0, %v5795_v45 }
  0x6e   : > { %597 = vrot.lane.b32.xlu1 %v594_v9, %s5659_s21  ;;  %595 = vrot.lane.b32.xlu0 %v592_v10, %s5659_s21  ;;  %v787_v9 = vmul.f32 %v786_v6, %v5752_v1  ;;  %v800_v10 = vstv %s5921_s26  ;;  %s6029_s26 = sld [smem:[#allocation2 + $0x3a]] }
  0x6f   : > { %v801_v20 = vmul.f32 %v800_v10, %v5752_v1 }
  0x72   : > { %618 = vrot.lane.b32.xlu1 %v615_v14, %s5658_s17  ;;  %616 = vrot.lane.b32.xlu0 %v613_v15, %s5658_s17  ;;  %v832_v14 = vmul.f32 %v831_v7, %v5752_v1  ;;  %v802_v15 = vmul.f32 %v800_v10, %v5755_v2  ;;  %v940_v7 = vmul.f32 %v938_v58, %v5795_v45 }
  0x74   : > { %v838_v25 = vrot.slane %v832_v14, 1 }
  0x76   : > { %638 = vrot.lane.b32.xlu1 %v633_v21, %s5659_s21  ;;  %636 = vrot.lane.b32.xlu0 %v632_v22, %s5659_s21  ;;  %v855_v21 = vmul.f32 %v852_v11, %v5758_v4  ;;  %v853_v22 = vmul.f32 %v852_v11, %v5752_v1  ;;  %v840_v36 = vsel %vm208_vm0, %v838_v25, %v839_v23 }
  0x77   : > { %v939_v11 = vmul.f32 %v938_v58, %v5798_v47 }
  0x78   : > { %v859_v37 = vrot.slane %v853_v22, 1  ;;  %v984_v22 = vmul.f32 %v983_v0, %v5798_v47 }
  0x7a   : > { %652 = vrot.lane.b32.xlu1 %v647_v28, %s5658_s17  ;;  %650 = vrot.lane.b32.xlu0 %v646_v30, %s5658_s17  ;;  %v862_v28 = vrot.slane %v855_v21, 1  ;;  %v892_v30 = vmul.f32 %v890_v26, %v5755_v2  ;;  %v861_v43 = vsel %vm208_vm0, %v859_v37, %v860_v27  ;;  %v1042_v37 = vstv %s5974_s16  ;;  %s6110_s16 = sld [smem:[#allocation2 + $0x18]] }
  0x7c   : > { %v863_v39 = vsel %vm208_vm0, %v860_v27, %v862_v28  ;;  %v898_v40 = vrot.slane %v892_v30, 2  ;;  %v1006_v30 = vmul.f32 %v1004_v13, %v5795_v45 }
  0x7e   : > { %690 = vrot.lane.b32.xlu1 %v687_v46, %s5659_s21  ;;  %688 = vrot.lane.b32.xlu0 %v685_v49, %s5659_s21  ;;  %v914_v46 = vmul.f32 %v911_v38, %v5758_v4  ;;  %v912_v49 = vmul.f32 %v911_v38, %v5752_v1  ;;  %v901_v50 = vsel %vm268_vm1, %v898_v40, %v900_v41 }
  0x7f   : > { %v899_v51 = vsel %vm268_vm1, %v897_v42, %v898_v40  ;;  %v990_v40 = vrot.slane %v984_v22, 1 }
  0x80   : > { %v921_v54 = vrot.slane %v914_v46, 2  ;;  %v918_v55 = vrot.slane %v912_v49, 2  ;;  %v1012_v49 = vrot.slane %v1006_v30, 1 }
  0x82   : > { %711 = vrot.lane.b32.xlu1 %v708_v52, %s5658_s17  ;;  %709 = vrot.lane.b32.xlu0 %v706_v53, %s5658_s17  ;;  %v169_v52 = vstv %s5951_s30  ;;  %v919_v53 = vrot.slane %v913_v44, 2  ;;  %s6053_s30 = sld [smem:[#allocation2 + $0x3d]] }
  0x83   : > { %v170_v57 = vmul.f32 %v169_v52, %v5752_v1  ;;  %v171_v6 = vmul.f32 %v169_v52, %v5755_v2 }
  0x84   : > { %v922_v62 = vsel %vm268_vm1, %v919_v53, %v921_v54  ;;  %v920_v63 = vsel %vm268_vm1, %v918_v55, %v919_v53  ;;  %v1045_v54 = vmul.f32 %v1042_v37, %v5801_v48  ;;  %v1043_v55 = vmul.f32 %v1042_v37, %v5798_v47 }
  0x86   : > { %749 = vrot.lane.b32.xlu1 %v746_v60, %s5659_s21  ;;  %747 = vrot.lane.b32.xlu0 %v744_v61, %s5659_s21  ;;  %v203_v60 = vmul.f32 %v201_v56, %v5755_v2  ;;  %v202_v61 = vmul.f32 %v201_v56, %v5752_v1 }
  0x88   : > { %v210_v14 = vrot.slane %v203_v60, 1 }
  0x8a   : > { %770 = vrot.lane.b32.xlu1 %v767_v3, %s5658_s17  ;;  %768 = vrot.lane.b32.xlu0 %v765_v5, %s5658_s17 }
  0x8e   : > { %793 = vrot.lane.b32.xlu1 %v788_v8, %s5659_s21  ;;  %791 = vrot.lane.b32.xlu0 %v787_v9, %s5659_s21  ;;  %v952_v8 = vstv %s5960_s5  ;;  %v261_v9 = vstv %s5159_s7  ;;  %s6083_s5 = sld [smem:[#allocation2 + $0x15]] }
  0x8f   : > { %v954_v21 = vmul.f32 %v952_v8, %v5795_v45  ;;  %v263_v23 = vmul.f32 %v261_v9, %v5755_v2  ;;  %v264_v24 = vmul.f32 %v261_v9, %v5758_v4  ;;  %v953_v27 = vmul.f32 %v952_v8, %v5798_v47  ;;  %s6099_s7 = sld [smem:[#allocation2 + $0x41]] }
  0x90   : > { %v262_v28 = vmul.f32 %v261_v9, %v5752_v1  ;;  %v991_v4 = vrot.slane %v985_v17, 1  ;;  %v1052_v9 = vrot.slane %v1045_v54, 2  ;;  %v414_v54 = vstv %s6033_s27  ;;  %s6171_s27 = sld [smem:[#allocation2 + $0x49]] }
  0x91   : > { %v270_v41 = vrot.slane %v263_v23, 2  ;;  %v272_v42 = vrot.slane %v264_v24, 2 }
  0x92   : > { %807 = vrot.lane.b32.xlu1 %v802_v15, %s5658_s17  ;;  %805 = vrot.lane.b32.xlu0 %v801_v20, %s5658_s17  ;;  %v209_v15 = vrot.slane %v202_v61, 1  ;;  %v986_v20 = vmul.f32 %v983_v0, %v5801_v48  ;;  %v269_v46 = vrot.slane %v262_v28, 2  ;;  %v992_v60 = vsel %vm208_vm0, %v990_v40, %v991_v4 }
  0x93   : > { %v1063_v61 = vstv %s5994_s22  ;;  %v273_v0 = vsel %vm268_vm1, %v270_v41, %v272_v42  ;;  %v1090_v40 = vstv %s6021_s25  ;;  %s6115_s22 = sld [smem:[#allocation2 + $0x44]] }
  0x94   : > { %v211_v2 = vsel %vm208_vm0, %v209_v15, %v210_v14  ;;  %v993_v38 = vrot.slane %v986_v20, 1  ;;  %v1064_v20 = vmul.f32 %v1063_v61, %v5798_v47  ;;  %s6156_s25 = sld [smem:[#allocation2 + $0x1b]] }
  0x96   : > { %845 = vrot.lane.b32.xlu1 %v842_v35, %s5659_s21  ;;  %843 = vrot.lane.b32.xlu0 %v840_v36, %s5659_s21  ;;  %v213_v36 = vsel %vm208_vm0, %v210_v14, %v212_v12  ;;  %v994_v56 = vsel %vm208_vm0, %v991_v4, %v993_v38  ;;  %v321_v12 = vstv %s6006_s23  ;;  %v1066_v14 = vmul.f32 %v1063_v61, %v5801_v48  ;;  %s6124_s23 = sld [smem:[#allocation2 + $0x46]] }
  0x98   : > { %v1073_v30 = vrot.slane %v1066_v14, 2 }
  0x9a   : > { %866 = vrot.lane.b32.xlu1 %v863_v39, %s5658_s17  ;;  %864 = vrot.lane.b32.xlu0 %v861_v43, %s5658_s17  ;;  %v1005_v39 = vmul.f32 %v1004_v13, %v5798_v47  ;;  %v1065_v13 = vmul.f32 %v1063_v61, %v5795_v45 }
  0x9c   : > { %v1071_v28 = vrot.slane %v1065_v13, 2 }
  0x9e   : > { %904 = vrot.lane.b32.xlu1 %v901_v50, %s5659_s21  ;;  %902 = vrot.lane.b32.xlu0 %v899_v51, %s5659_s21  ;;  %v1014_v50 = vrot.slane %v1007_v33, 1  ;;  %v1044_v51 = vmul.f32 %v1042_v37, %v5795_v45  ;;  %v1070_v37 = vrot.slane %v1064_v20, 2 }
  0xa0   : > { %v193_v3 = vpop.permute.xlu1 %192  ;;  %v179_v5 = vpop.permute.xlu0 %178 }
  0xa1   : > { %v184_v10 = vadd.f32 %v179_v5, %v170_v57  ;;  %v1011_v57 = vrot.slane %v1005_v39, 1  ;;  %v1015_v5 = vsel %vm208_vm0, %v1012_v49, %v1014_v50  ;;  %v1072_v50 = vsel %vm268_vm1, %v1070_v37, %v1071_v28 }
  0xa2   : > { %925 = vrot.lane.b32.xlu1 %v922_v62, %s5658_s17  ;;  %923 = vrot.lane.b32.xlu0 %v920_v63, %s5658_s17 }
  0xa3   : > { %v198_v34 = vadd.f32 %v193_v3, %v184_v10  ;;  %v271_v3 = vsel %vm268_vm1, %v269_v46, %v270_v41  ;;  %v1049_v10 = vrot.slane %v1043_v55, 2  ;;  %v1074_v41 = vsel %vm268_vm1, %v1071_v28, %v1073_v30 }
  0xa4   : > { %v195_v25 = vpop.permute.xlu1 %194  ;;  %v181_v26 = vpop.permute.xlu0 %180  ;;  %v1092_v55 = vmul.f32 %v1090_v40, %v5840_v29 }
  0xa5   : > { %v185_v35 = vadd.f32 %v181_v26, %v171_v6  ;;  %v216_v53 = vadd.f32 %v211_v2, %v198_v34  ;;  %v1050_v6 = vrot.slane %v1044_v51, 2  ;;  %v323_v26 = vmul.f32 %v321_v12, %v5795_v45 }
  0xa6   : > { %945 = vrot.lane.b32.xlu1 %v940_v7, %s5659_s21  ;;  %943 = vrot.lane.b32.xlu0 %v939_v11, %s5659_s21  ;;  %v1013_v11 = vsel %vm208_vm0, %v1011_v57, %v1012_v49 }
  0xa7   : > { %v199_v1 = vadd.f32 %v195_v25, %v185_v35  ;;  %v1053_v24 = vsel %vm268_vm1, %v1050_v6, %v1052_v9  ;;  %v1051_v25 = vsel %vm268_vm1, %v1049_v10, %v1050_v6  ;;  %v415_v9 = vmul.f32 %v414_v54, %v5798_v47 }
  0xa8   : > { %v234_v43 = vpop.permute.xlu1 %233  ;;  %v232_v44 = vpop.permute.xlu0 %231 }
  0xa9   : > { %v217_v52 = vadd.f32 %v213_v36, %v199_v1  ;;  %v237_v59 = vadd.f32 %v232_v44, %v216_v53  ;;  %v1135_v44 = vstv %s6029_s26  ;;  %s6158_s26 = sld [smem:[#allocation2 + $0x1e]] }
  0xaa   : > { %959 = vrot.lane.b32.xlu1 %v954_v21, %s5658_s17  ;;  %957 = vrot.lane.b32.xlu0 %v953_v27, %s5658_s17  ;;  %v355_v21 = vstv %s6008_s24  ;;  %v322_v27 = vmul.f32 %v321_v12, %v5798_v47  ;;  %v1137_v57 = vmul.f32 %v1135_v44, %v5840_v29  ;;  %v1138_v61 = vmul.f32 %v1135_v44, %v5846_v32  ;;  %s6145_s24 = sld [smem:[#allocation2 + $0x47]] }
  0xab   : > { %v238_v58 = vadd.f32 %v234_v43, %v217_v52  ;;  %v357_v33 = vmul.f32 %v355_v21, %v5795_v45  ;;  %v358_v34 = vmul.f32 %v355_v21, %v5801_v48  ;;  %v356_v2 = vmul.f32 %v355_v21, %v5798_v47 }
  0xac   : > { %v255_v62 = vpop.permute.xlu1 %254  ;;  %v253_v63 = vpop.permute.xlu0 %252 }
  0xad   : > { %v259_v7 = vadd.f32 %v255_v62, %v238_v58  ;;  %v258_v8 = vadd.f32 %v253_v63, %v237_v59  ;;  %v363_v42 = vrot.slane %v357_v33, 1  ;;  %v365_v43 = vrot.slane %v358_v34, 1 }
  0xae   : > { %997 = vrot.lane.b32.xlu1 %v994_v56, %s5659_s21  ;;  %995 = vrot.lane.b32.xlu0 %v992_v60, %s5659_s21  ;;  %v362_v51 = vrot.slane %v356_v2, 1  ;;  %v1091_v56 = vmul.f32 %v1090_v40, %v5843_v31  ;;  %v1156_v58 = vstv %s6039_s28  ;;  %v1104_v60 = vstv %s6045_s29  ;;  %s6179_s28 = sld [smem:[#allocation2 + $0x4c]] }
  0xaf   : > { %v277_v15 = vadd.f32 %v273_v0, %v259_v7  ;;  %v276_v17 = vadd.f32 %v271_v3, %v258_v8  ;;  %v366_v59 = vsel %vm208_vm0, %v363_v42, %v365_v43  ;;  %v1136_v62 = vmul.f32 %v1135_v44, %v5843_v31  ;;  %s6183_s29 = sld [smem:[#allocation2 + $0x21]] }
  0xb0   : > { %v294_v22 = vpop.permute.xlu1 %293  ;;  %v292_v23 = vpop.permute.xlu0 %291  ;;  %v364_v3 = vsel %vm208_vm0, %v362_v51, %v363_v42  ;;  %v417_v8 = vmul.f32 %v414_v54, %v5801_v48  ;;  %v1158_v10 = vmul.f32 %v1156_v58, %v5840_v29  ;;  %v1106_v14 = vmul.f32 %v1104_v60, %v5840_v29 }
  0xb1   : > { %v298_v35 = vadd.f32 %v294_v22, %v277_v15  ;;  %v297_v36 = vadd.f32 %v292_v23, %v276_v17  ;;  %v1143_v15 = vrot.slane %v1137_v57, 1  ;;  %v1145_v48 = vrot.slane %v1138_v61, 1 }
  0xb2   : > { %1018 = vrot.lane.b32.xlu1 %v1015_v5, %s5658_s17  ;;  %1016 = vrot.lane.b32.xlu0 %v1013_v11, %s5658_s17  ;;  %v416_v5 = vmul.f32 %v414_v54, %v5795_v45  ;;  %v1159_v11 = vmul.f32 %v1156_v58, %v5846_v32  ;;  %v1105_v45 = vmul.f32 %v1104_v60, %v5843_v31  ;;  %v1194_v17 = vstv %s6053_s30  ;;  %s6189_s30 = sld [smem:[#allocation2 + $0x4d]] }
  0xb3   : > { %v1157_v47 = vmul.f32 %v1156_v58, %v5843_v31  ;;  %v1142_v22 = vrot.slane %v1136_v62, 1  ;;  %v1164_v28 = vrot.slane %v1158_v10, 1  ;;  %v1196_v33 = vmul.f32 %v1194_v17, %v5840_v29 }
  0xb4   : > { %v315_v4 = vpop.permute.xlu1 %314  ;;  %v313_v38 = vpop.permute.xlu0 %312  ;;  %v422_v23 = vrot.slane %v416_v5, 2  ;;  %v1166_v30 = vrot.slane %v1159_v11, 1  ;;  %v1197_v34 = vmul.f32 %v1194_v17, %v5846_v32  ;;  %v1195_v37 = vmul.f32 %v1194_v17, %v5843_v31 }
  0xb5   : > { %v319_v39 = vadd.f32 %v315_v4, %v298_v35  ;;  %v318_v1 = vadd.f32 %v313_v38, %v297_v36  ;;  %v1146_v35 = vsel %vm208_vm0, %v1143_v15, %v1145_v48  ;;  %v1163_v36 = vrot.slane %v1157_v47, 1 }
  0xb6   : > { %1056 = vrot.lane.b32.xlu1 %v1053_v24, %s5659_s21  ;;  %1054 = vrot.lane.b32.xlu0 %v1051_v25, %s5659_s21  ;;  %v1144_v38 = vsel %vm208_vm0, %v1142_v22, %v1143_v15  ;;  %v1167_v43 = vsel %vm208_vm0, %v1164_v28, %v1166_v30  ;;  %v473_v44 = vstv %s6075_s4  ;;  %v1204_v51 = vrot.slane %v1197_v34, 2  ;;  %s6202_s4 = sld [smem:[#allocation2 + $0x4f]] }
  0xb7   : > { %v325_v46 = vadd.f32 %v323_v26, %v319_v39  ;;  %v324_v49 = vadd.f32 %v322_v27, %v318_v1  ;;  %v424_v26 = vrot.slane %v417_v8, 2  ;;  %v421_v27 = vrot.slane %v415_v9, 2 }
  0xb8   : > { %v335_v52 = vpop.permute.xlu1 %334  ;;  %v333_v53 = vpop.permute.xlu0 %332  ;;  %v1215_v39 = vstv %s6069_s3  ;;  %v1242_v48 = vstv %s6097_s6  ;;  %s6196_s3 = sld [smem:[#allocation2 + $0x4a]] }
  0xb9   : > { %v339_v63 = vadd.f32 %v335_v52, %v325_v46  ;;  %v338_v0 = vadd.f32 %v333_v53, %v324_v49  ;;  %v423_v42 = vsel %vm268_vm1, %v421_v27, %v422_v23  ;;  %v1165_v52 = vsel %vm208_vm0, %v1163_v36, %v1164_v28  ;;  %s6240_s6 = sld [smem:[#allocation2 + $0x27]] }
  0xba   : > { %1077 = vrot.lane.b32.xlu1 %v1074_v41, %s5658_s17  ;;  %1075 = vrot.lane.b32.xlu0 %v1072_v50, %s5658_s17  ;;  %v425_v41 = vsel %vm268_vm1, %v422_v23, %v424_v26  ;;  %v1202_v50 = vrot.slane %v1196_v33, 2  ;;  %v1201_v53 = vrot.slane %v1195_v37, 2  ;;  %v1217_v54 = vmul.f32 %v1215_v39, %v5840_v29 }
  0xbb   : > { %v1216_v58 = vmul.f32 %v1215_v39, %v5843_v31  ;;  %v1244_v28 = vmul.f32 %v1242_v48, %v5885_v16  ;;  %v566_v33 = vstv %s6110_s16  ;;  %v1243_v34 = vmul.f32 %v1242_v48, %v5888_v18  ;;  %s6263_s16 = sld [smem:[#allocation2 + $0x53]] }
  0xbc   : > { %v349_v6 = vpop.permute.xlu1 %348  ;;  %v347_v7 = vpop.permute.xlu0 %346  ;;  %v1205_v62 = vsel %vm268_vm1, %v1202_v50, %v1204_v51  ;;  %v1223_v5 = vrot.slane %v1217_v54, 2  ;;  %v1308_v37 = vstv %s6115_s22  ;;  %v1346_v54 = vstv %s6124_s23  ;;  %s6266_s22 = sld [smem:[#allocation2 + $0x55]]  ;;  %s148_s23 = sand.u32 1, %s5647_s10  }
  0xbd   : > { %v353_v12 = vadd.f32 %v349_v6, %v339_v63  ;;  %v352_v13 = vadd.f32 %v347_v7, %v338_v0  ;;  %v475_v63 = vmul.f32 %v473_v44, %v5840_v29  ;;  %v474_v0 = vmul.f32 %v473_v44, %v5843_v31 }
  0xbe   : > { %1097 = vrot.lane.b32.xlu1 %v1092_v55, %s5659_s21  ;;  %1095 = vrot.lane.b32.xlu0 %v1091_v56, %s5659_s21  ;;  %v1218_v55 = vmul.f32 %v1215_v39, %v5846_v32  ;;  %v1222_v11 = vrot.slane %v1216_v58, 2 }
  0xbf   : > { %v370_v20 = vadd.f32 %v366_v59, %v353_v12  ;;  %v369_v21 = vadd.f32 %v364_v3, %v352_v13  ;;  %v507_v59 = vstv %s6083_s5  ;;  %v1203_v3 = vsel %vm268_vm1, %v1201_v53, %v1202_v50  ;;  %s6229_s5 = sld [smem:[#allocation2 + $0x50]] }
  0xc0   : > { %v387_v24 = vpop.permute.xlu1 %386  ;;  %v385_v25 = vpop.permute.xlu0 %384  ;;  %v509_v6 = vmul.f32 %v507_v59, %v5840_v29  ;;  %v510_v7 = vmul.f32 %v507_v59, %v5846_v32  ;;  %v1225_v10 = vrot.slane %v1218_v55, 2  ;;  %v1311_v50 = vmul.f32 %v1308_v37, %v5891_v19 }
  0xc1   : > { %v391_v2 = vadd.f32 %v387_v24, %v370_v20  ;;  %v390_v4 = vadd.f32 %v385_v25, %v369_v21  ;;  %v1256_v20 = vstv %s6099_s7  ;;  %v1287_v21 = vstv %s6106_s8  ;;  %s6244_s7 = sld [smem:[#allocation2 + $0x24]] }
  0xc2   : > { %1111 = vrot.lane.b32.xlu1 %v1106_v14, %s5658_s17  ;;  %1109 = vrot.lane.b32.xlu0 %v1105_v45, %s5658_s17  ;;  %v508_v14 = vmul.f32 %v507_v59, %v5843_v31  ;;  %v515_v47 = vrot.slane %v509_v6, 1  ;;  %v517_v17 = vrot.slane %v510_v7, 1  ;;  %v1226_v24 = vsel %vm268_vm1, %v1223_v5, %v1225_v10  ;;  %s6256_s8 = sld [smem:[#allocation2 + $0x52]] }
  0xc3   : > { %v1224_v25 = vsel %vm268_vm1, %v1222_v11, %v1223_v5  ;;  %v1289_v36 = vmul.f32 %v1287_v21, %v5885_v16  ;;  %v1257_v53 = vmul.f32 %v1256_v20, %v5888_v18  ;;  %v1349_v5 = vmul.f32 %v1346_v54, %v5891_v19 }
  0xc4   : > { %v408_v1 = vpop.permute.xlu1 %407  ;;  %v406_v40 = vpop.permute.xlu0 %405  ;;  %v514_v30 = vrot.slane %v508_v14, 1  ;;  %v1347_v6 = vmul.f32 %v1346_v54, %v5888_v18 }
  0xc5   : > { %v412_v46 = vadd.f32 %v408_v1, %v391_v2  ;;  %v411_v49 = vadd.f32 %v406_v40, %v390_v4  ;;  %v518_v2 = vsel %vm208_vm0, %v515_v47, %v517_v17  ;;  %v1290_v4 = vmul.f32 %v1287_v21, %v5891_v19 }
  0xc6   : > { %1149 = vrot.lane.b32.xlu1 %v1146_v35, %s5659_s21  ;;  %1147 = vrot.lane.b32.xlu0 %v1144_v38, %s5659_s21  ;;  %v1258_v35 = vmul.f32 %v1256_v20, %v5885_v16  ;;  %v1288_v38 = vmul.f32 %v1287_v21, %v5888_v18  ;;  %v568_v40 = vmul.f32 %v566_v33, %v5840_v29  ;;  %v1295_v29 = vrot.slane %v1289_v36, 1 }
  0xc7   : > { %v429_v56 = vadd.f32 %v425_v41, %v412_v46  ;;  %v428_v57 = vadd.f32 %v423_v42, %v411_v49  ;;  %v569_v41 = vmul.f32 %v566_v33, %v5846_v32  ;;  %v516_v44 = vsel %vm208_vm0, %v514_v30, %v515_v47 }
  0xc8   : > { %v446_v60 = vpop.permute.xlu1 %445  ;;  %v444_v61 = vpop.permute.xlu0 %443  ;;  %v567_v46 = vmul.f32 %v566_v33, %v5843_v31  ;;  %v1310_v49 = vmul.f32 %v1308_v37, %v5885_v16  ;;  %v1297_v32 = vrot.slane %v1290_v4, 1  ;;  %v1294_v55 = vrot.slane %v1288_v38, 1 }
  0xc9   : > { %v450_v8 = vadd.f32 %v446_v60, %v429_v56  ;;  %v449_v9 = vadd.f32 %v444_v61, %v428_v57  ;;  %v1309_v56 = vmul.f32 %v1308_v37, %v5888_v18  ;;  %v574_v58 = vrot.slane %v568_v40, 2 }
  0xca   : > { %1170 = vrot.lane.b32.xlu1 %v1167_v43, %s5658_s17  ;;  %1168 = vrot.lane.b32.xlu0 %v1165_v52, %s5658_s17  ;;  %v576_v59 = vrot.slane %v569_v41, 2  ;;  %v1298_v7 = vsel %vm208_vm0, %v1295_v29, %v1297_v32  ;;  %v1296_v11 = vsel %vm208_vm0, %v1294_v55, %v1295_v29  ;;  %v1356_v21 = vrot.slane %v1349_v5, 2  ;;  %v6217_v5 = vld [vmem:[%s5749_s14 + $0x10] sm:$0x3] }
  0xcb   : > { %v659_v33 = vstv %s6158_s26  ;;  %v1442_v32 = vstv %s6179_s28  ;;  %s5152_s26 = sshll.u32 %s148_s23, 7 }
  0xcc   : > { %v467_v12 = vpop.permute.xlu1 %466  ;;  %v465_v13 = vpop.permute.xlu0 %464  ;;  %v660_v40 = vmul.f32 %v659_v33, %v5888_v18  ;;  %s6295_s28 = scalar_lea.vmem [#allocation5], %s5152_s26  ;;  %s6432_s26 = sld [smem:[#allocation2 + $0x64]] }
  0xcd   : > { %v471_v45 = vadd.f32 %v467_v12, %v450_v8  ;;  %v470_v15 = vadd.f32 %v465_v13, %v449_v9  ;;  %v1315_v8 = vrot.slane %v1309_v56, 1  ;;  %v1367_v12 = vstv %s6145_s24  ;;  %s6269_s24 = sld [smem:[#allocation2 + $0x2a]] }
  0xce   : > { %1208 = vrot.lane.b32.xlu1 %v1205_v62, %s5659_s21  ;;  %1206 = vrot.lane.b32.xlu0 %v1203_v3, %s5659_s21  ;;  %v573_v62 = vrot.slane %v567_v46, 2  ;;  %v1348_v3 = vmul.f32 %v1346_v54, %v5885_v16  ;;  %v1368_v30 = vmul.f32 %v1367_v12, %v5888_v18  ;;  %v666_v29 = vrot.slane %v660_v40, 1 }
  0xcf   : > { %v477_v22 = vadd.f32 %v475_v63, %v471_v45  ;;  %v476_v23 = vadd.f32 %v474_v0, %v470_v15  ;;  %v1316_v63 = vrot.slane %v1310_v49, 1  ;;  %v1318_v0 = vrot.slane %v1311_v50, 1 }
  0xd0   : > { %v487_v26 = vpop.permute.xlu1 %486  ;;  %v485_v27 = vpop.permute.xlu0 %484  ;;  %v577_v45 = vsel %vm268_vm1, %v574_v58, %v576_v59  ;;  %v575_v15 = vsel %vm268_vm1, %v573_v62, %v574_v58  ;;  %v1354_v47 = vrot.slane %v1348_v3, 2  ;;  %v718_v62 = vstv %s6183_s29  ;;  %s6321_s29 = sld [smem:[#allocation2 + $0x59]] }
  0xd1   : > { %v491_v39 = vadd.f32 %v487_v26, %v477_v22  ;;  %v490_v1 = vadd.f32 %v485_v27, %v476_v23  ;;  %v1319_v48 = vsel %vm208_vm0, %v1316_v63, %v1318_v0  ;;  %v1353_v22 = vrot.slane %v1347_v6, 2 }
  0xd2   : > { %1229 = vrot.lane.b32.xlu1 %v1226_v24, %s5658_s17  ;;  %1227 = vrot.lane.b32.xlu0 %v1224_v25, %s5658_s17  ;;  %v1317_v23 = vsel %vm208_vm0, %v1315_v8, %v1316_v63  ;;  %v625_v24 = vstv %s6156_s25  ;;  %v1369_v25 = vmul.f32 %v1367_v12, %v5885_v16  ;;  %v1370_v26 = vmul.f32 %v1367_v12, %v5891_v19  ;;  %v6212_v63 = vld [vmem:[%s5749_s14] sm:$0xff]  ;;  %s6276_s25 = sld [smem:[#allocation2 + $0x56]] }
  0xd3   : > { %v1357_v36 = vsel %vm268_vm1, %v1354_v47, %v1356_v21  ;;  %v1355_v37 = vsel %vm268_vm1, %v1353_v22, %v1354_v47  ;;  %v626_v4 = vmul.f32 %v625_v24, %v5888_v18  ;;  %v1445_v6 = vmul.f32 %v6217_v5, %v1442_v32 }
  0xd4   : > { %v501_v42 = vpop.permute.xlu1 %500  ;;  %v499_v43 = vpop.permute.xlu0 %498  ;;  %v1375_v38 = vrot.slane %v1369_v25, 2  ;;  %v719_v47 = vmul.f32 %v718_v62, %v5888_v18  ;;  %v1501_v18 = vstv %s6202_s4  ;;  %s6347_s4 = sld [smem:[#allocation2 + $0x5b]] }
  0xd5   : > { %v505_v51 = vadd.f32 %v501_v42, %v491_v39  ;;  %v504_v52 = vadd.f32 %v499_v43, %v490_v1  ;;  %v661_v39 = vmul.f32 %v659_v33, %v5885_v16  ;;  %v662_v1 = vmul.f32 %v659_v33, %v5891_v19 }
  0xd6   : > { %1249 = vrot.lane.b32.xlu1 %v1244_v28, %s5659_s21  ;;  %1247 = vrot.lane.b32.xlu0 %v1243_v34, %s5659_s21  ;;  %v1377_v43 = vrot.slane %v1370_v26, 2  ;;  %v1452_v25 = vrot.slane %v1445_v6, 1 }
  0xd7   : > { %v522_v31 = vadd.f32 %v518_v2, %v505_v51  ;;  %v521_v57 = vadd.f32 %v516_v44, %v504_v52  ;;  %v627_v2 = vmul.f32 %v625_v24, %v5885_v16  ;;  %v1374_v44 = vrot.slane %v1368_v30, 2 }
  0xd8   : > { %v539_v60 = vpop.permute.xlu1 %538  ;;  %v537_v61 = vpop.permute.xlu0 %536  ;;  %v1397_v52 = vstv %s6171_s27  ;;  %v669_v54 = vrot.slane %v662_v1, 1  ;;  %s6284_s27 = sld [smem:[#allocation2 + $0x58]] }
  0xd9   : > { %v543_v9 = vadd.f32 %v539_v60, %v522_v31  ;;  %v542_v10 = vadd.f32 %v537_v61, %v521_v57  ;;  %v1378_v31 = vsel %vm268_vm1, %v1375_v38, %v1377_v43  ;;  %v1376_v57 = vsel %vm268_vm1, %v1374_v44, %v1375_v38  ;;  %v6207_v60 = vld [vmem:[%s5749_s14 + $0x8] sm:$0xff] }
  0xda   : > { %1263 = vrot.lane.b32.xlu1 %v1258_v35, %s5658_s17  ;;  %1261 = vrot.lane.b32.xlu0 %v1257_v53, %s5658_s17  ;;  %v667_v53 = vrot.slane %v661_v39, 1  ;;  %v1399_v61 = vmul.f32 %v6207_v60, %v1397_v52  ;;  %v1398_v0 = vmul.f32 %v6212_v63, %v1397_v52  ;;  %v1444_v3 = vmul.f32 %v6207_v60, %v1442_v32 }
  0xdb   : > { %v1503_v38 = vmul.f32 %v6207_v60, %v1501_v18  ;;  %v1504_v39 = vmul.f32 %v6217_v5, %v1501_v18  ;;  %v1502_v43 = vmul.f32 %v6212_v63, %v1501_v18  ;;  %v1522_v44 = vstv %s6229_s5  ;;  %s6356_s5 = sld [smem:[#allocation2 + $0x5c]] }
  0xdc   : > { %v560_v13 = vpop.permute.xlu1 %559  ;;  %v558_v14 = vpop.permute.xlu0 %557  ;;  %v670_v8 = vsel %vm208_vm0, %v667_v53, %v669_v54 }
  0xdd   : > { %v564_v17 = vadd.f32 %v560_v13, %v543_v9  ;;  %v563_v20 = vadd.f32 %v558_v14, %v542_v10  ;;  %v668_v9 = vsel %vm208_vm0, %v666_v29, %v667_v53  ;;  %v1411_v10 = vstv %s6196_s3  ;;  %s6334_s3 = sld [smem:[#allocation2 + $0x30]] }
  0xde   : > { %1301 = vrot.lane.b32.xlu1 %v1298_v7, %s5659_s21  ;;  %1299 = vrot.lane.b32.xlu0 %v1296_v11, %s5659_s21  ;;  %v1463_v7 = vstv %s6189_s30  ;;  %v1443_v11 = vmul.f32 %v6212_v63, %v1442_v32  ;;  %v720_v14 = vmul.f32 %v718_v62, %v5885_v16  ;;  %v1413_v24 = vmul.f32 %v6207_v60, %v1411_v10  ;;  %s6329_s30 = sld [smem:[#allocation2 + $0x2d]] }
  0xdf   : > { %v581_v27 = vadd.f32 %v577_v45, %v564_v17  ;;  %v580_v28 = vadd.f32 %v575_v15, %v563_v20  ;;  %v721_v45 = vmul.f32 %v718_v62, %v5891_v19  ;;  %v1465_v17 = vmul.f32 %v6207_v60, %v1463_v7 }
  0xe0   : > { %v598_v34 = vpop.permute.xlu1 %597  ;;  %v596_v35 = vpop.permute.xlu0 %595  ;;  %v1466_v20 = vmul.f32 %v6217_v5, %v1463_v7  ;;  %v1464_v21 = vmul.f32 %v6212_v63, %v1463_v7  ;;  %v1412_v16 = vmul.f32 %v6212_v63, %v1411_v10  ;;  %v1450_v19 = vrot.slane %v1444_v3, 1 }
  0xe1   : > { %v602_v41 = vadd.f32 %v598_v34, %v581_v27  ;;  %v601_v42 = vadd.f32 %v596_v35, %v580_v28  ;;  %v1449_v26 = vrot.slane %v1443_v11, 1  ;;  %v726_v30 = vrot.slane %v720_v14, 2 }
  0xe2   : > { %1322 = vrot.lane.b32.xlu1 %v1319_v48, %s5658_s17  ;;  %1320 = vrot.lane.b32.xlu0 %v1317_v23, %s5658_s17  ;;  %v728_v33 = vrot.slane %v721_v45, 2  ;;  %v1453_v1 = vsel %vm208_vm0, %v1450_v19, %v1452_v25  ;;  %v1509_v32 = vrot.slane %v1503_v38, 2  ;;  %v814_v62 = vstv %s6240_s6  ;;  %s6360_s6 = sld [smem:[#allocation2 + $0x5e]] }
  0xe3   : > { %v1451_v40 = vsel %vm208_vm0, %v1449_v26, %v1450_v19  ;;  %v782_v7 = vstv %s6244_s7  ;;  %v816_v11 = vmul.f32 %v6207_v60, %v814_v62  ;;  %v817_v45 = vmul.f32 %v6217_v5, %v814_v62  ;;  %s6362_s7 = sld [smem:[#allocation2 + $0x33]] }
  0xe4   : > { %v619_v46 = vpop.permute.xlu1 %618  ;;  %v617_v49 = vpop.permute.xlu0 %616  ;;  %v1563_v25 = vstv %s6263_s16  ;;  %s6376_s16 = sld [smem:[#allocation2 + $0x61]] }
  0xe5   : > { %v623_v50 = vadd.f32 %v619_v46, %v602_v41  ;;  %v622_v51 = vadd.f32 %v617_v49, %v601_v42  ;;  %v822_v19 = vrot.slane %v816_v11, 1 }
  0xe6   : > { %1360 = vrot.lane.b32.xlu1 %v1357_v36, %s5659_s21  ;;  %1358 = vrot.lane.b32.xlu0 %v1355_v37, %s5659_s21  ;;  %v725_v36 = vrot.slane %v719_v47, 2  ;;  %v1471_v37 = vrot.slane %v1465_v17, 1  ;;  %v784_v47 = vmul.f32 %v6207_v60, %v782_v7  ;;  %v815_v17 = vmul.f32 %v6212_v63, %v814_v62 }
  0xe7   : > { %v629_v55 = vadd.f32 %v627_v2, %v623_v50  ;;  %v628_v56 = vadd.f32 %v626_v4, %v622_v51  ;;  %v1473_v2 = vrot.slane %v1466_v20, 1  ;;  %v1470_v4 = vrot.slane %v1464_v21, 1 }
  0xe8   : > { %v639_v58 = vpop.permute.xlu1 %638  ;;  %v637_v59 = vpop.permute.xlu0 %636  ;;  %v729_v50 = vsel %vm268_vm1, %v726_v30, %v728_v33  ;;  %v727_v51 = vsel %vm268_vm1, %v725_v36, %v726_v30  ;;  %v6302_v36 = vld [vmem:[%s5749_s14 + $0x20] sm:$0xff] }
  0xe9   : > { %v643_v12 = vadd.f32 %v639_v58, %v629_v55  ;;  %v642_v13 = vadd.f32 %v637_v59, %v628_v56  ;;  %v1474_v52 = vsel %vm208_vm0, %v1471_v37, %v1473_v2  ;;  %v1472_v53 = vsel %vm208_vm0, %v1470_v4, %v1471_v37  ;;  %v6306_v2 = vld [vmem:[%s5749_s14 + $0x18] sm:$0xff] }
  0xea   : > { %1381 = vrot.lane.b32.xlu1 %v1378_v31, %s5658_s17  ;;  %1379 = vrot.lane.b32.xlu0 %v1376_v57, %s5658_s17  ;;  %v1511_v55 = vrot.slane %v1504_v39, 2  ;;  %v1524_v56 = vmul.f32 %v6207_v60, %v1522_v44  ;;  %v1525_v31 = vmul.f32 %v6217_v5, %v1522_v44  ;;  %v1523_v57 = vmul.f32 %v6212_v63, %v1522_v44 }
  0xeb   : > { %v1565_v38 = vmul.f32 %v6302_v36, %v1563_v25 }
  0xec   : > { %v653_v15 = vpop.permute.xlu1 %652  ;;  %v651_v48 = vpop.permute.xlu0 %650  ;;  %v1512_v6 = vsel %vm268_vm1, %v1509_v32, %v1511_v55  ;;  %v1529_v10 = vrot.slane %v1523_v57, 2  ;;  %v1564_v57 = vmul.f32 %v6306_v2, %v1563_v25 }
  0xed   : > { %v657_v22 = vadd.f32 %v653_v15, %v643_v12  ;;  %v656_v23 = vadd.f32 %v651_v48, %v642_v13 }
  0xee   : > { %1404 = vrot.lane.b32.xlu1 %v1399_v61, %s5659_s21  ;;  %1402 = vrot.lane.b32.xlu0 %v1398_v0, %s5659_s21  ;;  %v1508_v61 = vrot.slane %v1502_v43, 2 }
  0xef   : > { %v674_v27 = vadd.f32 %v670_v8, %v657_v22  ;;  %v673_v28 = vadd.f32 %v668_v9, %v656_v23  ;;  %v1530_v8 = vrot.slane %v1524_v56, 2  ;;  %v1532_v9 = vrot.slane %v1525_v31, 2 }
  0xf0   : > { %v691_v34 = vpop.permute.xlu1 %690  ;;  %v689_v35 = vpop.permute.xlu0 %688  ;;  %v1510_v14 = vsel %vm268_vm1, %v1508_v61, %v1509_v32  ;;  %v783_v22 = vmul.f32 %v6212_v63, %v782_v7  ;;  %v1549_v23 = vstv %s6256_s8  ;;  %s6367_s8 = sld [smem:[#allocation2 + $0x5f]] }
  0xf1   : > { %v695_v41 = vadd.f32 %v691_v34, %v674_v27  ;;  %v694_v42 = vadd.f32 %v689_v35, %v673_v28  ;;  %v824_v27 = vrot.slane %v817_v45, 1  ;;  %v1594_v28 = vstv %s6266_s22  ;;  %s6406_s22 = sld [smem:[#allocation2 + $0x62]] }
  0xf2   : > { %1418 = vrot.lane.b32.xlu1 %v1413_v24, %s5658_s17  ;;  %1416 = vrot.lane.b32.xlu0 %v1412_v16, %s5658_s17  ;;  %v1533_v24 = vsel %vm268_vm1, %v1530_v8, %v1532_v9  ;;  %v1531_v16 = vsel %vm268_vm1, %v1529_v10, %v1530_v8  ;;  %v821_v34 = vrot.slane %v815_v17, 1  ;;  %v873_v35 = vstv %s6269_s24  ;;  %s6417_s24 = sld [smem:[#allocation2 + $0x36]] }
  0xf3   : > { %v1551_v37 = vmul.f32 %v6302_v36, %v1549_v23  ;;  %v1550_v4 = vmul.f32 %v6306_v2, %v1549_v23  ;;  %v1596_v39 = vmul.f32 %v6302_v36, %v1594_v28 }
  0xf4   : > { %v712_v46 = vpop.permute.xlu1 %711  ;;  %v710_v49 = vpop.permute.xlu0 %709 }
  0xf5   : > { %v716_v54 = vadd.f32 %v712_v46, %v695_v41  ;;  %v715_v29 = vadd.f32 %v710_v49, %v694_v42  ;;  %v1595_v41 = vmul.f32 %v6306_v2, %v1594_v28  ;;  %v1615_v42 = vstv %s6276_s25  ;;  %s6419_s25 = sld [smem:[#allocation2 + $0x39]] }
  0xf6   : > { %1456 = vrot.lane.b32.xlu1 %v1453_v1, %s5659_s21  ;;  %1454 = vrot.lane.b32.xlu0 %v1451_v40, %s5659_s21  ;;  %v6314_v1 = vld [vmem:[%s5749_s14 + $0x28] sm:$0x3]  ;;  %v825_v46 = vsel %vm208_vm0, %v822_v19, %v824_v27  ;;  %v875_v49 = vmul.f32 %v6207_v60, %v873_v35  ;;  %v1617_v56 = vmul.f32 %v6302_v36, %v1615_v42 }
  0xf7   : > { %v733_v58 = vadd.f32 %v729_v50, %v716_v54  ;;  %v732_v59 = vadd.f32 %v727_v51, %v715_v29  ;;  %v1597_v40 = vmul.f32 %v6314_v1, %v1594_v28  ;;  %v874_v54 = vmul.f32 %v6212_v63, %v873_v35 }
  0xf8   : > { %v750_v0 = vpop.permute.xlu1 %749  ;;  %v748_v3 = vpop.permute.xlu0 %747  ;;  %v1653_v29 = vstv %s6284_s27  ;;  %v1618_v31 = vmul.f32 %v6314_v1, %v1615_v42  ;;  %v1601_v61 = vrot.slane %v1595_v41, 1  ;;  %v932_v28 = vstv %s6329_s30  ;;  %s6434_s27 = sld [smem:[#allocation2 + $0x65]] }
  0xf9   : > { %v754_v12 = vadd.f32 %v750_v0, %v733_v58  ;;  %v753_v13 = vadd.f32 %v748_v3, %v732_v59  ;;  %v1602_v58 = vrot.slane %v1596_v39, 1  ;;  %v1604_v59 = vrot.slane %v1597_v40, 1  ;;  %s6446_s30 = sld [smem:[#allocation2 + $0x3c]] }
  0xfa   : > { %1477 = vrot.lane.b32.xlu1 %v1474_v52, %s5658_s17  ;;  %1475 = vrot.lane.b32.xlu0 %v1472_v53, %s5658_s17  ;;  %v823_v52 = vsel %vm208_vm0, %v821_v34, %v822_v19  ;;  %v876_v53 = vmul.f32 %v6217_v5, %v873_v35  ;;  %v881_v3 = vrot.slane %v875_v49, 2  ;;  %v880_v10 = vrot.slane %v874_v54, 2 }
  0xfb   : > { %v1655_v11 = vmul.f32 %v6302_v36, %v1653_v29  ;;  %v1605_v45 = vsel %vm208_vm0, %v1602_v58, %v1604_v59  ;;  %v966_v35 = vstv %s6334_s3  ;;  %v934_v49 = vmul.f32 %v6302_v36, %v932_v28  ;;  %s6452_s3 = sld [smem:[#allocation2 + $0x68]] }
  0xfc   : > { %v771_v15 = vpop.permute.xlu1 %770  ;;  %v769_v48 = vpop.permute.xlu0 %768  ;;  %v883_v9 = vrot.slane %v876_v53, 2  ;;  %v933_v54 = vmul.f32 %v6306_v2, %v932_v28 }
  0xfd   : > { %v775_v20 = vadd.f32 %v771_v15, %v754_v12  ;;  %v774_v21 = vadd.f32 %v769_v48, %v753_v13  ;;  %v1656_v12 = vmul.f32 %v6314_v1, %v1653_v29  ;;  %v1623_v13 = vrot.slane %v1617_v56, 1 }
  0xfe   : > { %1515 = vrot.lane.b32.xlu1 %v1512_v6, %s5659_s21  ;;  %1513 = vrot.lane.b32.xlu0 %v1510_v14, %s5659_s21  ;;  %v1616_v6 = vmul.f32 %v6306_v2, %v1615_v42  ;;  %v1625_v14 = vrot.slane %v1618_v31, 1  ;;  %v1603_v15 = vsel %vm208_vm0, %v1601_v61, %v1602_v58  ;;  %v1654_v48 = vmul.f32 %v6306_v2, %v1653_v29 }
  0xff   : > { %v777_v26 = vmax.f32 %v775_v20, 0.0  ;;  %v776_v18 = vmax.f32 %v774_v21, 0.0  ;;  %v1674_v21 = vstv %s6321_s29  ;;  %v1661_v19 = vrot.slane %v1655_v11, 2  ;;  %v6385_v11 = vld [vmem:[%s5749_s14 + $0x38] sm:$0xff]  ;;  %s6442_s29 = sld [smem:[#allocation2 + $0x67]] }
 0x100   : > { %v794_v30 = vpop.permute.xlu1 %793  ;;  %v792_v33 = vpop.permute.xlu0 %791  ;;  %v1622_v20 = vrot.slane %v1616_v6, 1  ;;  %v1663_v25 = vrot.slane %v1656_v12, 2  ;;  %v1626_v27 = vsel %vm208_vm0, %v1623_v13, %v1625_v14  ;;  %v1677_v34 = vmul.f32 %v6314_v1, %v1674_v21 }
 0x101   : > { %780 = vst.msk [vmem:[%s6295_s28 + $0x8] sm:$0xff] %vm778_vm2, %v777_v26  ;;  %779 = vst.msk [vmem:[%s6295_s28] sm:$0xff] %vm778_vm2, %v776_v18  ;;  %v798_v43 = vadd.f32 %v794_v30, %v784_v47  ;;  %v797_v44 = vadd.f32 %v792_v33, %v783_v22  ;;  %v1660_v30 = vrot.slane %v1654_v48, 2  ;;  %v1676_v33 = vmul.f32 %v6302_v36, %v1674_v21 }
 0x102   : > { %1536 = vrot.lane.b32.xlu1 %v1533_v24, %s5658_s17  ;;  %1534 = vrot.lane.b32.xlu0 %v1531_v16, %s5658_s17  ;;  %v884_v24 = vsel %vm268_vm1, %v881_v3, %v883_v9  ;;  %v882_v16 = vsel %vm268_vm1, %v880_v10, %v881_v3  ;;  %v1675_v39 = vmul.f32 %v6306_v2, %v1674_v21  ;;  %v1701_v56 = vstv %s6347_s4  ;;  %v6400_v21 = vld [vmem:[%s5749_s14 + $0x40] sm:$0x3]  ;;  %s6465_s4 = sld [smem:[#allocation2 + $0x6a]] }
 0x103   : > { %v1664_v42 = vsel %vm268_vm1, %v1661_v19, %v1663_v25  ;;  %v967_v31 = vmul.f32 %v6306_v2, %v966_v35  ;;  %v1703_v12 = vmul.f32 %v6385_v11, %v1701_v56  ;;  %v1025_v14 = vstv %s6362_s7  ;;  %s6503_s7 = sld [smem:[#allocation2 + $0x42]] }
 0x104   : > { %v808_v50 = vpop.permute.xlu1 %807  ;;  %v806_v51 = vpop.permute.xlu0 %805  ;;  %v1681_v29 = vrot.slane %v1675_v39, 2  ;;  %v1028_v25 = vmul.f32 %v6314_v1, %v1025_v14  ;;  %v1026_v28 = vmul.f32 %v6306_v2, %v1025_v14 }
 0x105   : > { %v812_v32 = vadd.f32 %v808_v50, %v798_v43  ;;  %v811_v55 = vadd.f32 %v806_v51, %v797_v44  ;;  %v968_v43 = vmul.f32 %v6302_v36, %v966_v35  ;;  %v969_v44 = vmul.f32 %v6314_v1, %v966_v35 }
 0x106   : > { %1556 = vrot.lane.b32.xlu1 %v1551_v37, %s5659_s21  ;;  %1554 = vrot.lane.b32.xlu0 %v1550_v4, %s5659_s21  ;;  %v1682_v50 = vrot.slane %v1676_v33, 2  ;;  %v1684_v51 = vrot.slane %v1677_v34, 2 }
 0x107   : > { %v829_v62 = vadd.f32 %v825_v46, %v812_v32  ;;  %v828_v0 = vadd.f32 %v823_v52, %v811_v55  ;;  %v1662_v46 = vsel %vm268_vm1, %v1660_v30, %v1661_v19  ;;  %v974_v59 = vrot.slane %v968_v43, 1 }
 0x108   : > { %v846_v7 = vpop.permute.xlu1 %845  ;;  %v844_v8 = vpop.permute.xlu0 %843  ;;  %v976_v61 = vrot.slane %v969_v44, 1  ;;  %v1027_v19 = vmul.f32 %v6302_v36, %v1025_v14  ;;  %v1084_v14 = vstv %s6417_s24  ;;  %s6534_s24 = sld [smem:[#allocation2 + $0x71]] }
 0x109   : > { %v850_v47 = vadd.f32 %v846_v7, %v829_v62  ;;  %v849_v17 = vadd.f32 %v844_v8, %v828_v0  ;;  %v1685_v62 = vsel %vm268_vm1, %v1682_v50, %v1684_v51  ;;  %v1715_v0 = vstv %s6356_s5  ;;  %s6490_s5 = sld [smem:[#allocation2 + $0x6b]] }
 0x10a   : > { %1570 = vrot.lane.b32.xlu1 %v1565_v38, %s5658_s17  ;;  %1568 = vrot.lane.b32.xlu0 %v1564_v57, %s5658_s17  ;;  %v1624_v38 = vsel %vm208_vm0, %v1622_v20, %v1623_v13  ;;  %v1683_v7 = vsel %vm268_vm1, %v1681_v29, %v1682_v50  ;;  %v1746_v8 = vstv %s6360_s6  ;;  %v973_v13 = vrot.slane %v967_v31, 1  ;;  %s6496_s6 = sld [smem:[#allocation2 + $0x3f]] }
 0x10b   : > { %v977_v48 = vsel %vm208_vm0, %v974_v59, %v976_v61  ;;  %v1748_v20 = vmul.f32 %v6385_v11, %v1746_v8  ;;  %v1033_v44 = vrot.slane %v1027_v19, 2  ;;  %v1032_v51 = vrot.slane %v1026_v28, 2 }
 0x10c   : > { %v867_v22 = vpop.permute.xlu1 %866  ;;  %v865_v23 = vpop.permute.xlu0 %864 }
 0x10d   : > { %v871_v26 = vadd.f32 %v867_v22, %v850_v47  ;;  %v870_v18 = vadd.f32 %v865_v23, %v849_v17  ;;  %v1717_v47 = vmul.f32 %v6385_v11, %v1715_v0  ;;  %v1767_v17 = vstv %s6367_s8  ;;  %s6522_s8 = sld [smem:[#allocation2 + $0x6d]] }
 0x10e   : > { %1608 = vrot.lane.b32.xlu1 %v1605_v45, %s5659_s21  ;;  %1606 = vrot.lane.b32.xlu0 %v1603_v15, %s5659_s21  ;;  %v6390_v45 = vld [vmem:[%s5749_s14 + $0x30] sm:$0xff]  ;;  %v1749_v22 = vmul.f32 %v6400_v21, %v1746_v8  ;;  %v1769_v30 = vmul.f32 %v6385_v11, %v1767_v17  ;;  %v1770_v33 = vmul.f32 %v6400_v21, %v1767_v17 }
 0x10f   : > { %v888_v37 = vadd.f32 %v884_v24, %v871_v26  ;;  %v887_v4 = vadd.f32 %v882_v16, %v870_v18  ;;  %v1702_v15 = vmul.f32 %v6390_v45, %v1701_v56  ;;  %v1747_v23 = vmul.f32 %v6390_v45, %v1746_v8 }
 0x110   : > { %v905_v40 = vpop.permute.xlu1 %904  ;;  %v903_v41 = vpop.permute.xlu0 %902  ;;  %v1756_v39 = vrot.slane %v1749_v22, 1  ;;  %v1118_v22 = vstv %s6419_s25  ;;  %s6540_s25 = sld [smem:[#allocation2 + $0x6e]] }
 0x111   : > { %v909_v52 = vadd.f32 %v905_v40, %v888_v37  ;;  %v908_v53 = vadd.f32 %v903_v41, %v887_v4  ;;  %v1716_v37 = vmul.f32 %v6390_v45, %v1715_v0  ;;  %v1805_v4 = vstv %s6376_s16  ;;  %s6526_s16 = sld [smem:[#allocation2 + $0x70]] }
 0x112   : > { %1629 = vrot.lane.b32.xlu1 %v1626_v27, %s5658_s17  ;;  %1627 = vrot.lane.b32.xlu0 %v1624_v38, %s5658_s17  ;;  %v975_v27 = vsel %vm208_vm0, %v973_v13, %v974_v59  ;;  %v1754_v38 = vrot.slane %v1748_v20, 1  ;;  %v1753_v40 = vrot.slane %v1747_v23, 1  ;;  %v1768_v41 = vmul.f32 %v6390_v45, %v1767_v17 }
 0x113   : > { %v1808_v29 = vmul.f32 %v6400_v21, %v1805_v4  ;;  %v1826_v59 = vstv %s6406_s22  ;;  %v1120_v28 = vmul.f32 %v6385_v11, %v1118_v22  ;;  %s6528_s22 = sld [smem:[#allocation2 + $0x45]] }
 0x114   : > { %v926_v32 = vpop.permute.xlu1 %925  ;;  %v924_v55 = vpop.permute.xlu0 %923  ;;  %v1774_v56 = vrot.slane %v1768_v41, 1  ;;  %v1827_v20 = vmul.f32 %v6390_v45, %v1826_v59  ;;  %v1853_v41 = vstv %s6432_s26  ;;  %s6547_s26 = sld [smem:[#allocation2 + $0x73]] }
 0x115   : > { %v930_v57 = vadd.f32 %v926_v32, %v909_v52  ;;  %v929_v58 = vadd.f32 %v924_v55, %v908_v53  ;;  %v1775_v52 = vrot.slane %v1769_v30, 1  ;;  %v1777_v53 = vrot.slane %v1770_v33, 1 }
 0x116   : > { %1667 = vrot.lane.b32.xlu1 %v1664_v42, %s5659_s21  ;;  %1665 = vrot.lane.b32.xlu0 %v1662_v46, %s5659_s21  ;;  %v1035_v46 = vrot.slane %v1028_v25, 2  ;;  %v1806_v32 = vmul.f32 %v6390_v45, %v1805_v4  ;;  %v1757_v55 = vsel %vm208_vm0, %v1754_v38, %v1756_v39  ;;  %v1086_v25 = vmul.f32 %v6385_v11, %v1084_v14 }
 0x117   : > { %v936_v3 = vadd.f32 %v934_v49, %v930_v57  ;;  %v935_v6 = vadd.f32 %v933_v54, %v929_v58  ;;  %v1807_v54 = vmul.f32 %v6385_v11, %v1805_v4  ;;  %v1755_v58 = vsel %vm208_vm0, %v1753_v40, %v1754_v38 }
 0x118   : > { %v946_v9 = vpop.permute.xlu1 %945  ;;  %v944_v10 = vpop.permute.xlu0 %943  ;;  %v1036_v0 = vsel %vm268_vm1, %v1033_v44, %v1035_v46  ;;  %v1776_v13 = vsel %vm208_vm0, %v1774_v56, %v1775_v52  ;;  %v1121_v30 = vmul.f32 %v6400_v21, %v1118_v22  ;;  %v1177_v56 = vstv %s6446_s30  ;;  %s6580_s30 = sld [smem:[#allocation2 + $0x48]] }
 0x119   : > { %v950_v24 = vadd.f32 %v946_v9, %v936_v3  ;;  %v949_v16 = vadd.f32 %v944_v10, %v935_v6  ;;  %v1034_v3 = vsel %vm268_vm1, %v1032_v51, %v1033_v44  ;;  %v1778_v6 = vsel %vm208_vm0, %v1775_v52, %v1777_v53 }
 0x11a   : > { %1688 = vrot.lane.b32.xlu1 %v1685_v62, %s5658_s17  ;;  %1686 = vrot.lane.b32.xlu0 %v1683_v7, %s5658_s17  ;;  %v1813_v7 = vrot.slane %v1807_v54, 2  ;;  %v1815_v10 = vrot.slane %v1808_v29, 2  ;;  %v1126_v44 = vrot.slane %v1120_v28, 1  ;;  %v1128_v46 = vrot.slane %v1121_v30, 1 }
 0x11c   : > { %v960_v26 = vpop.permute.xlu1 %959  ;;  %v958_v18 = vpop.permute.xlu0 %957 }
 0x11d   : > { %v964_v34 = vadd.f32 %v960_v26, %v950_v24  ;;  %v963_v35 = vadd.f32 %v958_v18, %v949_v16  ;;  %v1816_v16 = vsel %vm268_vm1, %v1813_v7, %v1815_v10  ;;  %v1085_v26 = vmul.f32 %v6390_v45, %v1084_v14 }
 0x11e   : > { %1708 = vrot.lane.b32.xlu1 %v1703_v12, %s5659_s21  ;;  %1706 = vrot.lane.b32.xlu0 %v1702_v15, %s5659_s21  ;;  %v1812_v12 = vrot.slane %v1806_v32, 2  ;;  %v1828_v15 = vmul.f32 %v6385_v11, %v1826_v59  ;;  %v6469_v32 = vld [vmem:[%s5749_s14 + $0x50] sm:$0xff]  ;;  %v1179_v10 = vmul.f32 %v6385_v11, %v1177_v56  ;;  %v1180_v14 = vmul.f32 %v6400_v21, %v1177_v56 }
 0x11f   : > { %v981_v42 = vadd.f32 %v977_v48, %v964_v34  ;;  %v980_v43 = vadd.f32 %v975_v27, %v963_v35  ;;  %v1829_v48 = vmul.f32 %v6400_v21, %v1826_v59  ;;  %v1833_v35 = vrot.slane %v1827_v20, 2 }
 0x120   : > { %v998_v49 = vpop.permute.xlu1 %997  ;;  %v996_v50 = vpop.permute.xlu0 %995  ;;  %v1814_v19 = vsel %vm268_vm1, %v1812_v12, %v1813_v7  ;;  %v1834_v18 = vrot.slane %v1828_v15, 2  ;;  %v1178_v15 = vmul.f32 %v6390_v45, %v1177_v56 }
 0x121   : > { %v1002_v31 = vadd.f32 %v998_v49, %v981_v42  ;;  %v1001_v57 = vadd.f32 %v996_v50, %v980_v43  ;;  %v1836_v27 = vrot.slane %v1829_v48, 2  ;;  %v1867_v42 = vstv %s6434_s27  ;;  %s6564_s27 = sld [smem:[#allocation2 + $0x74]] }
 0x122   : > { %1722 = vrot.lane.b32.xlu1 %v1717_v47, %s5658_s17  ;;  %1720 = vrot.lane.b32.xlu0 %v1716_v37, %s5658_s17  ;;  %v1119_v37 = vmul.f32 %v6390_v45, %v1118_v22  ;;  %v1898_v49 = vstv %s6442_s29  ;;  %v1835_v52 = vsel %vm268_vm1, %v1833_v35, %v1834_v18  ;;  %s6576_s29 = sld [smem:[#allocation2 + $0x4b]] }
 0x123   : > { %v1837_v43 = vsel %vm268_vm1, %v1834_v18, %v1836_v27  ;;  %v1900_v59 = vmul.f32 %v6469_v32, %v1898_v49  ;;  %v1185_v27 = vrot.slane %v1179_v10, 2 }
 0x124   : > { %v1019_v61 = vpop.permute.xlu1 %1018  ;;  %v1017_v62 = vpop.permute.xlu0 %1016  ;;  %v1125_v53 = vrot.slane %v1119_v37, 1 }
 0x125   : > { %v1023_v8 = vadd.f32 %v1019_v61, %v1002_v31  ;;  %v1022_v9 = vadd.f32 %v1017_v62, %v1001_v57  ;;  %v6474_v31 = vld [vmem:[%s5749_s14 + $0x48] sm:$0xff]  ;;  %v1919_v61 = vstv %s6452_s3  ;;  %v1129_v62 = vsel %vm208_vm0, %v1126_v44, %v1128_v46  ;;  %s6591_s3 = sld [smem:[#allocation2 + $0x76]] }
 0x126   : > { %1760 = vrot.lane.b32.xlu1 %v1757_v55, %s5659_s21  ;;  %1758 = vrot.lane.b32.xlu0 %v1755_v58, %s5659_s21  ;;  %v1855_v55 = vmul.f32 %v6469_v32, %v1853_v41  ;;  %v1854_v57 = vmul.f32 %v6474_v31, %v1853_v41  ;;  %v1869_v58 = vmul.f32 %v6469_v32, %v1867_v42  ;;  %v1978_v46 = vstv %s6490_s5  ;;  %s6603_s5 = sld [smem:[#allocation2 + $0x79]] }
 0x127   : > { %v1040_v47 = vadd.f32 %v1036_v0, %v1023_v8  ;;  %v1039_v17 = vadd.f32 %v1034_v3, %v1022_v9  ;;  %v6484_v0 = vld [vmem:[%s5749_s14 + $0x58] sm:$0x3]  ;;  %v1127_v9 = vsel %vm208_vm0, %v1125_v53, %v1126_v44  ;;  %v1921_v48 = vmul.f32 %v6469_v32, %v1919_v61 }
 0x128   : > { %v1057_v23 = vpop.permute.xlu1 %1056  ;;  %v1055_v24 = vpop.permute.xlu0 %1054  ;;  %v1901_v3 = vmul.f32 %v6484_v0, %v1898_v49  ;;  %v1868_v22 = vmul.f32 %v6474_v31, %v1867_v42 }
 0x129   : > { %v1061_v33 = vadd.f32 %v1057_v23, %v1040_v47  ;;  %v1060_v34 = vadd.f32 %v1055_v24, %v1039_v17  ;;  %v1922_v47 = vmul.f32 %v6484_v0, %v1919_v61  ;;  %v1920_v23 = vmul.f32 %v6474_v31, %v1919_v61 }
 0x12a   : > { %1781 = vrot.lane.b32.xlu1 %v1778_v6, %s5658_s17  ;;  %1779 = vrot.lane.b32.xlu0 %v1776_v13, %s5658_s17  ;;  %v1899_v6 = vmul.f32 %v6474_v31, %v1898_v49  ;;  %v1906_v24 = vrot.slane %v1900_v59, 1  ;;  %v1927_v35 = vrot.slane %v1921_v48, 1  ;;  %v1980_v59 = vmul.f32 %v6469_v32, %v1978_v46 }
 0x12b   : > { %v1929_v37 = vrot.slane %v1922_v47, 1  ;;  %v1981_v61 = vmul.f32 %v6484_v0, %v1978_v46 }
 0x12c   : > { %v1078_v4 = vpop.permute.xlu1 %1077  ;;  %v1076_v38 = vpop.permute.xlu0 %1075  ;;  %v1986_v47 = vrot.slane %v1980_v59, 2 }
 0x12d   : > { %v1082_v39 = vadd.f32 %v1078_v4, %v1061_v33  ;;  %v1081_v40 = vadd.f32 %v1076_v38, %v1060_v34  ;;  %v1187_v33 = vrot.slane %v1180_v14, 2  ;;  %v1184_v34 = vrot.slane %v1178_v15, 2 }
 0x12e   : > { %1819 = vrot.lane.b32.xlu1 %v1816_v16, %s5659_s21  ;;  %1817 = vrot.lane.b32.xlu0 %v1814_v19, %s5659_s21  ;;  %v1908_v16 = vrot.slane %v1901_v3, 1  ;;  %v1905_v19 = vrot.slane %v1899_v6, 1  ;;  %v1926_v4 = vrot.slane %v1920_v23, 1  ;;  %v1930_v53 = vsel %vm208_vm0, %v1927_v35, %v1929_v37 }
 0x12f   : > { %v1088_v50 = vadd.f32 %v1086_v25, %v1082_v39  ;;  %v1087_v51 = vadd.f32 %v1085_v26, %v1081_v40  ;;  %v1957_v25 = vstv %s6465_s4  ;;  %s6593_s4 = sld [smem:[#allocation2 + $0x77]] }
 0x130   : > { %v1098_v54 = vpop.permute.xlu1 %1097  ;;  %v1096_v29 = vpop.permute.xlu0 %1095  ;;  %v1959_v38 = vmul.f32 %v6469_v32, %v1957_v25  ;;  %v1909_v39 = vsel %vm208_vm0, %v1906_v24, %v1908_v16  ;;  %v1907_v40 = vsel %vm208_vm0, %v1905_v19, %v1906_v24  ;;  %v1960_v41 = vmul.f32 %v6484_v0, %v1957_v25 }
 0x131   : > { %v1102_v7 = vadd.f32 %v1098_v54, %v1088_v50  ;;  %v1101_v8 = vadd.f32 %v1096_v29, %v1087_v51  ;;  %v1958_v44 = vmul.f32 %v6474_v31, %v1957_v25  ;;  %v1188_v51 = vsel %vm268_vm1, %v1185_v27, %v1187_v33 }
 0x132   : > { %1840 = vrot.lane.b32.xlu1 %v1837_v43, %s5658_s17  ;;  %1838 = vrot.lane.b32.xlu0 %v1835_v52, %s5658_s17  ;;  %v1186_v52 = vsel %vm268_vm1, %v1184_v34, %v1185_v27  ;;  %v1236_v54 = vstv %s6496_s6  ;;  %v1928_v56 = vsel %vm208_vm0, %v1926_v4, %v1927_v35  ;;  %v2008_v33 = vstv %s6522_s8  ;;  %s6613_s6 = sld [smem:[#allocation2 + $0x4e]] }
 0x133   : > { %s6628_s8 = sld [smem:[#allocation2 + $0x7c]] }
 0x134   : > { %v1112_v12 = vpop.permute.xlu1 %1111  ;;  %v1110_v13 = vpop.permute.xlu0 %1109 }
 0x135   : > { %v1116_v17 = vadd.f32 %v1112_v12, %v1102_v7  ;;  %v1115_v20 = vadd.f32 %v1110_v13, %v1101_v8  ;;  %v1964_v7 = vrot.slane %v1958_v44, 2  ;;  %v1979_v8 = vmul.f32 %v6474_v31, %v1978_v46 }
 0x136   : > { %1860 = vrot.lane.b32.xlu1 %v1855_v55, %s5659_s21  ;;  %1858 = vrot.lane.b32.xlu0 %v1854_v57, %s5659_s21  ;;  %v1965_v57 = vrot.slane %v1959_v38, 2  ;;  %v1238_v12 = vmul.f32 %v6469_v32, %v1236_v54  ;;  %v1237_v13 = vmul.f32 %v6474_v31, %v1236_v54  ;;  %v2053_v38 = vstv %s6526_s16  ;;  %s6653_s16 = sld [smem:[#allocation2 + $0x7d]] }
 0x137   : > { %v1133_v26 = vadd.f32 %v1129_v62, %v1116_v17  ;;  %v1132_v18 = vadd.f32 %v1127_v9, %v1115_v20  ;;  %v1270_v62 = vstv %s6503_s7  ;;  %v1988_v17 = vrot.slane %v1981_v61, 2  ;;  %s6617_s7 = sld [smem:[#allocation2 + $0x7a]] }
 0x138   : > { %v1150_v28 = vpop.permute.xlu1 %1149  ;;  %v1148_v30 = vpop.permute.xlu0 %1147  ;;  %v1272_v14 = vmul.f32 %v6469_v32, %v1270_v62  ;;  %v1273_v15 = vmul.f32 %v6484_v0, %v1270_v62  ;;  %v1271_v20 = vmul.f32 %v6474_v31, %v1270_v62  ;;  %v1966_v24 = vsel %vm268_vm1, %v1964_v7, %v1965_v57 }
 0x139   : > { %v1154_v42 = vadd.f32 %v1150_v28, %v1133_v26  ;;  %v1153_v43 = vadd.f32 %v1148_v30, %v1132_v18  ;;  %v1985_v16 = vrot.slane %v1979_v8, 2  ;;  %v1989_v30 = vsel %vm268_vm1, %v1986_v47, %v1988_v17 }
 0x13a   : > { %1874 = vrot.lane.b32.xlu1 %v1869_v58, %s5658_s17  ;;  %1872 = vrot.lane.b32.xlu0 %v1868_v22, %s5658_s17  ;;  %v1967_v58 = vrot.slane %v1960_v41, 2  ;;  %v1278_v27 = vrot.slane %v1272_v14, 1  ;;  %v1280_v28 = vrot.slane %v1273_v15, 1  ;;  %v1277_v34 = vrot.slane %v1271_v20, 1 }
 0x13b   : > { %v1987_v4 = vsel %vm268_vm1, %v1985_v16, %v1986_v47  ;;  %v1329_v41 = vstv %s6528_s22  ;;  %v2074_v46 = vstv %s6534_s24  ;;  %s6664_s22 = sld [smem:[#allocation2 + $0x51]] }
 0x13c   : > { %v1171_v49 = vpop.permute.xlu1 %1170  ;;  %v1169_v50 = vpop.permute.xlu0 %1168  ;;  %v1968_v48 = vsel %vm268_vm1, %v1965_v57, %v1967_v58  ;;  %v1281_v44 = vsel %vm208_vm0, %v1278_v27, %v1280_v28  ;;  %v1332_v58 = vmul.f32 %v6484_v0, %v1329_v41  ;;  %v1330_v59 = vmul.f32 %v6474_v31, %v1329_v41  ;;  %s6666_s24 = sld [smem:[#allocation2 + $0x54]] }
 0x13d   : > { %v1175_v29 = vadd.f32 %v1171_v49, %v1154_v42  ;;  %v1174_v55 = vadd.f32 %v1169_v50, %v1153_v43  ;;  %v2010_v42 = vmul.f32 %v6207_v60, %v2008_v33  ;;  %v2009_v43 = vmul.f32 %v6212_v63, %v2008_v33 }
 0x13e   : > { %1912 = vrot.lane.b32.xlu1 %v1909_v39, %s5659_s21  ;;  %1910 = vrot.lane.b32.xlu0 %v1907_v40, %s5659_s21  ;;  %v1279_v49 = vsel %vm208_vm0, %v1277_v34, %v1278_v27  ;;  %v2022_v50 = vstv %s6540_s25  ;;  %v2076_v61 = vmul.f32 %v6207_v60, %v2074_v46  ;;  %v2077_v62 = vmul.f32 %v6217_v5, %v2074_v46  ;;  %s6679_s25 = sld [smem:[#allocation2 + $0x82]] }
 0x13f   : > { %v1192_v3 = vadd.f32 %v1188_v51, %v1175_v29  ;;  %v1191_v6 = vadd.f32 %v1186_v52, %v1174_v55  ;;  %v2055_v51 = vmul.f32 %v6207_v60, %v2053_v38  ;;  %v2056_v52 = vmul.f32 %v6217_v5, %v2053_v38 }
 0x140   : > { %v1209_v9 = vpop.permute.xlu1 %1208  ;;  %v1207_v10 = vpop.permute.xlu0 %1206  ;;  %v2054_v29 = vmul.f32 %v6212_v63, %v2053_v38  ;;  %v1331_v55 = vmul.f32 %v6469_v32, %v1329_v41  ;;  %v2024_v7 = vmul.f32 %v6207_v60, %v2022_v50  ;;  %v2023_v8 = vmul.f32 %v6212_v63, %v2022_v50 }
 0x141   : > { %v1213_v22 = vadd.f32 %v1209_v9, %v1192_v3  ;;  %v1212_v23 = vadd.f32 %v1207_v10, %v1191_v6  ;;  %v2061_v9 = vrot.slane %v2055_v51, 1  ;;  %v2063_v10 = vrot.slane %v2056_v52, 1  ;;  %v6606_v51 = vld [vmem:[%s5749_s14 + $0x10] sm:$0x3] }
 0x142   : > { %1933 = vrot.lane.b32.xlu1 %v1930_v53, %s5658_s17  ;;  %1931 = vrot.lane.b32.xlu0 %v1928_v56, %s5658_s17  ;;  %v1337_v47 = vrot.slane %v1331_v55, 2  ;;  %v2084_v16 = vrot.slane %v2077_v62, 1  ;;  %v2133_v34 = vstv %s6564_s27  ;;  %s6704_s27 = sld [smem:[#allocation2 + $0x57]] }
 0x143   : > { %v2136_v52 = vmul.f32 %v6606_v51, %v2133_v34 }
 0x144   : > { %v1230_v19 = vpop.permute.xlu1 %1229  ;;  %v1228_v25 = vpop.permute.xlu0 %1227 }
 0x145   : > { %v1234_v26 = vadd.f32 %v1230_v19, %v1213_v22  ;;  %v1233_v18 = vadd.f32 %v1228_v25, %v1212_v23  ;;  %v1339_v22 = vrot.slane %v1332_v58, 2  ;;  %v1336_v23 = vrot.slane %v1330_v59, 2 }
 0x146   : > { %1971 = vrot.lane.b32.xlu1 %v1968_v48, %s5659_s21  ;;  %1969 = vrot.lane.b32.xlu0 %v1966_v24, %s5659_s21  ;;  %v2060_v48 = vrot.slane %v2054_v29, 1  ;;  %v2082_v24 = vrot.slane %v2076_v61, 1 }
 0x147   : > { %v1240_v35 = vadd.f32 %v1238_v12, %v1234_v26  ;;  %v1239_v37 = vadd.f32 %v1237_v13, %v1233_v18  ;;  %v2075_v12 = vmul.f32 %v6212_v63, %v2074_v46  ;;  %v2112_v13 = vstv %s6547_s26  ;;  %s6693_s26 = sld [smem:[#allocation2 + $0x7f]] }
 0x148   : > { %v1250_v39 = vpop.permute.xlu1 %1249  ;;  %v1248_v40 = vpop.permute.xlu0 %1247  ;;  %v2114_v19 = vmul.f32 %v6207_v60, %v2112_v13  ;;  %v2115_v25 = vmul.f32 %v6217_v5, %v2112_v13  ;;  %v2064_v26 = vsel %vm208_vm0, %v2061_v9, %v2063_v10  ;;  %v2113_v27 = vmul.f32 %v6212_v63, %v2112_v13 }
 0x149   : > { %v1254_v53 = vadd.f32 %v1250_v39, %v1240_v35  ;;  %v1253_v54 = vadd.f32 %v1248_v40, %v1239_v37  ;;  %v2081_v18 = vrot.slane %v2075_v12, 1  ;;  %v2062_v33 = vsel %vm208_vm0, %v2060_v48, %v2061_v9 }
 0x14a   : > { %1992 = vrot.lane.b32.xlu1 %v1989_v30, %s5658_s17  ;;  %1990 = vrot.lane.b32.xlu0 %v1987_v4, %s5658_s17  ;;  %v1340_v5 = vsel %vm268_vm1, %v1337_v47, %v1339_v22  ;;  %v1338_v37 = vsel %vm268_vm1, %v1336_v23, %v1337_v47  ;;  %v2085_v4 = vsel %vm208_vm0, %v2082_v24, %v2084_v16  ;;  %v2120_v39 = vrot.slane %v2114_v19, 2 }
 0x14b   : > { %v2122_v40 = vrot.slane %v2115_v25, 2  ;;  %v2083_v41 = vsel %vm208_vm0, %v2081_v18, %v2082_v24  ;;  %v1425_v46 = vstv %s6576_s29  ;;  %v2160_v12 = vstv %s6591_s3  ;;  %s6710_s29 = sld [smem:[#allocation2 + $0x80]] }
 0x14c   : > { %v1264_v56 = vpop.permute.xlu1 %1263  ;;  %v1262_v57 = vpop.permute.xlu0 %1261  ;;  %v1428_v62 = vmul.f32 %v6606_v51, %v1425_v46  ;;  %v2174_v22 = vstv %s6593_s4  ;;  %v2205_v23 = vstv %s6603_s5  ;;  %s6720_s3 = sld [smem:[#allocation2 + $0x85]] }
 0x14d   : > { %v1268_v3 = vadd.f32 %v1264_v56, %v1254_v53  ;;  %v1267_v6 = vadd.f32 %v1262_v57, %v1253_v54  ;;  %v6610_v53 = vld [vmem:[%s5749_s14] sm:$0xff]  ;;  %v2123_v56 = vsel %vm268_vm1, %v2120_v39, %v2122_v40  ;;  %v1393_v57 = vstv %s6580_s30  ;;  %s6713_s30 = sld [smem:[#allocation2 + $0x83]] }
 0x14e   : > { %2015 = vrot.lane.b32.xlu1 %v2010_v42, %s5659_s21  ;;  %2013 = vrot.lane.b32.xlu0 %v2009_v43, %s5659_s21  ;;  %v2119_v42 = vrot.slane %v2113_v27, 2  ;;  %v6599_v43 = vld [vmem:[%s5749_s14 + $0x8] sm:$0xff]  ;;  %v2134_v54 = vmul.f32 %v6610_v53, %v2133_v34  ;;  %v1426_v13 = vmul.f32 %v6610_v53, %v1425_v46  ;;  %v1394_v47 = vmul.f32 %v6610_v53, %v1393_v57  ;;  %s6733_s4 = sld [smem:[#allocation2 + $0x86]] }
 0x14f   : > { %v1285_v14 = vadd.f32 %v1281_v44, %v1268_v3  ;;  %v1284_v15 = vadd.f32 %v1279_v49, %v1267_v6  ;;  %v2135_v44 = vmul.f32 %v6599_v43, %v2133_v34  ;;  %v1427_v61 = vmul.f32 %v6599_v43, %v1425_v46  ;;  %s6740_s5 = sld [smem:[#allocation2 + $0x5a]] }
 0x150   : > { %v1302_v17 = vpop.permute.xlu1 %1301  ;;  %v1300_v20 = vpop.permute.xlu0 %1299  ;;  %v2121_v58 = vsel %vm268_vm1, %v2119_v42, %v2120_v39  ;;  %v1395_v48 = vmul.f32 %v6599_v43, %v1393_v57  ;;  %v2162_v27 = vmul.f32 %v6302_v36, %v2160_v12  ;;  %v2176_v34 = vmul.f32 %v6302_v36, %v2174_v22 }
 0x151   : > { %v1306_v28 = vadd.f32 %v1302_v17, %v1285_v14  ;;  %v1305_v30 = vadd.f32 %v1300_v20, %v1284_v15  ;;  %v2141_v59 = vrot.slane %v2135_v44, 2  ;;  %v1433_v17 = vrot.slane %v1427_v61, 1 }
 0x152   : > { %2029 = vrot.lane.b32.xlu1 %v2024_v7, %s5658_s17  ;;  %2027 = vrot.lane.b32.xlu0 %v2023_v8, %s5658_s17  ;;  %v2143_v7 = vrot.slane %v2136_v52, 2  ;;  %v2140_v8 = vrot.slane %v2134_v54, 2  ;;  %v1435_v20 = vrot.slane %v1428_v62, 1 }
 0x154   : > { %v1323_v60 = vpop.permute.xlu1 %1322  ;;  %v1321_v35 = vpop.permute.xlu0 %1320  ;;  %v2144_v19 = vsel %vm268_vm1, %v2141_v59, %v2143_v7  ;;  %v2142_v25 = vsel %vm268_vm1, %v2140_v8, %v2141_v59 }
 0x155   : > { %v1327_v38 = vadd.f32 %v1323_v60, %v1306_v28  ;;  %v1326_v63 = vadd.f32 %v1321_v35, %v1305_v30  ;;  %v1432_v28 = vrot.slane %v1426_v13, 1  ;;  %v1484_v30 = vstv %s6613_s6  ;;  %s6750_s6 = sld [smem:[#allocation2 + $0x5d]] }
 0x156   : > { %2067 = vrot.lane.b32.xlu1 %v2064_v26, %s5659_s21  ;;  %2065 = vrot.lane.b32.xlu0 %v2062_v33, %s5659_s21  ;;  %v2161_v33 = vmul.f32 %v6306_v2, %v2160_v12  ;;  %v2207_v60 = vmul.f32 %v6302_v36, %v2205_v23  ;;  %v2226_v35 = vstv %s6617_s7  ;;  %v1486_v39 = vmul.f32 %v6599_v43, %v1484_v30  ;;  %s6763_s7 = sld [smem:[#allocation2 + $0x88]] }
 0x157   : > { %v1344_v49 = vadd.f32 %v1340_v5, %v1327_v38  ;;  %v1343_v50 = vadd.f32 %v1338_v37, %v1326_v63  ;;  %v1436_v5 = vsel %vm208_vm0, %v1433_v17, %v1435_v20  ;;  %v2208_v37 = vmul.f32 %v6314_v1, %v2205_v23 }
 0x158   : > { %v1361_v29 = vpop.permute.xlu1 %1360  ;;  %v1359_v55 = vpop.permute.xlu0 %1358  ;;  %v1487_v40 = vmul.f32 %v6606_v51, %v1484_v30  ;;  %v1434_v44 = vsel %vm208_vm0, %v1432_v28, %v1433_v17  ;;  %v1485_v46 = vmul.f32 %v6610_v53, %v1484_v30  ;;  %v2227_v59 = vmul.f32 %v6306_v2, %v2226_v35 }
 0x159   : > { %v1365_v3 = vadd.f32 %v1361_v29, %v1344_v49  ;;  %v1364_v6 = vadd.f32 %v1359_v55, %v1343_v50  ;;  %v2228_v49 = vmul.f32 %v6302_v36, %v2226_v35  ;;  %v2229_v50 = vmul.f32 %v6314_v1, %v2226_v35 }
 0x15a   : > { %2088 = vrot.lane.b32.xlu1 %v2085_v4, %s5658_s17  ;;  %2086 = vrot.lane.b32.xlu0 %v2083_v41, %s5658_s17  ;;  %v2206_v4 = vmul.f32 %v6306_v2, %v2205_v23  ;;  %v2175_v29 = vmul.f32 %v6306_v2, %v2174_v22  ;;  %v2264_v55 = vstv %s6628_s8  ;;  %v2215_v57 = vrot.slane %v2208_v37, 1  ;;  %s6769_s8 = sld [smem:[#allocation2 + $0x89]] }
 0x15b   : > { %v2236_v12 = vrot.slane %v2229_v50, 1  ;;  %v2266_v13 = vmul.f32 %v6302_v36, %v2264_v55  ;;  %v2285_v23 = vstv %s6653_s16  ;;  %v1543_v30 = vstv %s6664_s22  ;;  %s6781_s16 = sld [smem:[#allocation2 + $0x8b]] }
 0x15c   : > { %v1382_v9 = vpop.permute.xlu1 %1381  ;;  %v1380_v10 = vpop.permute.xlu0 %1379  ;;  %s6786_s22 = sld [smem:[#allocation2 + $0x60]] }
 0x15d   : > { %v1386_v14 = vadd.f32 %v1382_v9, %v1365_v3  ;;  %v1385_v15 = vadd.f32 %v1380_v10, %v1364_v6  ;;  %v1492_v3 = vrot.slane %v1486_v39, 2  ;;  %v1494_v6 = vrot.slane %v1487_v40, 2 }
 0x15e   : > { %2126 = vrot.lane.b32.xlu1 %v2123_v56, %s5659_s21  ;;  %2124 = vrot.lane.b32.xlu0 %v2121_v58, %s5659_s21  ;;  %v2213_v56 = vrot.slane %v2207_v60, 1  ;;  %v2212_v58 = vrot.slane %v2206_v4, 1  ;;  %v1491_v9 = vrot.slane %v1485_v46, 2  ;;  %v2234_v10 = vrot.slane %v2228_v49, 1  ;;  %v6690_v60 = vld [vmem:[%s5749_s14 + $0x28] sm:$0x3] }
 0x15f   : > { %v1388_v24 = vmax.f32 %v1386_v14, 0.0  ;;  %v1387_v16 = vmax.f32 %v1385_v15, 0.0  ;;  %v2267_v14 = vmul.f32 %v6314_v1, %v2264_v55  ;;  %v2265_v15 = vmul.f32 %v6306_v2, %v2264_v55  ;;  %v6696_v4 = vld [vmem:[%s5749_s14 + $0x18] sm:$0xff] }
 0x160   : > { %v1405_v26 = vpop.permute.xlu1 %1404  ;;  %v1403_v18 = vpop.permute.xlu0 %1402  ;;  %v2214_v22 = vsel %vm208_vm0, %v2212_v58, %v2213_v56  ;;  %v1495_v1 = vsel %vm268_vm1, %v1492_v3, %v1494_v6  ;;  %v1493_v2 = vsel %vm268_vm1, %v1491_v9, %v1492_v3  ;;  %v2288_v35 = vmul.f32 %v6690_v60, %v2285_v23 }
 0x161   : > { %5226 = vst.msk [vmem:[%s6295_s28 + $0x18] sm:$0xff] %vm778_vm2, %v1388_v24  ;;  %5225 = vst.msk [vmem:[%s6295_s28 + $0x10] sm:$0xff] %vm778_vm2, %v1387_v16  ;;  %v1409_v38 = vadd.f32 %v1405_v26, %v1395_v48  ;;  %v1408_v63 = vadd.f32 %v1403_v18, %v1394_v47  ;;  %v2216_v48 = vsel %vm208_vm0, %v2213_v56, %v2215_v57  ;;  %v2233_v47 = vrot.slane %v2227_v59, 1 }
 0x162   : > { %2147 = vrot.lane.b32.xlu1 %v2144_v19, %s5658_s17  ;;  %2145 = vrot.lane.b32.xlu0 %v2142_v25, %s5658_s17  ;;  %v2237_v16 = vsel %vm208_vm0, %v2234_v10, %v2236_v12  ;;  %v2272_v19 = vrot.slane %v2266_v13, 2  ;;  %v2274_v18 = vrot.slane %v2267_v14, 2  ;;  %v1544_v46 = vmul.f32 %v6696_v4, %v1543_v30 }
 0x163   : > { %v2235_v28 = vsel %vm208_vm0, %v2233_v47, %v2234_v10  ;;  %v2295_v50 = vrot.slane %v2288_v35, 2  ;;  %v2357_v3 = vstv %s6679_s25  ;;  %s6800_s25 = sld [smem:[#allocation2 + $0x8e]] }
 0x164   : > { %v1419_v41 = vpop.permute.xlu1 %1418  ;;  %v1417_v42 = vpop.permute.xlu0 %1416  ;;  %v2359_v47 = vmul.f32 %v6385_v11, %v2357_v3 }
 0x165   : > { %v1423_v52 = vadd.f32 %v1419_v41, %v1409_v38  ;;  %v1422_v54 = vadd.f32 %v1417_v42, %v1408_v63  ;;  %v2286_v38 = vmul.f32 %v6696_v4, %v2285_v23  ;;  %v1577_v63 = vstv %s6666_s24  ;;  %s6790_s24 = sld [smem:[#allocation2 + $0x8c]] }
 0x166   : > { %2167 = vrot.lane.b32.xlu1 %v2162_v27, %s5659_s21  ;;  %2165 = vrot.lane.b32.xlu0 %v2161_v33, %s5659_s21  ;;  %v2271_v27 = vrot.slane %v2265_v15, 2  ;;  %v6686_v33 = vld [vmem:[%s5749_s14 + $0x20] sm:$0xff]  ;;  %v2275_v41 = vsel %vm268_vm1, %v2272_v19, %v2274_v18  ;;  %v1578_v57 = vmul.f32 %v6696_v4, %v1577_v63 }
 0x167   : > { %v1440_v61 = vadd.f32 %v1436_v5, %v1423_v52  ;;  %v1439_v62 = vadd.f32 %v1434_v44, %v1422_v54  ;;  %v1545_v44 = vmul.f32 %v6686_v33, %v1543_v30  ;;  %v1579_v52 = vmul.f32 %v6686_v33, %v1577_v63 }
 0x168   : > { %v1457_v7 = vpop.permute.xlu1 %1456  ;;  %v1455_v8 = vpop.permute.xlu0 %1454  ;;  %v2273_v42 = vsel %vm268_vm1, %v2271_v27, %v2272_v19  ;;  %v1580_v54 = vmul.f32 %v6690_v60, %v1577_v63  ;;  %v2292_v56 = vrot.slane %v2286_v38, 2  ;;  %v1584_v14 = vrot.slane %v1578_v57, 1 }
 0x169   : > { %v1461_v17 = vadd.f32 %v1457_v7, %v1440_v61  ;;  %v1460_v20 = vadd.f32 %v1455_v8, %v1439_v62  ;;  %v2312_v7 = vstv %s6693_s26  ;;  %v1585_v8 = vrot.slane %v1579_v52, 1  ;;  %s6820_s26 = sld [smem:[#allocation2 + $0x8f]] }
 0x16a   : > { %2181 = vrot.lane.b32.xlu1 %v2176_v34, %s5658_s17  ;;  %2179 = vrot.lane.b32.xlu0 %v2175_v29, %s5658_s17  ;;  %v2287_v34 = vmul.f32 %v6686_v33, %v2285_v23  ;;  %v1587_v9 = vrot.slane %v1580_v54, 1  ;;  %v2314_v23 = vmul.f32 %v6385_v11, %v2312_v7  ;;  %v2365_v27 = vrot.slane %v2359_v47, 1 }
 0x16b   : > { %v1586_v19 = vsel %vm208_vm0, %v1584_v14, %v1585_v8  ;;  %v1695_v14 = vstv %s6740_s5  ;;  %s6874_s5 = sld [smem:[#allocation2 + $0x95]] }
 0x16c   : > { %v1478_v24 = vpop.permute.xlu1 %1477  ;;  %v1476_v36 = vpop.permute.xlu0 %1475  ;;  %v2293_v49 = vrot.slane %v2287_v34, 2 }
 0x16d   : > { %v1482_v25 = vadd.f32 %v1478_v24, %v1461_v17  ;;  %v1481_v26 = vadd.f32 %v1476_v36, %v1460_v20  ;;  %v2360_v17 = vmul.f32 %v6400_v21, %v2357_v3  ;;  %v2358_v20 = vmul.f32 %v6390_v45, %v2357_v3 }
 0x16e   : > { %2219 = vrot.lane.b32.xlu1 %v2216_v48, %s5659_s21  ;;  %2217 = vrot.lane.b32.xlu0 %v2214_v22, %s5659_s21  ;;  %v2296_v6 = vsel %vm268_vm1, %v2293_v49, %v2295_v50  ;;  %v2294_v13 = vsel %vm268_vm1, %v2292_v56, %v2293_v49  ;;  %v1636_v22 = vstv %s6704_s27  ;;  %v2313_v24 = vmul.f32 %v6390_v45, %v2312_v7  ;;  %s6832_s27 = sld [smem:[#allocation2 + $0x63]] }
 0x16f   : > { %v1499_v5 = vadd.f32 %v1495_v1, %v1482_v25  ;;  %v1498_v37 = vadd.f32 %v1493_v2, %v1481_v26  ;;  %v1588_v36 = vsel %vm208_vm0, %v1585_v8, %v1587_v9  ;;  %v2326_v1 = vstv %s6710_s29  ;;  %s6834_s29 = sld [smem:[#allocation2 + $0x66]] }
 0x170   : > { %v1516_v39 = vpop.permute.xlu1 %1515  ;;  %v1514_v40 = vpop.permute.xlu0 %1513  ;;  %v2378_v25 = vstv %s6713_s30  ;;  %v1639_v30 = vmul.f32 %v6690_v60, %v1636_v22  ;;  %v1637_v34 = vmul.f32 %v6696_v4, %v1636_v22  ;;  %v2364_v38 = vrot.slane %v2358_v20, 1  ;;  %s6847_s30 = sld [smem:[#allocation2 + $0x91]] }
 0x171   : > { %v1520_v29 = vadd.f32 %v1516_v39, %v1499_v5  ;;  %v1519_v55 = vadd.f32 %v1514_v40, %v1498_v37  ;;  %v2367_v37 = vrot.slane %v2360_v17, 1  ;;  %v2328_v63 = vmul.f32 %v6385_v11, %v2326_v1 }
 0x172   : > { %2240 = vrot.lane.b32.xlu1 %v2237_v16, %s5658_s17  ;;  %2238 = vrot.lane.b32.xlu0 %v2235_v28, %s5658_s17  ;;  %v1638_v28 = vmul.f32 %v6686_v33, %v1636_v22  ;;  %v2327_v39 = vmul.f32 %v6390_v45, %v2326_v1  ;;  %v2380_v40 = vmul.f32 %v6385_v11, %v2378_v25  ;;  %v2437_v3 = vstv %s6733_s4  ;;  %v6774_v22 = vld [vmem:[%s5749_s14 + $0x40] sm:$0x3]  ;;  %s6868_s4 = sld [smem:[#allocation2 + $0x69]] }
 0x173   : > { %v2379_v49 = vmul.f32 %v6390_v45, %v2378_v25  ;;  %v2368_v56 = vsel %vm208_vm0, %v2365_v27, %v2367_v37  ;;  %v2366_v57 = vsel %vm208_vm0, %v2364_v38, %v2365_v27 }
 0x174   : > { %v1537_v58 = vpop.permute.xlu1 %1536  ;;  %v1535_v59 = vpop.permute.xlu0 %1534  ;;  %v1644_v54 = vrot.slane %v1638_v28, 2 }
 0x175   : > { %v1541_v61 = vadd.f32 %v1537_v58, %v1520_v29  ;;  %v1540_v62 = vadd.f32 %v1535_v59, %v1519_v55  ;;  %v1646_v29 = vrot.slane %v1639_v30, 2  ;;  %v1643_v55 = vrot.slane %v1637_v34, 2 }
 0x176   : > { %2278 = vrot.lane.b32.xlu1 %v2275_v41, %s5659_s21  ;;  %2276 = vrot.lane.b32.xlu0 %v2273_v42, %s5659_s21  ;;  %v2416_v41 = vstv %s6720_s3  ;;  %v2386_v59 = vrot.slane %v2380_v40, 1  ;;  %v2385_v9 = vrot.slane %v2379_v49, 1  ;;  %s6861_s3 = sld [smem:[#allocation2 + $0x94]] }
 0x177   : > { %v1547_v10 = vadd.f32 %v1545_v44, %v1541_v61  ;;  %v1546_v12 = vadd.f32 %v1544_v46, %v1540_v62  ;;  %v2381_v46 = vmul.f32 %v6400_v21, %v2378_v25  ;;  %v2418_v58 = vmul.f32 %v6385_v11, %v2416_v41 }
 0x178   : > { %v1557_v15 = vpop.permute.xlu1 %1556  ;;  %v1555_v48 = vpop.permute.xlu0 %1554  ;;  %v2419_v61 = vmul.f32 %v6400_v21, %v2416_v41  ;;  %v2417_v62 = vmul.f32 %v6390_v45, %v2416_v41  ;;  %v1647_v11 = vsel %vm268_vm1, %v1644_v54, %v1646_v29  ;;  %v6766_v45 = vld [vmem:[%s5749_s14 + $0x38] sm:$0xff]  ;;  %v2478_v29 = vstv %s6769_s8  ;;  %s6904_s8 = sld [smem:[#allocation2 + $0x98]] }
 0x179   : > { %v1561_v2 = vadd.f32 %v1557_v15, %v1547_v10  ;;  %v1560_v16 = vadd.f32 %v1555_v48, %v1546_v12  ;;  %v2388_v8 = vrot.slane %v2381_v46, 1  ;;  %v2424_v48 = vrot.slane %v2418_v58, 2 }
 0x17a   : > { %2299 = vrot.lane.b32.xlu1 %v2296_v6, %s5658_s17  ;;  %2297 = vrot.lane.b32.xlu0 %v2294_v13, %s5658_s17  ;;  %v1645_v13 = vsel %vm268_vm1, %v1643_v55, %v1644_v54  ;;  %v2439_v47 = vmul.f32 %v6766_v45, %v2437_v3  ;;  %v2426_v17 = vrot.slane %v2419_v61, 2  ;;  %v2423_v20 = vrot.slane %v2417_v62, 2 }
 0x17b   : > { %v1697_v27 = vmul.f32 %v6766_v45, %v1695_v14  ;;  %v2509_v55 = vstv %s6781_s16  ;;  %s6910_s16 = sld [smem:[#allocation2 + $0x6f]] }
 0x17c   : > { %v1571_v26 = vpop.permute.xlu1 %1570  ;;  %v1569_v18 = vpop.permute.xlu0 %1568  ;;  %v2445_v30 = vrot.slane %v2439_v47, 2  ;;  %v2427_v34 = vsel %vm268_vm1, %v2424_v48, %v2426_v17 }
 0x17d   : > { %v1575_v35 = vadd.f32 %v1571_v26, %v1561_v2  ;;  %v1574_v5 = vadd.f32 %v1569_v18, %v1560_v16  ;;  %v2389_v16 = vsel %vm208_vm0, %v2386_v59, %v2388_v8  ;;  %v1729_v18 = vstv %s6750_s6  ;;  %s6880_s6 = sld [smem:[#allocation2 + $0x92]] }
 0x17e   : > { %2319 = vrot.lane.b32.xlu1 %v2314_v23, %s5659_s21  ;;  %2317 = vrot.lane.b32.xlu0 %v2313_v24, %s5659_s21  ;;  %v2440_v23 = vmul.f32 %v6774_v22, %v2437_v3  ;;  %v6778_v24 = vld [vmem:[%s5749_s14 + $0x30] sm:$0xff]  ;;  %v1732_v40 = vmul.f32 %v6774_v22, %v1729_v18 }
 0x17f   : > { %v1592_v42 = vadd.f32 %v1588_v36, %v1575_v35  ;;  %v1591_v44 = vadd.f32 %v1586_v19, %v1574_v5  ;;  %v2438_v36 = vmul.f32 %v6778_v24, %v2437_v3  ;;  %v2387_v19 = vsel %vm208_vm0, %v2385_v9, %v2386_v59 }
 0x180   : > { %v1609_v50 = vpop.permute.xlu1 %1608  ;;  %v1607_v52 = vpop.permute.xlu0 %1606  ;;  %v1696_v28 = vmul.f32 %v6778_v24, %v1695_v14  ;;  %v2425_v35 = vsel %vm268_vm1, %v2423_v20, %v2424_v48  ;;  %v2447_v5 = vrot.slane %v2440_v23, 2  ;;  %v1739_v59 = vrot.slane %v1732_v40, 1 }
 0x181   : > { %v1613_v6 = vadd.f32 %v1609_v50, %v1592_v42  ;;  %v1612_v7 = vadd.f32 %v1607_v52, %v1591_v44  ;;  %v2444_v37 = vrot.slane %v2438_v36, 2  ;;  %v1730_v44 = vmul.f32 %v6778_v24, %v1729_v18 }
 0x182   : > { %2333 = vrot.lane.b32.xlu1 %v2328_v63, %s5658_s17  ;;  %2331 = vrot.lane.b32.xlu0 %v2327_v39, %s5658_s17  ;;  %v1731_v39 = vmul.f32 %v6766_v45, %v1729_v18  ;;  %v2464_v50 = vstv %s6763_s7  ;;  %v2448_v52 = vsel %vm268_vm1, %v2445_v30, %v2447_v5  ;;  %v2480_v9 = vmul.f32 %v6469_v32, %v2478_v29  ;;  %s6888_s7 = sld [smem:[#allocation2 + $0x97]] }
 0x183   : > { %v2446_v54 = vsel %vm268_vm1, %v2444_v37, %v2445_v30  ;;  %v1736_v3 = vrot.slane %v1730_v44, 1  ;;  %v2465_v8 = vmul.f32 %v6474_v31, %v2464_v50 }
 0x184   : > { %v1630_v10 = vpop.permute.xlu1 %1629  ;;  %v1628_v12 = vpop.permute.xlu0 %1627  ;;  %v1737_v58 = vrot.slane %v1731_v39, 1 }
 0x185   : > { %v1634_v21 = vadd.f32 %v1630_v10, %v1613_v6  ;;  %v1633_v15 = vadd.f32 %v1628_v12, %v1612_v7  ;;  %v1788_v6 = vstv %s6786_s22  ;;  %v2466_v7 = vmul.f32 %v6469_v32, %v2464_v50  ;;  %s6925_s22 = sld [smem:[#allocation2 + $0x6c]] }
 0x186   : > { %2371 = vrot.lane.b32.xlu1 %v2368_v56, %s5659_s21  ;;  %2369 = vrot.lane.b32.xlu0 %v2366_v57, %s5659_s21  ;;  %v2530_v10 = vstv %s6790_s24  ;;  %v2511_v12 = vmul.f32 %v6469_v32, %v2509_v55  ;;  %v1790_v48 = vmul.f32 %v6766_v45, %v1788_v6  ;;  %v1738_v20 = vsel %vm208_vm0, %v1736_v3, %v1737_v58  ;;  %s6931_s24 = sld [smem:[#allocation2 + $0x9a]] }
 0x187   : > { %v1651_v1 = vadd.f32 %v1647_v11, %v1634_v21  ;;  %v1650_v2 = vadd.f32 %v1645_v13, %v1633_v15  ;;  %v2512_v11 = vmul.f32 %v6484_v0, %v2509_v55  ;;  %v2510_v13 = vmul.f32 %v6474_v31, %v2509_v55 }
 0x188   : > { %v1668_v25 = vpop.permute.xlu1 %1667  ;;  %v1666_v26 = vpop.permute.xlu0 %1665  ;;  %v1740_v15 = vsel %vm208_vm0, %v1737_v58, %v1739_v59  ;;  %v1791_v23 = vmul.f32 %v6774_v22, %v1788_v6  ;;  %v1789_v36 = vmul.f32 %v6778_v24, %v1788_v6  ;;  %v2517_v18 = vrot.slane %v2511_v12, 1 }
 0x189   : > { %v1672_v38 = vadd.f32 %v1668_v25, %v1651_v1  ;;  %v1671_v63 = vadd.f32 %v1666_v26, %v1650_v2  ;;  %v2532_v1 = vmul.f32 %v6469_v32, %v2530_v10  ;;  %v2568_v25 = vstv %s6800_s25  ;;  %s6940_s25 = sld [smem:[#allocation2 + $0x9d]] }
 0x18a   : > { %2392 = vrot.lane.b32.xlu1 %v2389_v16, %s5658_s17  ;;  %2390 = vrot.lane.b32.xlu0 %v2387_v19, %s5658_s17  ;;  %v2533_v19 = vmul.f32 %v6484_v0, %v2530_v10  ;;  %v2479_v26 = vmul.f32 %v6474_v31, %v2478_v29  ;;  %v1796_v5 = vrot.slane %v1790_v48, 2  ;;  %v1795_v39 = vrot.slane %v1789_v36, 2 }
 0x18b   : > { %v2570_v40 = vmul.f32 %v6469_v32, %v2568_v25  ;;  %v2589_v55 = vstv %s6820_s26  ;;  %s6943_s26 = sld [smem:[#allocation2 + $0x72]] }
 0x18c   : > { %v1689_v41 = vpop.permute.xlu1 %1688  ;;  %v1687_v42 = vpop.permute.xlu0 %1686  ;;  %v2540_v44 = vrot.slane %v2533_v19, 1 }
 0x18d   : > { %v1693_v46 = vadd.f32 %v1689_v41, %v1672_v38  ;;  %v1692_v49 = vadd.f32 %v1687_v42, %v1671_v63  ;;  %v1798_v63 = vrot.slane %v1791_v23, 2  ;;  %v2571_v41 = vmul.f32 %v6484_v0, %v2568_v25 }
 0x18e   : > { %2430 = vrot.lane.b32.xlu1 %v2427_v34, %s5659_s21  ;;  %2428 = vrot.lane.b32.xlu0 %v2425_v35, %s5659_s21  ;;  %v2516_v35 = vrot.slane %v2510_v13, 1  ;;  %v2538_v42 = vrot.slane %v2532_v1, 1 }
 0x18f   : > { %v1699_v56 = vadd.f32 %v1697_v27, %v1693_v46  ;;  %v1698_v57 = vadd.f32 %v1696_v28, %v1692_v49  ;;  %v2519_v27 = vrot.slane %v2512_v11, 1  ;;  %v2531_v28 = vmul.f32 %v6474_v31, %v2530_v10  ;;  %v6858_v10 = vld [vmem:[%s5749_s14 + $0x58] sm:$0x3] }
 0x190   : > { %v1709_v61 = vpop.permute.xlu1 %1708  ;;  %v1707_v62 = vpop.permute.xlu0 %1706  ;;  %v2569_v46 = vmul.f32 %v6474_v31, %v2568_v25  ;;  %v2518_v29 = vsel %vm208_vm0, %v2516_v35, %v2517_v18  ;;  %v1797_v31 = vsel %vm268_vm1, %v1795_v39, %v1796_v5  ;;  %v2578_v58 = vrot.slane %v2571_v41, 2 }
 0x191   : > { %v1713_v14 = vadd.f32 %v1709_v61, %v1699_v56  ;;  %v1712_v21 = vadd.f32 %v1707_v62, %v1698_v57  ;;  %v2520_v49 = vsel %vm208_vm0, %v2517_v18, %v2519_v27  ;;  %v2537_v50 = vrot.slane %v2531_v28, 1 }
 0x192   : > { %2451 = vrot.lane.b32.xlu1 %v2448_v52, %s5658_s17  ;;  %2449 = vrot.lane.b32.xlu0 %v2446_v54, %s5658_s17  ;;  %v1799_v56 = vsel %vm268_vm1, %v1796_v5, %v1798_v63  ;;  %v2576_v57 = vrot.slane %v2570_v40, 2  ;;  %v2541_v62 = vsel %vm208_vm0, %v2538_v42, %v2540_v44  ;;  %v2575_v3 = vrot.slane %v2569_v46, 2 }
 0x193   : > { %v2539_v6 = vsel %vm208_vm0, %v2537_v50, %v2538_v42  ;;  %v2592_v12 = vmul.f32 %v6858_v10, %v2589_v55  ;;  %v2619_v5 = vstv %s6847_s30  ;;  %v2664_v39 = vstv %s6861_s3  ;;  %s6962_s30 = sld [smem:[#allocation2 + $0xa0]] }
 0x194   : > { %v1723_v47 = vpop.permute.xlu1 %1722  ;;  %v1721_v17 = vpop.permute.xlu0 %1720  ;;  %v1940_v50 = vstv %s6868_s4  ;;  %s6990_s3 = sld [smem:[#allocation2 + $0xa1]] }
 0x195   : > { %v1727_v2 = vadd.f32 %v1723_v47, %v1713_v14  ;;  %v1726_v16 = vadd.f32 %v1721_v17, %v1712_v21  ;;  %v6864_v14 = vld [vmem:[%s5749_s14 + $0x48] sm:$0xff]  ;;  %v2579_v17 = vsel %vm268_vm1, %v2576_v57, %v2578_v58  ;;  %s7001_s4 = sld [smem:[#allocation2 + $0x78]] }
 0x196   : > { %2471 = vrot.lane.b32.xlu1 %v2466_v7, %s5659_s21  ;;  %2469 = vrot.lane.b32.xlu0 %v2465_v8, %s5659_s21  ;;  %v1847_v7 = vstv %s6832_s27  ;;  %v6854_v8 = vld [vmem:[%s5749_s14 + $0x50] sm:$0xff]  ;;  %v2590_v21 = vmul.f32 %v6864_v14, %v2589_v55  ;;  %s6947_s27 = sld [smem:[#allocation2 + $0x9e]] }
 0x197   : > { %v1744_v30 = vadd.f32 %v1740_v15, %v1727_v2  ;;  %v1743_v34 = vadd.f32 %v1738_v20, %v1726_v16  ;;  %v1881_v15 = vstv %s6834_s29  ;;  %v2577_v20 = vsel %vm268_vm1, %v2575_v3, %v2576_v57  ;;  %s6953_s29 = sld [smem:[#allocation2 + $0x9b]] }
 0x198   : > { %v1761_v37 = vpop.permute.xlu1 %1760  ;;  %v1759_v38 = vpop.permute.xlu0 %1758  ;;  %v1849_v23 = vmul.f32 %v6854_v8, %v1847_v7  ;;  %v1848_v36 = vmul.f32 %v6864_v14, %v1847_v7  ;;  %v2599_v2 = vrot.slane %v2592_v12, 2  ;;  %v1883_v16 = vmul.f32 %v6854_v8, %v1881_v15 }
 0x199   : > { %v1765_v52 = vadd.f32 %v1761_v37, %v1744_v30  ;;  %v1764_v54 = vadd.f32 %v1759_v38, %v1743_v34  ;;  %v1884_v19 = vmul.f32 %v6858_v10, %v1881_v15  ;;  %v2596_v18 = vrot.slane %v2590_v21, 2 }
 0x19a   : > { %2485 = vrot.lane.b32.xlu1 %v2480_v9, %s5658_s17  ;;  %2483 = vrot.lane.b32.xlu0 %v2479_v26, %s5658_s17  ;;  %v2591_v9 = vmul.f32 %v6854_v8, %v2589_v55  ;;  %v1882_v27 = vmul.f32 %v6864_v14, %v1881_v15  ;;  %v1889_v38 = vrot.slane %v1883_v16, 1  ;;  %v2685_v55 = vstv %s6874_s5  ;;  %s7006_s5 = sld [smem:[#allocation2 + $0x75]] }
 0x19b   : > { %v1891_v63 = vrot.slane %v1884_v19, 1  ;;  %v1941_v7 = vmul.f32 %v6864_v14, %v1940_v50  ;;  %v2688_v12 = vmul.f32 %v6606_v51, %v2685_v55 }
 0x19c   : > { %v1782_v32 = vpop.permute.xlu1 %1781  ;;  %v1780_v0 = vpop.permute.xlu0 %1779  ;;  %v2597_v1 = vrot.slane %v2591_v9, 2  ;;  %v1888_v44 = vrot.slane %v1882_v27, 1  ;;  %v2687_v9 = vmul.f32 %v6599_v43, %v2685_v55 }
 0x19d   : > { %v1786_v59 = vadd.f32 %v1782_v32, %v1765_v52  ;;  %v1785_v61 = vadd.f32 %v1780_v0, %v1764_v54  ;;  %v2621_v52 = vmul.f32 %v6599_v43, %v2619_v5  ;;  %v2666_v54 = vmul.f32 %v6599_v43, %v2664_v39 }
 0x19e   : > { %2523 = vrot.lane.b32.xlu1 %v2520_v49, %s5659_s21  ;;  %2521 = vrot.lane.b32.xlu0 %v2518_v29, %s5659_s21  ;;  %v2600_v37 = vsel %vm268_vm1, %v2597_v1, %v2599_v2  ;;  %v2598_v42 = vsel %vm268_vm1, %v2596_v18, %v2597_v1  ;;  %v2667_v29 = vmul.f32 %v6606_v51, %v2664_v39  ;;  %v2693_v18 = vrot.slane %v2687_v9, 1 }
 0x19f   : > { %v1803_v11 = vadd.f32 %v1799_v56, %v1786_v59  ;;  %v1802_v13 = vadd.f32 %v1797_v31, %v1785_v61  ;;  %v2620_v32 = vmul.f32 %v6610_v53, %v2619_v5  ;;  %v1892_v0 = vsel %vm208_vm0, %v1889_v38, %v1891_v63 }
 0x1a0   : > { %v1820_v48 = vpop.permute.xlu1 %1819  ;;  %v1818_v47 = vpop.permute.xlu0 %1817  ;;  %v2633_v56 = vstv %s6880_s6  ;;  %v2665_v31 = vmul.f32 %v6610_v53, %v2664_v39  ;;  %v1890_v59 = vsel %vm208_vm0, %v1888_v44, %v1889_v38  ;;  %v1942_v61 = vmul.f32 %v6854_v8, %v1940_v50  ;;  %s7020_s6 = sld [smem:[#allocation2 + $0xa3]] }
 0x1a1   : > { %v1824_v25 = vadd.f32 %v1820_v48, %v1803_v11  ;;  %v1823_v26 = vadd.f32 %v1818_v47, %v1802_v13  ;;  %v2672_v21 = vrot.slane %v2666_v54, 1  ;;  %v2674_v15 = vrot.slane %v2667_v29, 1 }
 0x1a2   : > { %2544 = vrot.lane.b32.xlu1 %v2541_v62, %s5658_s17  ;;  %2542 = vrot.lane.b32.xlu0 %v2539_v6, %s5658_s17  ;;  %v1943_v6 = vmul.f32 %v6858_v10, %v1940_v50  ;;  %v2635_v48 = vmul.f32 %v6599_v43, %v2633_v56  ;;  %v2634_v47 = vmul.f32 %v6610_v53, %v2633_v56  ;;  %v1948_v1 = vrot.slane %v1942_v61, 2 }
 0x1a3   : > { %v2686_v2 = vmul.f32 %v6610_v53, %v2685_v55  ;;  %v2695_v27 = vrot.slane %v2688_v12, 1  ;;  %v2744_v39 = vstv %s6904_s8  ;;  %v2036_v54 = vstv %s6910_s16  ;;  %s7031_s8 = sld [smem:[#allocation2 + $0xa6]] }
 0x1a4   : > { %v1841_v28 = vpop.permute.xlu1 %1840  ;;  %v1839_v30 = vpop.permute.xlu0 %1838  ;;  %s7034_s16 = sld [smem:[#allocation2 + $0x7b]] }
 0x1a5   : > { %v1845_v34 = vadd.f32 %v1841_v28, %v1824_v25  ;;  %v1844_v35 = vadd.f32 %v1839_v30, %v1823_v26  ;;  %v1950_v25 = vrot.slane %v1943_v6, 2  ;;  %v1947_v26 = vrot.slane %v1941_v7, 2 }
 0x1a6   : > { %2582 = vrot.lane.b32.xlu1 %v2579_v17, %s5659_s21  ;;  %2580 = vrot.lane.b32.xlu0 %v2577_v20, %s5659_s21  ;;  %v2671_v17 = vrot.slane %v2665_v31, 1  ;;  %v2723_v20 = vstv %s6888_s7  ;;  %v2675_v28 = vsel %vm208_vm0, %v2672_v21, %v2674_v15  ;;  %v2692_v63 = vrot.slane %v2686_v2, 1  ;;  %s7028_s7 = sld [smem:[#allocation2 + $0xa4]] }
 0x1a7   : > { %v1851_v40 = vadd.f32 %v1849_v23, %v1845_v34  ;;  %v1850_v41 = vadd.f32 %v1848_v36, %v1844_v35  ;;  %v2725_v30 = vmul.f32 %v6599_v43, %v2723_v20  ;;  %v2726_v35 = vmul.f32 %v6606_v51, %v2723_v20 }
 0x1a8   : > { %v1861_v46 = vpop.permute.xlu1 %1860  ;;  %v1859_v49 = vpop.permute.xlu0 %1858  ;;  %v2673_v34 = vsel %vm208_vm0, %v2671_v17, %v2672_v21  ;;  %v2724_v5 = vmul.f32 %v6610_v53, %v2723_v20  ;;  %v1949_v44 = vsel %vm268_vm1, %v1947_v26, %v1948_v1  ;;  %v2037_v6 = vmul.f32 %v6610_v53, %v2036_v54 }
 0x1a9   : > { %v1865_v57 = vadd.f32 %v1861_v46, %v1851_v40  ;;  %v1864_v58 = vadd.f32 %v1859_v49, %v1850_v41  ;;  %v2696_v46 = vsel %vm208_vm0, %v2693_v18, %v2695_v27  ;;  %v2733_v29 = vrot.slane %v2726_v35, 2 }
 0x1aa   : > { %2603 = vrot.lane.b32.xlu1 %v2600_v37, %s5658_s17  ;;  %2601 = vrot.lane.b32.xlu0 %v2598_v42, %s5658_s17  ;;  %v1951_v42 = vsel %vm268_vm1, %v1948_v1, %v1950_v25  ;;  %v2730_v55 = vrot.slane %v2724_v5, 2  ;;  %v2771_v17 = vstv %s6931_s24  ;;  %v2043_v2 = vrot.slane %v2037_v6, 1  ;;  %s7047_s24 = sld [smem:[#allocation2 + $0xa9]] }
 0x1ab   : > { %v2773_v35 = vmul.f32 %v6686_v33, %v2771_v17  ;;  %v2095_v5 = vstv %s6943_s26  ;;  %s7088_s26 = sld [smem:[#allocation2 + $0x7e]] }
 0x1ac   : > { %v1875_v62 = vpop.permute.xlu1 %1874  ;;  %v1873_v3 = vpop.permute.xlu0 %1872 }
 0x1ad   : > { %v1879_v11 = vadd.f32 %v1875_v62, %v1865_v57  ;;  %v1878_v13 = vadd.f32 %v1873_v3, %v1864_v58  ;;  %v2694_v57 = vsel %vm208_vm0, %v2692_v63, %v2693_v18  ;;  %v2745_v58 = vmul.f32 %v6610_v53, %v2744_v39 }
 0x1ae   : > { %2626 = vrot.lane.b32.xlu1 %v2621_v52, %s5659_s21  ;;  %2624 = vrot.lane.b32.xlu0 %v2620_v32, %s5659_s21  ;;  %v2731_v52 = vrot.slane %v2725_v30, 2  ;;  %v2746_v32 = vmul.f32 %v6599_v43, %v2744_v39  ;;  %v2038_v62 = vmul.f32 %v6599_v43, %v2036_v54  ;;  %v2039_v3 = vmul.f32 %v6606_v51, %v2036_v54 }
 0x1af   : > { %v1896_v23 = vadd.f32 %v1892_v0, %v1879_v11  ;;  %v1895_v36 = vadd.f32 %v1890_v59, %v1878_v13  ;;  %v2747_v0 = vmul.f32 %v6606_v51, %v2744_v39  ;;  %v2004_v51 = vstv %s6925_s22  ;;  %s7039_s22 = sld [smem:[#allocation2 + $0xa7]] }
 0x1b0   : > { %v1913_v16 = vpop.permute.xlu1 %1912  ;;  %v1911_v19 = vpop.permute.xlu0 %1910  ;;  %v2734_v7 = vsel %vm268_vm1, %v2731_v52, %v2733_v29  ;;  %v2732_v9 = vsel %vm268_vm1, %v2730_v55, %v2731_v52  ;;  %v2752_v12 = vrot.slane %v2746_v32, 2  ;;  %v2751_v15 = vrot.slane %v2745_v58, 2  ;;  %v6993_v55 = vld [vmem:[%s5749_s14] sm:$0xff] }
 0x1b1   : > { %v1917_v37 = vadd.f32 %v1913_v16, %v1896_v23  ;;  %v1916_v38 = vadd.f32 %v1911_v19, %v1895_v36  ;;  %v2754_v11 = vrot.slane %v2747_v0, 2  ;;  %v2044_v20 = vrot.slane %v2038_v62, 1 }
 0x1b2   : > { %2640 = vrot.lane.b32.xlu1 %v2635_v48, %s5658_s17  ;;  %2638 = vrot.lane.b32.xlu0 %v2634_v47, %s5658_s17  ;;  %v2046_v1 = vrot.slane %v2039_v3, 1  ;;  %v2006_v16 = vmul.f32 %v6599_v43, %v2004_v51  ;;  %v2005_v19 = vmul.f32 %v6610_v53, %v2004_v51  ;;  %v2753_v27 = vsel %vm268_vm1, %v2751_v15, %v2752_v12 }
 0x1b3   : > { %v2755_v25 = vsel %vm268_vm1, %v2752_v12, %v2754_v11  ;;  %v2772_v43 = vmul.f32 %v6696_v4, %v2771_v17  ;;  %v2785_v63 = vstv %s6953_s29  ;;  %v2096_v32 = vmul.f32 %v6993_v55, %v2095_v5  ;;  %s7103_s29 = sld [smem:[#allocation2 + $0xaf]] }
 0x1b4   : > { %v1934_v40 = vpop.permute.xlu1 %1933  ;;  %v1932_v41 = vpop.permute.xlu0 %1931  ;;  %v2047_v53 = vsel %vm208_vm0, %v2044_v20, %v2046_v1 }
 0x1b5   : > { %v1938_v49 = vadd.f32 %v1934_v40, %v1917_v37  ;;  %v1937_v50 = vadd.f32 %v1932_v41, %v1916_v38  ;;  %v2045_v37 = vsel %vm208_vm0, %v2043_v2, %v2044_v20  ;;  %v2837_v38 = vstv %s6947_s27  ;;  %s7090_s27 = sld [smem:[#allocation2 + $0x81]] }
 0x1b6   : > { %2678 = vrot.lane.b32.xlu1 %v2675_v28, %s5659_s21  ;;  %2676 = vrot.lane.b32.xlu0 %v2673_v34, %s5659_s21  ;;  %v2816_v28 = vstv %s6940_s25  ;;  %v2839_v0 = vmul.f32 %v6686_v33, %v2837_v38  ;;  %v2102_v15 = vrot.slane %v2096_v32, 2  ;;  %s7074_s25 = sld [smem:[#allocation2 + $0xaa]] }
 0x1b7   : > { %v1955_v56 = vadd.f32 %v1951_v42, %v1938_v49  ;;  %v1954_v31 = vadd.f32 %v1949_v44, %v1937_v50  ;;  %v2818_v39 = vmul.f32 %v6686_v33, %v2816_v28  ;;  %v2819_v40 = vmul.f32 %v6690_v60, %v2816_v28  ;;  %v6987_v50 = vld [vmem:[%s5749_s14 + $0x10] sm:$0x3] }
 0x1b8   : > { %v1972_v59 = vpop.permute.xlu1 %1971  ;;  %v1970_v61 = vpop.permute.xlu0 %1969  ;;  %v2817_v41 = vmul.f32 %v6696_v4, %v2816_v28  ;;  %v2098_v52 = vmul.f32 %v6987_v50, %v2095_v5 }
 0x1b9   : > { %v1976_v13 = vadd.f32 %v1972_v59, %v1955_v56  ;;  %v1975_v21 = vadd.f32 %v1970_v61, %v1954_v31  ;;  %v2840_v56 = vmul.f32 %v6690_v60, %v2837_v38  ;;  %v2838_v31 = vmul.f32 %v6696_v4, %v2837_v38 }
 0x1ba   : > { %2699 = vrot.lane.b32.xlu1 %v2696_v46, %s5658_s17  ;;  %2697 = vrot.lane.b32.xlu0 %v2694_v57, %s5658_s17  ;;  %v6983_v46 = vld [vmem:[%s5749_s14 + $0x8] sm:$0xff]  ;;  %v2787_v59 = vmul.f32 %v6686_v33, %v2785_v63  ;;  %v2786_v61 = vmul.f32 %v6696_v4, %v2785_v63  ;;  %v2824_v62 = vrot.slane %v2818_v39, 1  ;;  %v2826_v3 = vrot.slane %v2819_v40, 1 }
 0x1bb   : > { %v2097_v49 = vmul.f32 %v6983_v46, %v2095_v5  ;;  %v2823_v6 = vrot.slane %v2817_v41, 1  ;;  %v2844_v17 = vrot.slane %v2838_v31, 1  ;;  %v2154_v38 = vstv %s7006_s5  ;;  %s7128_s5 = sld [smem:[#allocation2 + $0xb0]] }
 0x1bc   : > { %v1993_v48 = vpop.permute.xlu1 %1992  ;;  %v1991_v47 = vpop.permute.xlu0 %1990  ;;  %v2155_v31 = vmul.f32 %v6696_v4, %v2154_v38 }
 0x1bd   : > { %v1997_v23 = vadd.f32 %v1993_v48, %v1976_v13  ;;  %v1996_v36 = vadd.f32 %v1991_v47, %v1975_v21  ;;  %v2103_v11 = vrot.slane %v2097_v49, 2  ;;  %v2105_v13 = vrot.slane %v2098_v52, 2 }
 0x1be   : > { %2737 = vrot.lane.b32.xlu1 %v2734_v7, %s5659_s21  ;;  %2735 = vrot.lane.b32.xlu0 %v2732_v9, %s5659_s21  ;;  %v2875_v7 = vstv %s6962_s30  ;;  %v2845_v48 = vrot.slane %v2839_v0, 1  ;;  %v2847_v47 = vrot.slane %v2840_v56, 1  ;;  %s7111_s30 = sld [smem:[#allocation2 + $0xac]] }
 0x1bf   : > { %v1999_v26 = vmax.f32 %v1997_v23, 0.0  ;;  %v1998_v18 = vmax.f32 %v1996_v36, 0.0  ;;  %v2877_v20 = vmul.f32 %v6686_v33, %v2875_v7  ;;  %v2827_v23 = vsel %vm208_vm0, %v2824_v62, %v2826_v3 }
 0x1c0   : > { %v2016_v30 = vpop.permute.xlu1 %2015  ;;  %v2014_v34 = vpop.permute.xlu0 %2013  ;;  %v2825_v36 = vsel %vm208_vm0, %v2823_v6, %v2824_v62  ;;  %v2878_v1 = vmul.f32 %v6690_v60, %v2875_v7  ;;  %v2104_v28 = vsel %vm268_vm1, %v2102_v15, %v2103_v11  ;;  %v2923_v6 = vstv %s7020_s6  ;;  %s7131_s6 = sld [smem:[#allocation2 + $0xb2]] }
 0x1c1   : > { %5264 = vst.msk [vmem:[%s6295_s28 + $0x28] sm:$0xff] %vm778_vm2, %v1999_v26  ;;  %5263 = vst.msk [vmem:[%s6295_s28 + $0x20] sm:$0xff] %vm778_vm2, %v1998_v18  ;;  %v2020_v42 = vadd.f32 %v2016_v30, %v2006_v16  ;;  %v2019_v44 = vadd.f32 %v2014_v34, %v2005_v19  ;;  %v2876_v19 = vmul.f32 %v6696_v4, %v2875_v7 }
 0x1c2   : > { %2758 = vrot.lane.b32.xlu1 %v2755_v25, %s5658_s17  ;;  %2756 = vrot.lane.b32.xlu0 %v2753_v27, %s5658_s17  ;;  %v2896_v25 = vstv %s6990_s3  ;;  %v2106_v27 = vsel %vm268_vm1, %v2103_v11, %v2105_v13  ;;  %v2848_v30 = vsel %vm208_vm0, %v2845_v48, %v2847_v47  ;;  %v2846_v34 = vsel %vm208_vm0, %v2844_v17, %v2845_v48  ;;  %s7115_s3 = sld [smem:[#allocation2 + $0x84]] }
 0x1c3   : > { %v2898_v63 = vmul.f32 %v6686_v33, %v2896_v25  ;;  %v2899_v39 = vmul.f32 %v6690_v60, %v2896_v25  ;;  %v2968_v48 = vstv %s7031_s8  ;;  %s7165_s8 = sld [smem:[#allocation2 + $0x87]] }
 0x1c4   : > { %v2030_v54 = vpop.permute.xlu1 %2029  ;;  %v2028_v29 = vpop.permute.xlu0 %2027 }
 0x1c5   : > { %v2034_v57 = vadd.f32 %v2030_v54, %v2020_v42  ;;  %v2033_v58 = vadd.f32 %v2028_v29, %v2019_v44  ;;  %v2882_v42 = vrot.slane %v2876_v19, 2  ;;  %v2897_v44 = vmul.f32 %v6696_v4, %v2896_v25 }
 0x1c6   : > { %2778 = vrot.lane.b32.xlu1 %v2773_v35, %s5659_s21  ;;  %2776 = vrot.lane.b32.xlu0 %v2772_v43, %s5659_s21  ;;  %v2883_v43 = vrot.slane %v2877_v20, 2  ;;  %v2156_v29 = vmul.f32 %v6686_v33, %v2154_v38  ;;  %v2925_v20 = vmul.f32 %v6766_v45, %v2923_v6  ;;  %v2989_v19 = vstv %s7039_s22  ;;  %v7078_v38 = vld [vmem:[%s5749_s14 + $0x18] sm:$0xff]  ;;  %s7189_s22 = sld [smem:[#allocation2 + $0xb5]] }
 0x1c7   : > { %v2051_v9 = vadd.f32 %v2047_v53, %v2034_v57  ;;  %v2050_v12 = vadd.f32 %v2045_v37, %v2033_v58  ;;  %v2188_v53 = vstv %s7001_s4  ;;  %v2885_v37 = vrot.slane %v2878_v1, 2  ;;  %s7121_s4 = sld [smem:[#allocation2 + $0xad]] }
 0x1c8   : > { %v2068_v21 = vpop.permute.xlu1 %2067  ;;  %v2066_v51 = vpop.permute.xlu0 %2065  ;;  %v2190_v54 = vmul.f32 %v6686_v33, %v2188_v53  ;;  %v2191_v32 = vmul.f32 %v6690_v60, %v2188_v53  ;;  %v2189_v0 = vmul.f32 %v6696_v4, %v2188_v53  ;;  %v2904_v57 = vrot.slane %v2898_v63, 2 }
 0x1c9   : > { %v2072_v2 = vadd.f32 %v2068_v21, %v2051_v9  ;;  %v2071_v16 = vadd.f32 %v2066_v51, %v2050_v12  ;;  %v2886_v56 = vsel %vm268_vm1, %v2883_v43, %v2885_v37  ;;  %v2906_v58 = vrot.slane %v2899_v39, 2 }
 0x1ca   : > { %2792 = vrot.lane.b32.xlu1 %v2787_v59, %s5658_s17  ;;  %2790 = vrot.lane.b32.xlu0 %v2786_v61, %s5658_s17  ;;  %v2884_v33 = vsel %vm268_vm1, %v2882_v42, %v2883_v43  ;;  %v2903_v62 = vrot.slane %v2897_v44, 2  ;;  %v2196_v7 = vrot.slane %v2190_v54, 1  ;;  %v2198_v11 = vrot.slane %v2191_v32, 1 }
 0x1cb   : > { %v2195_v13 = vrot.slane %v2189_v0, 1  ;;  %v2907_v4 = vsel %vm268_vm1, %v2904_v57, %v2906_v58  ;;  %v2970_v25 = vmul.f32 %v6766_v45, %v2968_v48  ;;  %v2991_v39 = vmul.f32 %v6766_v45, %v2989_v19 }
 0x1cc   : > { %v2089_v26 = vpop.permute.xlu1 %2088  ;;  %v2087_v18 = vpop.permute.xlu0 %2086  ;;  %v2905_v15 = vsel %vm268_vm1, %v2903_v62, %v2904_v57  ;;  %v2199_v1 = vsel %vm208_vm0, %v2196_v7, %v2198_v11  ;;  %v2990_v32 = vmul.f32 %v6778_v24, %v2989_v19 }
 0x1cd   : > { %v2093_v35 = vadd.f32 %v2089_v26, %v2072_v2  ;;  %v2092_v5 = vadd.f32 %v2087_v18, %v2071_v16  ;;  %v2197_v2 = vsel %vm208_vm0, %v2195_v13, %v2196_v7  ;;  %v2937_v16 = vstv %s7028_s7  ;;  %s7150_s7 = sld [smem:[#allocation2 + $0xb3]] }
 0x1ce   : > { %2830 = vrot.lane.b32.xlu1 %v2827_v23, %s5659_s21  ;;  %2828 = vrot.lane.b32.xlu0 %v2825_v36, %s5659_s21  ;;  %v2924_v23 = vmul.f32 %v6778_v24, %v2923_v6  ;;  %v2247_v36 = vstv %s7034_s16  ;;  %v2971_v26 = vmul.f32 %v6774_v22, %v2968_v48  ;;  %v2969_v18 = vmul.f32 %v6778_v24, %v2968_v48  ;;  %s7174_s16 = sld [smem:[#allocation2 + $0x8a]] }
 0x1cf   : > { %v2110_v40 = vadd.f32 %v2106_v27, %v2093_v35  ;;  %v2109_v41 = vadd.f32 %v2104_v28, %v2092_v5  ;;  %v7071_v35 = vld [vmem:[%s5749_s14 + $0x28] sm:$0x3]  ;;  %v2939_v37 = vmul.f32 %v6766_v45, %v2937_v16  ;;  %v2248_v63 = vmul.f32 %v7078_v38, %v2247_v36 }
 0x1d0   : > { %v2127_v49 = vpop.permute.xlu1 %2126  ;;  %v2125_v52 = vpop.permute.xlu0 %2124  ;;  %v2250_v5 = vmul.f32 %v7071_v35, %v2247_v36  ;;  %v2938_v44 = vmul.f32 %v6778_v24, %v2937_v16  ;;  %v2978_v54 = vrot.slane %v2971_v26, 1  ;;  %v2306_v16 = vstv %s7088_s26  ;;  %s7204_s26 = sld [smem:[#allocation2 + $0xb9]] }
 0x1d1   : > { %v2131_v59 = vadd.f32 %v2127_v49, %v2110_v40  ;;  %v2130_v61 = vadd.f32 %v2125_v52, %v2109_v41  ;;  %v2992_v40 = vmul.f32 %v6774_v22, %v2989_v19  ;;  %v3027_v49 = vstv %s7047_s24  ;;  %s7195_s24 = sld [smem:[#allocation2 + $0xb8]] }
 0x1d2   : > { %2851 = vrot.lane.b32.xlu1 %v2848_v30, %s5658_s17  ;;  %2849 = vrot.lane.b32.xlu0 %v2846_v34, %s5658_s17  ;;  %v7067_v30 = vld [vmem:[%s5749_s14 + $0x20] sm:$0xff]  ;;  %v2976_v52 = vrot.slane %v2970_v25, 1  ;;  %v2257_v57 = vrot.slane %v2250_v5, 2  ;;  %v3028_v6 = vmul.f32 %v6778_v24, %v3027_v49 }
 0x1d3   : > { %v2249_v34 = vmul.f32 %v7067_v30, %v2247_v36  ;;  %v2999_v62 = vrot.slane %v2992_v40, 1 }
 0x1d4   : > { %v2148_v60 = vpop.permute.xlu1 %2147  ;;  %v2146_v3 = vpop.permute.xlu0 %2145  ;;  %v2979_v7 = vsel %vm208_vm0, %v2976_v52, %v2978_v54 }
 0x1d5   : > { %v2152_v9 = vadd.f32 %v2148_v60, %v2131_v59  ;;  %v2151_v12 = vadd.f32 %v2146_v3, %v2130_v61  ;;  %v2254_v61 = vrot.slane %v2248_v63, 2  ;;  %v3029_v60 = vmul.f32 %v6766_v45, %v3027_v49 }
 0x1d6   : > { %2889 = vrot.lane.b32.xlu1 %v2886_v56, %s5659_s21  ;;  %2887 = vrot.lane.b32.xlu0 %v2884_v33, %s5659_s21  ;;  %v2997_v33 = vrot.slane %v2991_v39, 1  ;;  %v3030_v3 = vmul.f32 %v6774_v22, %v3027_v49  ;;  %v2307_v63 = vmul.f32 %v6778_v24, %v2306_v16 }
 0x1d7   : > { %v2158_v21 = vadd.f32 %v2156_v29, %v2152_v9  ;;  %v2157_v51 = vadd.f32 %v2155_v31, %v2151_v12  ;;  %v2975_v29 = vrot.slane %v2969_v18, 1  ;;  %v2255_v31 = vrot.slane %v2249_v34, 2 }
 0x1d8   : > { %v2168_v47 = vpop.permute.xlu1 %2167  ;;  %v2166_v17 = vpop.permute.xlu0 %2165  ;;  %v2996_v9 = vrot.slane %v2990_v32, 1  ;;  %v3037_v36 = vrot.slane %v3030_v3, 2 }
 0x1d9   : > { %v2172_v27 = vadd.f32 %v2168_v47, %v2158_v21  ;;  %v2171_v28 = vadd.f32 %v2166_v17, %v2157_v51  ;;  %v2977_v13 = vsel %vm208_vm0, %v2975_v29, %v2976_v52  ;;  %v2256_v48 = vsel %vm268_vm1, %v2254_v61, %v2255_v31 }
 0x1da   : > { %2910 = vrot.lane.b32.xlu1 %v2907_v4, %s5658_s17  ;;  %2908 = vrot.lane.b32.xlu0 %v2905_v15, %s5658_s17  ;;  %v3048_v4 = vstv %s7074_s25  ;;  %v2258_v15 = vsel %vm268_vm1, %v2255_v31, %v2257_v57  ;;  %v3000_v47 = vsel %vm208_vm0, %v2997_v33, %v2999_v62  ;;  %v3035_v17 = vrot.slane %v3029_v60, 2  ;;  %s7200_s25 = sld [smem:[#allocation2 + $0x8d]] }
 0x1db   : > { %v3050_v19 = vmul.f32 %v6766_v45, %v3048_v4  ;;  %v3051_v25 = vmul.f32 %v6774_v22, %v3048_v4  ;;  %v3120_v31 = vstv %s7103_s29  ;;  %s7219_s29 = sld [smem:[#allocation2 + $0xbb]] }
 0x1dc   : > { %v2182_v43 = vpop.permute.xlu1 %2181  ;;  %v2180_v53 = vpop.permute.xlu0 %2179  ;;  %v3122_v3 = vmul.f32 %v6854_v8, %v3120_v31 }
 0x1dd   : > { %v2186_v41 = vadd.f32 %v2182_v43, %v2172_v27  ;;  %v2185_v42 = vadd.f32 %v2180_v53, %v2171_v28  ;;  %v3049_v27 = vmul.f32 %v6778_v24, %v3048_v4  ;;  %v2340_v28 = vstv %s7090_s27  ;;  %s7211_s27 = sld [smem:[#allocation2 + $0xb6]] }
 0x1de   : > { %2930 = vrot.lane.b32.xlu1 %v2925_v20, %s5659_s21  ;;  %2928 = vrot.lane.b32.xlu0 %v2924_v23, %s5659_s21  ;;  %v3038_v43 = vsel %vm268_vm1, %v3035_v17, %v3037_v36  ;;  %v3056_v39 = vrot.slane %v3050_v19, 2  ;;  %v2342_v40 = vmul.f32 %v6766_v45, %v2340_v28  ;;  %v3058_v52 = vrot.slane %v3051_v25, 2  ;;  %v7162_v25 = vld [vmem:[%s5749_s14 + $0x30] sm:$0xff] }
 0x1df   : > { %v2203_v0 = vadd.f32 %v2199_v1, %v2186_v41  ;;  %v2202_v56 = vadd.f32 %v2197_v2, %v2185_v42  ;;  %v3034_v1 = vrot.slane %v3028_v6, 2  ;;  %v2998_v2 = vsel %vm208_vm0, %v2996_v9, %v2997_v33 }
 0x1e0   : > { %v2220_v58 = vpop.permute.xlu1 %2219  ;;  %v2218_v59 = vpop.permute.xlu0 %2217  ;;  %v2343_v41 = vmul.f32 %v6774_v22, %v2340_v28  ;;  %v2341_v42 = vmul.f32 %v6778_v24, %v2340_v28  ;;  %v3055_v54 = vrot.slane %v3049_v27, 2  ;;  %v2348_v22 = vrot.slane %v2342_v40, 1 }
 0x1e1   : > { %v2224_v12 = vadd.f32 %v2220_v58, %v2203_v0  ;;  %v2223_v11 = vadd.f32 %v2218_v59, %v2202_v56  ;;  %v3036_v53 = vsel %vm268_vm1, %v3034_v1, %v3035_v17  ;;  %v3059_v61 = vsel %vm268_vm1, %v3056_v39, %v3058_v52 }
 0x1e2   : > { %2944 = vrot.lane.b32.xlu1 %v2939_v37, %s5658_s17  ;;  %2942 = vrot.lane.b32.xlu0 %v2938_v44, %s5658_s17  ;;  %v2308_v37 = vmul.f32 %v6766_v45, %v2306_v16  ;;  %v3075_v45 = vstv %s7111_s30  ;;  %v2350_v24 = vrot.slane %v2343_v41, 1  ;;  %v2347_v57 = vrot.slane %v2341_v42, 1  ;;  %s7238_s30 = sld [smem:[#allocation2 + $0xbc]] }
 0x1e3   : > { %v3057_v33 = vsel %vm268_vm1, %v3055_v54, %v3056_v39  ;;  %v3123_v6 = vmul.f32 %v6858_v10, %v3120_v31  ;;  %v3077_v9 = vmul.f32 %v6854_v8, %v3075_v45  ;;  %v3128_v16 = vrot.slane %v3122_v3, 1 }
 0x1e4   : > { %v2241_v21 = vpop.permute.xlu1 %2240  ;;  %v2239_v51 = vpop.permute.xlu0 %2238  ;;  %v2349_v4 = vsel %vm208_vm0, %v2347_v57, %v2348_v22  ;;  %v2458_v3 = vstv %s7165_s8  ;;  %s7285_s8 = sld [smem:[#allocation2 + $0x96]] }
 0x1e5   : > { %v2245_v20 = vadd.f32 %v2241_v21, %v2224_v12  ;;  %v2244_v23 = vadd.f32 %v2239_v51, %v2223_v11  ;;  %v3076_v12 = vmul.f32 %v6864_v14, %v3075_v45  ;;  %v3089_v11 = vstv %s7121_s4  ;;  %s7265_s4 = sld [smem:[#allocation2 + $0x90]] }
 0x1e6   : > { %2982 = vrot.lane.b32.xlu1 %v2979_v7, %s5659_s21  ;;  %2980 = vrot.lane.b32.xlu0 %v2977_v13, %s5659_s21  ;;  %v2399_v7 = vstv %s7115_s3  ;;  %v2351_v13 = vsel %vm208_vm0, %v2348_v22, %v2350_v24  ;;  %v3121_v21 = vmul.f32 %v6864_v14, %v3120_v31  ;;  %v3141_v51 = vstv %s7128_s5  ;;  %s7250_s3 = sld [smem:[#allocation2 + $0x93]] }
 0x1e7   : > { %v2262_v26 = vadd.f32 %v2258_v15, %v2245_v20  ;;  %v2261_v18 = vadd.f32 %v2256_v48, %v2244_v23  ;;  %v7157_v20 = vld [vmem:[%s5749_s14 + $0x40] sm:$0x3]  ;;  %v3130_v19 = vrot.slane %v3123_v6, 1  ;;  %v3143_v28 = vmul.f32 %v6854_v8, %v3141_v51  ;;  %s7271_s5 = sld [smem:[#allocation2 + $0xbe]] }
 0x1e8   : > { %v2279_v34 = vpop.permute.xlu1 %2278  ;;  %v2277_v5 = vpop.permute.xlu0 %2276  ;;  %v2402_v23 = vmul.f32 %v7157_v20, %v2399_v7  ;;  %v3200_v45 = vstv %s7150_s7  ;;  %s7282_s7 = sld [smem:[#allocation2 + $0xc1]] }
 0x1e9   : > { %v2283_v44 = vadd.f32 %v2279_v34, %v2262_v26  ;;  %v2282_v49 = vadd.f32 %v2277_v5, %v2261_v18  ;;  %v2400_v26 = vmul.f32 %v7162_v25, %v2399_v7  ;;  %v3179_v34 = vstv %s7131_s6  ;;  %s7278_s6 = sld [smem:[#allocation2 + $0xbf]] }
 0x1ea   : > { %3003 = vrot.lane.b32.xlu1 %v3000_v47, %s5658_s17  ;;  %3001 = vrot.lane.b32.xlu0 %v2998_v2, %s5658_s17  ;;  %v7153_v47 = vld [vmem:[%s5749_s14 + $0x38] sm:$0xff]  ;;  %v3091_v2 = vmul.f32 %v6854_v8, %v3089_v11  ;;  %v3090_v5 = vmul.f32 %v6864_v14, %v3089_v11  ;;  %v2409_v41 = vrot.slane %v2402_v23, 2  ;;  %v3181_v52 = vmul.f32 %v6854_v8, %v3179_v34 }
 0x1eb   : > { %v2401_v17 = vmul.f32 %v7153_v47, %v2399_v7  ;;  %v3182_v54 = vmul.f32 %v6858_v10, %v3179_v34  ;;  %v3180_v31 = vmul.f32 %v6864_v14, %v3179_v34 }
 0x1ec   : > { %v2300_v29 = vpop.permute.xlu1 %2299  ;;  %v2298_v32 = vpop.permute.xlu0 %2297 }
 0x1ed   : > { %v2304_v0 = vadd.f32 %v2300_v29, %v2283_v44  ;;  %v2303_v56 = vadd.f32 %v2298_v32, %v2282_v49  ;;  %v2407_v40 = vrot.slane %v2401_v17, 2  ;;  %v2406_v49 = vrot.slane %v2400_v26, 2 }
 0x1ee   : > { %3041 = vrot.lane.b32.xlu1 %v3038_v43, %s5659_s21  ;;  %3039 = vrot.lane.b32.xlu0 %v3036_v53, %s5659_s21  ;;  %v3127_v43 = vrot.slane %v3121_v21, 1  ;;  %v3144_v53 = vmul.f32 %v6858_v10, %v3141_v51  ;;  %v3131_v29 = vsel %vm208_vm0, %v3128_v16, %v3130_v19  ;;  %v3149_v32 = vrot.slane %v3143_v28, 1 }
 0x1ef   : > { %v2310_v58 = vadd.f32 %v2308_v37, %v2304_v0  ;;  %v2309_v59 = vadd.f32 %v2307_v63, %v2303_v56  ;;  %v3142_v37 = vmul.f32 %v6864_v14, %v3141_v51 }
 0x1f0   : > { %v2320_v62 = vpop.permute.xlu1 %2319  ;;  %v2318_v60 = vpop.permute.xlu0 %2317  ;;  %v3151_v0 = vrot.slane %v3144_v53, 1  ;;  %v3129_v57 = vsel %vm208_vm0, %v3127_v43, %v3128_v16 }
 0x1f1   : > { %v2324_v15 = vadd.f32 %v2320_v62, %v2310_v58  ;;  %v2323_v48 = vadd.f32 %v2318_v60, %v2309_v59  ;;  %v3148_v56 = vrot.slane %v3142_v37, 1  ;;  %v2410_v58 = vsel %vm268_vm1, %v2407_v40, %v2409_v41 }
 0x1f2   : > { %3062 = vrot.lane.b32.xlu1 %v3059_v61, %s5658_s17  ;;  %3060 = vrot.lane.b32.xlu0 %v3057_v33, %s5658_s17  ;;  %v2408_v33 = vsel %vm268_vm1, %v2406_v49, %v2407_v40  ;;  %v3187_v62 = vrot.slane %v3181_v52, 2  ;;  %v3189_v60 = vrot.slane %v3182_v54, 2  ;;  %v3152_v11 = vsel %vm208_vm0, %v3149_v32, %v3151_v0 }
 0x1f4   : > { %v2334_v36 = vpop.permute.xlu1 %2333  ;;  %v2332_v1 = vpop.permute.xlu0 %2331 }
 0x1f5   : > { %v2338_v18 = vadd.f32 %v2334_v36, %v2324_v15  ;;  %v2337_v27 = vadd.f32 %v2332_v1, %v2323_v48  ;;  %v3201_v15 = vmul.f32 %v6864_v14, %v3200_v45  ;;  %v2492_v48 = vstv %s7174_s16  ;;  %s7289_s16 = sld [smem:[#allocation2 + $0xc2]] }
 0x1f6   : > { %3082 = vrot.lane.b32.xlu1 %v3077_v9, %s5659_s21  ;;  %3080 = vrot.lane.b32.xlu0 %v3076_v12, %s5659_s21  ;;  %v3202_v9 = vmul.f32 %v6854_v8, %v3200_v45  ;;  %v3203_v12 = vmul.f32 %v6858_v10, %v3200_v45  ;;  %v2460_v36 = vmul.f32 %v6854_v8, %v2458_v3  ;;  %v3296_v45 = vstv %s7204_s26  ;;  %s7337_s26 = sld [smem:[#allocation2 + $0x99]] }
 0x1f7   : > { %v2355_v63 = vadd.f32 %v2351_v13, %v2338_v18  ;;  %v2354_v39 = vadd.f32 %v2349_v4, %v2337_v27  ;;  %v3150_v13 = vsel %vm208_vm0, %v3148_v56, %v3149_v32  ;;  %v3186_v4 = vrot.slane %v3180_v31, 2 }
 0x1f8   : > { %v2372_v42 = vpop.permute.xlu1 %2371  ;;  %v2370_v44 = vpop.permute.xlu0 %2369  ;;  %v3190_v1 = vsel %vm268_vm1, %v3187_v62, %v3189_v60  ;;  %v3208_v16 = vrot.slane %v3202_v9, 2  ;;  %v3210_v19 = vrot.slane %v3203_v12, 2  ;;  %v2494_v18 = vmul.f32 %v6854_v8, %v2492_v48  ;;  %v7245_v12 = vld [vmem:[%s5749_s14 + $0x48] sm:$0xff] }
 0x1f9   : > { %v2376_v22 = vadd.f32 %v2372_v42, %v2355_v63  ;;  %v2375_v24 = vadd.f32 %v2370_v44, %v2354_v39  ;;  %v3188_v26 = vsel %vm268_vm1, %v3186_v4, %v3187_v62  ;;  %v2495_v27 = vmul.f32 %v6858_v10, %v2492_v48  ;;  %v7235_v62 = vld [vmem:[%s5749_s14 + $0x50] sm:$0xff] }
 0x1fa   : > { %3096 = vrot.lane.b32.xlu1 %v3091_v2, %s5658_s17  ;;  %3094 = vrot.lane.b32.xlu0 %v3090_v5, %s5658_s17  ;;  %v2459_v2 = vmul.f32 %v6864_v14, %v2458_v3  ;;  %v3207_v5 = vrot.slane %v3201_v15, 2  ;;  %v2493_v43 = vmul.f32 %v6864_v14, %v2492_v48  ;;  %v3211_v40 = vsel %vm268_vm1, %v3208_v16, %v3210_v19 }
 0x1fb   : > { %v3230_v8 = vstv %s7189_s22  ;;  %v2500_v10 = vrot.slane %v2494_v18, 1  ;;  %v2502_v41 = vrot.slane %v2495_v27, 1  ;;  %v3275_v42 = vstv %s7195_s24  ;;  %s7297_s22 = sld [smem:[#allocation2 + $0xc4]] }
 0x1fc   : > { %v2393_v59 = vpop.permute.xlu1 %2392  ;;  %v2391_v61 = vpop.permute.xlu0 %2390  ;;  %v3209_v49 = vsel %vm268_vm1, %v3207_v5, %v3208_v16  ;;  %v2499_v52 = vrot.slane %v2493_v43, 1  ;;  %v2551_v32 = vstv %s7200_s25  ;;  %v3232_v0 = vmul.f32 %v6983_v46, %v3230_v8  ;;  %s7324_s24 = sld [smem:[#allocation2 + $0xc5]] }
 0x1fd   : > { %v2397_v6 = vadd.f32 %v2393_v59, %v2376_v22  ;;  %v2396_v7 = vadd.f32 %v2391_v61, %v2375_v24  ;;  %v3277_v56 = vmul.f32 %v6983_v46, %v3275_v42  ;;  %v3278_v31 = vmul.f32 %v6987_v50, %v3275_v42  ;;  %s7332_s25 = sld [smem:[#allocation2 + $0x9c]] }
 0x1fe   : > { %3134 = vrot.lane.b32.xlu1 %v3131_v29, %s5659_s21  ;;  %3132 = vrot.lane.b32.xlu0 %v3129_v57, %s5659_s21  ;;  %v3231_v22 = vmul.f32 %v6993_v55, %v3230_v8  ;;  %v2503_v24 = vsel %vm208_vm0, %v2500_v10, %v2502_v41  ;;  %v3244_v57 = vstv %s7211_s27  ;;  %v2553_v60 = vmul.f32 %v7235_v62, %v2551_v32  ;;  %s7350_s27 = sld [smem:[#allocation2 + $0xc7]] }
 0x1ff   : > { %v2414_v21 = vadd.f32 %v2410_v58, %v2397_v6  ;;  %v2413_v51 = vadd.f32 %v2408_v33, %v2396_v7  ;;  %v3276_v58 = vmul.f32 %v6993_v55, %v3275_v42  ;;  %v2501_v33 = vsel %vm208_vm0, %v2499_v52, %v2500_v10  ;;  %v7241_v7 = vld [vmem:[%s5749_s14 + $0x58] sm:$0x3] }
 0x200   : > { %v2431_v17 = vpop.permute.xlu1 %2430  ;;  %v2429_v23 = vpop.permute.xlu0 %2428  ;;  %v2554_v9 = vmul.f32 %v7241_v7, %v2551_v32  ;;  %v3299_v4 = vmul.f32 %v6987_v50, %v3296_v45  ;;  %v3283_v15 = vrot.slane %v3277_v56, 1  ;;  %v3285_v48 = vrot.slane %v3278_v31, 1 }
 0x201   : > { %v2435_v28 = vadd.f32 %v2431_v17, %v2414_v21  ;;  %v2434_v34 = vadd.f32 %v2429_v23, %v2413_v51  ;;  %v3246_v17 = vmul.f32 %v6983_v46, %v3244_v57  ;;  %v3245_v23 = vmul.f32 %v6993_v55, %v3244_v57 }
 0x202   : > { %3155 = vrot.lane.b32.xlu1 %v3152_v11, %s5658_s17  ;;  %3153 = vrot.lane.b32.xlu0 %v3150_v13, %s5658_s17  ;;  %v2552_v11 = vmul.f32 %v7245_v12, %v2551_v32  ;;  %v3298_v13 = vmul.f32 %v6983_v46, %v3296_v45  ;;  %v2559_v19 = vrot.slane %v2553_v60, 2  ;;  %v3306_v43 = vrot.slane %v3299_v4, 1 }
 0x203   : > { %v3355_v42 = vstv %s7238_s30  ;;  %v2647_v56 = vstv %s7250_s3  ;;  %s7362_s30 = sld [smem:[#allocation2 + $0xca]] }
 0x204   : > { %v2452_v53 = vpop.permute.xlu1 %2451  ;;  %v2450_v37 = vpop.permute.xlu0 %2449  ;;  %v3304_v5 = vrot.slane %v3298_v13, 1  ;;  %s7365_s3 = sld [smem:[#allocation2 + $0x9f]] }
 0x205   : > { %v2456_v63 = vadd.f32 %v2452_v53, %v2435_v28  ;;  %v2455_v39 = vadd.f32 %v2450_v37, %v2434_v34  ;;  %v2561_v28 = vrot.slane %v2554_v9, 2  ;;  %v2558_v34 = vrot.slane %v2552_v11, 2 }
 0x206   : > { %3193 = vrot.lane.b32.xlu1 %v3190_v1, %s5659_s21  ;;  %3191 = vrot.lane.b32.xlu0 %v3188_v26, %s5659_s21  ;;  %v3334_v1 = vstv %s7219_s29  ;;  %v3297_v26 = vmul.f32 %v6993_v55, %v3296_v45  ;;  %v3286_v53 = vsel %vm208_vm0, %v3283_v15, %v3285_v48  ;;  %v2648_v9 = vmul.f32 %v6993_v55, %v2647_v56  ;;  %s7359_s29 = sld [smem:[#allocation2 + $0xc8]] }
 0x207   : > { %v2462_v14 = vadd.f32 %v2460_v36, %v2456_v63  ;;  %v2461_v44 = vadd.f32 %v2459_v2, %v2455_v39  ;;  %v3282_v36 = vrot.slane %v3276_v58, 1  ;;  %v3336_v37 = vmul.f32 %v6983_v46, %v3334_v1 }
 0x208   : > { %v2472_v54 = vpop.permute.xlu1 %2471  ;;  %v2470_v29 = vpop.permute.xlu0 %2469  ;;  %v3337_v39 = vmul.f32 %v6987_v50, %v3334_v1  ;;  %v3303_v41 = vrot.slane %v3297_v26, 1  ;;  %v2560_v52 = vsel %vm268_vm1, %v2558_v34, %v2559_v19  ;;  %v2615_v48 = vstv %s7265_s4  ;;  %s7370_s4 = sld [smem:[#allocation2 + $0xcb]] }
 0x209   : > { %v2476_v59 = vadd.f32 %v2472_v54, %v2462_v14  ;;  %v2475_v61 = vadd.f32 %v2470_v29, %v2461_v44  ;;  %v3284_v63 = vsel %vm208_vm0, %v3282_v36, %v3283_v15  ;;  %v3307_v54 = vsel %vm208_vm0, %v3304_v5, %v3306_v43 }
 0x20a   : > { %3214 = vrot.lane.b32.xlu1 %v3211_v40, %s5658_s17  ;;  %3212 = vrot.lane.b32.xlu0 %v3209_v49, %s5658_s17  ;;  %v3335_v40 = vmul.f32 %v6993_v55, %v3334_v1  ;;  %v2562_v49 = vsel %vm268_vm1, %v2559_v19, %v2561_v28  ;;  %v3344_v31 = vrot.slane %v3337_v39, 2  ;;  %v3382_v1 = vstv %s7271_s5  ;;  %s7378_s5 = sld [smem:[#allocation2 + $0xcd]] }
 0x20b   : > { %v2616_v28 = vmul.f32 %v6993_v55, %v2615_v48 }
 0x20c   : > { %v2486_v3 = vpop.permute.xlu1 %2485  ;;  %v2484_v6 = vpop.permute.xlu0 %2483  ;;  %v3341_v45 = vrot.slane %v3335_v40, 2  ;;  %v3384_v40 = vmul.f32 %v7067_v30, %v3382_v1 }
 0x20d   : > { %v2490_v21 = vadd.f32 %v2486_v3, %v2476_v59  ;;  %v2489_v51 = vadd.f32 %v2484_v6, %v2475_v61  ;;  %v3305_v59 = vsel %vm208_vm0, %v3303_v41, %v3304_v5  ;;  %v3356_v61 = vmul.f32 %v6993_v55, %v3355_v42 }
 0x20e   : > { %3237 = vrot.lane.b32.xlu1 %v3232_v0, %s5659_s21  ;;  %3235 = vrot.lane.b32.xlu0 %v3231_v22, %s5659_s21  ;;  %v3342_v0 = vrot.slane %v3336_v37, 2  ;;  %v3357_v22 = vmul.f32 %v6983_v46, %v3355_v42  ;;  %v2649_v3 = vmul.f32 %v6983_v46, %v2647_v56  ;;  %v2650_v6 = vmul.f32 %v6987_v50, %v2647_v56 }
 0x20f   : > { %v2507_v2 = vadd.f32 %v2503_v24, %v2490_v21  ;;  %v2506_v16 = vadd.f32 %v2501_v33, %v2489_v51  ;;  %v3358_v24 = vmul.f32 %v6987_v50, %v3355_v42  ;;  %v3427_v37 = vstv %s7282_s7  ;;  %s7410_s7 = sld [smem:[#allocation2 + $0xa2]] }
 0x210   : > { %v2524_v18 = vpop.permute.xlu1 %2523  ;;  %v2522_v27 = vpop.permute.xlu0 %2521  ;;  %v3345_v11 = vsel %vm268_vm1, %v3342_v0, %v3344_v31  ;;  %v3343_v13 = vsel %vm268_vm1, %v3341_v45, %v3342_v0  ;;  %v3363_v4 = vrot.slane %v3357_v22, 2  ;;  %v2657_v26 = vrot.slane %v2650_v6, 1 }
 0x211   : > { %v2528_v8 = vadd.f32 %v2524_v18, %v2507_v2  ;;  %v2527_v10 = vadd.f32 %v2522_v27, %v2506_v16  ;;  %v3365_v21 = vrot.slane %v3358_v24, 2  ;;  %v2655_v2 = vrot.slane %v2649_v3, 1 }
 0x212   : > { %3251 = vrot.lane.b32.xlu1 %v3246_v17, %s5658_s17  ;;  %3249 = vrot.lane.b32.xlu0 %v3245_v23, %s5658_s17  ;;  %v3362_v17 = vrot.slane %v3356_v61, 2  ;;  %v2654_v18 = vrot.slane %v2648_v9, 1  ;;  %v2617_v27 = vmul.f32 %v6983_v46, %v2615_v48 }
 0x213   : > { %v3366_v34 = vsel %vm268_vm1, %v3363_v4, %v3365_v21  ;;  %v2658_v41 = vsel %vm208_vm0, %v2655_v2, %v2657_v26 }
 0x214   : > { %v2545_v14 = vpop.permute.xlu1 %2544  ;;  %v2543_v44 = vpop.permute.xlu0 %2542  ;;  %v2656_v42 = vsel %vm208_vm0, %v2654_v18, %v2655_v2  ;;  %v3507_v18 = vstv %s7324_s24  ;;  %s7437_s24 = sld [smem:[#allocation2 + $0xa8]] }
 0x215   : > { %v2549_v29 = vadd.f32 %v2545_v14, %v2528_v8  ;;  %v2548_v32 = vadd.f32 %v2543_v44, %v2527_v10  ;;  %v3383_v8 = vmul.f32 %v7078_v38, %v3382_v1  ;;  %v2706_v10 = vstv %s7285_s8  ;;  %s7412_s8 = sld [smem:[#allocation2 + $0xa5]] }
 0x216   : > { %3289 = vrot.lane.b32.xlu1 %v3286_v53, %s5659_s21  ;;  %3287 = vrot.lane.b32.xlu0 %v3284_v63, %s5659_s21  ;;  %v3364_v53 = vsel %vm268_vm1, %v3362_v17, %v3363_v4  ;;  %v3396_v14 = vstv %s7278_s6  ;;  %v3448_v44 = vstv %s7289_s16  ;;  %v2708_v0 = vmul.f32 %v6983_v46, %v2706_v10  ;;  %s7399_s6 = sld [smem:[#allocation2 + $0xce]] }
 0x217   : > { %v2566_v57 = vadd.f32 %v2562_v49, %v2549_v29  ;;  %v2565_v58 = vadd.f32 %v2560_v52, %v2548_v32  ;;  %v3429_v49 = vmul.f32 %v7067_v30, %v3427_v37  ;;  %v3430_v52 = vmul.f32 %v7071_v35, %v3427_v37  ;;  %s7425_s16 = sld [smem:[#allocation2 + $0xd3]] }
 0x218   : > { %v2583_v33 = vpop.permute.xlu1 %2582  ;;  %v2581_v60 = vpop.permute.xlu0 %2580  ;;  %v2709_v56 = vmul.f32 %v6987_v50, %v2706_v10  ;;  %v3398_v22 = vmul.f32 %v7067_v30, %v3396_v14  ;;  %v2707_v24 = vmul.f32 %v6993_v55, %v2706_v10  ;;  %v3397_v46 = vmul.f32 %v7078_v38, %v3396_v14 }
 0x219   : > { %v2587_v51 = vadd.f32 %v2583_v33, %v2566_v57  ;;  %v2586_v15 = vadd.f32 %v2581_v60, %v2565_v58  ;;  %v3450_v57 = vmul.f32 %v7067_v30, %v3448_v44  ;;  %v3451_v58 = vmul.f32 %v7071_v35, %v3448_v44 }
 0x21a   : > { %3310 = vrot.lane.b32.xlu1 %v3307_v54, %s5658_s17  ;;  %3308 = vrot.lane.b32.xlu0 %v3305_v59, %s5658_s17  ;;  %v3428_v54 = vmul.f32 %v7078_v38, %v3427_v37  ;;  %v3449_v33 = vmul.f32 %v7078_v38, %v3448_v44  ;;  %v3486_v60 = vstv %s7297_s22  ;;  %v3435_v50 = vrot.slane %v3429_v49, 1  ;;  %s7433_s22 = sld [smem:[#allocation2 + $0xd0]] }
 0x21b   : > { %v3437_v3 = vrot.slane %v3430_v52, 1  ;;  %v3458_v48 = vrot.slane %v3451_v58, 1  ;;  %v3488_v17 = vmul.f32 %v7067_v30, %v3486_v60  ;;  %v3489_v2 = vmul.f32 %v7071_v35, %v3486_v60 }
 0x21c   : > { %v2604_v23 = vpop.permute.xlu1 %2603  ;;  %v2602_v36 = vpop.permute.xlu0 %2601  ;;  %v3434_v55 = vrot.slane %v3428_v54, 1  ;;  %v3487_v26 = vmul.f32 %v7078_v38, %v3486_v60  ;;  %v2765_v10 = vstv %s7337_s26  ;;  %v3508_v52 = vmul.f32 %v7078_v38, %v3507_v18  ;;  %s7450_s26 = sld [smem:[#allocation2 + $0xd4]] }
 0x21d   : > { %v2608_v16 = vadd.f32 %v2604_v23, %v2587_v51  ;;  %v2607_v19 = vadd.f32 %v2602_v36, %v2586_v15  ;;  %v2713_v51 = vrot.slane %v2707_v24, 2  ;;  %v3456_v15 = vrot.slane %v3450_v57, 1 }
 0x21e   : > { %3348 = vrot.lane.b32.xlu1 %v3345_v11, %s5659_s21  ;;  %3346 = vrot.lane.b32.xlu0 %v3343_v13, %s5659_s21  ;;  %v2714_v11 = vrot.slane %v2708_v0, 2  ;;  %v2716_v13 = vrot.slane %v2709_v56, 2  ;;  %v3455_v23 = vrot.slane %v3449_v33, 1  ;;  %v3438_v36 = vsel %vm208_vm0, %v3435_v50, %v3437_v3 }
 0x21f   : > { %v2610_v5 = vmax.f32 %v2608_v16, 0.0  ;;  %v2609_v43 = vmax.f32 %v2607_v19, 0.0  ;;  %v3436_v1 = vsel %vm208_vm0, %v3434_v55, %v3435_v50  ;;  %v3493_v49 = vrot.slane %v3487_v26, 2 }
 0x220   : > { %v2627_v63 = vpop.permute.xlu1 %2626  ;;  %v2625_v39 = vpop.permute.xlu0 %2624  ;;  %v2767_v0 = vmul.f32 %v7067_v30, %v2765_v10  ;;  %v3514_v33 = vrot.slane %v3508_v52, 2  ;;  %v3534_v50 = vstv %s7350_s27  ;;  %v3600_v26 = vstv %s7370_s4  ;;  %s7453_s27 = sld [smem:[#allocation2 + $0xd6]] }
 0x221   : > { %5302 = vst.msk [vmem:[%s6295_s28 + $0x38] sm:$0xff] %vm778_vm2, %v2610_v5  ;;  %5301 = vst.msk [vmem:[%s6295_s28 + $0x30] sm:$0xff] %vm778_vm2, %v2609_v43  ;;  %v2631_v29 = vadd.f32 %v2627_v63, %v2617_v27  ;;  %v2630_v32 = vadd.f32 %v2625_v39, %v2616_v28  ;;  %v2715_v5 = vsel %vm268_vm1, %v2713_v51, %v2714_v11  ;;  %s7502_s4 = sld [smem:[#allocation2 + $0xd9]] }
 0x222   : > { %3369 = vrot.lane.b32.xlu1 %v3366_v34, %s5658_s17  ;;  %3367 = vrot.lane.b32.xlu0 %v3364_v53, %s5658_s17  ;;  %v2717_v34 = vsel %vm268_vm1, %v2714_v11, %v2716_v13  ;;  %v3459_v43 = vsel %vm208_vm0, %v3456_v15, %v3458_v48  ;;  %v3494_v53 = vrot.slane %v3488_v17, 2  ;;  %v3457_v39 = vsel %vm208_vm0, %v3455_v23, %v3456_v15 }
 0x223   : > { %v3579_v15 = vstv %s7362_s30  ;;  %v3536_v23 = vmul.f32 %v7153_v47, %v3534_v50  ;;  %v3601_v52 = vmul.f32 %v7162_v25, %v3600_v26  ;;  %s7478_s30 = sld [smem:[#allocation2 + $0xab]] }
 0x224   : > { %v2641_v31 = vpop.permute.xlu1 %2640  ;;  %v2639_v45 = vpop.permute.xlu0 %2638 }
 0x225   : > { %v2645_v59 = vadd.f32 %v2641_v31, %v2631_v29  ;;  %v2644_v61 = vadd.f32 %v2639_v45, %v2630_v32 }
 0x226   : > { %3389 = vrot.lane.b32.xlu1 %v3384_v40, %s5659_s21  ;;  %3387 = vrot.lane.b32.xlu0 %v3383_v8, %s5659_s21  ;;  %v2799_v40 = vstv %s7332_s25  ;;  %v3496_v8 = vrot.slane %v3489_v2, 2  ;;  %s7443_s25 = sld [smem:[#allocation2 + $0xd1]] }
 0x227   : > { %v2662_v6 = vadd.f32 %v2658_v41, %v2645_v59  ;;  %v2661_v9 = vadd.f32 %v2656_v42, %v2644_v61  ;;  %v3509_v41 = vmul.f32 %v7067_v30, %v3507_v18  ;;  %v3510_v42 = vmul.f32 %v7071_v35, %v3507_v18 }
 0x228   : > { %v2679_v4 = vpop.permute.xlu1 %2678  ;;  %v2677_v21 = vpop.permute.xlu0 %2676  ;;  %v2801_v32 = vmul.f32 %v7067_v30, %v2799_v40  ;;  %v2802_v56 = vmul.f32 %v7071_v35, %v2799_v40  ;;  %v2800_v31 = vmul.f32 %v7078_v38, %v2799_v40  ;;  %v3497_v45 = vsel %vm268_vm1, %v3494_v53, %v3496_v8 }
 0x229   : > { %v2683_v16 = vadd.f32 %v2679_v4, %v2662_v6  ;;  %v2682_v19 = vadd.f32 %v2677_v21, %v2661_v9  ;;  %v3515_v24 = vrot.slane %v3509_v41, 2  ;;  %v3517_v57 = vrot.slane %v3510_v42, 2 }
 0x22a   : > { %3403 = vrot.lane.b32.xlu1 %v3398_v22, %s5658_s17  ;;  %3401 = vrot.lane.b32.xlu0 %v3397_v46, %s5658_s17  ;;  %v2766_v22 = vmul.f32 %v7078_v38, %v2765_v10  ;;  %v3495_v61 = vsel %vm268_vm1, %v3493_v49, %v3494_v53  ;;  %v2807_v3 = vrot.slane %v2801_v32, 1  ;;  %v2809_v9 = vrot.slane %v2802_v56, 1 }
 0x22b   : > { %v2806_v11 = vrot.slane %v2800_v31, 1  ;;  %v3518_v13 = vsel %vm268_vm1, %v3515_v24, %v3517_v57  ;;  %v3516_v51 = vsel %vm268_vm1, %v3514_v33, %v3515_v24  ;;  %v3581_v18 = vmul.f32 %v7153_v47, %v3579_v15 }
 0x22c   : > { %v2700_v27 = vpop.permute.xlu1 %2699  ;;  %v2698_v28 = vpop.permute.xlu0 %2697  ;;  %v2810_v2 = vsel %vm208_vm0, %v2807_v3, %v2809_v9  ;;  %v3602_v8 = vmul.f32 %v7153_v47, %v3600_v26  ;;  %v3603_v10 = vmul.f32 %v7157_v20, %v3600_v26 }
 0x22d   : > { %v2704_v37 = vadd.f32 %v2700_v27, %v2683_v16  ;;  %v2703_v63 = vadd.f32 %v2698_v28, %v2682_v19  ;;  %v2808_v16 = vsel %vm208_vm0, %v2806_v11, %v2807_v3  ;;  %v3548_v19 = vstv %s7359_s29  ;;  %s7472_s29 = sld [smem:[#allocation2 + $0xd7]] }
 0x22e   : > { %3441 = vrot.lane.b32.xlu1 %v3438_v36, %s5659_s21  ;;  %3439 = vrot.lane.b32.xlu0 %v3436_v1, %s5659_s21  ;;  %v3535_v36 = vmul.f32 %v7162_v25, %v3534_v50  ;;  %v2858_v1 = vstv %s7365_s3  ;;  %v3582_v27 = vmul.f32 %v7157_v20, %v3579_v15  ;;  %v3580_v28 = vmul.f32 %v7162_v25, %v3579_v15  ;;  %s7487_s3 = sld [smem:[#allocation2 + $0xae]] }
 0x22f   : > { %v2721_v14 = vadd.f32 %v2717_v34, %v2704_v37  ;;  %v2720_v44 = vadd.f32 %v2715_v5, %v2703_v63  ;;  %v2861_v53 = vmul.f32 %v7071_v35, %v2858_v1  ;;  %v2859_v40 = vmul.f32 %v7078_v38, %v2858_v1 }
 0x230   : > { %v2738_v54 = vpop.permute.xlu1 %2737  ;;  %v2736_v29 = vpop.permute.xlu0 %2735  ;;  %v3589_v35 = vrot.slane %v3582_v27, 1  ;;  %v3586_v49 = vrot.slane %v3580_v28, 1  ;;  %v3659_v50 = vstv %s7399_s6  ;;  %s7513_s6 = sld [smem:[#allocation2 + $0xb1]] }
 0x231   : > { %v2742_v58 = vadd.f32 %v2738_v54, %v2721_v14  ;;  %v2741_v59 = vadd.f32 %v2736_v29, %v2720_v44  ;;  %v3549_v14 = vmul.f32 %v7162_v25, %v3548_v19  ;;  %v3638_v44 = vstv %s7378_s5  ;;  %s7508_s5 = sld [smem:[#allocation2 + $0xdc]] }
 0x232   : > { %3462 = vrot.lane.b32.xlu1 %v3459_v43, %s5658_s17  ;;  %3460 = vrot.lane.b32.xlu0 %v3457_v39, %s5658_s17  ;;  %v2860_v43 = vmul.f32 %v7067_v30, %v2858_v1  ;;  %v3550_v39 = vmul.f32 %v7153_v47, %v3548_v19  ;;  %v3587_v30 = vrot.slane %v3581_v18, 1  ;;  %v2868_v32 = vrot.slane %v2861_v53, 2 }
 0x233   : > { %v2865_v31 = vrot.slane %v2859_v40, 2  ;;  %v3640_v24 = vmul.f32 %v7153_v47, %v3638_v44  ;;  %v3641_v57 = vmul.f32 %v7157_v20, %v3638_v44  ;;  %v2951_v19 = vstv %s7412_s8  ;;  %s7524_s8 = sld [smem:[#allocation2 + $0xda]] }
 0x234   : > { %v2759_v60 = vpop.permute.xlu1 %2758  ;;  %v2757_v46 = vpop.permute.xlu0 %2756  ;;  %v2866_v29 = vrot.slane %v2860_v43, 2  ;;  %v2953_v53 = vmul.f32 %v7153_v47, %v2951_v19 }
 0x235   : > { %v2763_v55 = vadd.f32 %v2759_v60, %v2742_v58  ;;  %v2762_v6 = vadd.f32 %v2757_v46, %v2741_v59  ;;  %v3639_v58 = vmul.f32 %v7162_v25, %v3638_v44  ;;  %v3590_v59 = vsel %vm208_vm0, %v3587_v30, %v3589_v35 }
 0x236   : > { %3500 = vrot.lane.b32.xlu1 %v3497_v45, %s5659_s21  ;;  %3498 = vrot.lane.b32.xlu0 %v3495_v61, %s5659_s21  ;;  %v3608_v45 = vrot.slane %v3602_v8, 1  ;;  %v3607_v61 = vrot.slane %v3601_v52, 1  ;;  %v3588_v46 = vsel %vm208_vm0, %v3586_v49, %v3587_v30  ;;  %v2867_v9 = vsel %vm268_vm1, %v2865_v31, %v2866_v29 }
 0x237   : > { %v2769_v4 = vadd.f32 %v2767_v0, %v2763_v55  ;;  %v2768_v21 = vadd.f32 %v2766_v22, %v2762_v6  ;;  %v3610_v22 = vrot.slane %v3603_v10, 1  ;;  %v2869_v6 = vsel %vm268_vm1, %v2866_v29, %v2868_v32 }
 0x238   : > { %v2779_v48 = vpop.permute.xlu1 %2778  ;;  %v2777_v17 = vpop.permute.xlu0 %2776  ;;  %v3645_v15 = vrot.slane %v3639_v58, 2  ;;  %v3731_v30 = vstv %s7425_s16  ;;  %v3686_v35 = vstv %s7433_s22  ;;  %v2959_v49 = vrot.slane %v2953_v53, 1  ;;  %s7532_s16 = sld [smem:[#allocation2 + $0xdf]] }
 0x239   : > { %v2783_v34 = vadd.f32 %v2779_v48, %v2769_v4  ;;  %v2782_v5 = vadd.f32 %v2777_v17, %v2768_v21  ;;  %v3611_v11 = vsel %vm208_vm0, %v3608_v45, %v3610_v22  ;;  %v3609_v48 = vsel %vm208_vm0, %v3607_v61, %v3608_v45  ;;  %s7557_s22 = sld [smem:[#allocation2 + $0xe0]] }
 0x23a   : > { %3521 = vrot.lane.b32.xlu1 %v3518_v13, %s5658_s17  ;;  %3519 = vrot.lane.b32.xlu0 %v3516_v51, %s5658_s17  ;;  %v3646_v13 = vrot.slane %v3640_v24, 2  ;;  %v3648_v51 = vrot.slane %v3641_v57, 2  ;;  %v2917_v17 = vstv %s7410_s7  ;;  %v3733_v45 = vmul.f32 %v7235_v62, %v3731_v30  ;;  %s7517_s7 = sld [smem:[#allocation2 + $0xdd]] }
 0x23b   : > { %v3734_v22 = vmul.f32 %v7241_v7, %v3731_v30  ;;  %v3010_v24 = vstv %s7437_s24  ;;  %v3688_v57 = vmul.f32 %v7235_v62, %v3686_v35  ;;  %v3687_v58 = vmul.f32 %v7245_v12, %v3686_v35  ;;  %s7563_s24 = sld [smem:[#allocation2 + $0xb7]] }
 0x23c   : > { %v2793_v37 = vpop.permute.xlu1 %2792  ;;  %v2791_v63 = vpop.permute.xlu0 %2790  ;;  %v3649_v27 = vsel %vm268_vm1, %v3646_v13, %v3648_v51  ;;  %v3647_v28 = vsel %vm268_vm1, %v3645_v15, %v3646_v13  ;;  %v3011_v51 = vmul.f32 %v7162_v25, %v3010_v24 }
 0x23d   : > { %v2797_v41 = vadd.f32 %v2793_v37, %v2783_v34  ;;  %v2796_v42 = vadd.f32 %v2791_v63, %v2782_v5  ;;  %v2919_v34 = vmul.f32 %v7153_v47, %v2917_v17  ;;  %v2918_v5 = vmul.f32 %v7162_v25, %v2917_v17 }
 0x23e   : > { %3541 = vrot.lane.b32.xlu1 %v3536_v23, %s5659_s21  ;;  %3539 = vrot.lane.b32.xlu0 %v3535_v36, %s5659_s21  ;;  %v3661_v23 = vmul.f32 %v7153_v47, %v3659_v50  ;;  %v3662_v36 = vmul.f32 %v7157_v20, %v3659_v50  ;;  %v2954_v37 = vmul.f32 %v7157_v20, %v2951_v19 }
 0x23f   : > { %v2814_v38 = vadd.f32 %v2810_v2, %v2797_v41  ;;  %v2813_v54 = vadd.f32 %v2808_v16, %v2796_v42  ;;  %v3660_v16 = vmul.f32 %v7162_v25, %v3659_v50  ;;  %v2952_v63 = vmul.f32 %v7162_v25, %v2951_v19 }
 0x240   : > { %v2831_v0 = vpop.permute.xlu1 %2830  ;;  %v2829_v56 = vpop.permute.xlu0 %2828  ;;  %v3667_v43 = vrot.slane %v3661_v23, 2  ;;  %v3669_v8 = vrot.slane %v3662_v36, 2  ;;  %v2961_v52 = vrot.slane %v2954_v37, 1  ;;  %v3790_v23 = vstv %s7453_s27  ;;  %s7591_s27 = sld [smem:[#allocation2 + $0xe3]] }
 0x241   : > { %v2835_v33 = vadd.f32 %v2831_v0, %v2814_v38  ;;  %v2834_v60 = vadd.f32 %v2829_v56, %v2813_v54  ;;  %v3666_v10 = vrot.slane %v3660_v16, 2  ;;  %v2958_v38 = vrot.slane %v2952_v63, 1 }
 0x242   : > { %3555 = vrot.lane.b32.xlu1 %v3550_v39, %s5658_s17  ;;  %3553 = vrot.lane.b32.xlu0 %v3549_v14, %s5658_s17  ;;  %v3670_v32 = vsel %vm268_vm1, %v3667_v43, %v3669_v8  ;;  %v2962_v61 = vsel %vm208_vm0, %v2959_v49, %v2961_v52  ;;  %v3791_v63 = vmul.f32 %v7245_v12, %v3790_v23 }
 0x243   : > { %v3668_v0 = vsel %vm268_vm1, %v3666_v10, %v3667_v43 }
 0x244   : > { %v2852_v3 = vpop.permute.xlu1 %2851  ;;  %v2850_v55 = vpop.permute.xlu0 %2849 }
 0x245   : > { %v2856_v4 = vadd.f32 %v2852_v3, %v2835_v33  ;;  %v2855_v21 = vadd.f32 %v2850_v55, %v2834_v60  ;;  %v2960_v33 = vsel %vm208_vm0, %v2958_v38, %v2959_v49  ;;  %v3732_v60 = vmul.f32 %v7245_v12, %v3731_v30 }
 0x246   : > { %3593 = vrot.lane.b32.xlu1 %v3590_v59, %s5659_s21  ;;  %3591 = vrot.lane.b32.xlu0 %v3588_v46, %s5659_s21  ;;  %v3700_v59 = vstv %s7443_s25  ;;  %v3752_v46 = vstv %s7450_s26  ;;  %v3012_v55 = vmul.f32 %v7153_v47, %v3010_v24  ;;  %s7578_s25 = sld [smem:[#allocation2 + $0xb4]] }
 0x247   : > { %v2873_v1 = vadd.f32 %v2869_v6, %v2856_v4  ;;  %v2872_v2 = vadd.f32 %v2867_v9, %v2855_v21  ;;  %v3013_v6 = vmul.f32 %v7157_v20, %v3010_v24  ;;  %v3702_v13 = vmul.f32 %v7235_v62, %v3700_v59  ;;  %s7584_s26 = sld [smem:[#allocation2 + $0xe2]] }
 0x248   : > { %v2890_v26 = vpop.permute.xlu1 %2889  ;;  %v2888_v18 = vpop.permute.xlu0 %2887  ;;  %v3739_v4 = vrot.slane %v3733_v45, 1  ;;  %v3741_v21 = vrot.slane %v3734_v22, 1  ;;  %v3754_v17 = vmul.f32 %v7235_v62, %v3752_v46  ;;  %v3701_v47 = vmul.f32 %v7245_v12, %v3700_v59 }
 0x249   : > { %v2894_v39 = vadd.f32 %v2890_v26, %v2873_v1  ;;  %v2893_v40 = vadd.f32 %v2888_v18, %v2872_v2  ;;  %v3738_v20 = vrot.slane %v3732_v60, 1  ;;  %v3755_v36 = vmul.f32 %v7241_v7, %v3752_v46 }
 0x24a   : > { %3614 = vrot.lane.b32.xlu1 %v3611_v11, %s5658_s17  ;;  %3612 = vrot.lane.b32.xlu0 %v3609_v48, %s5658_s17  ;;  %v3753_v1 = vmul.f32 %v7245_v12, %v3752_v46  ;;  %v3018_v16 = vrot.slane %v3012_v55, 2  ;;  %v3020_v19 = vrot.slane %v3013_v6, 2  ;;  %v3760_v43 = vrot.slane %v3754_v17, 1 }
 0x24b   : > { %v3762_v53 = vrot.slane %v3755_v36, 1  ;;  %v3740_v10 = vsel %vm208_vm0, %v3738_v20, %v3739_v4  ;;  %v3069_v49 = vstv %s7478_s30  ;;  %v3103_v24 = vstv %s7487_s3  ;;  %s7598_s30 = sld [smem:[#allocation2 + $0xba]] }
 0x24c   : > { %v2911_v41 = vpop.permute.xlu1 %2910  ;;  %v2909_v42 = vpop.permute.xlu0 %2908  ;;  %v3759_v37 = vrot.slane %v3753_v1, 1  ;;  %v3071_v59 = vmul.f32 %v7235_v62, %v3069_v49  ;;  %v3106_v55 = vmul.f32 %v7241_v7, %v3103_v24  ;;  %v3841_v17 = vstv %s7502_s4  ;;  %s7602_s3 = sld [smem:[#allocation2 + $0xe6]] }
 0x24d   : > { %v2915_v14 = vadd.f32 %v2911_v41, %v2894_v39  ;;  %v2914_v44 = vadd.f32 %v2909_v42, %v2893_v40  ;;  %v3811_v39 = vstv %s7472_s29  ;;  %v3021_v41 = vsel %vm268_vm1, %v3018_v16, %v3020_v19  ;;  %s7595_s29 = sld [smem:[#allocation2 + $0xe5]] }
 0x24e   : > { %3652 = vrot.lane.b32.xlu1 %v3649_v27, %s5659_s21  ;;  %3650 = vrot.lane.b32.xlu0 %v3647_v28, %s5659_s21  ;;  %v3017_v27 = vrot.slane %v3011_v51, 2  ;;  %v3792_v28 = vmul.f32 %v7235_v62, %v3790_v23  ;;  %v3812_v22 = vmul.f32 %v7245_v12, %v3811_v39  ;;  %v3886_v20 = vstv %s7508_s5  ;;  %s7610_s4 = sld [smem:[#allocation2 + $0xe8]] }
 0x24f   : > { %v2921_v54 = vadd.f32 %v2919_v34, %v2915_v14  ;;  %v2920_v29 = vadd.f32 %v2918_v5, %v2914_v44  ;;  %v3793_v34 = vmul.f32 %v7241_v7, %v3790_v23  ;;  %v3742_v5 = vsel %vm208_vm0, %v3739_v4, %v3741_v21  ;;  %s7644_s5 = sld [smem:[#allocation2 + $0xe9]] }
 0x250   : > { %v2931_v56 = vpop.permute.xlu1 %2930  ;;  %v2929_v31 = vpop.permute.xlu0 %2928  ;;  %v3019_v44 = vsel %vm268_vm1, %v3017_v27, %v3018_v16  ;;  %v3798_v30 = vrot.slane %v3792_v28, 2 }
 0x251   : > { %v2935_v50 = vadd.f32 %v2931_v56, %v2921_v54  ;;  %v2934_v3 = vadd.f32 %v2929_v31, %v2920_v29  ;;  %v3800_v35 = vrot.slane %v3793_v34, 2  ;;  %v3813_v54 = vmul.f32 %v7235_v62, %v3811_v39  ;;  %v7542_v34 = vld [vmem:[%s5749_s14 + $0x10] sm:$0x3] }
 0x252   : > { %3673 = vrot.lane.b32.xlu1 %v3670_v32, %s5658_s17  ;;  %3671 = vrot.lane.b32.xlu0 %v3668_v0, %s5658_s17  ;;  %v3814_v29 = vmul.f32 %v7241_v7, %v3811_v39  ;;  %v3763_v32 = vsel %vm208_vm0, %v3760_v43, %v3762_v53  ;;  %v3761_v0 = vsel %vm208_vm0, %v3759_v37, %v3760_v43  ;;  %v3797_v56 = vrot.slane %v3791_v63, 2  ;;  %v7549_v53 = vld [vmem:[%s5749_s14] sm:$0xff] }
 0x253   : > { %v3819_v60 = vrot.slane %v3813_v54, 2  ;;  %v3907_v43 = vstv %s7517_s7  ;;  %v3842_v37 = vmul.f32 %v7549_v53, %v3841_v17  ;;  %v3855_v39 = vstv %s7524_s8  ;;  %s7659_s7 = sld [smem:[#allocation2 + $0xc0]] }
 0x254   : > { %v2945_v9 = vpop.permute.xlu1 %2944  ;;  %v2943_v11 = vpop.permute.xlu0 %2942  ;;  %v3821_v46 = vrot.slane %v3814_v29, 2  ;;  %s7679_s8 = sld [smem:[#allocation2 + $0xeb]] }
 0x255   : > { %v2949_v15 = vadd.f32 %v2945_v9, %v2935_v50  ;;  %v2948_v48 = vadd.f32 %v2943_v11, %v2934_v3  ;;  %v3799_v50 = vsel %vm268_vm1, %v3797_v56, %v3798_v30  ;;  %v3105_v3 = vmul.f32 %v7235_v62, %v3103_v24 }
 0x256   : > { %3693 = vrot.lane.b32.xlu1 %v3688_v57, %s5659_s21  ;;  %3691 = vrot.lane.b32.xlu0 %v3687_v58, %s5659_s21  ;;  %v3818_v11 = vrot.slane %v3812_v22, 2  ;;  %v3908_v22 = vmul.f32 %v7549_v53, %v3907_v43 }
 0x257   : > { %v2966_v2 = vadd.f32 %v2962_v61, %v2949_v15  ;;  %v2965_v25 = vadd.f32 %v2960_v33, %v2948_v48  ;;  %v3801_v61 = vsel %vm268_vm1, %v3798_v30, %v3800_v35  ;;  %v3070_v33 = vmul.f32 %v7245_v12, %v3069_v49 }
 0x258   : > { %v2983_v26 = vpop.permute.xlu1 %2982  ;;  %v2981_v18 = vpop.permute.xlu0 %2980  ;;  %v3822_v48 = vsel %vm268_vm1, %v3819_v60, %v3821_v46  ;;  %v3111_v23 = vrot.slane %v3105_v3, 1 }
 0x259   : > { %v2987_v40 = vadd.f32 %v2983_v26, %v2966_v2  ;;  %v2986_v8 = vadd.f32 %v2981_v18, %v2965_v25  ;;  %v3820_v2 = vsel %vm268_vm1, %v3818_v11, %v3819_v60  ;;  %v3162_v26 = vstv %s7513_s6  ;;  %v7537_v18 = vld [vmem:[%s5749_s14 + $0x8] sm:$0xff]  ;;  %s7657_s6 = sld [smem:[#allocation2 + $0xbd]] }
 0x25a   : > { %3707 = vrot.lane.b32.xlu1 %v3702_v13, %s5658_s17  ;;  %3705 = vrot.lane.b32.xlu0 %v3701_v47, %s5658_s17  ;;  %v3104_v13 = vmul.f32 %v7245_v12, %v3103_v24  ;;  %v3113_v47 = vrot.slane %v3106_v55, 1  ;;  %v3843_v27 = vmul.f32 %v7537_v18, %v3841_v17  ;;  %v3888_v28 = vmul.f32 %v7537_v18, %v3886_v20 }
 0x25b   : > { %v3165_v30 = vmul.f32 %v7241_v7, %v3162_v26  ;;  %v3163_v35 = vmul.f32 %v7245_v12, %v3162_v26  ;;  %v3909_v49 = vmul.f32 %v7537_v18, %v3907_v43  ;;  %v3856_v7 = vmul.f32 %v7549_v53, %v3855_v39 }
 0x25c   : > { %v3004_v42 = vpop.permute.xlu1 %3003  ;;  %v3002_v14 = vpop.permute.xlu0 %3001  ;;  %v3110_v25 = vrot.slane %v3104_v13, 1  ;;  %v3114_v63 = vsel %vm208_vm0, %v3111_v23, %v3113_v47  ;;  %v3894_v29 = vrot.slane %v3888_v28, 1  ;;  %v3945_v12 = vstv %s7532_s16  ;;  %s7682_s16 = sld [smem:[#allocation2 + $0xee]] }
 0x25d   : > { %v3008_v52 = vadd.f32 %v3004_v42, %v2987_v40  ;;  %v3007_v38 = vadd.f32 %v3002_v14, %v2986_v8  ;;  %v3887_v40 = vmul.f32 %v7549_v53, %v3886_v20  ;;  %v3164_v42 = vmul.f32 %v7235_v62, %v3162_v26 }
 0x25e   : > { %3745 = vrot.lane.b32.xlu1 %v3742_v5, %s5659_s21  ;;  %3743 = vrot.lane.b32.xlu0 %v3740_v10, %s5659_s21  ;;  %v3889_v5 = vmul.f32 %v7542_v34, %v3886_v20  ;;  %v3857_v62 = vmul.f32 %v7537_v18, %v3855_v39  ;;  %v3947_v46 = vmul.f32 %v7537_v18, %v3945_v12  ;;  %v3914_v11 = vrot.slane %v3908_v22, 1 }
 0x25f   : > { %v3025_v31 = vadd.f32 %v3021_v41, %v3008_v52  ;;  %v3024_v45 = vadd.f32 %v3019_v44, %v3007_v38  ;;  %v3112_v41 = vsel %vm208_vm0, %v3110_v25, %v3111_v23  ;;  %v3910_v52 = vmul.f32 %v7542_v34, %v3907_v43 }
 0x260   : > { %v3042_v57 = vpop.permute.xlu1 %3041  ;;  %v3040_v58 = vpop.permute.xlu0 %3039  ;;  %v3948_v3 = vmul.f32 %v7542_v34, %v3945_v12  ;;  %v3946_v55 = vmul.f32 %v7549_v53, %v3945_v12  ;;  %v3966_v13 = vstv %s7557_s22  ;;  %v3953_v47 = vrot.slane %v3947_v46, 2  ;;  %s7686_s22 = sld [smem:[#allocation2 + $0xc3]] }
 0x261   : > { %v3046_v6 = vadd.f32 %v3042_v57, %v3025_v31  ;;  %v3045_v9 = vadd.f32 %v3040_v58, %v3024_v45  ;;  %v3170_v45 = vrot.slane %v3164_v42, 2  ;;  %v3172_v58 = vrot.slane %v3165_v30, 2 }
 0x262   : > { %3766 = vrot.lane.b32.xlu1 %v3763_v32, %s5658_s17  ;;  %3764 = vrot.lane.b32.xlu0 %v3761_v0, %s5658_s17  ;;  %v3896_v32 = vrot.slane %v3889_v5, 1  ;;  %v3893_v0 = vrot.slane %v3887_v40, 1  ;;  %v3258_v20 = vstv %s7563_s24  ;;  %v3969_v25 = vmul.f32 %v7542_v34, %v3966_v13  ;;  %s7693_s24 = sld [smem:[#allocation2 + $0xec]] }
 0x263   : > { %v3260_v43 = vmul.f32 %v7537_v18, %v3258_v20 }
 0x264   : > { %v3063_v4 = vpop.permute.xlu1 %3062  ;;  %v3061_v21 = vpop.permute.xlu0 %3060  ;;  %v3897_v60 = vsel %vm208_vm0, %v3894_v29, %v3896_v32 }
 0x265   : > { %v3067_v51 = vadd.f32 %v3063_v4, %v3046_v6  ;;  %v3066_v15 = vadd.f32 %v3061_v21, %v3045_v9 }
 0x266   : > { %3804 = vrot.lane.b32.xlu1 %v3801_v61, %s5659_s21  ;;  %3802 = vrot.lane.b32.xlu0 %v3799_v50, %s5659_s21  ;;  %v3915_v61 = vrot.slane %v3909_v49, 1  ;;  %v3895_v50 = vsel %vm208_vm0, %v3893_v0, %v3894_v29  ;;  %v3993_v49 = vstv %s7584_s26  ;;  %s7714_s26 = sld [smem:[#allocation2 + $0xfd]] }
 0x267   : > { %v3073_v36 = vadd.f32 %v3071_v59, %v3067_v51  ;;  %v3072_v1 = vadd.f32 %v3070_v33, %v3066_v15  ;;  %v3169_v59 = vrot.slane %v3163_v35, 2  ;;  %v3917_v33 = vrot.slane %v3910_v52, 1 }
 0x268   : > { %v3083_v16 = vpop.permute.xlu1 %3082  ;;  %v3081_v19 = vpop.permute.xlu0 %3080  ;;  %v3173_v51 = vsel %vm268_vm1, %v3170_v45, %v3172_v58  ;;  %v3916_v26 = vsel %vm208_vm0, %v3914_v11, %v3915_v61  ;;  %v3266_v52 = vrot.slane %v3260_v43, 1 }
 0x269   : > { %v3087_v8 = vadd.f32 %v3083_v16, %v3073_v36  ;;  %v3086_v10 = vadd.f32 %v3081_v19, %v3072_v1  ;;  %v3171_v15 = vsel %vm268_vm1, %v3169_v59, %v3170_v45  ;;  %v3955_v36 = vrot.slane %v3948_v3, 2  ;;  %v7624_v59 = vld [vmem:[%s5749_s14 + $0x18] sm:$0xff] }
 0x26a   : > { %3825 = vrot.lane.b32.xlu1 %v3822_v48, %s5658_s17  ;;  %3823 = vrot.lane.b32.xlu0 %v3820_v2, %s5658_s17  ;;  %v3918_v48 = vsel %vm208_vm0, %v3915_v61, %v3917_v33  ;;  %v3952_v1 = vrot.slane %v3946_v55, 2  ;;  %v3968_v2 = vmul.f32 %v7537_v18, %v3966_v13  ;;  %v4038_v45 = vstv %s7595_s29  ;;  %s7736_s29 = sld [smem:[#allocation2 + $0x101]] }
 0x26b   : > { %v3956_v39 = vsel %vm268_vm1, %v3953_v47, %v3955_v36  ;;  %v3994_v61 = vmul.f32 %v7624_v59, %v3993_v49  ;;  %v3317_v33 = vstv %s7598_s30  ;;  %v4059_v3 = vstv %s7602_s3  ;;  %s7741_s30 = sld [smem:[#allocation2 + $0xfe]] }
 0x26c   : > { %v3097_v14 = vpop.permute.xlu1 %3096  ;;  %v3095_v44 = vpop.permute.xlu0 %3094  ;;  %v3954_v40 = vsel %vm268_vm1, %v3952_v1, %v3953_v47  ;;  %v4039_v11 = vmul.f32 %v7624_v59, %v4038_v45  ;;  %s7749_s3 = sld [smem:[#allocation2 + $0xc9]] }
 0x26d   : > { %v3101_v38 = vadd.f32 %v3097_v14, %v3087_v8  ;;  %v3100_v54 = vadd.f32 %v3095_v44, %v3086_v10  ;;  %v3974_v8 = vrot.slane %v3968_v2, 2  ;;  %v3976_v10 = vrot.slane %v3969_v25, 2 }
 0x26e   : > { %3848 = vrot.lane.b32.xlu1 %v3843_v27, %s5659_s21  ;;  %3846 = vrot.lane.b32.xlu0 %v3842_v37, %s5659_s21  ;;  %v3967_v27 = vmul.f32 %v7549_v53, %v3966_v13  ;;  %v3261_v37 = vmul.f32 %v7542_v34, %v3258_v20  ;;  %v3226_v14 = vstv %s7578_s25  ;;  %v4097_v25 = vstv %s7610_s4  ;;  %s7697_s25 = sld [smem:[#allocation2 + $0xef]] }
 0x26f   : > { %v3118_v56 = vadd.f32 %v3114_v63, %v3101_v38  ;;  %v3117_v31 = vadd.f32 %v3112_v41, %v3100_v54  ;;  %v3259_v63 = vmul.f32 %v7549_v53, %v3258_v20  ;;  %v3977_v0 = vsel %vm268_vm1, %v3974_v8, %v3976_v10  ;;  %s7751_s4 = sld [smem:[#allocation2 + $0xc6]] }
 0x270   : > { %v3135_v24 = vpop.permute.xlu1 %3134  ;;  %v3133_v57 = vpop.permute.xlu0 %3132  ;;  %v3973_v44 = vrot.slane %v3967_v27, 2  ;;  %v3268_v29 = vrot.slane %v3261_v37, 1  ;;  %v4060_v27 = vmul.f32 %v7624_v59, %v4059_v3 }
 0x271   : > { %v3139_v6 = vadd.f32 %v3135_v24, %v3118_v56  ;;  %v3138_v9 = vadd.f32 %v3133_v57, %v3117_v31  ;;  %v3265_v32 = vrot.slane %v3259_v63, 1  ;;  %v7620_v57 = vld [vmem:[%s5749_s14 + $0x20] sm:$0xff] }
 0x272   : > { %3862 = vrot.lane.b32.xlu1 %v3857_v62, %s5658_s17  ;;  %3860 = vrot.lane.b32.xlu0 %v3856_v7, %s5658_s17  ;;  %v3228_v62 = vmul.f32 %v7537_v18, %v3226_v14  ;;  %v3227_v7 = vmul.f32 %v7549_v53, %v3226_v14  ;;  %v3975_v31 = vsel %vm268_vm1, %v3973_v44, %v3974_v8  ;;  %v4066_v14 = vrot.slane %v4060_v27, 1 }
 0x273   : > { %v3995_v58 = vmul.f32 %v7620_v57, %v3993_v49  ;;  %v3267_v46 = vsel %vm208_vm0, %v3265_v32, %v3266_v52  ;;  %v4040_v55 = vmul.f32 %v7620_v57, %v4038_v45  ;;  %v4061_v47 = vmul.f32 %v7620_v57, %v4059_v3 }
 0x274   : > { %v3156_v4 = vpop.permute.xlu1 %3155  ;;  %v3154_v21 = vpop.permute.xlu0 %3153 }
 0x275   : > { %v3160_v17 = vadd.f32 %v3156_v4, %v3139_v6  ;;  %v3159_v23 = vadd.f32 %v3154_v21, %v3138_v9  ;;  %v7640_v6 = vld [vmem:[%s5749_s14 + $0x28] sm:$0x3]  ;;  %v3319_v21 = vmul.f32 %v7537_v18, %v3317_v33  ;;  %v4067_v8 = vrot.slane %v4061_v47, 1 }
 0x276   : > { %3900 = vrot.lane.b32.xlu1 %v3897_v60, %s5659_s21  ;;  %3898 = vrot.lane.b32.xlu0 %v3895_v50, %s5659_s21  ;;  %v3269_v60 = vsel %vm208_vm0, %v3266_v52, %v3268_v29  ;;  %v4007_v50 = vstv %s7591_s27  ;;  %v4041_v9 = vmul.f32 %v7640_v6, %v4038_v45  ;;  %v4062_v20 = vmul.f32 %v7640_v6, %v4059_v3  ;;  %s7725_s27 = sld [smem:[#allocation2 + $0x100]] }
 0x277   : > { %v3177_v16 = vadd.f32 %v3173_v51, %v3160_v17  ;;  %v3176_v19 = vadd.f32 %v3171_v15, %v3159_v23  ;;  %v3320_v51 = vmul.f32 %v7542_v34, %v3317_v33  ;;  %v4009_v17 = vmul.f32 %v7620_v57, %v4007_v50 }
 0x278   : > { %v3194_v28 = vpop.permute.xlu1 %3193  ;;  %v3192_v5 = vpop.permute.xlu0 %3191  ;;  %v3318_v23 = vmul.f32 %v7549_v53, %v3317_v33  ;;  %v4008_v2 = vmul.f32 %v7624_v59, %v4007_v50  ;;  %v3325_v43 = vrot.slane %v3319_v21, 2  ;;  %v4069_v10 = vrot.slane %v4062_v20, 1 }
 0x279   : > { %v3198_v41 = vadd.f32 %v3194_v28, %v3177_v16  ;;  %v3197_v42 = vadd.f32 %v3192_v5, %v3176_v19  ;;  %v4046_v16 = vrot.slane %v4040_v55, 1  ;;  %v4048_v19 = vrot.slane %v4041_v9, 1 }
 0x27a   : > { %3921 = vrot.lane.b32.xlu1 %v3918_v48, %s5658_s17  ;;  %3919 = vrot.lane.b32.xlu0 %v3916_v26, %s5658_s17  ;;  %v4045_v26 = vrot.slane %v4039_v11, 1  ;;  %v3327_v37 = vrot.slane %v3320_v51, 2  ;;  %v4100_v44 = vmul.f32 %v7640_v6, %v4097_v25  ;;  %v3410_v50 = vstv %s7659_s7  ;;  %s7785_s7 = sld [smem:[#allocation2 + $0xcc]] }
 0x27b   : > { %v3411_v20 = vmul.f32 %v7624_v59, %v3410_v50 }
 0x27c   : > { %v3215_v30 = vpop.permute.xlu1 %3214  ;;  %v3213_v35 = vpop.permute.xlu0 %3212  ;;  %v4047_v52 = vsel %vm208_vm0, %v4045_v26, %v4046_v16  ;;  %v3328_v32 = vsel %vm268_vm1, %v3325_v43, %v3327_v37  ;;  %v4145_v26 = vstv %s7679_s8  ;;  %s7814_s8 = sld [smem:[#allocation2 + $0x106]] }
 0x27d   : > { %v3219_v38 = vadd.f32 %v3215_v30, %v3198_v41  ;;  %v3218_v54 = vadd.f32 %v3213_v35, %v3197_v42  ;;  %v4099_v41 = vmul.f32 %v7620_v57, %v4097_v25  ;;  %v4049_v42 = vsel %vm208_vm0, %v4046_v16, %v4048_v19 }
 0x27e   : > { %3959 = vrot.lane.b32.xlu1 %v3956_v39, %s5659_s21  ;;  %3957 = vrot.lane.b32.xlu0 %v3954_v40, %s5659_s21  ;;  %v3324_v40 = vrot.slane %v3318_v23, 2  ;;  %v4118_v30 = vstv %s7644_s5  ;;  %v3417_v37 = vrot.slane %v3411_v20, 1  ;;  %s7759_s5 = sld [smem:[#allocation2 + $0x103]] }
 0x27f   : > { %v3221_v12 = vmax.f32 %v3219_v38, 0.0  ;;  %v3220_v56 = vmax.f32 %v3218_v54, 0.0  ;;  %v4098_v38 = vmul.f32 %v7624_v59, %v4097_v25  ;;  %v4121_v45 = vmul.f32 %v7640_v6, %v4118_v30 }
 0x280   : > { %v3238_v22 = vpop.permute.xlu1 %3237  ;;  %v3236_v24 = vpop.permute.xlu0 %3235 }
 0x281   : > { %5340 = vst.msk [vmem:[%s6295_s28 + $0x48] sm:$0xff] %vm778_vm2, %v3221_v12  ;;  %5339 = vst.msk [vmem:[%s6295_s28 + $0x40] sm:$0xff] %vm778_vm2, %v3220_v56  ;;  %v3242_v13 = vadd.f32 %v3238_v22, %v3228_v62  ;;  %v3241_v4 = vadd.f32 %v3236_v24, %v3227_v7  ;;  %v3326_v62 = vsel %vm268_vm1, %v3324_v40, %v3325_v43  ;;  %v4107_v24 = vrot.slane %v4100_v44, 2 }
 0x282   : > { %3980 = vrot.lane.b32.xlu1 %v3977_v0, %s5658_s17  ;;  %3978 = vrot.lane.b32.xlu0 %v3975_v31, %s5658_s17  ;;  %v4070_v7 = vsel %vm208_vm0, %v4067_v8, %v4069_v10  ;;  %v4105_v0 = vrot.slane %v4099_v41, 2  ;;  %v4120_v31 = vmul.f32 %v7620_v57, %v4118_v30  ;;  %v4068_v22 = vsel %vm208_vm0, %v4066_v14, %v4067_v8  ;;  %v7706_v8 = vld [vmem:[%s5749_s14 + $0x38] sm:$0xff]  ;;  %v7710_v41 = vld [vmem:[%s5749_s14 + $0x30] sm:$0xff] }
 0x283   : > { %v4147_v10 = vmul.f32 %v7706_v8, %v4145_v26  ;;  %v3469_v14 = vstv %s7686_s22  ;;  %v4159_v44 = vstv %s7693_s24  ;;  %s7823_s22 = sld [smem:[#allocation2 + $0x107]] }
 0x284   : > { %v3252_v15 = vpop.permute.xlu1 %3251  ;;  %v3250_v48 = vpop.permute.xlu0 %3249  ;;  %v4108_v21 = vsel %vm268_vm1, %v4105_v0, %v4107_v24  ;;  %v4161_v24 = vmul.f32 %v7706_v8, %v4159_v44  ;;  %s7825_s24 = sld [smem:[#allocation2 + $0x10a]] }
 0x285   : > { %v3256_v36 = vadd.f32 %v3252_v15, %v3242_v13  ;;  %v3255_v1 = vadd.f32 %v3250_v48, %v3241_v4  ;;  %v4126_v13 = vrot.slane %v4120_v31, 2  ;;  %v4128_v4 = vrot.slane %v4121_v45, 2 }
 0x286   : > { %4000 = vrot.lane.b32.xlu1 %v3995_v58, %s5659_s21  ;;  %3998 = vrot.lane.b32.xlu0 %v3994_v61, %s5659_s21  ;;  %v3376_v58 = vstv %s7657_s6  ;;  %v4119_v61 = vmul.f32 %v7624_v59, %v4118_v30  ;;  %v3412_v15 = vmul.f32 %v7620_v57, %v3410_v50  ;;  %v3413_v48 = vmul.f32 %v7640_v6, %v3410_v50  ;;  %s7775_s6 = sld [smem:[#allocation2 + $0x104]] }
 0x287   : > { %v3273_v28 = vadd.f32 %v3269_v60, %v3256_v36  ;;  %v3272_v5 = vadd.f32 %v3267_v46, %v3255_v1  ;;  %v4104_v46 = vrot.slane %v4098_v38, 2  ;;  %v3378_v9 = vmul.f32 %v7620_v57, %v3376_v58 }
 0x288   : > { %v3290_v63 = vpop.permute.xlu1 %3289  ;;  %v3288_v39 = vpop.permute.xlu0 %3287  ;;  %v3377_v11 = vmul.f32 %v7624_v59, %v3376_v58  ;;  %v4125_v51 = vrot.slane %v4119_v61, 2  ;;  %v4129_v16 = vsel %vm268_vm1, %v4126_v13, %v4128_v4  ;;  %v3418_v27 = vrot.slane %v3412_v15, 1 }
 0x289   : > { %v3294_v35 = vadd.f32 %v3290_v63, %v3273_v28  ;;  %v3293_v49 = vadd.f32 %v3288_v39, %v3272_v5  ;;  %v4106_v47 = vsel %vm268_vm1, %v4104_v46, %v4105_v0  ;;  %v3420_v28 = vrot.slane %v3413_v48, 1 }
 0x28a   : > { %4014 = vrot.lane.b32.xlu1 %v4009_v17, %s5658_s17  ;;  %4012 = vrot.lane.b32.xlu0 %v4008_v2, %s5658_s17  ;;  %v4127_v19 = vsel %vm268_vm1, %v4125_v51, %v4126_v13  ;;  %v4190_v63 = vstv %s7682_s16  ;;  %v3471_v0 = vmul.f32 %v7620_v57, %v3469_v14  ;;  %v7733_v31 = vstv %s7697_s25  ;;  %s7817_s16 = sld [smem:[#allocation2 + $0x109]] }
 0x28b   : > { %v4192_v30 = vmul.f32 %v7706_v8, %v4190_v63  ;;  %v4160_v58 = vmul.f32 %v7710_v41, %v4159_v44  ;;  %v4452_v48 = vstv %s7714_s26  ;;  %v3528_v44 = vstv %s7751_s4  ;;  %s7831_s25 = sld [smem:[#allocation2 + $0xd2]] }
 0x28c   : > { %v3311_v54 = vpop.permute.xlu1 %3310  ;;  %v3309_v29 = vpop.permute.xlu0 %3308  ;;  %v3477_v13 = vrot.slane %v3471_v0, 2  ;;  %v4556_v0 = vstv %s7759_s5  ;;  %s7835_s26 = sld [smem:[#allocation2 + $0xcf]] }
 0x28d   : > { %v3315_v12 = vadd.f32 %v3311_v54, %v3294_v35  ;;  %v3314_v56 = vadd.f32 %v3309_v29, %v3293_v49  ;;  %v7721_v35 = vld [vmem:[%s5749_s14 + $0x40] sm:$0x3]  ;;  %v3421_v29 = vsel %vm208_vm0, %v3418_v27, %v3420_v28  ;;  %v4198_v61 = vrot.slane %v4192_v30, 1  ;;  %s7905_s4 = sld [smem:[#allocation2 + $0x112]] }
 0x28e   : > { %4052 = vrot.lane.b32.xlu1 %v4049_v42, %s5659_s21  ;;  %4050 = vrot.lane.b32.xlu0 %v4047_v52, %s5659_s21  ;;  %v4146_v42 = vmul.f32 %v7710_v41, %v4145_v26  ;;  %v4193_v49 = vmul.f32 %v7721_v35, %v4190_v63  ;;  %v4191_v52 = vmul.f32 %v7710_v41, %v4190_v63  ;;  %v4518_v28 = vstv %s7736_s29  ;;  %s7857_s29 = sld [smem:[#allocation2 + $0x10d]] }
 0x28f   : > { %v3332_v33 = vadd.f32 %v3328_v32, %v3315_v12  ;;  %v3331_v60 = vadd.f32 %v3326_v62, %v3314_v56  ;;  %v3419_v32 = vsel %vm208_vm0, %v3417_v37, %v3418_v27  ;;  %v3472_v12 = vmul.f32 %v7640_v6, %v3469_v14  ;;  %s7911_s5 = sld [smem:[#allocation2 + $0xdb]] }
 0x290   : > { %v3349_v3 = vpop.permute.xlu1 %3348  ;;  %v3347_v55 = vpop.permute.xlu0 %3346  ;;  %v3470_v56 = vmul.f32 %v7624_v59, %v3469_v14  ;;  %v4519_v30 = vmul.f32 %v7549_v53, %v4518_v28 }
 0x291   : > { %v3353_v17 = vadd.f32 %v3349_v3, %v3332_v33  ;;  %v3352_v23 = vadd.f32 %v3347_v55, %v3331_v60  ;;  %v4200_v33 = vrot.slane %v4193_v49, 1  ;;  %v4197_v60 = vrot.slane %v4191_v52, 1 }
 0x292   : > { %4073 = vrot.lane.b32.xlu1 %v4070_v7, %s5658_s17  ;;  %4071 = vrot.lane.b32.xlu0 %v4068_v22, %s5658_s17  ;;  %v4212_v3 = vmul.f32 %v7710_v41, %v7733_v31  ;;  %v7747_v55 = vmul.f32 %v7706_v8, %v7733_v31  ;;  %v3479_v4 = vrot.slane %v3472_v12, 2  ;;  %v7780_v49 = vmul.f32 %v7537_v18, %v4518_v28 }
 0x293   : > { %v4201_v51 = vsel %vm208_vm0, %v4198_v61, %v4200_v33  ;;  %v4199_v15 = vsel %vm208_vm0, %v4197_v60, %v4198_v61  ;;  %v4525_v33 = vrot.slane %v4519_v30, 1 }
 0x294   : > { %v3370_v36 = vpop.permute.xlu1 %3369  ;;  %v3368_v1 = vpop.permute.xlu0 %3367  ;;  %v4218_v20 = vrot.slane %v4212_v3, 1  ;;  %v4526_v60 = vrot.slane %v7780_v49, 1 }
 0x295   : > { %v3374_v2 = vadd.f32 %v3370_v36, %v3353_v17  ;;  %v3373_v25 = vadd.f32 %v3368_v1, %v3352_v23  ;;  %v4497_v17 = vstv %s7725_s27  ;;  %v4219_v36 = vrot.slane %v7747_v55, 1  ;;  %s7843_s27 = sld [smem:[#allocation2 + $0x10c]] }
 0x296   : > { %4111 = vrot.lane.b32.xlu1 %v4108_v21, %s5659_s21  ;;  %4109 = vrot.lane.b32.xlu0 %v4106_v47, %s5659_s21  ;;  %v3476_v21 = vrot.slane %v3470_v56, 2  ;;  %v4498_v27 = vmul.f32 %v7549_v53, %v4497_v17  ;;  %v4499_v37 = vmul.f32 %v7537_v18, %v4497_v17 }
 0x297   : > { %v3380_v5 = vadd.f32 %v3378_v9, %v3374_v2  ;;  %v3379_v43 = vadd.f32 %v3377_v11, %v3373_v25  ;;  %v3480_v25 = vsel %vm268_vm1, %v3477_v13, %v3479_v4 }
 0x298   : > { %v3390_v39 = vpop.permute.xlu1 %3389  ;;  %v3388_v40 = vpop.permute.xlu0 %3387 }
 0x299   : > { %v3394_v38 = vadd.f32 %v3390_v39, %v3380_v5  ;;  %v3393_v54 = vadd.f32 %v3388_v40, %v3379_v43  ;;  %v4453_v5 = vmul.f32 %v7549_v53, %v4452_v48  ;;  %v4466_v43 = vstv %s7741_s30  ;;  %s7874_s30 = sld [smem:[#allocation2 + $0xd5]] }
 0x29a   : > { %4132 = vrot.lane.b32.xlu1 %v4129_v16, %s5658_s17  ;;  %4130 = vrot.lane.b32.xlu0 %v4127_v19, %s5658_s17  ;;  %v3478_v16 = vsel %vm268_vm1, %v3476_v21, %v3477_v13  ;;  %v4220_v40 = vsel %vm208_vm0, %v4218_v20, %v4219_v36  ;;  %v4467_v52 = vmul.f32 %v7549_v53, %v4466_v43 }
 0x29b   : > { %v4468_v61 = vmul.f32 %v7537_v18, %v4466_v43 }
 0x29c   : > { %v3404_v62 = vpop.permute.xlu1 %3403  ;;  %v3402_v7 = vpop.permute.xlu0 %3401 }
 0x29d   : > { %v3408_v45 = vadd.f32 %v3404_v62, %v3394_v38  ;;  %v3407_v22 = vadd.f32 %v3402_v7, %v3393_v54  ;;  %v4454_v38 = vmul.f32 %v7537_v18, %v4452_v48  ;;  %v4504_v54 = vrot.slane %v4498_v27, 1 }
 0x29e   : > { %4152 = vrot.lane.b32.xlu1 %v4147_v10, %s5659_s21  ;;  %4150 = vrot.lane.b32.xlu0 %v4146_v42, %s5659_s21  ;;  %v3562_v10 = vstv %s7749_s3  ;;  %s7903_s3 = sld [smem:[#allocation2 + $0x10f]] }
 0x29f   : > { %v3425_v46 = vadd.f32 %v3421_v29, %v3408_v45  ;;  %v3424_v50 = vadd.f32 %v3419_v32, %v3407_v22  ;;  %v4500_v29 = vmul.f32 %v7542_v34, %v4497_v17  ;;  %v4505_v32 = vrot.slane %v4499_v37, 1 }
 0x2a0   : > { %v3442_v9 = vpop.permute.xlu1 %3441  ;;  %v3440_v11 = vpop.permute.xlu0 %3439  ;;  %v3564_v62 = vmul.f32 %v7706_v8, %v3562_v10  ;;  %v3565_v7 = vmul.f32 %v7721_v35, %v3562_v10  ;;  %v3530_v45 = vmul.f32 %v7706_v8, %v3528_v44  ;;  %v3529_v22 = vmul.f32 %v7710_v41, %v3528_v44 }
 0x2a1   : > { %v3446_v23 = vadd.f32 %v3442_v9, %v3425_v46  ;;  %v3445_v47 = vadd.f32 %v3440_v11, %v3424_v50  ;;  %v3563_v46 = vmul.f32 %v7710_v41, %v3562_v10  ;;  %v4507_v9 = vrot.slane %v4500_v29, 1 }
 0x2a2   : > { %4166 = vrot.lane.b32.xlu1 %v4161_v24, %s5658_s17  ;;  %4164 = vrot.lane.b32.xlu0 %v4160_v58, %s5658_s17  ;;  %v4557_v11 = vmul.f32 %v7549_v53, %v4556_v0  ;;  %v4506_v13 = vsel %vm208_vm0, %v4504_v54, %v4505_v32  ;;  %v3570_v4 = vrot.slane %v3564_v62, 1  ;;  %v3572_v21 = vrot.slane %v3565_v7, 1 }
 0x2a3   : > { %v4521_v17 = vmul.f32 %v7542_v34, %v4518_v28  ;;  %v4559_v28 = vmul.f32 %v7542_v34, %v4556_v0 }
 0x2a4   : > { %v3463_v1 = vpop.permute.xlu1 %3462  ;;  %v3461_v2 = vpop.permute.xlu0 %3460 }
 0x2a5   : > { %v3467_v19 = vadd.f32 %v3463_v1, %v3446_v23  ;;  %v3466_v26 = vadd.f32 %v3461_v2, %v3445_v47  ;;  %v4577_v23 = vstv %s7775_s6  ;;  %v3569_v1 = vrot.slane %v3563_v46, 1  ;;  %s7916_s6 = sld [smem:[#allocation2 + $0x110]] }
 0x2a6   : > { %4204 = vrot.lane.b32.xlu1 %v4201_v51, %s5659_s21  ;;  %4202 = vrot.lane.b32.xlu0 %v4199_v15, %s5659_s21  ;;  %v4558_v51 = vmul.f32 %v7537_v18, %v4556_v0  ;;  %v4527_v2 = vsel %vm208_vm0, %v4525_v33, %v4526_v60  ;;  %v4578_v27 = vmul.f32 %v7549_v53, %v4577_v23  ;;  %v4566_v54 = vrot.slane %v4559_v28, 2 }
 0x2a7   : > { %v3484_v63 = vadd.f32 %v3480_v25, %v3467_v19  ;;  %v3483_v39 = vadd.f32 %v3478_v16, %v3466_v26  ;;  %v4508_v25 = vsel %vm208_vm0, %v4505_v32, %v4507_v9  ;;  %v4563_v16 = vrot.slane %v4557_v11, 2 }
 0x2a8   : > { %v3501_v42 = vpop.permute.xlu1 %3500  ;;  %v3499_v14 = vpop.permute.xlu0 %3498  ;;  %v3621_v19 = vstv %s7785_s7  ;;  %v4564_v26 = vrot.slane %v4558_v51, 2  ;;  %v4580_v7 = vmul.f32 %v7542_v34, %v4577_v23  ;;  %v4649_v46 = vstv %s7817_s16  ;;  %s7920_s7 = sld [smem:[#allocation2 + $0xd8]] }
 0x2a9   : > { %v3505_v12 = vadd.f32 %v3501_v42, %v3484_v63  ;;  %v3504_v56 = vadd.f32 %v3499_v14, %v3483_v39  ;;  %v3573_v63 = vsel %vm208_vm0, %v3570_v4, %v3572_v21  ;;  %v4528_v39 = vrot.slane %v4521_v17, 1  ;;  %s7941_s16 = sld [smem:[#allocation2 + $0xf1]] }
 0x2aa   : > { %4457 = vrot.lane.b32.xlu1 %v4453_v5, %s5659_s21  ;;  %4223 = vrot.lane.b32.xlu0 %v4220_v40, %s5658_s17  ;;  %v7811_v5 = vmul.f32 %v7537_v18, %v4577_v23  ;;  %v3571_v42 = vsel %vm208_vm0, %v3569_v1, %v3570_v4  ;;  %v3623_v53 = vmul.f32 %v7706_v8, %v3621_v19  ;;  %v4670_v51 = vstv %s7825_s24  ;;  %s7961_s24 = sld [smem:[#allocation2 + $0x115]] }
 0x2ab   : > { %v3624_v18 = vmul.f32 %v7721_v35, %v3621_v19  ;;  %v3622_v14 = vmul.f32 %v7710_v41, %v3621_v19  ;;  %v4565_v49 = vsel %vm268_vm1, %v4563_v16, %v4564_v26  ;;  %v4529_v62 = vsel %vm208_vm0, %v4526_v60, %v4528_v39 }
 0x2ac   : > { %v3522_v24 = vpop.permute.xlu1 %3521  ;;  %v3520_v58 = vpop.permute.xlu0 %3519  ;;  %v4587_v60 = vrot.slane %v4580_v7, 2  ;;  %v4651_v17 = vmul.f32 %v7620_v57, %v4649_v46  ;;  %v3714_v23 = vstv %s7831_s25  ;;  %v4671_v19 = vmul.f32 %v7624_v59, %v4670_v51  ;;  %s7970_s25 = sld [smem:[#allocation2 + $0xf2]] }
 0x2ad   : > { %v3526_v50 = vadd.f32 %v3522_v24, %v3505_v12  ;;  %v3525_v3 = vadd.f32 %v3520_v58, %v3504_v56  ;;  %v3629_v56 = vrot.slane %v3623_v53, 2  ;;  %v4567_v58 = vsel %vm268_vm1, %v4564_v26, %v4566_v54 }
 0x2ae   : > { %4471 = vrot.lane.b32.xlu1 %v4467_v52, %s5658_s17  ;;  %4459 = vrot.lane.b32.xlu0 %v4454_v38, %s5659_s21  ;;  %v4584_v52 = vrot.slane %v4578_v27, 2  ;;  %v4585_v38 = vrot.slane %v7811_v5, 2  ;;  %v7861_v26 = vmul.f32 %v7620_v57, %v4670_v51  ;;  %v4652_v27 = vmul.f32 %v7640_v6, %v4649_v46 }
 0x2af   : > { %v3532_v15 = vadd.f32 %v3530_v45, %v3526_v50  ;;  %v3531_v48 = vadd.f32 %v3529_v22, %v3525_v3  ;;  %v3631_v45 = vrot.slane %v3624_v18, 2  ;;  %v3628_v22 = vrot.slane %v3622_v14, 2 }
 0x2b0   : > { %v3542_v47 = vpop.permute.xlu1 %3541  ;;  %v3540_v20 = vpop.permute.xlu0 %3539  ;;  %v4586_v24 = vsel %vm268_vm1, %v4584_v52, %v4585_v38  ;;  %v4588_v1 = vsel %vm268_vm1, %v4585_v38, %v4587_v60  ;;  %v4657_v18 = vrot.slane %v4651_v17, 1  ;;  %v4677_v54 = vrot.slane %v4671_v19, 1 }
 0x2b1   : > { %v3546_v43 = vadd.f32 %v3542_v47, %v3532_v15  ;;  %v3545_v37 = vadd.f32 %v3540_v20, %v3531_v48  ;;  %v3632_v9 = vsel %vm268_vm1, %v3629_v56, %v3631_v45  ;;  %v3630_v11 = vsel %vm268_vm1, %v3628_v22, %v3629_v56 }
 0x2b2   : > { %4509 = vrot.lane.b32.xlu1 %v4506_v13, %s5659_s21  ;;  %4473 = vrot.lane.b32.xlu0 %v4468_v61, %s5658_s17  ;;  %v4604_v61 = vstv %s7814_s8  ;;  %v4618_v15 = vstv %s7823_s22  ;;  %v4650_v48 = vmul.f32 %v7624_v59, %v4649_v46  ;;  %s7926_s8 = sld [smem:[#allocation2 + $0x113]] }
 0x2b3   : > { %v4605_v21 = vmul.f32 %v7624_v59, %v4604_v61  ;;  %v4619_v5 = vmul.f32 %v7624_v59, %v4618_v15  ;;  %v4606_v28 = vmul.f32 %v7620_v57, %v4604_v61  ;;  %s7954_s22 = sld [smem:[#allocation2 + $0xde]] }
 0x2b4   : > { %v3556_v40 = vpop.permute.xlu1 %3555  ;;  %v3554_v10 = vpop.permute.xlu0 %3553  ;;  %v4656_v53 = vrot.slane %v4650_v48, 1 }
 0x2b5   : > { %v3560_v44 = vadd.f32 %v3556_v40, %v3546_v43  ;;  %v3559_v30 = vadd.f32 %v3554_v10, %v3545_v37  ;;  %v7867_v43 = vld [vmem:[%s5749_s14 + $0x50] sm:$0xff]  ;;  %v7880_v10 = vld [vmem:[%s5749_s14 + $0x48] sm:$0xff] }
 0x2b6   : > { %4530 = vrot.lane.b32.xlu1 %v4527_v2, %s5658_s17  ;;  %4511 = vrot.lane.b32.xlu0 %v4508_v25, %s5659_s21  ;;  %v3680_v2 = vstv %s7835_s26  ;;  %v3716_v37 = vmul.f32 %v7867_v43, %v3714_v23  ;;  %v4658_v45 = vsel %vm208_vm0, %v4656_v53, %v4657_v18  ;;  %s7997_s26 = sld [smem:[#allocation2 + $0x116]] }
 0x2b7   : > { %v3577_v29 = vadd.f32 %v3573_v63, %v3560_v44  ;;  %v3576_v32 = vadd.f32 %v3571_v42, %v3559_v30  ;;  %v7871_v63 = vld [vmem:[%s5749_s14 + $0x58] sm:$0x3]  ;;  %v3682_v40 = vmul.f32 %v7867_v43, %v3680_v2  ;;  %v3681_v42 = vmul.f32 %v7880_v10, %v3680_v2 }
 0x2b8   : > { %v3594_v0 = vpop.permute.xlu1 %3593  ;;  %v3592_v12 = vpop.permute.xlu0 %3591  ;;  %v3717_v39 = vmul.f32 %v7871_v63, %v3714_v23  ;;  %v4620_v30 = vmul.f32 %v7620_v57, %v4618_v15 }
 0x2b9   : > { %v3598_v33 = vadd.f32 %v3594_v0, %v3577_v29  ;;  %v3597_v34 = vadd.f32 %v3592_v12, %v3576_v32  ;;  %v4678_v29 = vrot.slane %v7861_v26, 1  ;;  %v4659_v32 = vrot.slane %v4652_v27, 1 }
 0x2ba   : > { %4568 = vrot.lane.b32.xlu1 %v4565_v49, %s5659_s21  ;;  %4532 = vrot.lane.b32.xlu0 %v4529_v62, %s5658_s17  ;;  %v4708_v49 = vstv %s7843_s27  ;;  %v3715_v62 = vmul.f32 %v7880_v10, %v3714_v23  ;;  %v3722_v12 = vrot.slane %v3716_v37, 1  ;;  %v3724_v56 = vrot.slane %v3717_v39, 1  ;;  %s8009_s27 = sld [smem:[#allocation2 + $0xe1]] }
 0x2bb   : > { %v4709_v22 = vmul.f32 %v7624_v59, %v4708_v49  ;;  %v4711_v15 = vmul.f32 %v7640_v6, %v4708_v49 }
 0x2bc   : > { %v3615_v50 = vpop.permute.xlu1 %3614  ;;  %v3613_v3 = vpop.permute.xlu0 %3612 }
 0x2bd   : > { %v3619_v13 = vadd.f32 %v3615_v50, %v3598_v33  ;;  %v3618_v4 = vadd.f32 %v3613_v3, %v3597_v34  ;;  %v4673_v33 = vmul.f32 %v7640_v6, %v4670_v51  ;;  %v4729_v34 = vstv %s7857_s29  ;;  %s8012_s29 = sld [smem:[#allocation2 + $0xe4]] }
 0x2be   : > { %4589 = vrot.lane.b32.xlu1 %v4586_v24, %s5658_s17  ;;  %4570 = vrot.lane.b32.xlu0 %v4567_v58, %s5659_s21  ;;  %v4710_v24 = vmul.f32 %v7620_v57, %v4708_v49  ;;  %v3721_v50 = vrot.slane %v3715_v62, 1  ;;  %v4679_v3 = vsel %vm208_vm0, %v4677_v54, %v4678_v29  ;;  %v4731_v51 = vmul.f32 %v7620_v57, %v4729_v34 }
 0x2bf   : > { %v3636_v47 = vadd.f32 %v3632_v9, %v3619_v13  ;;  %v3635_v20 = vadd.f32 %v3630_v11, %v3618_v4  ;;  %v4660_v9 = vsel %vm208_vm0, %v4657_v18, %v4659_v32  ;;  %v3725_v11 = vsel %vm208_vm0, %v3722_v12, %v3724_v56 }
 0x2c0   : > { %v3653_v25 = vpop.permute.xlu1 %3652  ;;  %v3651_v16 = vpop.permute.xlu0 %3650  ;;  %v3773_v13 = vstv %s7874_s30  ;;  %v4715_v4 = vrot.slane %v4709_v22, 2  ;;  %v4716_v23 = vrot.slane %v4710_v24, 2  ;;  %v3723_v2 = vsel %vm208_vm0, %v3721_v50, %v3722_v12  ;;  %s8029_s30 = sld [smem:[#allocation2 + $0xf4]] }
 0x2c1   : > { %v3657_v14 = vadd.f32 %v3653_v25, %v3636_v47  ;;  %v3656_v44 = vadd.f32 %v3651_v16, %v3635_v20  ;;  %v4680_v47 = vrot.slane %v4673_v33, 1  ;;  %v3775_v25 = vmul.f32 %v7867_v43, %v3773_v13 }
 0x2c2   : > { %4609 = vrot.lane.b32.xlu1 %v4605_v21, %s5659_s21  ;;  %4591 = vrot.lane.b32.xlu0 %v4588_v1, %s5658_s17  ;;  %v4730_v21 = vmul.f32 %v7624_v59, %v4729_v34  ;;  %v3776_v59 = vmul.f32 %v7871_v63, %v3773_v13  ;;  %v3774_v57 = vmul.f32 %v7880_v10, %v3773_v13  ;;  %v4737_v27 = vrot.slane %v4731_v51, 2  ;;  %v7951_v51 = vld [vmem:[%s5749_s14 + $0x10] sm:$0x3] }
 0x2c3   : > { %v4801_v32 = vstv %s7905_s4  ;;  %v3869_v22 = vstv %s7911_s5  ;;  %s8048_s4 = sld [smem:[#allocation2 + $0x118]] }
 0x2c4   : > { %v3674_v52 = vpop.permute.xlu1 %3673  ;;  %v3672_v38 = vpop.permute.xlu0 %3671  ;;  %v4736_v26 = vrot.slane %v4730_v21, 2  ;;  %v4802_v33 = vmul.f32 %v7710_v41, %v4801_v32  ;;  %v4803_v50 = vmul.f32 %v7706_v8, %v4801_v32  ;;  %v4804_v13 = vmul.f32 %v7721_v35, %v4801_v32  ;;  %s8056_s5 = sld [smem:[#allocation2 + $0xf7]] }
 0x2c5   : > { %v3678_v7 = vadd.f32 %v3674_v52, %v3657_v14  ;;  %v3677_v0 = vadd.f32 %v3672_v38, %v3656_v44  ;;  %v3781_v14 = vrot.slane %v3775_v25, 2  ;;  %v3783_v44 = vrot.slane %v3776_v59, 2 }
 0x2c6   : > { %4623 = vrot.lane.b32.xlu1 %v4619_v5, %s5658_s17  ;;  %4611 = vrot.lane.b32.xlu0 %v4606_v28, %s5659_s21  ;;  %v4718_v5 = vrot.slane %v4711_v15, 2  ;;  %v4732_v28 = vmul.f32 %v7640_v6, %v4729_v34  ;;  %v4738_v6 = vsel %vm268_vm1, %v4736_v26, %v4737_v27  ;;  %v3872_v15 = vmul.f32 %v7951_v51, %v3869_v22 }
 0x2c7   : > { %v3684_v58 = vadd.f32 %v3682_v40, %v3678_v7  ;;  %v3683_v61 = vadd.f32 %v3681_v42, %v3677_v0  ;;  %v4717_v40 = vsel %vm268_vm1, %v4715_v4, %v4716_v23  ;;  %v4681_v42 = vsel %vm208_vm0, %v4678_v29, %v4680_v47  ;;  %v7947_v4 = vld [vmem:[%s5749_s14 + $0x8] sm:$0xff] }
 0x2c8   : > { %v3694_v60 = vpop.permute.xlu1 %3693  ;;  %v3692_v46 = vpop.permute.xlu0 %3691  ;;  %v4719_v49 = vsel %vm268_vm1, %v4716_v23, %v4718_v5  ;;  %v4739_v52 = vrot.slane %v4732_v28, 2  ;;  %v4756_v29 = vstv %s7903_s3  ;;  %v3784_v0 = vsel %vm268_vm1, %v3781_v14, %v3783_v44  ;;  %s8033_s3 = sld [smem:[#allocation2 + $0xe7]] }
 0x2c9   : > { %v3698_v48 = vadd.f32 %v3694_v60, %v3684_v58  ;;  %v3697_v17 = vadd.f32 %v3692_v46, %v3683_v61  ;;  %v4757_v24 = vmul.f32 %v7710_v41, %v4756_v29  ;;  %v4770_v61 = vstv %s7916_s6  ;;  %s8061_s6 = sld [smem:[#allocation2 + $0xf5]] }
 0x2ca   : > { %4661 = vrot.lane.b32.xlu1 %v4658_v45, %s5659_s21  ;;  %4625 = vrot.lane.b32.xlu0 %v4620_v30, %s5658_s17  ;;  %v3780_v30 = vrot.slane %v3774_v57, 2  ;;  %v4740_v58 = vsel %vm268_vm1, %v4737_v27, %v4739_v52  ;;  %v3837_v46 = vstv %s7920_s7  ;;  %v3871_v21 = vmul.f32 %v7947_v4, %v3869_v22  ;;  %s8066_s7 = sld [smem:[#allocation2 + $0x11b]] }
 0x2cb   : > { %v3839_v47 = vmul.f32 %v7947_v4, %v3837_v46  ;;  %v4808_v59 = vrot.slane %v4802_v33, 1  ;;  %v4809_v57 = vrot.slane %v4803_v50, 1  ;;  %v4811_v27 = vrot.slane %v4804_v13, 1 }
 0x2cc   : > { %v3708_v20 = vpop.permute.xlu1 %3707  ;;  %v3706_v1 = vpop.permute.xlu0 %3705  ;;  %v3782_v12 = vsel %vm268_vm1, %v3780_v30, %v3781_v14  ;;  %v3877_v5 = vrot.slane %v3871_v21, 1  ;;  %v3879_v28 = vrot.slane %v3872_v15, 1  ;;  %v3928_v32 = vstv %s7954_s22  ;;  %s8088_s22 = sld [smem:[#allocation2 + $0xf8]] }
 0x2cd   : > { %v3712_v16 = vadd.f32 %v3708_v20, %v3698_v48  ;;  %v3711_v19 = vadd.f32 %v3706_v1, %v3697_v17  ;;  %v4771_v48 = vmul.f32 %v7710_v41, %v4770_v61  ;;  %v7958_v17 = vld [vmem:[%s5749_s14] sm:$0xff]  ;;  %v4822_v1 = vstv %s7926_s8  ;;  %s8075_s8 = sld [smem:[#allocation2 + $0x119]] }
 0x2ce   : > { %4682 = vrot.lane.b32.xlu1 %v4679_v3, %s5658_s17  ;;  %4663 = vrot.lane.b32.xlu0 %v4660_v9, %s5659_s21  ;;  %v3870_v23 = vmul.f32 %v7958_v17, %v3869_v22  ;;  %v3838_v20 = vmul.f32 %v7958_v17, %v3837_v46  ;;  %v4823_v14 = vmul.f32 %v7710_v41, %v4822_v1  ;;  %v4270_v21 = vstv %s7970_s25  ;;  %s8095_s25 = sld [smem:[#allocation2 + $0x11c]] }
 0x2cf   : > { %v3729_v37 = vadd.f32 %v3725_v11, %v3712_v16  ;;  %v3728_v39 = vadd.f32 %v3723_v2, %v3711_v19  ;;  %v4214_v11 = vmul.f32 %v7721_v35, %v7733_v31  ;;  %v4758_v31 = vmul.f32 %v7706_v8, %v4756_v29 }
 0x2d0   : > { %v3746_v53 = vpop.permute.xlu1 %3745  ;;  %v3744_v18 = vpop.permute.xlu0 %3743  ;;  %v4812_v29 = vsel %vm208_vm0, %v4809_v57, %v4811_v27  ;;  %v3929_v46 = vmul.f32 %v7958_v17, %v3928_v32 }
 0x2d1   : > { %v3750_v38 = vadd.f32 %v3746_v53, %v3729_v37  ;;  %v3749_v54 = vadd.f32 %v3744_v18, %v3728_v39  ;;  %v4221_v26 = vrot.slane %v4214_v11, 1  ;;  %v4772_v53 = vmul.f32 %v7706_v8, %v4770_v61 }
 0x2d2   : > { %4720 = vrot.lane.b32.xlu1 %v4717_v40, %s5659_s21  ;;  %4684 = vrot.lane.b32.xlu0 %v4681_v42, %s5658_s17  ;;  %v3876_v40 = vrot.slane %v3870_v23, 1  ;;  %v4824_v42 = vmul.f32 %v7706_v8, %v4822_v1  ;;  %v4825_v18 = vmul.f32 %v7721_v35, %v4822_v1  ;;  %v3930_v61 = vmul.f32 %v7947_v4, %v3928_v32 }
 0x2d4   : > { %v3767_v62 = vpop.permute.xlu1 %3766  ;;  %v3765_v7 = vpop.permute.xlu0 %3764  ;;  %v4832_v55 = vrot.slane %v4825_v18, 1  ;;  %v4881_v18 = vstv %s7997_s26  ;;  %s8113_s26 = sld [smem:[#allocation2 + $0xfa]] }
 0x2d5   : > { %v3771_v56 = vadd.f32 %v3767_v62, %v3750_v38  ;;  %v3770_v45 = vadd.f32 %v3765_v7, %v3749_v54  ;;  %v4222_v54 = vsel %vm208_vm0, %v4219_v36, %v4221_v26  ;;  %v3880_v62 = vsel %vm208_vm0, %v3877_v5, %v3879_v28 }
 0x2d6   : > { %4741 = vrot.lane.b32.xlu1 %v4738_v6, %s5658_s17  ;;  %4722 = vrot.lane.b32.xlu0 %v4719_v49, %s5659_s21  ;;  %v4810_v6 = vsel %vm208_vm0, %v4808_v59, %v4809_v57  ;;  %v4249_v49 = vstv %s7941_s16  ;;  %v3878_v7 = vsel %vm208_vm0, %v3876_v40, %v3877_v5  ;;  %v4272_v26 = vmul.f32 %v7706_v8, %v4270_v21  ;;  %s8086_s16 = sld [smem:[#allocation2 + $0xea]] }
 0x2d7   : > { %v3788_v34 = vadd.f32 %v3784_v0, %v3771_v56  ;;  %v3787_v60 = vadd.f32 %v3782_v12, %v3770_v45  ;;  %v4830_v0 = vrot.slane %v4824_v42, 1  ;;  %v4860_v12 = vstv %s7961_s24  ;;  %s8092_s24 = sld [smem:[#allocation2 + $0xed]] }
 0x2d8   : > { %v3805_v3 = vpop.permute.xlu1 %3804  ;;  %v3803_v9 = vpop.permute.xlu0 %3802  ;;  %v4829_v56 = vrot.slane %v4823_v14, 1  ;;  %v4251_v36 = vmul.f32 %v7706_v8, %v4249_v49  ;;  %v4252_v45 = vmul.f32 %v7721_v35, %v4249_v49  ;;  %v4862_v50 = vmul.f32 %v7706_v8, %v4860_v12 }
 0x2d9   : > { %v3809_v2 = vadd.f32 %v3805_v3, %v3788_v34  ;;  %v3808_v25 = vadd.f32 %v3803_v9, %v3787_v60  ;;  %v3931_v60 = vmul.f32 %v7951_v51, %v3928_v32  ;;  %v4863_v3 = vmul.f32 %v7721_v35, %v4860_v12 }
 0x2da   : > { %4761 = vrot.lane.b32.xlu1 %v4757_v24, %s5659_s21  ;;  %4743 = vrot.lane.b32.xlu0 %v4740_v58, %s5658_s17  ;;  %v4250_v58 = vmul.f32 %v7710_v41, %v4249_v49  ;;  %v4861_v13 = vmul.f32 %v7710_v41, %v4860_v12  ;;  %v4833_v15 = vsel %vm208_vm0, %v4830_v0, %v4832_v55  ;;  %v4257_v23 = vrot.slane %v4251_v36, 2 }
 0x2db   : > { %v3938_v57 = vrot.slane %v3931_v60, 2  ;;  %v4870_v28 = vrot.slane %v4863_v3, 2  ;;  %v4271_v40 = vmul.f32 %v7710_v41, %v4270_v21  ;;  %v4278_v49 = vrot.slane %v4272_v26, 2 }
 0x2dc   : > { %v3826_v16 = vpop.permute.xlu1 %3825  ;;  %v3824_v19 = vpop.permute.xlu0 %3823  ;;  %v4256_v1 = vrot.slane %v4250_v58, 2  ;;  %v4882_v36 = vmul.f32 %v7710_v41, %v4881_v18 }
 0x2dd   : > { %v3830_v37 = vadd.f32 %v3826_v16, %v3809_v2  ;;  %v3829_v39 = vadd.f32 %v3824_v19, %v3808_v25  ;;  %v3936_v2 = vrot.slane %v3930_v61, 2  ;;  %v3935_v16 = vrot.slane %v3929_v46, 2 }
 0x2de   : > { %4775 = vrot.lane.b32.xlu1 %v4771_v48, %s5658_s17  ;;  %4763 = vrot.lane.b32.xlu0 %v4758_v31, %s5659_s21  ;;  %v4831_v48 = vsel %vm208_vm0, %v4829_v56, %v4830_v0  ;;  %v4259_v31 = vrot.slane %v4252_v45, 2  ;;  %v4868_v19 = vrot.slane %v4862_v50, 2  ;;  %v4883_v0 = vmul.f32 %v7706_v8, %v4881_v18 }
 0x2df   : > { %v3832_v44 = vmax.f32 %v3830_v37, 0.0  ;;  %v3831_v30 = vmax.f32 %v3829_v39, 0.0  ;;  %v4867_v37 = vrot.slane %v4861_v13, 2  ;;  %v4273_v39 = vmul.f32 %v7721_v35, %v4270_v21  ;;  %v8052_v21 = vld [vmem:[%s5749_s14 + $0x28] sm:$0x3] }
 0x2e0   : > { %v3849_v52 = vpop.permute.xlu1 %3848  ;;  %v3847_v38 = vpop.permute.xlu0 %3846  ;;  %v4260_v42 = vsel %vm268_vm1, %v4257_v23, %v4259_v31  ;;  %v4884_v56 = vmul.f32 %v7721_v35, %v4881_v18  ;;  %v4021_v61 = vstv %s8012_s29  ;;  %v8045_v35 = vld [vmem:[%s5749_s14 + $0x18] sm:$0xff]  ;;  %v4889_v46 = vrot.slane %v4883_v0, 2  ;;  %s8149_s29 = sld [smem:[#allocation2 + $0xfb]] }
 0x2e1   : > { %5378 = vst.msk [vmem:[%s6295_s28 + $0x58] sm:$0xff] %vm778_vm2, %v3832_v44  ;;  %5377 = vst.msk [vmem:[%s6295_s28 + $0x50] sm:$0xff] %vm778_vm2, %v3831_v30  ;;  %v3853_v22 = vadd.f32 %v3849_v52, %v3839_v47  ;;  %v3852_v24 = vadd.f32 %v3847_v38, %v3838_v20  ;;  %v3939_v30 = vsel %vm268_vm1, %v3936_v2, %v3938_v57  ;;  %v4280_v32 = vrot.slane %v4273_v39, 2 }
 0x2e2   : > { %4813 = vrot.lane.b32.xlu1 %v4810_v6, %s5659_s21  ;;  %4777 = vrot.lane.b32.xlu0 %v4772_v53, %s5658_s17  ;;  %v4258_v53 = vsel %vm268_vm1, %v4256_v1, %v4257_v23  ;;  %v3937_v6 = vsel %vm268_vm1, %v3935_v16, %v3936_v2  ;;  %v4891_v50 = vrot.slane %v4884_v56, 2  ;;  %v4888_v3 = vrot.slane %v4882_v36, 2 }
 0x2e3   : > { %v4281_v8 = vsel %vm268_vm1, %v4278_v49, %v4280_v32  ;;  %v4311_v32 = vstv %s8061_s6  ;;  %s5432_s6 = sld [smem:[#allocation2 + $0x10b]] }
 0x2e4   : > { %v3863_v33 = vpop.permute.xlu1 %3862  ;;  %v3861_v34 = vpop.permute.xlu0 %3860  ;;  %v4892_v2 = vsel %vm268_vm1, %v4889_v46, %v4891_v50 }
 0x2e5   : > { %v3867_v9 = vadd.f32 %v3863_v33, %v3853_v22  ;;  %v3866_v11 = vadd.f32 %v3861_v34, %v3852_v24  ;;  %v8041_v34 = vld [vmem:[%s5749_s14 + $0x20] sm:$0xff] }
 0x2e6   : > { %4225 = vrot.lane.b32.xlu1 %v4222_v54, %s5658_s17  ;;  %4815 = vrot.lane.b32.xlu0 %v4812_v29, %s5659_s21  ;;  %v4871_v54 = vsel %vm268_vm1, %v4868_v19, %v4870_v28  ;;  %v4869_v29 = vsel %vm268_vm1, %v4867_v37, %v4868_v19  ;;  %v4023_v13 = vmul.f32 %v8041_v34, %v4021_v61 }
 0x2e7   : > { %v3884_v47 = vadd.f32 %v3880_v62, %v3867_v9  ;;  %v3883_v20 = vadd.f32 %v3878_v7, %v3866_v11  ;;  %v4277_v62 = vrot.slane %v4271_v40, 2  ;;  %v3987_v7 = vstv %s8009_s27  ;;  %s8124_s27 = sld [smem:[#allocation2 + $0x11e]] }
 0x2e8   : > { %v3901_v25 = vpop.permute.xlu1 %3900  ;;  %v3899_v59 = vpop.permute.xlu0 %3898  ;;  %v3989_v41 = vmul.f32 %v8041_v34, %v3987_v7  ;;  %v3988_v60 = vmul.f32 %v8045_v35, %v3987_v7  ;;  %v4029_v16 = vrot.slane %v4023_v13, 1  ;;  %v4908_v40 = vstv %s8048_s4  ;;  %s5417_s4 = sld [smem:[#allocation2 + $0xfc]] }
 0x2e9   : > { %v3905_v27 = vadd.f32 %v3901_v25, %v3884_v47  ;;  %v3904_v5 = vadd.f32 %v3899_v59, %v3883_v20  ;;  %v4279_v33 = vsel %vm268_vm1, %v4277_v62, %v4278_v49  ;;  %v4297_v47 = vstv %s8029_s30  ;;  %s8162_s30 = sld [smem:[#allocation2 + $0x11f]] }
 0x2ea   : > { %4836 = vrot.lane.b32.xlu1 %v4833_v15, %s5658_s17  ;;  %4834 = vrot.lane.b32.xlu0 %v4831_v48, %s5658_s17  ;;  %v4024_v15 = vmul.f32 %v8052_v21, %v4021_v61  ;;  %v4022_v48 = vmul.f32 %v8045_v35, %v4021_v61  ;;  %v4890_v25 = vsel %vm268_vm1, %v4888_v3, %v4889_v46  ;;  %v4953_v61 = vstv %s8066_s7  ;;  %s5435_s7 = sld [smem:[#allocation2 + $0x10e]] }
 0x2eb   : > { %v4299_v37 = vmul.f32 %v7867_v43, %v4297_v47  ;;  %v4298_v39 = vmul.f32 %v7880_v10, %v4297_v47 }
 0x2ec   : > { %v3922_v14 = vpop.permute.xlu1 %3921  ;;  %v3920_v44 = vpop.permute.xlu0 %3919  ;;  %v4031_v19 = vrot.slane %v4024_v15, 1  ;;  %v4028_v26 = vrot.slane %v4022_v48, 1  ;;  %v4955_v15 = vmul.f32 %v7867_v43, %v4953_v61 }
 0x2ed   : > { %v3926_v52 = vadd.f32 %v3922_v14, %v3905_v27  ;;  %v3925_v38 = vadd.f32 %v3920_v44, %v3904_v5  ;;  %v4080_v27 = vstv %s8033_s3  ;;  %s5420_s3 = sld [smem:[#allocation2 + $0xff]] }
 0x2ee   : > { %4263 = vrot.lane.b32.xlu1 %v4260_v42, %s5659_s21  ;;  %4261 = vrot.lane.b32.xlu0 %v4258_v53, %s5659_s21  ;;  %v4082_v42 = vmul.f32 %v8041_v34, %v4080_v27  ;;  %v4083_v53 = vmul.f32 %v8052_v21, %v4080_v27  ;;  %v4032_v44 = vsel %vm208_vm0, %v4029_v16, %v4031_v19 }
 0x2ef   : > { %v3943_v12 = vadd.f32 %v3939_v30, %v3926_v52  ;;  %v3942_v55 = vadd.f32 %v3937_v6, %v3925_v38  ;;  %v4030_v30 = vsel %vm208_vm0, %v4028_v26, %v4029_v16  ;;  %v4081_v6 = vmul.f32 %v8045_v35, %v4080_v27 }
 0x2f0   : > { %v3960_v45 = vpop.permute.xlu1 %3959  ;;  %v3958_v22 = vpop.permute.xlu0 %3957  ;;  %v4342_v38 = vstv %s8056_s5  ;;  %v4088_v0 = vrot.slane %v4082_v42, 2  ;;  %v4139_v27 = vstv %s8086_s16  ;;  %v4974_v42 = vstv %s8095_s25  ;;  %s5429_s5 = sld [smem:[#allocation2 + $0x108]] }
 0x2f1   : > { %v3964_v24 = vadd.f32 %v3960_v45, %v3943_v12  ;;  %v3963_v58 = vadd.f32 %v3958_v22, %v3942_v55  ;;  %v4090_v12 = vrot.slane %v4083_v53, 2  ;;  %v4087_v36 = vrot.slane %v4081_v6, 2  ;;  %v8128_v6 = vld [vmem:[%s5749_s14 + $0x38] sm:$0xff]  ;;  %s5403_s16 = sld [smem:[#allocation2 + $0xf0]] }
 0x2f2   : > { %4874 = vrot.lane.b32.xlu1 %v4871_v54, %s5659_s21  ;;  %4872 = vrot.lane.b32.xlu0 %v4869_v29, %s5659_s21  ;;  %v4910_v54 = vmul.f32 %v7867_v43, %v4908_v40  ;;  %v4909_v29 = vmul.f32 %v7880_v10, %v4908_v40  ;;  %v4344_v45 = vmul.f32 %v7867_v43, %v4342_v38  ;;  %s8294_s25 = sld [smem:[#allocation2 + $0x117]] }
 0x2f3   : > { %v4345_v22 = vmul.f32 %v7871_v63, %v4342_v38  ;;  %v4343_v46 = vmul.f32 %v7880_v10, %v4342_v38 }
 0x2f4   : > { %v3981_v9 = vpop.permute.xlu1 %3980  ;;  %v3979_v11 = vpop.permute.xlu0 %3978 }
 0x2f5   : > { %v3985_v23 = vadd.f32 %v3981_v9, %v3964_v24  ;;  %v3984_v31 = vadd.f32 %v3979_v11, %v3963_v58  ;;  %v4089_v9 = vsel %vm268_vm1, %v4087_v36, %v4088_v0  ;;  %v4350_v11 = vrot.slane %v4344_v45, 1 }
 0x2f6   : > { %4284 = vrot.lane.b32.xlu1 %v4281_v8, %s5658_s17  ;;  %4282 = vrot.lane.b32.xlu0 %v4279_v33, %s5658_s17  ;;  %v4313_v8 = vmul.f32 %v7867_v43, %v4311_v32  ;;  %v4312_v33 = vmul.f32 %v7880_v10, %v4311_v32  ;;  %v4352_v13 = vrot.slane %v4345_v22, 1  ;;  %v4975_v22 = vmul.f32 %v7880_v10, %v4974_v42 }
 0x2f7   : > { %v3991_v20 = vadd.f32 %v3989_v41, %v3985_v23  ;;  %v3990_v1 = vadd.f32 %v3988_v60, %v3984_v31  ;;  %v4091_v41 = vsel %vm268_vm1, %v4088_v0, %v4090_v12  ;;  %v4922_v60 = vstv %s8075_s8  ;;  %s5438_s8 = sld [smem:[#allocation2 + $0x111]] }
 0x2f8   : > { %v4001_v59 = vpop.permute.xlu1 %4000  ;;  %v3999_v57 = vpop.permute.xlu0 %3998  ;;  %v4956_v31 = vmul.f32 %v7871_v63, %v4953_v61  ;;  %v4924_v47 = vmul.f32 %v7867_v43, %v4922_v60  ;;  %v4353_v26 = vsel %vm208_vm0, %v4350_v11, %v4352_v13  ;;  %v4976_v12 = vmul.f32 %v7867_v43, %v4974_v42 }
 0x2f9   : > { %v4005_v5 = vadd.f32 %v4001_v59, %v3991_v20  ;;  %v4004_v28 = vadd.f32 %v3999_v57, %v3990_v1  ;;  %v4923_v20 = vmul.f32 %v7880_v10, %v4922_v60  ;;  %v4954_v1 = vmul.f32 %v7880_v10, %v4953_v61 }
 0x2fa   : > { %4895 = vrot.lane.b32.xlu1 %v4892_v2, %s5658_s17  ;;  %4893 = vrot.lane.b32.xlu0 %v4890_v25, %s5658_s17  ;;  %v4349_v59 = vrot.slane %v4343_v46, 1  ;;  %v4363_v57 = vstv %s8088_s22  ;;  %v4963_v40 = vrot.slane %v4956_v31, 1  ;;  %v4401_v46 = vstv %s8113_s26  ;;  %s5441_s22 = sld [smem:[#allocation2 + $0x114]] }
 0x2fb   : > { %v4960_v53 = vrot.slane %v4954_v1, 1  ;;  %v4982_v13 = vrot.slane %v4976_v12, 1  ;;  %v4981_v31 = vrot.slane %v4975_v22, 1  ;;  %v5012_v1 = vstv %s8124_s27  ;;  %s5409_s26 = sld [smem:[#allocation2 + $0xf6]] }
 0x2fc   : > { %v4015_v18 = vpop.permute.xlu1 %4014  ;;  %v4013_v14 = vpop.permute.xlu0 %4012  ;;  %s5447_s27 = sld [smem:[#allocation2 + $0x11a]] }
 0x2fd   : > { %v4019_v49 = vadd.f32 %v4015_v18, %v4005_v5  ;;  %v4018_v52 = vadd.f32 %v4013_v14, %v4004_v28  ;;  %v4961_v5 = vrot.slane %v4955_v15, 1  ;;  %v4173_v28 = vstv %s8092_s24  ;;  %s8285_s24 = sld [smem:[#allocation2 + $0xf3]] }
 0x2fe   : > { %4304 = vrot.lane.b32.xlu1 %v4299_v37, %s5659_s21  ;;  %4302 = vrot.lane.b32.xlu0 %v4298_v39, %s5659_s21  ;;  %v4365_v18 = vmul.f32 %v7867_v43, %v4363_v57  ;;  %v4366_v14 = vmul.f32 %v7871_v63, %v4363_v57 }
 0x2ff   : > { %v4036_v62 = vadd.f32 %v4032_v44, %v4019_v49  ;;  %v4035_v7 = vadd.f32 %v4030_v30, %v4018_v52  ;;  %v4364_v44 = vmul.f32 %v7880_v10, %v4363_v57  ;;  %v4351_v30 = vsel %vm208_vm0, %v4349_v59, %v4350_v11  ;;  %v8132_v52 = vld [vmem:[%s5749_s14 + $0x30] sm:$0xff] }
 0x300   : > { %v4053_v55 = vpop.permute.xlu1 %4052  ;;  %v4051_v56 = vpop.permute.xlu0 %4050  ;;  %v4141_v49 = vmul.f32 %v8128_v6, %v4139_v27  ;;  %v4140_v38 = vmul.f32 %v8132_v52, %v4139_v27  ;;  %v4174_v0 = vmul.f32 %v8132_v52, %v4173_v28  ;;  %v4964_v45 = vsel %vm208_vm0, %v4961_v5, %v4963_v40 }
 0x301   : > { %v4057_v24 = vadd.f32 %v4053_v55, %v4036_v62  ;;  %v4056_v58 = vadd.f32 %v4051_v56, %v4035_v7  ;;  %v8137_v62 = vld [vmem:[%s5749_s14 + $0x40] sm:$0x3]  ;;  %v4977_v55 = vmul.f32 %v7871_v63, %v4974_v42  ;;  %v4373_v61 = vrot.slane %v4366_v14, 1 }
 0x302   : > { %4915 = vrot.lane.b32.xlu1 %v4910_v54, %s5659_s21  ;;  %4913 = vrot.lane.b32.xlu0 %v4909_v29, %s5659_s21  ;;  %v4175_v54 = vmul.f32 %v8128_v6, %v4173_v28  ;;  %v4176_v7 = vmul.f32 %v8137_v62, %v4173_v28  ;;  %v4180_v11 = vrot.slane %v4174_v0, 1  ;;  %v4402_v59 = vmul.f32 %v7880_v10, %v4401_v46 }
 0x303   : > { %v4984_v15 = vrot.slane %v4977_v55, 1 }
 0x304   : > { %v4074_v50 = vpop.permute.xlu1 %4073  ;;  %v4072_v3 = vpop.permute.xlu0 %4071  ;;  %v4181_v60 = vrot.slane %v4175_v54, 1 }
 0x305   : > { %v4078_v48 = vadd.f32 %v4074_v50, %v4057_v24  ;;  %v4077_v23 = vadd.f32 %v4072_v3, %v4056_v58  ;;  %v4962_v24 = vsel %vm208_vm0, %v4960_v53, %v4961_v5  ;;  %v4371_v58 = vrot.slane %v4365_v18, 1 }
 0x306   : > { %4318 = vrot.lane.b32.xlu1 %v4313_v8, %s5658_s17  ;;  %4316 = vrot.lane.b32.xlu0 %v4312_v33, %s5658_s17  ;;  %v4370_v8 = vrot.slane %v4364_v44, 1  ;;  %v4985_v27 = vsel %vm208_vm0, %v4982_v13, %v4984_v15  ;;  %v5015_v53 = vmul.f32 %v7871_v63, %v5012_v1  ;;  %v5013_v18 = vmul.f32 %v7880_v10, %v5012_v1 }
 0x307   : > { %v4095_v2 = vadd.f32 %v4091_v41, %v4078_v48  ;;  %v4094_v25 = vadd.f32 %v4089_v9, %v4077_v23  ;;  %v4183_v9 = vrot.slane %v4176_v7, 1 }
 0x308   : > { %v4112_v16 = vpop.permute.xlu1 %4111  ;;  %v4110_v19 = vpop.permute.xlu0 %4109  ;;  %v5022_v0 = vrot.slane %v5015_v53, 2  ;;  %v5019_v12 = vrot.slane %v5013_v18, 2 }
 0x309   : > { %v4116_v37 = vadd.f32 %v4112_v16, %v4095_v2  ;;  %v4115_v39 = vadd.f32 %v4110_v19, %v4094_v25  ;;  %v4374_v2 = vsel %vm208_vm0, %v4371_v58, %v4373_v61  ;;  %v4372_v25 = vsel %vm208_vm0, %v4370_v8, %v4371_v58 }
 0x30a   : > { %4929 = vrot.lane.b32.xlu1 %v4924_v47, %s5658_s17  ;;  %4927 = vrot.lane.b32.xlu0 %v4923_v20, %s5658_s17  ;;  %v4403_v47 = vmul.f32 %v7867_v43, %v4401_v46  ;;  %v4404_v20 = vmul.f32 %v7871_v63, %v4401_v46  ;;  %v4184_v19 = vsel %vm208_vm0, %v4181_v60, %v4183_v9  ;;  %v5033_v61 = vstv %s8162_s30  ;;  %s8338_s30 = sld [smem:[#allocation2 + $0x11d]] }
 0x30b   : > { %v5036_v9 = vmul.f32 %v7871_v63, %v5033_v61 }
 0x30c   : > { %v4133_v29 = vpop.permute.xlu1 %4132  ;;  %v4131_v32 = vpop.permute.xlu0 %4130  ;;  %v4409_v40 = vrot.slane %v4403_v47, 2  ;;  %v4411_v42 = vrot.slane %v4404_v20, 2 }
 0x30d   : > { %v4137_v56 = vadd.f32 %v4133_v29, %v4116_v37  ;;  %v4136_v36 = vadd.f32 %v4131_v32, %v4115_v39  ;;  %v4983_v37 = vsel %vm208_vm0, %v4981_v31, %v4982_v13  ;;  %v5014_v39 = vmul.f32 %v7867_v43, %v5012_v1 }
 0x30e   : > { %4356 = vrot.lane.b32.xlu1 %v4353_v26, %s5659_s21  ;;  %4354 = vrot.lane.b32.xlu0 %v4351_v30, %s5659_s21  ;;  %v4182_v26 = vsel %vm208_vm0, %v4180_v11, %v4181_v60  ;;  %v4408_v30 = vrot.slane %v4402_v59, 2  ;;  %v5034_v11 = vmul.f32 %v7880_v10, %v5033_v61  ;;  %v5043_v47 = vrot.slane %v5036_v9, 2 }
 0x30f   : > { %v4143_v33 = vadd.f32 %v4141_v49, %v4137_v56  ;;  %v4142_v41 = vadd.f32 %v4140_v38, %v4136_v36  ;;  %v4422_v49 = vstv %s8149_s29  ;;  %v5020_v7 = vrot.slane %v5014_v39, 2  ;;  %s8311_s29 = sld [smem:[#allocation2 + $0xf9]] }
 0x310   : > { %v4153_v50 = vpop.permute.xlu1 %4152  ;;  %v4151_v3 = vpop.permute.xlu0 %4150  ;;  %v4424_v55 = vmul.f32 %v7867_v43, %v4422_v49  ;;  %v4425_v56 = vmul.f32 %v7871_v63, %v4422_v49  ;;  %v4412_v36 = vsel %vm268_vm1, %v4409_v40, %v4411_v42  ;;  %v4423_v22 = vmul.f32 %v7880_v10, %v4422_v49 }
 0x311   : > { %v4157_v48 = vadd.f32 %v4153_v50, %v4143_v33  ;;  %v4156_v23 = vadd.f32 %v4151_v3, %v4142_v41  ;;  %v5023_v33 = vsel %vm268_vm1, %v5020_v7, %v5022_v0  ;;  %v5021_v41 = vsel %vm268_vm1, %v5019_v12, %v5020_v7 }
 0x312   : > { %4967 = vrot.lane.b32.xlu1 %v4964_v45, %s5659_s21  ;;  %4965 = vrot.lane.b32.xlu0 %v4962_v24, %s5659_s21  ;;  %v4410_v45 = vsel %vm268_vm1, %v4408_v30, %v4409_v40  ;;  %v4430_v60 = vrot.slane %v4424_v55, 2  ;;  %v4432_v46 = vrot.slane %v4425_v56, 2  ;;  %v4429_v50 = vrot.slane %v4423_v22, 2 }
 0x313   : > { %v5035_v3 = vmul.f32 %v7867_v43, %v5033_v61  ;;  %v5040_v20 = vrot.slane %v5034_v11, 2 }
 0x314   : > { %v4167_v57 = vpop.permute.xlu1 %4166  ;;  %v4165_v16 = vpop.permute.xlu0 %4164 }
 0x315   : > { %v4171_v5 = vadd.f32 %v4167_v57, %v4157_v48  ;;  %v4170_v28 = vadd.f32 %v4165_v16, %v4156_v23  ;;  %v4433_v48 = vsel %vm268_vm1, %v4430_v60, %v4432_v46  ;;  %v4431_v23 = vsel %vm268_vm1, %v4429_v50, %v4430_v60 }
 0x316   : > { %4377 = vrot.lane.b32.xlu1 %v4374_v2, %s5658_s17  ;;  %4375 = vrot.lane.b32.xlu0 %v4372_v25, %s5658_s17  ;;  %v5041_v31 = vrot.slane %v5035_v3, 2  ;;  %v4480_v16 = vstv %s5420_s3  ;;  %s5072_s3 = sshll.u32 %s6295_s28, 4  ;;  %s8377_s3 = int_to_ptr.vmem [resolvable:$true] %s5072_s3 }
 0x317   : > { %v4188_v14 = vadd.f32 %v4184_v19, %v4171_v5  ;;  %v4187_v44 = vadd.f32 %v4182_v26, %v4170_v28  ;;  %v4448_v19 = vstv %s5417_s4  ;;  %v4481_v26 = vmul.f32 %v7958_v17, %v4480_v16 }
 0x318   : > { %v4205_v38 = vpop.permute.xlu1 %4204  ;;  %v4203_v54 = vpop.permute.xlu0 %4202  ;;  %v5044_v43 = vsel %vm268_vm1, %v5041_v31, %v5043_v47  ;;  %v5042_v63 = vsel %vm268_vm1, %v5040_v20, %v5041_v31  ;;  %v4483_v5 = vmul.f32 %v7951_v51, %v4480_v16  ;;  %v4449_v39 = vmul.f32 %v7958_v17, %v4448_v19 }
 0x319   : > { %v8171_v29 = vadd.f32 %v4205_v38, %v4188_v14  ;;  %v4208_v32 = vadd.f32 %v4203_v54, %v4187_v44  ;;  %v4450_v40 = vmul.f32 %v7947_v4, %v4448_v19  ;;  %v4487_v42 = vrot.slane %v4481_v26, 1 }
 0x31a   : > { %4988 = vrot.lane.b32.xlu1 %v4985_v27, %s5658_s17  ;;  %4986 = vrot.lane.b32.xlu0 %v4983_v37, %s5658_s17  ;;  %v4482_v27 = vmul.f32 %v7947_v4, %v4480_v16  ;;  %v4490_v18 = vrot.slane %v4483_v5, 1 }
 0x31c   : > { %v4458_v24 = vpop.permute.xlu1 %4457  ;;  %v4224_v58 = vpop.permute.xlu0 %4223  ;;  %v4488_v53 = vrot.slane %v4482_v27, 1 }
 0x31d   : > { %v8181_v8 = vadd.f32 %v4224_v58, %v4208_v32  ;;  %v4463_v30 = vadd.f32 %v4458_v24, %v4449_v39 }
 0x31e   : > { %4415 = vrot.lane.b32.xlu1 %v4412_v36, %s5659_s21  ;;  %4413 = vrot.lane.b32.xlu0 %v4410_v45, %s5659_s21  ;;  %v4489_v7 = vsel %vm208_vm0, %v4487_v42, %v4488_v53  ;;  %v4491_v0 = vsel %vm208_vm0, %v4488_v53, %v4490_v18 }
 0x320   : > { %v4472_v13 = vpop.permute.xlu1 %4471  ;;  %v4460_v15 = vpop.permute.xlu0 %4459 }
 0x321   : > { %v4464_v49 = vadd.f32 %v4460_v15, %v4450_v40  ;;  %v4477_v38 = vadd.f32 %v4472_v13, %v4463_v30 }
 0x322   : > { %5026 = vrot.lane.b32.xlu1 %v5023_v33, %s5659_s21  ;;  %5024 = vrot.lane.b32.xlu0 %v5021_v41, %s5659_s21  ;;  %s5423_s21 = sld [smem:[#allocation2 + $0x102]] }
 0x323   : > { %v4494_v22 = vadd.f32 %v4489_v7, %v4477_v38 }
 0x324   : > { %v4510_v1 = vpop.permute.xlu1 %4509  ;;  %v4474_v2 = vpop.permute.xlu0 %4473 }
 0x325   : > { %v4478_v54 = vadd.f32 %v4474_v2, %v4464_v49  ;;  %v4515_v46 = vadd.f32 %v4510_v1, %v4494_v22 }
 0x326   : > { %4436 = vrot.lane.b32.xlu1 %v4433_v48, %s5658_s17  ;;  %4434 = vrot.lane.b32.xlu0 %v4431_v23, %s5658_s17 }
 0x327   : > { %v4495_v58 = vadd.f32 %v4491_v0, %v4478_v54 }
 0x328   : > { %v4531_v10 = vpop.permute.xlu1 %4530  ;;  %v4512_v25 = vpop.permute.xlu0 %4511  ;;  %v4539_v32 = vstv %s5423_s21 }
 0x329   : > { %v4540_v56 = vmul.f32 %v7958_v17, %v4539_v32  ;;  %v4541_v36 = vmul.f32 %v7947_v4, %v4539_v32  ;;  %v4542_v45 = vmul.f32 %v7951_v51, %v4539_v32  ;;  %v4516_v50 = vadd.f32 %v4512_v25, %v4495_v58 }
 0x32a   : > { %5047 = vrot.lane.b32.xlu1 %v5044_v43, %s5658_s17  ;;  %5045 = vrot.lane.b32.xlu0 %v5042_v63, %s5658_s17  ;;  %s5426_s17 = sld [smem:[#allocation2 + $0x105]]  ;;  %v4536_v11 = vadd.f32 %v4531_v10, %v4515_v46  ;;  %v4691_v32 = vstv %s5432_s6  ;;  %s5660_s6 = smov [#allocation5]  }
 0x32b   : > { %v4546_v33 = vrot.slane %v4540_v56, 2  ;;  %v4547_v41 = vrot.slane %v4541_v36, 2  ;;  %v4549_v60 = vrot.slane %v4542_v45, 2  ;;  %v4692_v56 = vmul.f32 %v8045_v35, %v4691_v32 }
 0x32c   : > { %v4569_v59 = vpop.permute.xlu1 %4568  ;;  %v4533_v57 = vpop.permute.xlu0 %4532  ;;  %v4693_v36 = vmul.f32 %v8041_v34, %v4691_v32  ;;  %v4694_v45 = vmul.f32 %v8052_v21, %v4691_v32 }
 0x32d   : > { %v4537_v13 = vadd.f32 %v4533_v57, %v4516_v50  ;;  %v4548_v17 = vsel %vm268_vm1, %v4546_v33, %v4547_v41  ;;  %v4550_v4 = vsel %vm268_vm1, %v4547_v41, %v4549_v60  ;;  %v4632_v57 = vstv %s5429_s5  ;;  %s5591_s5 = scalar_lea.vmem %s8377_s3, 2048 }
 0x32e   : > { %v4553_v48 = vadd.f32 %v4548_v17, %v4536_v11  ;;  %v4633_v26 = vmul.f32 %v8045_v35, %v4632_v57  ;;  %v4634_v27 = vmul.f32 %v8041_v34, %v4632_v57  ;;  %v4635_v5 = vmul.f32 %v8052_v21, %v4632_v57  ;;  %p5592_p9 = scmp.ne.s32.totalorder %s8377_s3, %s5591_s5 }
 0x32f   : > { %v4554_v23 = vadd.f32 %v4550_v4, %v4537_v13  ;;  %v4698_v33 = vrot.slane %v4692_v56, 2  ;;  %v4843_v56 = vstv %s5441_s22 }
 0x330   : > { %v4590_v28 = vpop.permute.xlu1 %4589  ;;  %v4571_v37 = vpop.permute.xlu0 %4570  ;;  %v4598_v31 = vstv %s5426_s17  ;;  %v4574_v1 = vadd.f32 %v4569_v59, %v4553_v48  ;;  %v4640_v42 = vrot.slane %v4634_v27, 1  ;;  %v4642_v53 = vrot.slane %v4635_v5, 1  ;;  %p5593_p10 = pnand %p5592_p9, %p5716_p5 }
 0x331   : > { %v4575_v2 = vadd.f32 %v4571_v37, %v4554_v23  ;;  %v4599_v43 = vmul.f32 %v8045_v35, %v4598_v31  ;;  %v4600_v25 = vmul.f32 %v8041_v34, %v4598_v31 }
 0x332   : > { %v4595_v63 = vadd.f32 %v4590_v28, %v4574_v1  ;;  %v4639_v28 = vrot.slane %v4633_v26, 1  ;;  %v4643_v0 = vsel %vm208_vm0, %v4640_v42, %v4642_v53  ;;  %p5594_p12 = pneg %p5593_p10 }
 0x334   : > { %v4610_v14 = vpop.permute.xlu1 %4609  ;;  %v4592_v44 = vpop.permute.xlu0 %4591  ;;  %v4601_v39 = vadd.f32 %v4599_v43, %v4595_v63  ;;  %v4641_v7 = vsel %vm208_vm0, %v4639_v28, %v4640_v42 }
 0x335   : > { %v4596_v10 = vadd.f32 %v4592_v44, %v4575_v2 }
 0x336   : > { %v4615_v18 = vadd.f32 %v4610_v14, %v4601_v39 }
 0x337   : > { %v4602_v59 = vadd.f32 %v4600_v25, %v4596_v10  ;;  %v4784_v25 = vstv %s5438_s8 }
 0x338   : > { %v4624_v12 = vpop.permute.xlu1 %4623  ;;  %v4612_v55 = vpop.permute.xlu0 %4611  ;;  %v4785_v57 = vmul.f32 %v8132_v52, %v4784_v25  ;;  %v4786_v26 = vmul.f32 %v8128_v6, %v4784_v25 }
 0x339   : > { %v4616_v44 = vadd.f32 %v4612_v55, %v4602_v59  ;;  %v4629_v38 = vadd.f32 %v4624_v12, %v4615_v18  ;;  %v4699_v12 = vrot.slane %v4693_v36, 2  ;;  %v4232_v59 = vstv %s5403_s16 }
 0x33a   : > { %v4791_v28 = vrot.slane %v4785_v57, 1  ;;  %v4235_v32 = vmul.f32 %v8137_v62, %v4232_v59  ;;  %v8321_v57 = vld [vmem:[%s5749_s14 + $0x50] sm:$0xff] }
 0x33b   : > { %v4646_v55 = vadd.f32 %v4641_v7, %v4629_v38  ;;  %v4700_v21 = vsel %vm268_vm1, %v4698_v33, %v4699_v12  ;;  %v4234_v38 = vmul.f32 %v8128_v6, %v4232_v59 }
 0x33c   : > { %v8210_v61 = vpop.permute.xlu1 %4661  ;;  %v4626_v24 = vpop.permute.xlu0 %4625  ;;  %v4242_v33 = vrot.slane %v4235_v32, 2 }
 0x33d   : > { %v4630_v54 = vadd.f32 %v4626_v24, %v4616_v44  ;;  %v4701_v24 = vrot.slane %v4694_v45, 2  ;;  %v4667_v46 = vadd.f32 %v8210_v61, %v4646_v55  ;;  %v4750_v61 = vstv %s5435_s7  ;;  %s5595_s7 = sshll.u32 %s5660_s6, 4  ;;  %s5596_s7 = int_to_ptr.vmem [resolvable:$false] %s5595_s7 }
 0x33e   : > { %v4752_v10 = vmul.f32 %v8128_v6, %v4750_v61  ;;  %v4240_v55 = vrot.slane %v4234_v38, 2  ;;  %s5597_s8 = scalar_lea.vmem %s5596_s7, 4096  ;;  %p5598_p13 = scmp.lt.s32.totalorder %s8377_s3, %s5596_s7 }
 0x33f   : > { %v4647_v58 = vadd.f32 %v4643_v0, %v4630_v54  ;;  %v4702_v11 = vsel %vm268_vm1, %v4699_v12, %v4701_v24  ;;  %v4233_v54 = vmul.f32 %v8132_v52, %v4232_v59  ;;  %v4845_v12 = vmul.f32 %v8128_v6, %v4843_v56  ;;  %p5599_p0 = scmp.lt.s32.totalorder %s5597_s8, %s5591_s5 }
 0x340   : > { %v4683_v3 = vpop.permute.xlu1 %4682  ;;  %v4664_v9 = vpop.permute.xlu0 %4663 }
 0x341   : > { %v4668_v35 = vadd.f32 %v4664_v9, %v4647_v58  ;;  %v4688_v34 = vadd.f32 %v4683_v3, %v4667_v46  ;;  %v4239_v58 = vrot.slane %v4233_v54, 2  ;;  %p5600_p1 = por %p5599_p0, %p5598_p13 }
 0x343   : > { %v4705_v4 = vadd.f32 %v4700_v21, %v4688_v34  ;;  %v4241_v6 = vsel %vm268_vm1, %v4239_v58, %v4240_v55  ;;  %v4851_v21 = vrot.slane %v4845_v12, 2  ;;  %p5601_p2 = pnand %p5600_p1, %p5594_p12 }
 0x344   : > { %v8214_v51 = vpop.permute.xlu1 %4720  ;;  %v4685_v15 = vpop.permute.xlu0 %4684 }
 0x345   : > { %v4689_v50 = vadd.f32 %v4685_v15, %v4668_v35  ;;  %v4726_v3 = vadd.f32 %v8214_v51, %v4705_v4  ;;  %v4751_v15 = vmul.f32 %v8132_v52, %v4750_v61  ;;  %v4787_v51 = vmul.f32 %v8137_v62, %v4784_v25 }
 0x346   : > { %v4291_v61 = vstv %s8285_s24  ;;  %v4325_v25 = vstv %s5409_s26 }
 0x347   : > { %v4706_v48 = vadd.f32 %v4702_v11, %v4689_v50 }
 0x348   : > { %v8216_v47 = vpop.permute.xlu1 %4741  ;;  %v4723_v20 = vpop.permute.xlu0 %4722 }
 0x349   : > { %v4727_v9 = vadd.f32 %v4723_v20, %v4706_v48  ;;  %v4747_v43 = vadd.f32 %v8216_v47, %v4726_v3  ;;  %v4792_v47 = vrot.slane %v4786_v26, 1  ;;  %v4293_v26 = vmul.f32 %v8321_v57, %v4291_v61 }
 0x34b   : > { %v4753_v5 = vadd.f32 %v4751_v15, %v4747_v43  ;;  %v4793_v36 = vsel %vm208_vm0, %v4791_v28, %v4792_v47  ;;  %v4246_v43 = vadd.f32 %v4241_v6, %v8181_v8 }
 0x34c   : > { %v8220_v16 = vpop.permute.xlu1 %4761  ;;  %v4744_v19 = vpop.permute.xlu0 %4743 }
 0x34d   : > { %v4748_v63 = vadd.f32 %v4744_v19, %v4727_v9  ;;  %v4794_v19 = vrot.slane %v4787_v51, 1  ;;  %v4767_v18 = vadd.f32 %v8220_v16, %v4753_v5  ;;  %v4902_v51 = vstv %s8294_s25 }
 0x34e   : > { %v4904_v32 = vmul.f32 %v8321_v57, %v4902_v51 }
 0x34f   : > { %v4754_v39 = vadd.f32 %v4752_v10, %v4748_v63  ;;  %v4795_v45 = vsel %vm208_vm0, %v4792_v47, %v4794_v19  ;;  %v4327_v47 = vmul.f32 %v8321_v57, %v4325_v25  ;;  %v5575_v19 = vld [vmem:[%s5749_s14 + $0x58] sm:$0x3] }
 0x350   : > { %v8225_v37 = vpop.permute.xlu1 %4775  ;;  %v8227_v40 = vpop.permute.xlu0 %4763 }
 0x351   : > { %v4768_v44 = vadd.f32 %v8227_v40, %v4754_v39  ;;  %v4781_v7 = vadd.f32 %v8225_v37, %v4767_v18  ;;  %v4846_v37 = vmul.f32 %v8137_v62, %v4843_v56  ;;  %v4243_v62 = vsel %vm268_vm1, %v4240_v55, %v4242_v33 }
 0x352   : > { %v4936_v39 = vstv %s5447_s27  ;;  %v4328_v18 = vmul.f32 %v5575_v19, %v4325_v25  ;;  %v4333_v33 = vrot.slane %v4327_v47, 1 }
 0x353   : > { %v4798_v24 = vadd.f32 %v4793_v36, %v4781_v7  ;;  %v4938_v7 = vmul.f32 %v8321_v57, %v4936_v39 }
 0x354   : > { %v8229_v30 = vpop.permute.xlu1 %4813  ;;  %v8231_v49 = vpop.permute.xlu0 %4777  ;;  %v4335_v12 = vrot.slane %v4328_v18, 1 }
 0x355   : > { %v4782_v0 = vadd.f32 %v8231_v49, %v4768_v44  ;;  %v4844_v49 = vmul.f32 %v8132_v52, %v4843_v56  ;;  %v4853_v52 = vrot.slane %v4846_v37, 2  ;;  %v4819_v4 = vadd.f32 %v8229_v30, %v4798_v24 }
 0x357   : > { %v4799_v46 = vadd.f32 %v4795_v45, %v4782_v0  ;;  %v4850_v11 = vrot.slane %v4844_v49, 2  ;;  %v4854_v30 = vsel %vm268_vm1, %v4851_v21, %v4853_v52  ;;  %v4939_v0 = vmul.f32 %v5575_v19, %v4936_v39 }
 0x358   : > { %v8238_v22 = vpop.permute.xlu1 %4225  ;;  %v8240_v14 = vpop.permute.xlu0 %4815  ;;  %v4384_v45 = vstv %s8311_s29 }
 0x359   : > { %v4230_v50 = vadd.f32 %v8238_v22, %v8171_v29  ;;  %v4820_v48 = vadd.f32 %v8240_v14, %v4799_v46  ;;  %v4852_v14 = vsel %vm268_vm1, %v4850_v11, %v4851_v21  ;;  %v4944_v46 = vrot.slane %v4938_v7, 1 }
 0x35a   : > { %v4386_v52 = vmul.f32 %v8321_v57, %v4384_v45 }
 0x35b   : > { %v4247_v15 = vadd.f32 %v4243_v62, %v4230_v50  ;;  %v4946_v50 = vrot.slane %v4939_v0, 1 }
 0x35c   : > { %v8242_v41 = vpop.permute.xlu1 %4836  ;;  %v8244_v60 = vpop.permute.xlu0 %4834 }
 0x35d   : > { %v4841_v29 = vadd.f32 %v8242_v41, %v4820_v48  ;;  %v4840_v22 = vadd.f32 %v8244_v60, %v4819_v4  ;;  %v8325_v41 = vld [vmem:[%s5749_s14 + $0x48] sm:$0xff]  ;;  %s5460_s14 = sshll.u32 %s5699_s13, 11  ;;  %s8385_s13 = scalar_lea.sflag [#allocation3], %s148_s23 }
 0x35e   : > { %v4292_v60 = vmul.f32 %v8325_v41, %v4291_v61  ;;  %v4326_v44 = vmul.f32 %v8325_v41, %v4325_v25  ;;  %v4937_v56 = vmul.f32 %v8325_v41, %v4936_v39  ;;  %v4336_v61 = vsel %vm208_vm0, %v4333_v33, %v4335_v12  ;;  %s8375_s17 = scalar_lea.hbm %s8427_s2, %s5460_s14 }
 0x35f   : > { %v4858_v59 = vadd.f32 %v4854_v30, %v4841_v29  ;;  %v4857_v28 = vadd.f32 %v4852_v14, %v4840_v22 }
 0x360   : > { %v8249_v13 = vpop.permute.xlu1 %4263  ;;  %v8251_v17 = vpop.permute.xlu0 %4261  ;;  %v4332_v37 = vrot.slane %v4326_v44, 1  ;;  %v4943_v6 = vrot.slane %v4937_v56, 1 }
 0x361   : > { %v4268_v63 = vadd.f32 %v8249_v13, %v4247_v15  ;;  %v4267_v10 = vadd.f32 %v8251_v17, %v4246_v43  ;;  %v4995_v15 = vstv %s8338_s30  ;;  %v4947_v43 = vsel %vm208_vm0, %v4944_v46, %v4946_v50 }
 0x362   : > { %v4945_v30 = vsel %vm208_vm0, %v4943_v6, %v4944_v46  ;;  %v4998_v39 = vmul.f32 %v5575_v19, %v4995_v15 }
 0x364   : > { %v8253_v23 = vpop.permute.xlu1 %4874  ;;  %v8255_v31 = vpop.permute.xlu0 %4872 }
 0x365   : > { %v4879_v38 = vadd.f32 %v8253_v23, %v4858_v59  ;;  %v4878_v54 = vadd.f32 %v8255_v31, %v4857_v28 }
 0x368   : > { %v8259_v1 = vpop.permute.xlu1 %4284  ;;  %v8261_v2 = vpop.permute.xlu0 %4282 }
 0x369   : > { %v4289_v13 = vadd.f32 %v8259_v1, %v4268_v63  ;;  %v4288_v17 = vadd.f32 %v8261_v2, %v4267_v10  ;;  %v4903_v1 = vmul.f32 %v8325_v41, %v4902_v51 }
 0x36b   : > { %v4295_v58 = vadd.f32 %v4293_v26, %v4289_v13  ;;  %v4294_v31 = vadd.f32 %v4292_v60, %v4288_v17 }
 0x36c   : > { %v8268_v20 = vpop.permute.xlu1 %4895  ;;  %v8270_v27 = vpop.permute.xlu0 %4893 }
 0x36d   : > { %v4900_v55 = vadd.f32 %v8268_v20, %v4879_v38  ;;  %v4899_v23 = vadd.f32 %v8270_v27, %v4878_v54  ;;  %v4387_v20 = vmul.f32 %v5575_v19, %v4384_v45 }
 0x36f   : > { %v4906_v11 = vadd.f32 %v4904_v32, %v4900_v55  ;;  %v4905_v27 = vadd.f32 %v4903_v1, %v4899_v23  ;;  %v4394_v10 = vrot.slane %v4387_v20, 2  ;;  %v5005_v32 = vrot.slane %v4998_v39, 2 }
 0x370   : > { %v8272_v42 = vpop.permute.xlu1 %4304  ;;  %v8274_v53 = vpop.permute.xlu0 %4302 }
 0x371   : > { %v4309_v49 = vadd.f32 %v8272_v42, %v4295_v58  ;;  %v4308_v24 = vadd.f32 %v8274_v53, %v4294_v31  ;;  %v4334_v42 = vsel %vm208_vm0, %v4332_v37, %v4333_v33  ;;  %v4385_v53 = vmul.f32 %v8325_v41, %v4384_v45 }
 0x373   : > { %v4391_v51 = vrot.slane %v4385_v53, 2 }
 0x374   : > { %v8287_v16 = vpop.permute.xlu1 %4915  ;;  %v8289_v40 = vpop.permute.xlu0 %4913 }
 0x375   : > { %v4920_v29 = vadd.f32 %v8287_v16, %v4906_v11  ;;  %v4919_v22 = vadd.f32 %v8289_v40, %v4905_v27  ;;  %v4997_v16 = vmul.f32 %v8321_v57, %v4995_v15  ;;  %v4996_v40 = vmul.f32 %v8325_v41, %v4995_v15 }
 0x377   : > { %v5003_v54 = vrot.slane %v4997_v16, 2  ;;  %v5002_v7 = vrot.slane %v4996_v40, 2 }
 0x378   : > { %v8296_v35 = vpop.permute.xlu1 %4318  ;;  %v8298_v34 = vpop.permute.xlu0 %4316 }
 0x379   : > { %v4323_v4 = vadd.f32 %v8296_v35, %v4309_v49  ;;  %v4322_v48 = vadd.f32 %v8298_v34, %v4308_v24  ;;  %v4392_v35 = vrot.slane %v4386_v52, 2  ;;  %v5006_v45 = vsel %vm268_vm1, %v5003_v54, %v5005_v32 }
 0x37a   : > { %v5004_v55 = vsel %vm268_vm1, %v5002_v7, %v5003_v54 }
 0x37b   : > { %v4340_v26 = vadd.f32 %v4336_v61, %v4323_v4  ;;  %v4339_v60 = vadd.f32 %v4334_v42, %v4322_v48  ;;  %v4395_v13 = vsel %vm268_vm1, %v4392_v35, %v4394_v10 }
 0x37c   : > { %v8307_v3 = vpop.permute.xlu1 %4929  ;;  %v8309_v9 = vpop.permute.xlu0 %4927 }
 0x37d   : > { %v4934_v34 = vadd.f32 %v8307_v3, %v4920_v29  ;;  %v4933_v25 = vadd.f32 %v8309_v9, %v4919_v22  ;;  %v4393_v9 = vsel %vm268_vm1, %v4391_v51, %v4392_v35 }
 0x37f   : > { %v4951_v18 = vadd.f32 %v4947_v43, %v4934_v34  ;;  %v4950_v44 = vadd.f32 %v4945_v30, %v4933_v25 }
 0x380   : > { %v4357_v8 = vpop.permute.xlu1 %4356  ;;  %v4355_v5 = vpop.permute.xlu0 %4354 }
 0x381   : > { %v4361_v59 = vadd.f32 %v4357_v8, %v4340_v26  ;;  %v4360_v28 = vadd.f32 %v4355_v5, %v4339_v60 }
 0x384   : > { %v4968_v2 = vpop.permute.xlu1 %4967  ;;  %v4966_v36 = vpop.permute.xlu0 %4965 }
 0x385   : > { %v4972_v1 = vadd.f32 %v4968_v2, %v4951_v18  ;;  %v4971_v57 = vadd.f32 %v4966_v36, %v4950_v44 }
 0x388   : > { %v4378_v62 = vpop.permute.xlu1 %4377  ;;  %v4376_v21 = vpop.permute.xlu0 %4375 }
 0x389   : > { %v4382_v38 = vadd.f32 %v4378_v62, %v4361_v59  ;;  %v4381_v3 = vadd.f32 %v4376_v21, %v4360_v28 }
 0x38b   : > { %v4399_v5 = vadd.f32 %v4395_v13, %v4382_v38  ;;  %v4398_v56 = vadd.f32 %v4393_v9, %v4381_v3 }
 0x38c   : > { %v4989_v14 = vpop.permute.xlu1 %4988  ;;  %v4987_v63 = vpop.permute.xlu0 %4986 }
 0x38d   : > { %v4993_v41 = vadd.f32 %v4989_v14, %v4972_v1  ;;  %v4992_v8 = vadd.f32 %v4987_v63, %v4971_v57 }
 0x38f   : > { %v5010_v2 = vadd.f32 %v5006_v45, %v4993_v41  ;;  %v5009_v36 = vadd.f32 %v5004_v55, %v4992_v8 }
 0x390   : > { %v4416_v17 = vpop.permute.xlu1 %4415  ;;  %v4414_v47 = vpop.permute.xlu0 %4413 }
 0x391   : > { %v4420_v23 = vadd.f32 %v4416_v17, %v4399_v5  ;;  %v4419_v58 = vadd.f32 %v4414_v47, %v4398_v56 }
 0x394   : > { %v5027_v19 = vpop.permute.xlu1 %5026  ;;  %v5025_v0 = vpop.permute.xlu0 %5024 }
 0x395   : > { %v5031_v49 = vadd.f32 %v5027_v19, %v5010_v2  ;;  %v5030_v24 = vadd.f32 %v5025_v0, %v5009_v36 }
 0x398   : > { %v4437_v31 = vpop.permute.xlu1 %4436  ;;  %v4435_v33 = vpop.permute.xlu0 %4434 }
 0x399   : > { %v4441_v12 = vadd.f32 %v4437_v31, %v4420_v23  ;;  %v4440_v37 = vadd.f32 %v4435_v33, %v4419_v58 }
 0x39b   : > { %v4443_v46 = vmax.f32 %v4441_v12, 0.0  ;;  %v4442_v50 = vmax.f32 %v4440_v37, 0.0 }
 0x39c   : > { %v5048_v6 = vpop.permute.xlu1 %5047  ;;  %v5046_v62 = vpop.permute.xlu0 %5045 }
 0x39d   : > { %5416 = vst.msk [vmem:[%s6295_s28 + $0x68] sm:$0xff] %vm778_vm2, %v4443_v46  ;;  %5415 = vst.msk [vmem:[%s6295_s28 + $0x60] sm:$0xff] %vm778_vm2, %v4442_v50  ;;  %v5052_v21 = vadd.f32 %v5048_v6, %v5031_v49  ;;  %v5051_v52 = vadd.f32 %v5046_v62, %v5030_v24 }
 0x39f   : > { %v5054_v20 = vmax.f32 %v5052_v21, 0.0  ;;  %v5053_v11 = vmax.f32 %v5051_v52, 0.0 }
 0x3a1   : > { %5454 = vst.msk [vmem:[%s6295_s28 + $0x78] sm:$0xff] %vm778_vm2, %v5054_v20  ;;  %5453 = vst.msk [vmem:[%s6295_s28 + $0x70] sm:$0xff] %vm778_vm2, %v5053_v11 }
 0x3a2   : > { %5604 = shalt.err (!%p5601_p2)
}
 0x3a3   : > { %s5605_s23 = scalar_lea.hbm %s8375_s17, 2048  ;;  %s5609_s22 = scalar_lea.hbm %s8427_s2, 4096 }
 0x3a4   : > { %p5606_p3 = scmp.ne.s32.totalorder %s8375_s17, %s5605_s23  ;;  %p5610_p8 = scmp.lt.s32.totalorder %s8375_s17, %s8427_s2 }
 0x3a5   : > { %p5611_p11 = scmp.lt.s32.totalorder %s5609_s22, %s5605_s23 }
 0x3a6   : > { %p5607_p4 = pnand %p5606_p3, %p5716_p5 }
 0x3a7   : > { %p5612_p9 = por %p5611_p11, %p5610_p8 }
 0x3a8   : > { %p5608_p7 = pneg %p5607_p4 }
 0x3aa   : > { %p5613_p10 = pnand %p5612_p9, %p5608_p7 }
 0x3ac   : > { %5616 = shalt.err (!%p5613_p10)
}
 0x3ad   : > { %s5661_s26 = smov 128   ;;  %s5662_s27 = smov 8  }
 0x3ae   : > { %5466 = dma.vmem_to_hbm [thread:$0]  (%p5716_p5), %s8377_s3, 2048, %s8375_s17, %s8385_s13, %s5661_s26, %s5661_s26, %s5662_s27  }
 0x3af PF: > { %p5478_p12 = scmp.ge.s32.totalorder %s5655_s12, 2  ;;  %s5087_s29 = sand.u32 1, %s5643_s9  }
 0x3b0   : > { %s5088_s30 = scalar_lea.sflag [#allocation3], %s5087_s29 }
 0x3b1   : > { %p5473_p13 = pnand %p5478_p12, %p5720_p6 }
 0x3b3   : > { %p5474_p0 = pneg %p5473_p13 }
 0x3b5   : > { %5638 = dma.done.wait (%p5474_p0), %s5088_s30, 2048  }
 0x3b6   : > { %5640 = vsyncadd (%p5474_p0), %s5088_s30, 4294965248  ;;  %p13_p1 = scmp.ge.s32.totalorder %s5703_s15, 4   ;;  %s8431_s9 = smov %s5647_s10 }
 0x3b7   : > { %s8432_s10 = smov %s5651_s11  ;;  %s8433_s11 = smov %s5714_s18 }
 0x3b8   : > { %s8434_s12 = smov %s5703_s15  ;;  %15 = sbr.rel (!%p13_p1) target bundleno = 4 (0x4), region = 75 }
 0x3bd   :  { %5093 = vsyncpa [#allocation3], 1 }
 0x3be   :  { %5095 = vsyncpa [#allocation3 + $0x1], 1 }
 0x3bf   :  { %5096 = vsyncpa [#allocation4], 1 }
 0x3c0   :  { %5098 = vsyncpa [#allocation4 + $0x1], 1 }

</bundles_post_ra>
